<compile_context>
chip_gen: v6e
topology: v6e:2x2x1
jax: 0.10.0
libtpu: 0.0.40
codegen_flags: <defaults>
</compile_context>

<pallas_src>
import jax
import jax.numpy as jnp
from jax import lax
from jax.experimental import pallas as pl
from jax.experimental.pallas import tpu as pltpu

N_ACTIONS = 7          # synthetic env.action_space.n
Q_PAD = 128            # lane-dense padded action dim for the head output

# Geometry implied by the module.
P1H, P1W = 11, 7       # conv1 (k=4, s=4) output spatial dims  (input 44x28)
P2H, P2W = 9, 5        # conv2 (k=3, s=1, valid) output spatial dims
K1 = 4 * 4 * 3         # conv1 patch size = 48
C1B = 32               # conv channels per branch
C1 = 2 * C1B           # merged conv1 channels = 64
FC = 512               # Linear(1440, 512)
HD = 256               # Linear(1024, 256)


# ----------------------------------------------------------------------------
# Fused Pallas kernel: one grid step == one batch item, everything in VMEM.
# ----------------------------------------------------------------------------
def _qnet_kernel(p1_ref, w1_ref, b1_ref,
                 w2a_ref, b2a_ref, w2b_ref, b2b_ref,
                 wfa_ref, bfa_ref, wfb_ref, bfb_ref,
                 w3a_ref, w3b_ref, b3_ref, w4_ref, b4_ref,
                 o_ref,
                 y1_ref, y2a_ref, y2b_ref):
    f32 = jnp.float32
    bf16 = jnp.bfloat16

    # ---- conv1 (both branches merged; per-width block-diagonal weight) ------
    # (11, 336) @ (336, 448) -> rows = h, cols = (w, branch, c)
    a1 = jnp.dot(p1_ref[...], w1_ref[...], preferred_element_type=f32)
    y1_ref[...] = jnp.maximum(a1 + b1_ref[...], 0.0).astype(bf16)

    # ---- conv2 per branch: 3 block-Toeplitz matmuls over kernel-height ------
    def conv2(w2_ref, b2_ref, y2_ref):
        acc = jnp.zeros((P2H, P2W * C1B), f32)                      # (9, 160)
        for i in range(3):
            acc = acc + jnp.dot(y1_ref[pl.ds(i, P2H), :], w2_ref[i],
                                preferred_element_type=f32)
        y2_ref[...] = jnp.maximum(acc + b2_ref[...], 0.0).astype(bf16)

    conv2(w2a_ref, b2a_ref, y2a_ref)
    conv2(w2b_ref, b2b_ref, y2b_ref)

    # ---- Linear(1440,512)+ReLU per branch (NCHW flatten folded into WF) -----
    def fc(y2_ref, wf_ref, bf_ref):
        acc = jnp.zeros((1, FC), f32)
        for oh in range(P2H):
            acc = acc + jnp.dot(y2_ref[pl.ds(oh, 1), :], wf_ref[oh],
                                preferred_element_type=f32)
        return jnp.maximum(acc + bf_ref[...], 0.0).astype(bf16)      # (1, 512)

    a = fc(y2a_ref, wfa_ref, bfa_ref)
    b = fc(y2b_ref, wfb_ref, bfb_ref)

    # ---- head: Linear(1024,256)+ReLU with the concat folded into split W ----
    h = jnp.dot(a, w3a_ref[...], preferred_element_type=f32)
    h = h + jnp.dot(b, w3b_ref[...], preferred_element_type=f32)
    h = jnp.maximum(h + b3_ref[...], 0.0).astype(bf16)               # (1, 256)

    # ---- final Linear(256, n_actions), zero-padded to 128 lanes -------------
    q = jnp.dot(h, w4_ref[...], preferred_element_type=f32) + b4_ref[...]
    o_ref[...] = q.astype(o_ref.dtype)                               # (1, 128)


# ----------------------------------------------------------------------------
# Weight preparation (done once, outside the kernel)
# ----------------------------------------------------------------------------
def prep_params(params):
    """Fold conv structure / flatten permutation / concat into matmul weights."""
    wc1a, bc1a, wc2a, bc2a, wfa, bfa = params["net1"]
    wc1b, bc1b, wc2b, bc2b, wfb, bfb = params["net2"]
    ow1, ob1 = params["out_w1"], params["out_b1"]
    ow2, ob2 = params["out_w2"], params["out_b2"]
    f32, bf16 = jnp.float32, jnp.bfloat16

    # conv1: merge branches' output channels (48 -> 64) and expand to a per-w
    # block-diagonal matrix so one matmul produces all 7 width positions.
    wc1m = jnp.concatenate([wc1a.reshape(K1, C1B), wc1b.reshape(K1, C1B)], axis=1)
    w1 = jnp.kron(jnp.eye(P1W, dtype=f32), wc1m)                     # (336, 448)
    b1 = jnp.tile(jnp.concatenate([bc1a, bc1b]), P1W)[None, :]       # (1, 448)

    # conv2: block-Toeplitz over the width axis, one (448, 160) matrix per
    # kernel-height shift; only this branch's input-channel rows are nonzero.
    def toeplitz(wc2, br):
        w = jnp.zeros((3, P1W, C1, P2W, C1B), f32)
        for j in range(3):
            for wo in range(P2W):
                w = w.at[:, wo + j, br * C1B:(br + 1) * C1B, wo, :].set(wc2[:, j])
        return w.reshape(3, P1W * C1, P2W * C1B)                     # (3, 448, 160)

    w2a, w2b = toeplitz(wc2a, 0), toeplitz(wc2b, 1)
    b2a = jnp.tile(bc2a, P2W)[None, :]                               # (1, 160)
    b2b = jnp.tile(bc2b, P2W)[None, :]

    # Linear(1440,512): fold the PyTorch NCHW flatten (index c*45 + oh*5 + w)
    # into the weight so the kernel's (oh, w, c) layout multiplies directly.
    def fold_fc(wf):
        return (wf.reshape(C1B, P2H, P2W, FC)
                  .transpose(1, 2, 0, 3)
                  .reshape(P2H, P2W * C1B, FC))                      # (9, 160, 512)

    wfa_f, wfb_f = fold_fc(wfa), fold_fc(wfb)

    # head: cat([a,b]) @ out_w1 == a @ out_w1[:512] + b @ out_w1[512:]
    w3a, w3b = ow1[:FC], ow1[FC:]
    # final layer padded to 128 output lanes (lane-dense store)
    w4 = jnp.zeros((HD, Q_PAD), f32).at[:, :ow2.shape[1]].set(ow2)
    b4 = jnp.zeros((Q_PAD,), f32).at[:ow2.shape[1]].set(ob2)

    cast = lambda t: t.astype(bf16)
    return dict(
        w1=cast(w1), b1=b1,
        w2a=cast(w2a), b2a=b2a, w2b=cast(w2b), b2b=b2b,
        wfa=cast(wfa_f), bfa=bfa[None, :], wfb=cast(wfb_f), bfb=bfb[None, :],
        w3a=cast(w3a), w3b=cast(w3b), b3=ob1[None, :],
        w4=cast(w4), b4=b4[None, :],
    )


# ----------------------------------------------------------------------------
# Forward wrapper
# ----------------------------------------------------------------------------
def _im2col_k4s4(x_nchw):
    """NCHW -> (N, 11, 7*48) conv1 patches; last-dim order (w, kh, kw, cin)."""
    x = jnp.transpose(x_nchw, (0, 2, 3, 1)).astype(jnp.float32)      # NHWC
    n = x.shape[0]
    p = x.reshape(n, P1H, 4, P1W, 4, 3).transpose(0, 1, 3, 2, 4, 5)
    return p.reshape(n, P1H, P1W * K1).astype(jnp.bfloat16)


def qnet_forward(x_nchw, p):
    if x_nchw.ndim == 3:
        x_nchw = x_nchw[None]
    n = x_nchw.shape[0]
    p1 = _im2col_k4s4(x_nchw)                                        # (n, 11, 336)

    # advisory cost estimate for the XLA scheduler
    flops = 2 * n * (P1H * (P1W * K1) * (P1W * C1)
                     + 2 * 3 * P2H * (P1W * C1) * (P2W * C1B)
                     + 2 * P2H * (P2W * C1B) * FC
                     + 2 * FC * HD + HD * Q_PAD)
    weight_bytes = 2 * (336 * 448 + 2 * 3 * 448 * 160 + 2 * P2H * 160 * FC
                        + 2 * FC * HD + HD * Q_PAD)
    bias_bytes = 4 * (448 + 2 * 160 + 2 * FC + HD + Q_PAD)
    bytes_accessed = weight_bytes + bias_bytes + p1.size * 2 + n * Q_PAD * 4

    def full(arr):
        return pl.BlockSpec(arr.shape, lambda b, _nd=arr.ndim: (0,) * _nd)

    out = pl.pallas_call(
        _qnet_kernel,
        out_shape=jax.ShapeDtypeStruct((n, 1, Q_PAD), jnp.float32),
        grid=(n,),
        in_specs=[
            pl.BlockSpec((None, P1H, P1W * K1), lambda b: (b, 0, 0)),  # p1
            full(p["w1"]), full(p["b1"]),
            full(p["w2a"]), full(p["b2a"]), full(p["w2b"]), full(p["b2b"]),
            full(p["wfa"]), full(p["bfa"]), full(p["wfb"]), full(p["bfb"]),
            full(p["w3a"]), full(p["w3b"]), full(p["b3"]),
            full(p["w4"]), full(p["b4"]),
        ],
        out_specs=pl.BlockSpec((None, 1, Q_PAD), lambda b: (b, 0, 0)),
        scratch_shapes=[
            pltpu.VMEM((P1H, P1W * C1), jnp.bfloat16),    # y1  (11, 448)
            pltpu.VMEM((P2H, P2W * C1B), jnp.bfloat16),   # y2 branch 1 (9, 160)
            pltpu.VMEM((P2H, P2W * C1B), jnp.bfloat16),   # y2 branch 2 (9, 160)
        ],
        compiler_params=pltpu.CompilerParams(
            dimension_semantics=("parallel",),
            vmem_limit_bytes=32 * 1024 * 1024,
        ),
        cost_estimate=pl.CostEstimate(flops=flops, transcendentals=0,
                                      bytes_accessed=bytes_accessed),
    )(p1, p["w1"], p["b1"], p["w2a"], p["b2a"], p["w2b"], p["b2b"],
      p["wfa"], p["bfa"], p["wfb"], p["bfb"],
      p["w3a"], p["w3b"], p["b3"], p["w4"], p["b4"])

    return out[:, 0, :N_ACTIONS]


# ----------------------------------------------------------------------------
# Pure-JAX reference (lax.conv) for correctness checking
# ----------------------------------------------------------------------------
def qnet_reference(x_nchw, params):
    x = jnp.transpose(x_nchw, (0, 2, 3, 1)).astype(jnp.float32)
    dn = ("NHWC", "HWIO", "NHWC")

    def br(xx, p):
        wc1, bc1, wc2, bc2, wf, bf = p
        y = lax.conv_general_dilated(xx, wc1, (4, 4), "VALID", dimension_numbers=dn) + bc1
        y = jnp.maximum(y, 0.0)
        y = lax.conv_general_dilated(y, wc2, (1, 1), "VALID", dimension_numbers=dn) + bc2
        y = jnp.maximum(y, 0.0)
        n = y.shape[0]
        y = jnp.transpose(y, (0, 3, 1, 2)).reshape(n, -1)
        return jnp.maximum(y @ wf + bf, 0.0)

    a = br(x, params["net1"])
    b = br(x, params["net2"])
    h = jnp.maximum(jnp.concatenate([a, b], axis=1) @ params["out_w1"]
                    + params["out_b1"], 0.0)
    return h @ params["out_w2"] + params["out_b2"]


def _bf16_round(t):
    return t.astype(jnp.bfloat16).astype(jnp.float32)


def round_params_like_kernel(params):
    """Round the weights exactly as the kernel consumes them (bf16)."""
    def net(p):
        wc1, bc1, wc2, bc2, wf, bf = p
        return (_bf16_round(wc1), bc1, _bf16_round(wc2), bc2, _bf16_round(wf), bf)
    return {
        "net1": net(params["net1"]),
        "net2": net(params["net2"]),
        "out_w1": _bf16_round(params["out_w1"]),
        "out_b1": params["out_b1"],
        "out_w2": _bf16_round(params["out_w2"]),
        "out_b2": params["out_b2"],
    }


# ----------------------------------------------------------------------------
# Deterministic synthetic parameters
# ----------------------------------------------------------------------------
def init_params(key, n_actions):
    def w(k, shape, scale=0.05):
        return (scale * jax.random.normal(k, shape)).astype(jnp.float32)

    def net(k0):
        k = jax.random.split(k0, 6)
        return (
            w(k[0], (4, 4, 3, 32)),    # conv1 HWIO
            w(k[1], (32,)),
            w(k[2], (3, 3, 32, 32)),   # conv2 HWIO
            w(k[3], (32,)),
            w(k[4], (1440, 512)),      # Linear (in, out)
            w(k[5], (512,)),
        )

    k1, k2, k3, k4, k5, k6 = jax.random.split(key, 6)
    return {
        "net1": net(k1),
        "net2": net(k2),
        "out_w1": w(k3, (1024, 256)),
        "out_b1": w(k4, (256,)),
        "out_w2": w(k5, (256, n_actions)),
        "out_b2": w(k6, (n_actions,)),
    }


if __name__ == "__main__":
    key = jax.random.PRNGKey(0)
    k_params, k_x = jax.random.split(key)

    params = init_params(k_params, N_ACTIONS)
    x = jax.random.normal(k_x, (2, 3, 44, 28), dtype=jnp.float32)   # NCHW like PyTorch

    prepped = prep_params(params)
    fwd = jax.jit(qnet_forward)
    q = jax.block_until_ready(fwd(x, prepped))
    assert q.shape == (2, N_ACTIONS)

    # Reference with matched bf16-rounded weights/input (kernel runs bf16 MXU
    # matmuls with f32 accumulation; only activation rounding differs).
    x_r = _bf16_round(x)
    q_ref = jax.block_until_ready(qnet_reference(x_r, round_params_like_kernel(params)))
    err = float(jnp.max(jnp.abs(q - q_ref)))
    assert jnp.allclose(q, q_ref, rtol=2e-2, atol=2e-2), \
        f"mismatch vs reference (max abs err {err})"

    print("KERNEL_OK")
</pallas_src>

<mosaic_0001>
module attributes {stable_mosaic.version = 11 : i64} {
  func.func @_qnet_kernel(%arg0: i32, %arg1: memref<1x11x336xbf16, #tpu.memory_space<vmem>>, %arg2: memref<336x448xbf16, #tpu.memory_space<vmem>>, %arg3: memref<1x448xf32, #tpu.memory_space<vmem>>, %arg4: memref<3x448x160xbf16, #tpu.memory_space<vmem>>, %arg5: memref<1x160xf32, #tpu.memory_space<vmem>>, %arg6: memref<3x448x160xbf16, #tpu.memory_space<vmem>>, %arg7: memref<1x160xf32, #tpu.memory_space<vmem>>, %arg8: memref<9x160x512xbf16, #tpu.memory_space<vmem>>, %arg9: memref<1x512xf32, #tpu.memory_space<vmem>>, %arg10: memref<9x160x512xbf16, #tpu.memory_space<vmem>>, %arg11: memref<1x512xf32, #tpu.memory_space<vmem>>, %arg12: memref<512x256xbf16, #tpu.memory_space<vmem>>, %arg13: memref<512x256xbf16, #tpu.memory_space<vmem>>, %arg14: memref<1x256xf32, #tpu.memory_space<vmem>>, %arg15: memref<256x128xbf16, #tpu.memory_space<vmem>>, %arg16: memref<1x128xf32, #tpu.memory_space<vmem>>, %arg17: memref<1x1x128xf32, #tpu.memory_space<vmem>>, %arg18: memref<11x448xbf16, #tpu.memory_space<vmem>>, %arg19: memref<9x160xbf16, #tpu.memory_space<vmem>>, %arg20: memref<9x160xbf16, #tpu.memory_space<vmem>>) attributes {dimension_semantics = [#tpu.dimension_semantics<parallel>], iteration_bounds = array<i64: 2>, scalar_prefetch = 0 : i64, scratch_operands = 3 : i64, tpu.core_type = #tpu.core_type<tc>, window_params = [{transform_indices = @transform_0, window_bounds = array<i64: 1, 11, 336>}, {pipeline_mode = #tpu.pipeline_mode<synchronous>, transform_indices = @transform_1, window_bounds = array<i64: 336, 448>}, {pipeline_mode = #tpu.pipeline_mode<synchronous>, transform_indices = @transform_2, window_bounds = array<i64: 1, 448>}, {pipeline_mode = #tpu.pipeline_mode<synchronous>, transform_indices = @transform_3, window_bounds = array<i64: 3, 448, 160>}, {pipeline_mode = #tpu.pipeline_mode<synchronous>, transform_indices = @transform_4, window_bounds = array<i64: 1, 160>}, {pipeline_mode = #tpu.pipeline_mode<synchronous>, transform_indices = @transform_5, window_bounds = array<i64: 3, 448, 160>}, {pipeline_mode = #tpu.pipeline_mode<synchronous>, transform_indices = @transform_6, window_bounds = array<i64: 1, 160>}, {pipeline_mode = #tpu.pipeline_mode<synchronous>, transform_indices = @transform_7, window_bounds = array<i64: 9, 160, 512>}, {pipeline_mode = #tpu.pipeline_mode<synchronous>, transform_indices = @transform_8, window_bounds = array<i64: 1, 512>}, {pipeline_mode = #tpu.pipeline_mode<synchronous>, transform_indices = @transform_9, window_bounds = array<i64: 9, 160, 512>}, {pipeline_mode = #tpu.pipeline_mode<synchronous>, transform_indices = @transform_10, window_bounds = array<i64: 1, 512>}, {pipeline_mode = #tpu.pipeline_mode<synchronous>, transform_indices = @transform_11, window_bounds = array<i64: 512, 256>}, {pipeline_mode = #tpu.pipeline_mode<synchronous>, transform_indices = @transform_12, window_bounds = array<i64: 512, 256>}, {pipeline_mode = #tpu.pipeline_mode<synchronous>, transform_indices = @transform_13, window_bounds = array<i64: 1, 256>}, {pipeline_mode = #tpu.pipeline_mode<synchronous>, transform_indices = @transform_14, window_bounds = array<i64: 256, 128>}, {pipeline_mode = #tpu.pipeline_mode<synchronous>, transform_indices = @transform_15, window_bounds = array<i64: 1, 128>}, {transform_indices = @transform_16, window_bounds = array<i64: 1, 1, 128>}]} {
    %c0 = arith.constant 0 : index
    %c0_0 = arith.constant 0 : index
    %c0_1 = arith.constant 0 : index
    %0 = vector.load %arg1[%c0, %c0_0, %c0_1] : memref<1x11x336xbf16, #tpu.memory_space<vmem>>, vector<1x11x336xbf16>
    %1 = vector.shape_cast %0 : vector<1x11x336xbf16> to vector<11x336xbf16>
    %c0_2 = arith.constant 0 : index
    %c0_3 = arith.constant 0 : index
    %2 = vector.load %arg2[%c0_2, %c0_3] : memref<336x448xbf16, #tpu.memory_space<vmem>>, vector<336x448xbf16>
    %cst = arith.constant dense<0.000000e+00> : vector<11x448xf32>
    %3 = tpu.matmul %1, %2, %cst {dimension_numbers = #tpu.dot_dimension_numbers<[1], [0], [0], [1], [0, 0, 1, 1], [], []>} : vector<11x336xbf16>, vector<336x448xbf16>, vector<11x448xf32> -> vector<11x448xf32>
    %c0_4 = arith.constant 0 : index
    %c0_5 = arith.constant 0 : index
    %4 = vector.load %arg3[%c0_4, %c0_5] : memref<1x448xf32, #tpu.memory_space<vmem>>, vector<1x448xf32>
    %5 = vector.broadcast %4 : vector<1x448xf32> to vector<11x448xf32>
    %6 = arith.addf %3, %5 : vector<11x448xf32>
    %cst_6 = arith.constant 0.000000e+00 : f32
    %7 = vector.broadcast %cst_6 : f32 to vector<11x448xf32>
    %8 = arith.maximumf %6, %7 : vector<11x448xf32>
    %9 = arith.truncf %8 : vector<11x448xf32> to vector<11x448xbf16>
    %c0_7 = arith.constant 0 : index
    %c0_8 = arith.constant 0 : index
    %10 = vector.load %arg18[%c0_7, %c0_8] : memref<11x448xbf16, #tpu.memory_space<vmem>>, vector<11x448xbf16>
    tpu.vector_store %arg18[%c0_7, %c0_8], %9 {strides = array<i32>} : memref<11x448xbf16, #tpu.memory_space<vmem>>, vector<11x448xbf16>,
    %cst_9 = arith.constant 0.000000e+00 : f32
    %11 = vector.broadcast %cst_9 : f32 to vector<9x160xf32>
    %c0_10 = arith.constant 0 : index
    %c0_11 = arith.constant 0 : index
    %12 = vector.load %arg18[%c0_10, %c0_11] : memref<11x448xbf16, #tpu.memory_space<vmem>>, vector<9x448xbf16>
    %c0_12 = arith.constant 0 : index
    %c0_13 = arith.constant 0 : index
    %c0_14 = arith.constant 0 : index
    %13 = vector.load %arg4[%c0_12, %c0_13, %c0_14] : memref<3x448x160xbf16, #tpu.memory_space<vmem>>, vector<1x448x160xbf16>
    %14 = vector.shape_cast %13 : vector<1x448x160xbf16> to vector<448x160xbf16>
    %cst_15 = arith.constant dense<0.000000e+00> : vector<9x160xf32>
    %15 = tpu.matmul %12, %14, %cst_15 {dimension_numbers = #tpu.dot_dimension_numbers<[1], [0], [0], [1], [0, 0, 1, 1], [], []>} : vector<9x448xbf16>, vector<448x160xbf16>, vector<9x160xf32> -> vector<9x160xf32>
    %16 = arith.addf %11, %15 : vector<9x160xf32>
    %c1 = arith.constant 1 : index
    %c0_16 = arith.constant 0 : index
    %17 = vector.load %arg18[%c1, %c0_16] : memref<11x448xbf16, #tpu.memory_space<vmem>>, vector<9x448xbf16>
    %c1_17 = arith.constant 1 : index
    %c0_18 = arith.constant 0 : index
    %c0_19 = arith.constant 0 : index
    %18 = vector.load %arg4[%c1_17, %c0_18, %c0_19] : memref<3x448x160xbf16, #tpu.memory_space<vmem>>, vector<1x448x160xbf16>
    %19 = vector.shape_cast %18 : vector<1x448x160xbf16> to vector<448x160xbf16>
    %cst_20 = arith.constant dense<0.000000e+00> : vector<9x160xf32>
    %20 = tpu.matmul %17, %19, %cst_20 {dimension_numbers = #tpu.dot_dimension_numbers<[1], [0], [0], [1], [0, 0, 1, 1], [], []>} : vector<9x448xbf16>, vector<448x160xbf16>, vector<9x160xf32> -> vector<9x160xf32>
    %21 = arith.addf %16, %20 : vector<9x160xf32>
    %c2 = arith.constant 2 : index
    %c0_21 = arith.constant 0 : index
    %22 = vector.load %arg18[%c2, %c0_21] : memref<11x448xbf16, #tpu.memory_space<vmem>>, vector<9x448xbf16>
    %c2_22 = arith.constant 2 : index
    %c0_23 = arith.constant 0 : index
    %c0_24 = arith.constant 0 : index
    %23 = vector.load %arg4[%c2_22, %c0_23, %c0_24] : memref<3x448x160xbf16, #tpu.memory_space<vmem>>, vector<1x448x160xbf16>
    %24 = vector.shape_cast %23 : vector<1x448x160xbf16> to vector<448x160xbf16>
    %cst_25 = arith.constant dense<0.000000e+00> : vector<9x160xf32>
    %25 = tpu.matmul %22, %24, %cst_25 {dimension_numbers = #tpu.dot_dimension_numbers<[1], [0], [0], [1], [0, 0, 1, 1], [], []>} : vector<9x448xbf16>, vector<448x160xbf16>, vector<9x160xf32> -> vector<9x160xf32>
    %26 = arith.addf %21, %25 : vector<9x160xf32>
    %c0_26 = arith.constant 0 : index
    %c0_27 = arith.constant 0 : index
    %27 = vector.load %arg5[%c0_26, %c0_27] : memref<1x160xf32, #tpu.memory_space<vmem>>, vector<1x160xf32>
    %28 = vector.broadcast %27 : vector<1x160xf32> to vector<9x160xf32>
    %29 = arith.addf %26, %28 : vector<9x160xf32>
    %cst_28 = arith.constant 0.000000e+00 : f32
    %30 = vector.broadcast %cst_28 : f32 to vector<9x160xf32>
    %31 = arith.maximumf %29, %30 : vector<9x160xf32>
    %32 = arith.truncf %31 : vector<9x160xf32> to vector<9x160xbf16>
    %c0_29 = arith.constant 0 : index
    %c0_30 = arith.constant 0 : index
    %33 = vector.load %arg19[%c0_29, %c0_30] : memref<9x160xbf16, #tpu.memory_space<vmem>>, vector<9x160xbf16>
    tpu.vector_store %arg19[%c0_29, %c0_30], %32 {strides = array<i32>} : memref<9x160xbf16, #tpu.memory_space<vmem>>, vector<9x160xbf16>,
    %cst_31 = arith.constant 0.000000e+00 : f32
    %34 = vector.broadcast %cst_31 : f32 to vector<9x160xf32>
    %c0_32 = arith.constant 0 : index
    %c0_33 = arith.constant 0 : index
    %35 = vector.load %arg18[%c0_32, %c0_33] : memref<11x448xbf16, #tpu.memory_space<vmem>>, vector<9x448xbf16>
    %c0_34 = arith.constant 0 : index
    %c0_35 = arith.constant 0 : index
    %c0_36 = arith.constant 0 : index
    %36 = vector.load %arg6[%c0_34, %c0_35, %c0_36] : memref<3x448x160xbf16, #tpu.memory_space<vmem>>, vector<1x448x160xbf16>
    %37 = vector.shape_cast %36 : vector<1x448x160xbf16> to vector<448x160xbf16>
    %cst_37 = arith.constant dense<0.000000e+00> : vector<9x160xf32>
    %38 = tpu.matmul %35, %37, %cst_37 {dimension_numbers = #tpu.dot_dimension_numbers<[1], [0], [0], [1], [0, 0, 1, 1], [], []>} : vector<9x448xbf16>, vector<448x160xbf16>, vector<9x160xf32> -> vector<9x160xf32>
    %39 = arith.addf %34, %38 : vector<9x160xf32>
    %c1_38 = arith.constant 1 : index
    %c0_39 = arith.constant 0 : index
    %40 = vector.load %arg18[%c1_38, %c0_39] : memref<11x448xbf16, #tpu.memory_space<vmem>>, vector<9x448xbf16>
    %c1_40 = arith.constant 1 : index
    %c0_41 = arith.constant 0 : index
    %c0_42 = arith.constant 0 : index
    %41 = vector.load %arg6[%c1_40, %c0_41, %c0_42] : memref<3x448x160xbf16, #tpu.memory_space<vmem>>, vector<1x448x160xbf16>
    %42 = vector.shape_cast %41 : vector<1x448x160xbf16> to vector<448x160xbf16>
    %cst_43 = arith.constant dense<0.000000e+00> : vector<9x160xf32>
    %43 = tpu.matmul %40, %42, %cst_43 {dimension_numbers = #tpu.dot_dimension_numbers<[1], [0], [0], [1], [0, 0, 1, 1], [], []>} : vector<9x448xbf16>, vector<448x160xbf16>, vector<9x160xf32> -> vector<9x160xf32>
    %44 = arith.addf %39, %43 : vector<9x160xf32>
    %c2_44 = arith.constant 2 : index
    %c0_45 = arith.constant 0 : index
    %45 = vector.load %arg18[%c2_44, %c0_45] : memref<11x448xbf16, #tpu.memory_space<vmem>>, vector<9x448xbf16>
    %c2_46 = arith.constant 2 : index
    %c0_47 = arith.constant 0 : index
    %c0_48 = arith.constant 0 : index
    %46 = vector.load %arg6[%c2_46, %c0_47, %c0_48] : memref<3x448x160xbf16, #tpu.memory_space<vmem>>, vector<1x448x160xbf16>
    %47 = vector.shape_cast %46 : vector<1x448x160xbf16> to vector<448x160xbf16>
    %cst_49 = arith.constant dense<0.000000e+00> : vector<9x160xf32>
    %48 = tpu.matmul %45, %47, %cst_49 {dimension_numbers = #tpu.dot_dimension_numbers<[1], [0], [0], [1], [0, 0, 1, 1], [], []>} : vector<9x448xbf16>, vector<448x160xbf16>, vector<9x160xf32> -> vector<9x160xf32>
    %49 = arith.addf %44, %48 : vector<9x160xf32>
    %c0_50 = arith.constant 0 : index
    %c0_51 = arith.constant 0 : index
    %50 = vector.load %arg7[%c0_50, %c0_51] : memref<1x160xf32, #tpu.memory_space<vmem>>, vector<1x160xf32>
    %51 = vector.broadcast %50 : vector<1x160xf32> to vector<9x160xf32>
    %52 = arith.addf %49, %51 : vector<9x160xf32>
    %cst_52 = arith.constant 0.000000e+00 : f32
    %53 = vector.broadcast %cst_52 : f32 to vector<9x160xf32>
    %54 = arith.maximumf %52, %53 : vector<9x160xf32>
    %55 = arith.truncf %54 : vector<9x160xf32> to vector<9x160xbf16>
    %c0_53 = arith.constant 0 : index
    %c0_54 = arith.constant 0 : index
    %56 = vector.load %arg20[%c0_53, %c0_54] : memref<9x160xbf16, #tpu.memory_space<vmem>>, vector<9x160xbf16>
    tpu.vector_store %arg20[%c0_53, %c0_54], %55 {strides = array<i32>} : memref<9x160xbf16, #tpu.memory_space<vmem>>, vector<9x160xbf16>,
    %cst_55 = arith.constant 0.000000e+00 : f32
    %57 = vector.broadcast %cst_55 : f32 to vector<1x512xf32>
    %c0_56 = arith.constant 0 : index
    %c0_57 = arith.constant 0 : index
    %58 = vector.load %arg19[%c0_56, %c0_57] : memref<9x160xbf16, #tpu.memory_space<vmem>>, vector<1x160xbf16>
    %c0_58 = arith.constant 0 : index
    %c0_59 = arith.constant 0 : index
    %c0_60 = arith.constant 0 : index
    %59 = vector.load %arg8[%c0_58, %c0_59, %c0_60] : memref<9x160x512xbf16, #tpu.memory_space<vmem>>, vector<1x160x512xbf16>
    %60 = vector.shape_cast %59 : vector<1x160x512xbf16> to vector<160x512xbf16>
    %cst_61 = arith.constant dense<0.000000e+00> : vector<1x512xf32>
    %61 = tpu.matmul %58, %60, %cst_61 {dimension_numbers = #tpu.dot_dimension_numbers<[1], [0], [0], [1], [0, 0, 1, 1], [], []>} : vector<1x160xbf16>, vector<160x512xbf16>, vector<1x512xf32> -> vector<1x512xf32>
    %62 = arith.addf %57, %61 : vector<1x512xf32>
    %c1_62 = arith.constant 1 : index
    %c0_63 = arith.constant 0 : index
    %63 = vector.load %arg19[%c1_62, %c0_63] : memref<9x160xbf16, #tpu.memory_space<vmem>>, vector<1x160xbf16>
    %c1_64 = arith.constant 1 : index
    %c0_65 = arith.constant 0 : index
    %c0_66 = arith.constant 0 : index
    %64 = vector.load %arg8[%c1_64, %c0_65, %c0_66] : memref<9x160x512xbf16, #tpu.memory_space<vmem>>, vector<1x160x512xbf16>
    %65 = vector.shape_cast %64 : vector<1x160x512xbf16> to vector<160x512xbf16>
    %cst_67 = arith.constant dense<0.000000e+00> : vector<1x512xf32>
    %66 = tpu.matmul %63, %65, %cst_67 {dimension_numbers = #tpu.dot_dimension_numbers<[1], [0], [0], [1], [0, 0, 1, 1], [], []>} : vector<1x160xbf16>, vector<160x512xbf16>, vector<1x512xf32> -> vector<1x512xf32>
    %67 = arith.addf %62, %66 : vector<1x512xf32>
    %c2_68 = arith.constant 2 : index
    %c0_69 = arith.constant 0 : index
    %68 = vector.load %arg19[%c2_68, %c0_69] : memref<9x160xbf16, #tpu.memory_space<vmem>>, vector<1x160xbf16>
    %c2_70 = arith.constant 2 : index
    %c0_71 = arith.constant 0 : index
    %c0_72 = arith.constant 0 : index
    %69 = vector.load %arg8[%c2_70, %c0_71, %c0_72] : memref<9x160x512xbf16, #tpu.memory_space<vmem>>, vector<1x160x512xbf16>
    %70 = vector.shape_cast %69 : vector<1x160x512xbf16> to vector<160x512xbf16>
    %cst_73 = arith.constant dense<0.000000e+00> : vector<1x512xf32>
    %71 = tpu.matmul %68, %70, %cst_73 {dimension_numbers = #tpu.dot_dimension_numbers<[1], [0], [0], [1], [0, 0, 1, 1], [], []>} : vector<1x160xbf16>, vector<160x512xbf16>, vector<1x512xf32> -> vector<1x512xf32>
    %72 = arith.addf %67, %71 : vector<1x512xf32>
    %c3 = arith.constant 3 : index
    %c0_74 = arith.constant 0 : index
    %73 = vector.load %arg19[%c3, %c0_74] : memref<9x160xbf16, #tpu.memory_space<vmem>>, vector<1x160xbf16>
    %c3_75 = arith.constant 3 : index
    %c0_76 = arith.constant 0 : index
    %c0_77 = arith.constant 0 : index
    %74 = vector.load %arg8[%c3_75, %c0_76, %c0_77] : memref<9x160x512xbf16, #tpu.memory_space<vmem>>, vector<1x160x512xbf16>
    %75 = vector.shape_cast %74 : vector<1x160x512xbf16> to vector<160x512xbf16>
    %cst_78 = arith.constant dense<0.000000e+00> : vector<1x512xf32>
    %76 = tpu.matmul %73, %75, %cst_78 {dimension_numbers = #tpu.dot_dimension_numbers<[1], [0], [0], [1], [0, 0, 1, 1], [], []>} : vector<1x160xbf16>, vector<160x512xbf16>, vector<1x512xf32> -> vector<1x512xf32>
    %77 = arith.addf %72, %76 : vector<1x512xf32>
    %c4 = arith.constant 4 : index
    %c0_79 = arith.constant 0 : index
    %78 = vector.load %arg19[%c4, %c0_79] : memref<9x160xbf16, #tpu.memory_space<vmem>>, vector<1x160xbf16>
    %c4_80 = arith.constant 4 : index
    %c0_81 = arith.constant 0 : index
    %c0_82 = arith.constant 0 : index
    %79 = vector.load %arg8[%c4_80, %c0_81, %c0_82] : memref<9x160x512xbf16, #tpu.memory_space<vmem>>, vector<1x160x512xbf16>
    %80 = vector.shape_cast %79 : vector<1x160x512xbf16> to vector<160x512xbf16>
    %cst_83 = arith.constant dense<0.000000e+00> : vector<1x512xf32>
    %81 = tpu.matmul %78, %80, %cst_83 {dimension_numbers = #tpu.dot_dimension_numbers<[1], [0], [0], [1], [0, 0, 1, 1], [], []>} : vector<1x160xbf16>, vector<160x512xbf16>, vector<1x512xf32> -> vector<1x512xf32>
    %82 = arith.addf %77, %81 : vector<1x512xf32>
    %c5 = arith.constant 5 : index
    %c0_84 = arith.constant 0 : index
    %83 = vector.load %arg19[%c5, %c0_84] : memref<9x160xbf16, #tpu.memory_space<vmem>>, vector<1x160xbf16>
    %c5_85 = arith.constant 5 : index
    %c0_86 = arith.constant 0 : index
    %c0_87 = arith.constant 0 : index
    %84 = vector.load %arg8[%c5_85, %c0_86, %c0_87] : memref<9x160x512xbf16, #tpu.memory_space<vmem>>, vector<1x160x512xbf16>
    %85 = vector.shape_cast %84 : vector<1x160x512xbf16> to vector<160x512xbf16>
    %cst_88 = arith.constant dense<0.000000e+00> : vector<1x512xf32>
    %86 = tpu.matmul %83, %85, %cst_88 {dimension_numbers = #tpu.dot_dimension_numbers<[1], [0], [0], [1], [0, 0, 1, 1], [], []>} : vector<1x160xbf16>, vector<160x512xbf16>, vector<1x512xf32> -> vector<1x512xf32>
    %87 = arith.addf %82, %86 : vector<1x512xf32>
    %c6 = arith.constant 6 : index
    %c0_89 = arith.constant 0 : index
    %88 = vector.load %arg19[%c6, %c0_89] : memref<9x160xbf16, #tpu.memory_space<vmem>>, vector<1x160xbf16>
    %c6_90 = arith.constant 6 : index
    %c0_91 = arith.constant 0 : index
    %c0_92 = arith.constant 0 : index
    %89 = vector.load %arg8[%c6_90, %c0_91, %c0_92] : memref<9x160x512xbf16, #tpu.memory_space<vmem>>, vector<1x160x512xbf16>
    %90 = vector.shape_cast %89 : vector<1x160x512xbf16> to vector<160x512xbf16>
    %cst_93 = arith.constant dense<0.000000e+00> : vector<1x512xf32>
    %91 = tpu.matmul %88, %90, %cst_93 {dimension_numbers = #tpu.dot_dimension_numbers<[1], [0], [0], [1], [0, 0, 1, 1], [], []>} : vector<1x160xbf16>, vector<160x512xbf16>, vector<1x512xf32> -> vector<1x512xf32>
    %92 = arith.addf %87, %91 : vector<1x512xf32>
    %c7 = arith.constant 7 : index
    %c0_94 = arith.constant 0 : index
    %93 = vector.load %arg19[%c7, %c0_94] : memref<9x160xbf16, #tpu.memory_space<vmem>>, vector<1x160xbf16>
    %c7_95 = arith.constant 7 : index
    %c0_96 = arith.constant 0 : index
    %c0_97 = arith.constant 0 : index
    %94 = vector.load %arg8[%c7_95, %c0_96, %c0_97] : memref<9x160x512xbf16, #tpu.memory_space<vmem>>, vector<1x160x512xbf16>
    %95 = vector.shape_cast %94 : vector<1x160x512xbf16> to vector<160x512xbf16>
    %cst_98 = arith.constant dense<0.000000e+00> : vector<1x512xf32>
    %96 = tpu.matmul %93, %95, %cst_98 {dimension_numbers = #tpu.dot_dimension_numbers<[1], [0], [0], [1], [0, 0, 1, 1], [], []>} : vector<1x160xbf16>, vector<160x512xbf16>, vector<1x512xf32> -> vector<1x512xf32>
    %97 = arith.addf %92, %96 : vector<1x512xf32>
    %c8 = arith.constant 8 : index
    %c0_99 = arith.constant 0 : index
    %98 = vector.load %arg19[%c8, %c0_99] : memref<9x160xbf16, #tpu.memory_space<vmem>>, vector<1x160xbf16>
    %c8_100 = arith.constant 8 : index
    %c0_101 = arith.constant 0 : index
    %c0_102 = arith.constant 0 : index
    %99 = vector.load %arg8[%c8_100, %c0_101, %c0_102] : memref<9x160x512xbf16, #tpu.memory_space<vmem>>, vector<1x160x512xbf16>
    %100 = vector.shape_cast %99 : vector<1x160x512xbf16> to vector<160x512xbf16>
    %cst_103 = arith.constant dense<0.000000e+00> : vector<1x512xf32>
    %101 = tpu.matmul %98, %100, %cst_103 {dimension_numbers = #tpu.dot_dimension_numbers<[1], [0], [0], [1], [0, 0, 1, 1], [], []>} : vector<1x160xbf16>, vector<160x512xbf16>, vector<1x512xf32> -> vector<1x512xf32>
    %102 = arith.addf %97, %101 : vector<1x512xf32>
    %c0_104 = arith.constant 0 : index
    %c0_105 = arith.constant 0 : index
    %103 = vector.load %arg9[%c0_104, %c0_105] : memref<1x512xf32, #tpu.memory_space<vmem>>, vector<1x512xf32>
    %104 = arith.addf %102, %103 : vector<1x512xf32>
    %cst_106 = arith.constant 0.000000e+00 : f32
    %105 = vector.broadcast %cst_106 : f32 to vector<1x512xf32>
    %106 = arith.maximumf %104, %105 : vector<1x512xf32>
    %107 = arith.truncf %106 : vector<1x512xf32> to vector<1x512xbf16>
    %cst_107 = arith.constant 0.000000e+00 : f32
    %108 = vector.broadcast %cst_107 : f32 to vector<1x512xf32>
    %c0_108 = arith.constant 0 : index
    %c0_109 = arith.constant 0 : index
    %109 = vector.load %arg20[%c0_108, %c0_109] : memref<9x160xbf16, #tpu.memory_space<vmem>>, vector<1x160xbf16>
    %c0_110 = arith.constant 0 : index
    %c0_111 = arith.constant 0 : index
    %c0_112 = arith.constant 0 : index
    %110 = vector.load %arg10[%c0_110, %c0_111, %c0_112] : memref<9x160x512xbf16, #tpu.memory_space<vmem>>, vector<1x160x512xbf16>
    %111 = vector.shape_cast %110 : vector<1x160x512xbf16> to vector<160x512xbf16>
    %cst_113 = arith.constant dense<0.000000e+00> : vector<1x512xf32>
    %112 = tpu.matmul %109, %111, %cst_113 {dimension_numbers = #tpu.dot_dimension_numbers<[1], [0], [0], [1], [0, 0, 1, 1], [], []>} : vector<1x160xbf16>, vector<160x512xbf16>, vector<1x512xf32> -> vector<1x512xf32>
    %113 = arith.addf %108, %112 : vector<1x512xf32>
    %c1_114 = arith.constant 1 : index
    %c0_115 = arith.constant 0 : index
    %114 = vector.load %arg20[%c1_114, %c0_115] : memref<9x160xbf16, #tpu.memory_space<vmem>>, vector<1x160xbf16>
    %c1_116 = arith.constant 1 : index
    %c0_117 = arith.constant 0 : index
    %c0_118 = arith.constant 0 : index
    %115 = vector.load %arg10[%c1_116, %c0_117, %c0_118] : memref<9x160x512xbf16, #tpu.memory_space<vmem>>, vector<1x160x512xbf16>
    %116 = vector.shape_cast %115 : vector<1x160x512xbf16> to vector<160x512xbf16>
    %cst_119 = arith.constant dense<0.000000e+00> : vector<1x512xf32>
    %117 = tpu.matmul %114, %116, %cst_119 {dimension_numbers = #tpu.dot_dimension_numbers<[1], [0], [0], [1], [0, 0, 1, 1], [], []>} : vector<1x160xbf16>, vector<160x512xbf16>, vector<1x512xf32> -> vector<1x512xf32>
    %118 = arith.addf %113, %117 : vector<1x512xf32>
    %c2_120 = arith.constant 2 : index
    %c0_121 = arith.constant 0 : index
    %119 = vector.load %arg20[%c2_120, %c0_121] : memref<9x160xbf16, #tpu.memory_space<vmem>>, vector<1x160xbf16>
    %c2_122 = arith.constant 2 : index
    %c0_123 = arith.constant 0 : index
    %c0_124 = arith.constant 0 : index
    %120 = vector.load %arg10[%c2_122, %c0_123, %c0_124] : memref<9x160x512xbf16, #tpu.memory_space<vmem>>, vector<1x160x512xbf16>
    %121 = vector.shape_cast %120 : vector<1x160x512xbf16> to vector<160x512xbf16>
    %cst_125 = arith.constant dense<0.000000e+00> : vector<1x512xf32>
    %122 = tpu.matmul %119, %121, %cst_125 {dimension_numbers = #tpu.dot_dimension_numbers<[1], [0], [0], [1], [0, 0, 1, 1], [], []>} : vector<1x160xbf16>, vector<160x512xbf16>, vector<1x512xf32> -> vector<1x512xf32>
    %123 = arith.addf %118, %122 : vector<1x512xf32>
    %c3_126 = arith.constant 3 : index
    %c0_127 = arith.constant 0 : index
    %124 = vector.load %arg20[%c3_126, %c0_127] : memref<9x160xbf16, #tpu.memory_space<vmem>>, vector<1x160xbf16>
    %c3_128 = arith.constant 3 : index
    %c0_129 = arith.constant 0 : index
    %c0_130 = arith.constant 0 : index
    %125 = vector.load %arg10[%c3_128, %c0_129, %c0_130] : memref<9x160x512xbf16, #tpu.memory_space<vmem>>, vector<1x160x512xbf16>
    %126 = vector.shape_cast %125 : vector<1x160x512xbf16> to vector<160x512xbf16>
    %cst_131 = arith.constant dense<0.000000e+00> : vector<1x512xf32>
    %127 = tpu.matmul %124, %126, %cst_131 {dimension_numbers = #tpu.dot_dimension_numbers<[1], [0], [0], [1], [0, 0, 1, 1], [], []>} : vector<1x160xbf16>, vector<160x512xbf16>, vector<1x512xf32> -> vector<1x512xf32>
    %128 = arith.addf %123, %127 : vector<1x512xf32>
    %c4_132 = arith.constant 4 : index
    %c0_133 = arith.constant 0 : index
    %129 = vector.load %arg20[%c4_132, %c0_133] : memref<9x160xbf16, #tpu.memory_space<vmem>>, vector<1x160xbf16>
    %c4_134 = arith.constant 4 : index
    %c0_135 = arith.constant 0 : index
    %c0_136 = arith.constant 0 : index
    %130 = vector.load %arg10[%c4_134, %c0_135, %c0_136] : memref<9x160x512xbf16, #tpu.memory_space<vmem>>, vector<1x160x512xbf16>
    %131 = vector.shape_cast %130 : vector<1x160x512xbf16> to vector<160x512xbf16>
    %cst_137 = arith.constant dense<0.000000e+00> : vector<1x512xf32>
    %132 = tpu.matmul %129, %131, %cst_137 {dimension_numbers = #tpu.dot_dimension_numbers<[1], [0], [0], [1], [0, 0, 1, 1], [], []>} : vector<1x160xbf16>, vector<160x512xbf16>, vector<1x512xf32> -> vector<1x512xf32>
    %133 = arith.addf %128, %132 : vector<1x512xf32>
    %c5_138 = arith.constant 5 : index
    %c0_139 = arith.constant 0 : index
    %134 = vector.load %arg20[%c5_138, %c0_139] : memref<9x160xbf16, #tpu.memory_space<vmem>>, vector<1x160xbf16>
    %c5_140 = arith.constant 5 : index
    %c0_141 = arith.constant 0 : index
    %c0_142 = arith.constant 0 : index
    %135 = vector.load %arg10[%c5_140, %c0_141, %c0_142] : memref<9x160x512xbf16, #tpu.memory_space<vmem>>, vector<1x160x512xbf16>
    %136 = vector.shape_cast %135 : vector<1x160x512xbf16> to vector<160x512xbf16>
    %cst_143 = arith.constant dense<0.000000e+00> : vector<1x512xf32>
    %137 = tpu.matmul %134, %136, %cst_143 {dimension_numbers = #tpu.dot_dimension_numbers<[1], [0], [0], [1], [0, 0, 1, 1], [], []>} : vector<1x160xbf16>, vector<160x512xbf16>, vector<1x512xf32> -> vector<1x512xf32>
    %138 = arith.addf %133, %137 : vector<1x512xf32>
    %c6_144 = arith.constant 6 : index
    %c0_145 = arith.constant 0 : index
    %139 = vector.load %arg20[%c6_144, %c0_145] : memref<9x160xbf16, #tpu.memory_space<vmem>>, vector<1x160xbf16>
    %c6_146 = arith.constant 6 : index
    %c0_147 = arith.constant 0 : index
    %c0_148 = arith.constant 0 : index
    %140 = vector.load %arg10[%c6_146, %c0_147, %c0_148] : memref<9x160x512xbf16, #tpu.memory_space<vmem>>, vector<1x160x512xbf16>
    %141 = vector.shape_cast %140 : vector<1x160x512xbf16> to vector<160x512xbf16>
    %cst_149 = arith.constant dense<0.000000e+00> : vector<1x512xf32>
    %142 = tpu.matmul %139, %141, %cst_149 {dimension_numbers = #tpu.dot_dimension_numbers<[1], [0], [0], [1], [0, 0, 1, 1], [], []>} : vector<1x160xbf16>, vector<160x512xbf16>, vector<1x512xf32> -> vector<1x512xf32>
    %143 = arith.addf %138, %142 : vector<1x512xf32>
    %c7_150 = arith.constant 7 : index
    %c0_151 = arith.constant 0 : index
    %144 = vector.load %arg20[%c7_150, %c0_151] : memref<9x160xbf16, #tpu.memory_space<vmem>>, vector<1x160xbf16>
    %c7_152 = arith.constant 7 : index
    %c0_153 = arith.constant 0 : index
    %c0_154 = arith.constant 0 : index
    %145 = vector.load %arg10[%c7_152, %c0_153, %c0_154] : memref<9x160x512xbf16, #tpu.memory_space<vmem>>, vector<1x160x512xbf16>
    %146 = vector.shape_cast %145 : vector<1x160x512xbf16> to vector<160x512xbf16>
    %cst_155 = arith.constant dense<0.000000e+00> : vector<1x512xf32>
    %147 = tpu.matmul %144, %146, %cst_155 {dimension_numbers = #tpu.dot_dimension_numbers<[1], [0], [0], [1], [0, 0, 1, 1], [], []>} : vector<1x160xbf16>, vector<160x512xbf16>, vector<1x512xf32> -> vector<1x512xf32>
    %148 = arith.addf %143, %147 : vector<1x512xf32>
    %c8_156 = arith.constant 8 : index
    %c0_157 = arith.constant 0 : index
    %149 = vector.load %arg20[%c8_156, %c0_157] : memref<9x160xbf16, #tpu.memory_space<vmem>>, vector<1x160xbf16>
    %c8_158 = arith.constant 8 : index
    %c0_159 = arith.constant 0 : index
    %c0_160 = arith.constant 0 : index
    %150 = vector.load %arg10[%c8_158, %c0_159, %c0_160] : memref<9x160x512xbf16, #tpu.memory_space<vmem>>, vector<1x160x512xbf16>
    %151 = vector.shape_cast %150 : vector<1x160x512xbf16> to vector<160x512xbf16>
    %cst_161 = arith.constant dense<0.000000e+00> : vector<1x512xf32>
    %152 = tpu.matmul %149, %151, %cst_161 {dimension_numbers = #tpu.dot_dimension_numbers<[1], [0], [0], [1], [0, 0, 1, 1], [], []>} : vector<1x160xbf16>, vector<160x512xbf16>, vector<1x512xf32> -> vector<1x512xf32>
    %153 = arith.addf %148, %152 : vector<1x512xf32>
    %c0_162 = arith.constant 0 : index
    %c0_163 = arith.constant 0 : index
    %154 = vector.load %arg11[%c0_162, %c0_163] : memref<1x512xf32, #tpu.memory_space<vmem>>, vector<1x512xf32>
    %155 = arith.addf %153, %154 : vector<1x512xf32>
    %cst_164 = arith.constant 0.000000e+00 : f32
    %156 = vector.broadcast %cst_164 : f32 to vector<1x512xf32>
    %157 = arith.maximumf %155, %156 : vector<1x512xf32>
    %158 = arith.truncf %157 : vector<1x512xf32> to vector<1x512xbf16>
    %c0_165 = arith.constant 0 : index
    %c0_166 = arith.constant 0 : index
    %159 = vector.load %arg12[%c0_165, %c0_166] : memref<512x256xbf16, #tpu.memory_space<vmem>>, vector<512x256xbf16>
    %cst_167 = arith.constant dense<0.000000e+00> : vector<1x256xf32>
    %160 = tpu.matmul %107, %159, %cst_167 {dimension_numbers = #tpu.dot_dimension_numbers<[1], [0], [0], [1], [0, 0, 1, 1], [], []>} : vector<1x512xbf16>, vector<512x256xbf16>, vector<1x256xf32> -> vector<1x256xf32>
    %c0_168 = arith.constant 0 : index
    %c0_169 = arith.constant 0 : index
    %161 = vector.load %arg13[%c0_168, %c0_169] : memref<512x256xbf16, #tpu.memory_space<vmem>>, vector<512x256xbf16>
    %cst_170 = arith.constant dense<0.000000e+00> : vector<1x256xf32>
    %162 = tpu.matmul %158, %161, %cst_170 {dimension_numbers = #tpu.dot_dimension_numbers<[1], [0], [0], [1], [0, 0, 1, 1], [], []>} : vector<1x512xbf16>, vector<512x256xbf16>, vector<1x256xf32> -> vector<1x256xf32>
    %163 = arith.addf %160, %162 : vector<1x256xf32>
    %c0_171 = arith.constant 0 : index
    %c0_172 = arith.constant 0 : index
    %164 = vector.load %arg14[%c0_171, %c0_172] : memref<1x256xf32, #tpu.memory_space<vmem>>, vector<1x256xf32>
    %165 = arith.addf %163, %164 : vector<1x256xf32>
    %cst_173 = arith.constant 0.000000e+00 : f32
    %166 = vector.broadcast %cst_173 : f32 to vector<1x256xf32>
    %167 = arith.maximumf %165, %166 : vector<1x256xf32>
    %168 = arith.truncf %167 : vector<1x256xf32> to vector<1x256xbf16>
    %c0_174 = arith.constant 0 : index
    %c0_175 = arith.constant 0 : index
    %169 = vector.load %arg15[%c0_174, %c0_175] : memref<256x128xbf16, #tpu.memory_space<vmem>>, vector<256x128xbf16>
    %cst_176 = arith.constant dense<0.000000e+00> : vector<1x128xf32>
    %170 = tpu.matmul %168, %169, %cst_176 {dimension_numbers = #tpu.dot_dimension_numbers<[1], [0], [0], [1], [0, 0, 1, 1], [], []>} : vector<1x256xbf16>, vector<256x128xbf16>, vector<1x128xf32> -> vector<1x128xf32>
    %c0_177 = arith.constant 0 : index
    %c0_178 = arith.constant 0 : index
    %171 = vector.load %arg16[%c0_177, %c0_178] : memref<1x128xf32, #tpu.memory_space<vmem>>, vector<1x128xf32>
    %172 = arith.addf %170, %171 : vector<1x128xf32>
    %c0_179 = arith.constant 0 : index
    %c0_180 = arith.constant 0 : index
    %c0_181 = arith.constant 0 : index
    %173 = vector.load %arg17[%c0_179, %c0_180, %c0_181] : memref<1x1x128xf32, #tpu.memory_space<vmem>>, vector<1x1x128xf32>
    %174 = vector.shape_cast %173 : vector<1x1x128xf32> to vector<1x128xf32>
    %175 = vector.shape_cast %172 : vector<1x128xf32> to vector<1x1x128xf32>
    tpu.vector_store %arg17[%c0_179, %c0_180, %c0_181], %175 {strides = array<i32>} : memref<1x1x128xf32, #tpu.memory_space<vmem>>, vector<1x1x128xf32>,
    return
  }
  func.func @transform_0(%arg0: i32) -> (i32, i32, i32) {
    %c0_i32 = arith.constant 0 : i32
    %c0_i32_0 = arith.constant 0 : i32
    %c0_i32_1 = arith.constant 0 : i32
    return %arg0, %c0_i32, %c0_i32_0 : i32, i32, i32
  }
  func.func @transform_1(%arg0: i32) -> (i32, i32) {
    %c0_i32 = arith.constant 0 : i32
    %c0_i32_0 = arith.constant 0 : i32
    %c0_i32_1 = arith.constant 0 : i32
    return %c0_i32, %c0_i32_0 : i32, i32
  }
  func.func @transform_2(%arg0: i32) -> (i32, i32) {
    %c0_i32 = arith.constant 0 : i32
    %c0_i32_0 = arith.constant 0 : i32
    %c0_i32_1 = arith.constant 0 : i32
    return %c0_i32, %c0_i32_0 : i32, i32
  }
  func.func @transform_3(%arg0: i32) -> (i32, i32, i32) {
    %c0_i32 = arith.constant 0 : i32
    %c0_i32_0 = arith.constant 0 : i32
    %c0_i32_1 = arith.constant 0 : i32
    %c0_i32_2 = arith.constant 0 : i32
    return %c0_i32, %c0_i32_0, %c0_i32_1 : i32, i32, i32
  }
  func.func @transform_4(%arg0: i32) -> (i32, i32) {
    %c0_i32 = arith.constant 0 : i32
    %c0_i32_0 = arith.constant 0 : i32
    %c0_i32_1 = arith.constant 0 : i32
    return %c0_i32, %c0_i32_0 : i32, i32
  }
  func.func @transform_5(%arg0: i32) -> (i32, i32, i32) {
    %c0_i32 = arith.constant 0 : i32
    %c0_i32_0 = arith.constant 0 : i32
    %c0_i32_1 = arith.constant 0 : i32
    %c0_i32_2 = arith.constant 0 : i32
    return %c0_i32, %c0_i32_0, %c0_i32_1 : i32, i32, i32
  }
  func.func @transform_6(%arg0: i32) -> (i32, i32) {
    %c0_i32 = arith.constant 0 : i32
    %c0_i32_0 = arith.constant 0 : i32
    %c0_i32_1 = arith.constant 0 : i32
    return %c0_i32, %c0_i32_0 : i32, i32
  }
  func.func @transform_7(%arg0: i32) -> (i32, i32, i32) {
    %c0_i32 = arith.constant 0 : i32
    %c0_i32_0 = arith.constant 0 : i32
    %c0_i32_1 = arith.constant 0 : i32
    %c0_i32_2 = arith.constant 0 : i32
    return %c0_i32, %c0_i32_0, %c0_i32_1 : i32, i32, i32
  }
  func.func @transform_8(%arg0: i32) -> (i32, i32) {
    %c0_i32 = arith.constant 0 : i32
    %c0_i32_0 = arith.constant 0 : i32
    %c0_i32_1 = arith.constant 0 : i32
    return %c0_i32, %c0_i32_0 : i32, i32
  }
  func.func @transform_9(%arg0: i32) -> (i32, i32, i32) {
    %c0_i32 = arith.constant 0 : i32
    %c0_i32_0 = arith.constant 0 : i32
    %c0_i32_1 = arith.constant 0 : i32
    %c0_i32_2 = arith.constant 0 : i32
    return %c0_i32, %c0_i32_0, %c0_i32_1 : i32, i32, i32
  }
  func.func @transform_10(%arg0: i32) -> (i32, i32) {
    %c0_i32 = arith.constant 0 : i32
    %c0_i32_0 = arith.constant 0 : i32
    %c0_i32_1 = arith.constant 0 : i32
    return %c0_i32, %c0_i32_0 : i32, i32
  }
  func.func @transform_11(%arg0: i32) -> (i32, i32) {
    %c0_i32 = arith.constant 0 : i32
    %c0_i32_0 = arith.constant 0 : i32
    %c0_i32_1 = arith.constant 0 : i32
    return %c0_i32, %c0_i32_0 : i32, i32
  }
  func.func @transform_12(%arg0: i32) -> (i32, i32) {
    %c0_i32 = arith.constant 0 : i32
    %c0_i32_0 = arith.constant 0 : i32
    %c0_i32_1 = arith.constant 0 : i32
    return %c0_i32, %c0_i32_0 : i32, i32
  }
  func.func @transform_13(%arg0: i32) -> (i32, i32) {
    %c0_i32 = arith.constant 0 : i32
    %c0_i32_0 = arith.constant 0 : i32
    %c0_i32_1 = arith.constant 0 : i32
    return %c0_i32, %c0_i32_0 : i32, i32
  }
  func.func @transform_14(%arg0: i32) -> (i32, i32) {
    %c0_i32 = arith.constant 0 : i32
    %c0_i32_0 = arith.constant 0 : i32
    %c0_i32_1 = arith.constant 0 : i32
    return %c0_i32, %c0_i32_0 : i32, i32
  }
  func.func @transform_15(%arg0: i32) -> (i32, i32) {
    %c0_i32 = arith.constant 0 : i32
    %c0_i32_0 = arith.constant 0 : i32
    %c0_i32_1 = arith.constant 0 : i32
    return %c0_i32, %c0_i32_0 : i32, i32
  }
  func.func @transform_16(%arg0: i32) -> (i32, i32, i32) {
    %c0_i32 = arith.constant 0 : i32
    %c0_i32_0 = arith.constant 0 : i32
    %c0_i32_1 = arith.constant 0 : i32
    return %arg0, %c0_i32, %c0_i32_0 : i32, i32, i32
  }
}

</mosaic_0001>

<bundles_post_ra>
// kernel: qnet_forward.1
= control target key start
LH: loop header
LB: loop body
LE: loop exit
PB: predicated region body
PF: predicated region fallthrough
CT: control target
= control target key end

     0   :  { %s19927_s0 = inlined_call_operand.vmem [shape: bf16[2,11,336], index: 0, kind: input, shape index: {}]   ;;  %s19928_s1 = inlined_call_operand.hbm [shape: bf16[336,448], index: 1, kind: input, shape index: {}]   ;;  %s19929_s2 = inlined_call_operand.vmem [shape: f32[1,448], index: 2, kind: input, shape index: {}]   ;;  %s19930_s3 = inlined_call_operand.vmem [shape: bf16[3,448,160], index: 3, kind: input, shape index: {}]   ;;  %s19931_s4 = inlined_call_operand.vmem [shape: f32[1,160], index: 4, kind: input, shape index: {}]   ;;  %s19932_s5 = inlined_call_operand.vmem [shape: bf16[3,448,160], index: 5, kind: input, shape index: {}]   ;;  %s19933_s6 = inlined_call_operand.vmem [shape: f32[1,160], index: 6, kind: input, shape index: {}]   ;;  %s19934_s7 = inlined_call_operand.vmem [shape: bf16[9,160,512], index: 7, kind: input, shape index: {}]   ;;  %s19935_s8 = inlined_call_operand.vmem [shape: f32[1,512], index: 8, kind: input, shape index: {}]   ;;  %s19936_s9 = inlined_call_operand.vmem [shape: bf16[9,160,512], index: 9, kind: input, shape index: {}]   ;;  %s19937_s10 = inlined_call_operand.vmem [shape: f32[1,512], index: 10, kind: input, shape index: {}]   ;;  %s19938_s11 = inlined_call_operand.hbm [shape: bf16[512,256], index: 11, kind: input, shape index: {}]   ;;  %s19939_s12 = inlined_call_operand.hbm [shape: bf16[512,256], index: 12, kind: input, shape index: {}]   ;;  %s19940_s13 = inlined_call_operand.vmem [shape: f32[1,256], index: 13, kind: input, shape index: {}]   ;;  %s19941_s14 = inlined_call_operand.vmem [shape: bf16[256,128], index: 14, kind: input, shape index: {}]   ;;  %s19942_s15 = inlined_call_operand.vmem [shape: f32[1,128], index: 15, kind: input, shape index: {}]   ;;  %s19943_s16 = inlined_call_operand.hbm [shape: f32[2,1,128], index: 16, kind: output, shape index: {}]  }
   0x1   :  { %19951 = sst [smem:[#allocation21_spill]] %s19927_s0 }
   0x2   :  { %19952 = sst [smem:[#allocation22_spill]] %s19943_s16 }
   0x3   :  { %21 = vsyncpa [#allocation6], 0 }
   0x4   :  { %22 = vsyncpa [#allocation9], 0 }
   0x5   :  { %23 = vsyncpa [#allocation7], 0 }
   0x6   :  { %25 = vsyncpa [#allocation7 + $0x1], 0  ;;  %s16061_s21 = smov 0   ;;  %s16063_s22 = smov 0  }
   0x7   :  { %s16065_s23 = smov 0   ;;  %s16067_s24 = smov 0  }
   0x8 LB: > { %19953 = sst [smem:[#allocation15_spill]] %s15953_s21  ;;  %s16082_s25 = sadd.s32 4294967295, %s15965_s24   ;;  %s15965_s24 = sphi %s16067_s24, %s19981_s24   ;;  %s15961_s23 = sphi %s16065_s23, %s19983_s23   ;;  %s15957_s22 = sphi %s16063_s22, %s19985_s22   ;;  %s15953_s21 = sphi %s16061_s21, %s19984_s21  }
   0x9   : > { %19954 = sst [smem:[#allocation16_spill]] %s15961_s23  ;;  %s11500_s26 = sadd.s32 4294967294, %s15965_s24  }
   0xa   : > { %19955 = sst [smem:[#allocation17_spill]] %s15965_s24  ;;  %s16086_s27 = sadd.s32 1, %s15965_s24  }
   0xb   : > { %19956 = sst [smem:[#allocation18_spill]] %s16086_s27  ;;  %s379_s28 = sadd.s32 1, %s15961_s23 }
   0xc   : > { %s376_s29 = ssub.s32 %s15965_s24, %s16086_s27  ;;  %p389_p0 = scmp.ne.s32.totalorder %s15961_s23, %s15957_s22 }
   0xd   : > { %p377_p1 = scmp.eq.s32.totalorder %s376_s29, 0  ;;  %p390_p2 = scmp.eq.s32.totalorder %s16082_s25, 1 }
   0xe   : > { %p395_p3 = scmp.ne.s32.totalorder %s15957_s22, %s15953_s21  ;;  %p396_p4 = scmp.eq.s32.totalorder %s11500_s26, 1 }
   0xf   : > { %s16097_s30 = scalar_select %p377_p1, %s15961_s23, %s379_s28  }
  0x10   : > { %p16099_p5 = por %p390_p2, %p389_p0  ;;  %p16103_p6 = por %p396_p4, %p395_p3 }
  0x11   : > { %19957 = sst [smem:[#allocation19_spill]] %s16097_s30  ;;  %p11501_p7 = scmp.ge.s32.totalorder %s15965_s24, 1 }
  0x12   : > { %s19959_s17 = scalar_select %p16103_p6, 1, 0 }
  0x13   : > { %p403_p8 = scmp.lt.s32.totalorder %s15965_s24, 3  ;;  %p13812_p9 = scmp.eq.s32.totalorder %s16082_s25, 0 }
  0x14   : > { %19960 = sst [smem:[#allocation20_spill]] %s19959_s17  ;;  %s15967_s19 = smov [#allocation8]  }
  0x15   : > { %p16110_p10 = pnand %p11501_p7, %p403_p8  ;;  %s455_s20 = sshll.u32 %s15967_s19, 4  ;;  %s456_s20 = int_to_ptr.vmem [resolvable:$true] %s455_s20 }
  0x16   : > { %s15968_s28 = smov [#allocation5]   ;;  %s15830_s30 = scalar_lea.vmem %s456_s20, 8192 }
  0x17   : > { %p13798_p11 = pneg %p16110_p10  ;;  %s415_s29 = sshll.u32 %s15968_s28, 4  ;;  %s416_s29 = int_to_ptr.vmem [resolvable:$true] %s415_s29 }
  0x18   : > { %p15831_p0 = scmp.ne.s32.totalorder %s456_s20, %s15830_s30  ;;  %p15838_p3 = scmp.lt.s32.totalorder %s456_s20, %s456_s20 }
  0x19   : > { %p16118_p12 = pnand %p13812_p9, %p13798_p11  ;;  %p15839_p4 = scmp.lt.s32.totalorder %s15830_s30, %s15830_s30 }
  0x1b   : > { %p15821_p13 = pneg %p16118_p12  ;;  %p15840_p7 = por %p15839_p4, %p15838_p3 }
  0x1d   : > { %p15833_p1 = pnand %p15831_p0, %p15821_p13 }
  0x1f   : > { %p15834_p2 = pneg %p15833_p1 }
  0x21   : > { %p15841_p8 = pnand %p15840_p7, %p15834_p2 }
  0x23   : > { %15844 = shalt.err (!%p15841_p8)
}
  0x24   : > { %s15969_s19 = smov 128   ;;  %s15970_s23 = smov 8  }
  0x25   : > { %13804 = dma.hbm_to_vmem [thread:$0]  (!%p16118_p12), %s19938_s11, 8192, %s456_s20, [#allocation9], %s15969_s19, %s15969_s19, %s15970_s23  }
  0x26   : > { %s15856_s17 = scalar_lea.vmem %s416_s29, 10752  ;;  %p15864_p2 = scmp.lt.s32.totalorder %s416_s29, %s416_s29 }
  0x27   : > { %p15857_p11 = scmp.ne.s32.totalorder %s416_s29, %s15856_s17  ;;  %p15865_p3 = scmp.lt.s32.totalorder %s15856_s17, %s15856_s17 }
  0x29   : > { %p15859_p0 = pnand %p15857_p11, %p15821_p13  ;;  %p15866_p4 = por %p15865_p3, %p15864_p2 }
  0x2b   : > { %p15860_p1 = pneg %p15859_p0 }
  0x2d   : > { %p15867_p7 = pnand %p15866_p4, %p15860_p1 }
  0x2f   : > { %15870 = shalt.err (!%p15867_p7)
}
  0x30   : > { %s15971_s30 = smov 256   ;;  %s15972_s21 = smov 16  }
  0x31   : > { %13801 = dma.hbm_to_vmem [thread:$0]  (!%p16118_p12), %s19928_s1, 10752, %s416_s29, [#allocation6], %s15971_s30, %s15971_s30, %s15972_s21  }
  0x32   : > { %s15973_s27 = smov [#allocation10]  }
  0x33   : > { %s468_s20 = sshll.u32 %s15973_s27, 4  ;;  %s469_s20 = int_to_ptr.vmem [resolvable:$true] %s468_s20 }
  0x34   : > { %s15882_s28 = scalar_lea.vmem %s469_s20, 8192  ;;  %p15890_p1 = scmp.lt.s32.totalorder %s469_s20, %s469_s20 }
  0x35   : > { %p15883_p8 = scmp.ne.s32.totalorder %s469_s20, %s15882_s28  ;;  %p15891_p2 = scmp.lt.s32.totalorder %s15882_s28, %s15882_s28 }
  0x37   : > { %p15885_p11 = pnand %p15883_p8, %p15821_p13  ;;  %p15892_p3 = por %p15891_p2, %p15890_p1 }
  0x39   : > { %p15886_p0 = pneg %p15885_p11 }
  0x3b   : > { %p15893_p4 = pnand %p15892_p3, %p15886_p0 }
  0x3d   : > { %15896 = shalt.err (!%p15893_p4)
}
  0x3e   : > { %13807 = dma.hbm_to_vmem [thread:$0]  (!%p16118_p12), %s19939_s12, 8192, %s469_s20, [#allocation9], %s15969_s19, %s15969_s19, %s15970_s23  }
  0x3f   : > { %501 = sbr.rel (%p16110_p10) target bundleno = 2096 (0x830), region = 84 }
  0x44   : > { %15940 = dma.done.wait (%p13812_p9), [#allocation6], 10752  }
  0x45   : > { %15942 = vsyncadd (%p13812_p9), [#allocation6], 4294956544 }
  0x46   : > { %15944 = dma.done.wait (%p13812_p9), [#allocation9], 16384  }
  0x47   : > { %15946 = vsyncadd (%p13812_p9), [#allocation9], 4294950912  ;;  %v15974_v0 = vmov 0   ;;  %v13859_v1 = vld [vmem:[#allocation5 + $0xe4] ss:$16 sps:$4 sm:$0xff]   ;;  %p558_p10 = scmp.lt.s32.totalorder %s16082_s25, 1 }
  0x48   : > { %1188 = vmatprep.mubr.bf16.mxu1 %v15974_v0  ;;  %v13861_v2 = vld [vmem:[#allocation5 + $0x284] ss:$16 sps:$4 sm:$0xff]   ;;  %1113 = vmatprep.subr.bf16.mxu0 %v13859_v1  ;;  %v13863_v3 = vld [vmem:[#allocation5 + $0xe0] ss:$16 sps:$4 sm:$0xff]   ;;  %s19963_s26 = sld [smem:[#allocation21_spill]]  ;;  %vm1109_vm0 = vcmask 654336  }
  0x49   : > { %v13864_v4 = vld [vmem:[#allocation5 + $0x280] ss:$16 sps:$4 sm:$0xff]   ;;  %1162 = vmatprep.subr.bf16.mxu1 %v13861_v2  ;;  %v13865_v5 = vld [vmem:[#allocation5 + $0xc4] ss:$16 sps:$4 sm:$0xff]   ;;  %1114 = vmatpush1.bf16.msra.mxu0 %v13863_v3  ;;  %s559_s23 = scalar_select %p558_p10, %s16082_s25, 1  ;;  %vm1322_vm1 = vcmask 1041408  }
  0x4a   : > { %1163 = vmatpush1.bf16.msra.mxu1 %v13864_v4  ;;  %v13867_v6 = vld [vmem:[#allocation5 + $0x264] ss:$16 sps:$4 sm:$0xff]   ;;  %v13869_v7 = vld [vmem:[#allocation5 + $0xc0] ss:$16 sps:$4 sm:$0xff]   ;;  %1115 = vmatprep.subr.bf16.mxu0 %v13865_v5  ;;  %v13894_v22 = vld [vmem:[#allocation5 + $0xec] ss:$16 sps:$4 sm:$0xff]  }
  0x4b   : > { %v13870_v8 = vld [vmem:[#allocation5 + $0x260] ss:$16 sps:$4 sm:$0xff]   ;;  %1164 = vmatprep.subr.bf16.mxu1 %v13867_v6  ;;  %v13871_v9 = vld [vmem:[#allocation5 + $0xa4] ss:$16 sps:$4 sm:$0xff]   ;;  %s13783_s24 = smul.u32 24, %s559_s23  ;;  %vm1325_vm3 = vcmask 1045508  }
  0x4c   : > { %v13873_v10 = vld [vmem:[#allocation5 + $0x244] ss:$16 sps:$4 sm:$0xff]   ;;  %v13875_v11 = vld [vmem:[#allocation5 + $0xa0] ss:$16 sps:$4 sm:$0xff]   ;;  %v13892_v24 = vld [vmem:[#allocation5 + $0xe8] ss:$16 sps:$4 sm:$0xff]  }
  0x4d   : > { %v13876_v12 = vld [vmem:[#allocation5 + $0x240] ss:$16 sps:$4 sm:$0xff]   ;;  %1116 = vmatpush1.bf16.msra.mxu0 %v13869_v7  ;;  %v13877_v13 = vld [vmem:[#allocation5 + $0x84] ss:$16 sps:$4 sm:$0xff]   ;;  %v13900_v27 = vld [vmem:[#allocation5 + $0xcc] ss:$16 sps:$4 sm:$0xff]  }
  0x4e   : > { %1165 = vmatpush1.bf16.msra.mxu1 %v13870_v8  ;;  %1117 = vmatprep.subr.bf16.mxu0 %v13871_v9  ;;  %v13879_v14 = vld [vmem:[#allocation5 + $0x224] ss:$16 sps:$4 sm:$0xff]   ;;  %v13881_v15 = vld [vmem:[#allocation5 + $0x80] ss:$16 sps:$4 sm:$0xff]   ;;  %s16170_s29 = scalar_lea.vmem %s19963_s26, %s13783_s24  ;;  %v13898_v28 = vld [vmem:[#allocation5 + $0xc8] ss:$16 sps:$4 sm:$0xff]  }
  0x4f   : > { %1166 = vmatprep.subr.bf16.mxu1 %v13873_v10  ;;  %v13882_v16 = vld [vmem:[#allocation5 + $0x220] ss:$16 sps:$4 sm:$0xff]   ;;  %v13883_v17 = vld [vmem:[#allocation5 + $0x64] ss:$16 sps:$4 sm:$0xff]   ;;  %v13906_v31 = vld [vmem:[#allocation5 + $0xac] ss:$16 sps:$4 sm:$0xff]  }
  0x50   : > { %v13885_v18 = vld [vmem:[#allocation5 + $0x204] ss:$16 sps:$4 sm:$0xff]   ;;  %v13887_v19 = vld [vmem:[#allocation5 + $0x60] ss:$16 sps:$4 sm:$0xff]   ;;  %v13904_v32 = vld [vmem:[#allocation5 + $0xa8] ss:$16 sps:$4 sm:$0xff]  }
  0x51   : > { %1118 = vmatpush1.bf16.msra.mxu0 %v13875_v11  ;;  %v13888_v20 = vld [vmem:[#allocation5 + $0x200] ss:$16 sps:$4 sm:$0xff]   ;;  %v13889_v21 = vld [vmem:[#allocation5 + $0x44] ss:$16 sps:$4 sm:$0xff]   ;;  %v13912_v35 = vld [vmem:[#allocation5 + $0x8c] ss:$16 sps:$4 sm:$0xff]  }
  0x52   : > { %1167 = vmatpush1.bf16.msra.mxu1 %v13876_v12  ;;  %1119 = vmatprep.subr.bf16.mxu0 %v13877_v13  ;;  %v16173_v23 = vld [vmem:[%s16170_s29 + $0x8] ss:$12 sps:$4 sm:$0x3f]   ;;  %v13895_v25 = vld [vmem:[#allocation5 + $0x40] ss:$16 sps:$4 sm:$0xff]   ;;  %vm1318_vm8 = vcmask 1043456  }
  0x53   : > { %1168 = vmatprep.subr.bf16.mxu1 %v13879_v14  ;;  %v13896_v26 = vld [vmem:[#allocation5 + $0x24] ss:$16 sps:$4 sm:$0xff]   ;;  %v13901_v29 = vld [vmem:[#allocation5 + $0x20] ss:$16 sps:$4 sm:$0xff]   ;;  %v13910_v36 = vld [vmem:[#allocation5 + $0x88] ss:$16 sps:$4 sm:$0xff]  }
  0x54   : > { %v13902_v30 = vld [vmem:[#allocation5 + $0x4] ss:$16 sps:$4 sm:$0xff]   ;;  %v13907_v33 = vld [vmem:[#allocation5] ss:$16 sps:$4 sm:$0xff]   ;;  %v13918_v39 = vld [vmem:[#allocation5 + $0x6c] ss:$16 sps:$4 sm:$0xff]  }
  0x55   : > { %1120 = vmatpush1.bf16.msra.mxu0 %v13881_v15  ;;  %v13908_v34 = vld [vmem:[#allocation5 + $0x1e4] ss:$16 sps:$4 sm:$0xff]   ;;  %v13913_v37 = vld [vmem:[#allocation5 + $0x1e0] ss:$16 sps:$4 sm:$0xff]   ;;  %v13916_v40 = vld [vmem:[#allocation5 + $0x68] ss:$16 sps:$4 sm:$0xff]  }
  0x56   : > { %1169 = vmatpush1.bf16.msra.mxu1 %v13882_v16  ;;  %1121 = vmatprep.subr.bf16.mxu0 %v13883_v17  ;;  %v13914_v38 = vld [vmem:[#allocation5 + $0x1c4] ss:$16 sps:$4 sm:$0xff]   ;;  %v13919_v41 = vld [vmem:[#allocation5 + $0x1c0] ss:$16 sps:$4 sm:$0xff]   ;;  %v13924_v43 = vld [vmem:[#allocation5 + $0x4c] ss:$16 sps:$4 sm:$0xff]  }
  0x57   : > { %1170 = vmatprep.subr.bf16.mxu1 %v13885_v18  ;;  %v13920_v42 = vld [vmem:[#allocation5 + $0x1a4] ss:$16 sps:$4 sm:$0xff]   ;;  %v13922_v44 = vld [vmem:[#allocation5 + $0x48] ss:$16 sps:$4 sm:$0xff]   ;;  %v13925_v45 = vld [vmem:[#allocation5 + $0x1a0] ss:$16 sps:$4 sm:$0xff]  }
  0x58   : > { %v13926_v46 = vld [vmem:[#allocation5 + $0x184] ss:$16 sps:$4 sm:$0xff]   ;;  %v13930_v47 = vld [vmem:[#allocation5 + $0x2c] ss:$16 sps:$4 sm:$0xff]   ;;  %v13928_v48 = vld [vmem:[#allocation5 + $0x28] ss:$16 sps:$4 sm:$0xff]  }
  0x59   : > { %1122 = vmatpush1.bf16.msra.mxu0 %v13887_v19  ;;  %v13931_v49 = vld [vmem:[#allocation5 + $0x180] ss:$16 sps:$4 sm:$0xff]   ;;  %v13932_v50 = vld [vmem:[#allocation5 + $0x164] ss:$16 sps:$4 sm:$0xff]   ;;  %v13936_v51 = vld [vmem:[#allocation5 + $0xc] ss:$16 sps:$4 sm:$0xff]  }
  0x5a   : > { %1171 = vmatpush1.bf16.msra.mxu1 %v13888_v20  ;;  %1123 = vmatprep.subr.bf16.mxu0 %v13889_v21  ;;  %v13958_v52 = vld [vmem:[%s16170_s29 + $0x4] ss:$12 sps:$4 sm:$0x3f]   ;;  %v13934_v53 = vld [vmem:[#allocation5 + $0x8] ss:$16 sps:$4 sm:$0xff]   ;;  %vm1319_vm9 = vcmask 523268  }
  0x5b   : > { %1199 = vmatprep.subr.bf16.mxu1 %v13894_v22  ;;  %1145 = vmatprep.mubr.bf16.mxu0 %v13958_v52  ;;  %v13937_v54 = vld [vmem:[#allocation5 + $0x160] ss:$16 sps:$4 sm:$0xff]   ;;  %v13938_v55 = vld [vmem:[#allocation5 + $0x144] ss:$16 sps:$4 sm:$0xff]   ;;  %v13942_v56 = vld [vmem:[#allocation5 + $0x1ec] ss:$16 sps:$4 sm:$0xff]  }
  0x5c   : > { %v13940_v57 = vld [vmem:[#allocation5 + $0x1e8] ss:$16 sps:$4 sm:$0xff]   ;;  %v13943_v58 = vld [vmem:[#allocation5 + $0x140] ss:$16 sps:$4 sm:$0xff]   ;;  %v13944_v59 = vld [vmem:[#allocation5 + $0x124] ss:$16 sps:$4 sm:$0xff]  }
  0x5d   : > { %11598 = vmatmul.mubr.msk.bf16.vlgmr.msra.gmra.mxu1 %vm1109_vm0, %v16173_v23  ;;  %1124 = vmatpush1.bf16.msra.mxu0 %v13895_v25  ;;  %v13948_v60 = vld [vmem:[#allocation5 + $0x1cc] ss:$16 sps:$4 sm:$0xff]   ;;  %v13946_v61 = vld [vmem:[#allocation5 + $0x1c8] ss:$16 sps:$4 sm:$0xff]   ;;  %v13949_v62 = vld [vmem:[#allocation5 + $0x120] ss:$16 sps:$4 sm:$0xff]  }
  0x5e   : > { %1200 = vmatpush1.bf16.msra.mxu1 %v13892_v24  ;;  %1125 = vmatprep.subr.bf16.mxu0 %v13896_v26  ;;  %v13950_v63 = vld [vmem:[#allocation5 + $0x104] ss:$16 sps:$4 sm:$0xff]   ;;  %v13954_v1 = vld [vmem:[#allocation5 + $0x1ac] ss:$16 sps:$4 sm:$0xff]   ;;  %v13952_v2 = vld [vmem:[#allocation5 + $0x1a8] ss:$16 sps:$4 sm:$0xff]  }
  0x5f   : > { %1201 = vmatprep.subr.bf16.mxu1 %v13900_v27  ;;  %1231 = vmatprep.mubr.bf16.mxu1 %v13958_v52  ;;  %v13955_v3 = vld [vmem:[#allocation5 + $0x100] ss:$16 sps:$4 sm:$0xff]   ;;  %v13961_v4 = vld [vmem:[#allocation5 + $0x18c] ss:$16 sps:$4 sm:$0xff]   ;;  %v13959_v6 = vld [vmem:[#allocation5 + $0x188] ss:$16 sps:$4 sm:$0xff]  }
  0x60   : > { %v13956_v5 = vld [vmem:[%s16170_s29] ss:$12 sps:$4 sm:$0x3f]   ;;  %v13962_v8 = vld [vmem:[#allocation5 + $0x168] ss:$16 sps:$4 sm:$0xff]   ;;  %vm1332_vm10 = vcmask 521220   ;;  %vm16411_vm11 = vmor %vm1319_vm9, %vm1318_vm8 }
  0x61   : > { %1126 = vmatpush1.bf16.msra.mxu0 %v13901_v29  ;;  %v13964_v7 = vld [vmem:[#allocation5 + $0x16c] ss:$16 sps:$4 sm:$0xff]   ;;  %v13965_v10 = vld [vmem:[#allocation5 + $0x148] ss:$16 sps:$4 sm:$0xff]   ;;  %vm1323_vm2 = vsmask.f32 1280 }
  0x62   : > { %1202 = vmatpush1.bf16.msra.mxu1 %v13898_v28  ;;  %1127 = vmatprep.subr.bf16.mxu0 %v13902_v30  ;;  %v13967_v9 = vld [vmem:[#allocation5 + $0x14c] ss:$16 sps:$4 sm:$0xff]   ;;  %v13968_v12 = vld [vmem:[#allocation5 + $0x128] ss:$16 sps:$4 sm:$0xff]   ;;  %vm1326_vm4 = vsmask.f32 5376  ;;  %vm16365_vm5 = vmand %vm1322_vm1, %vm1323_vm2 }
  0x63   : > { %1203 = vmatprep.subr.bf16.mxu1 %v13906_v31  ;;  %v13970_v11 = vld [vmem:[#allocation5 + $0x12c] ss:$16 sps:$4 sm:$0xff]   ;;  %v13971_v14 = vld [vmem:[#allocation5 + $0x108] ss:$16 sps:$4 sm:$0xff]   ;;  %vm1327_vm6 = vmand %vm1325_vm3, %vm1326_vm4  ;;  %vm1782_vm14 = vcmask 523264   ;;  %vm2732_vm15 = vcmask 261124  }
  0x64   : > { %v13973_v13 = vld [vmem:[#allocation5 + $0x10c] ss:$16 sps:$4 sm:$0xff]   ;;  %v13974_v16 = vld [vmem:[#allocation5 + $0x288] ss:$16 sps:$4 sm:$0xff]   ;;  %vm1328_vm7 = vmor %vm1327_vm6, %vm16365_vm5  ;;  %vm2735_vm1 = vcmask 1040384   ;;  %vm2738_vm2 = vcmask 258052  }
  0x65   : > { %1128 = vmatpush1.bf16.msra.mxu0 %v13907_v33  ;;  %v13976_v15 = vld [vmem:[#allocation5 + $0x28c] ss:$16 sps:$4 sm:$0xff]   ;;  %v13977_v18 = vld [vmem:[#allocation5 + $0x268] ss:$16 sps:$4 sm:$0xff]   ;;  %vm16419_vm12 = vmand %vm1332_vm10, %vm1326_vm4  ;;  %vm2739_vm3 = vsmask.f32 4352 }
  0x66   : > { %1204 = vmatpush1.bf16.msra.mxu1 %v13904_v32  ;;  %1129 = vmatprep.subr.bf16.mxu0 %v13908_v34  ;;  %v13979_v17 = vld [vmem:[#allocation5 + $0x26c] ss:$16 sps:$4 sm:$0xff]   ;;  %v13980_v20 = vld [vmem:[#allocation5 + $0x248] ss:$16 sps:$4 sm:$0xff]   ;;  %vm1334_vm13 = vmor %vm16419_vm12, %vm16365_vm5  ;;  %s556_s26 = sand.u32 1, %s15957_s22   ;;  %s13750_s30 = sshll.u32 %s16082_s25, 4 }
  0x67   : > { %1205 = vmatprep.subr.bf16.mxu1 %v13912_v35  ;;  %v13982_v19 = vld [vmem:[#allocation5 + $0x24c] ss:$16 sps:$4 sm:$0xff]   ;;  %v13989_v22 = vld [vmem:[%s19930_s3 + $0x230] ss:$8 sps:$4 sm:$0xff]   ;;  %v13992_v26 = vld [vmem:[%s19930_s3 + $0x220] ss:$8 sps:$4 sm:$0xff]  }
  0x68   : > { %v13985_v21 = vld [vmem:[#allocation5 + $0x22c] ss:$16 sps:$4 sm:$0xff]   ;;  %v13986_v29 = vld [vmem:[#allocation5 + $0x208] ss:$16 sps:$4 sm:$0xff]   ;;  %vm17384_vm4 = vmor %vm2732_vm15, %vm1318_vm8  ;;  %vm4436_vm8 = vcmask 261120   ;;  %s557_s27 = scalar_lea.vmem [#allocation11], %s556_s26 }
  0x69   : > { %1130 = vmatpush2.bf16.msra.mxu0 %v13913_v37  ;;  %v13991_v24 = vld [vmem:[%s19930_s3 + $0x234] ss:$8 sps:$4 sm:$0xff]   ;;  %v13994_v25 = vld [vmem:[%s19930_s3 + $0x224] ss:$8 sps:$4 sm:$0xff]   ;;  %v13995_v30 = vld [vmem:[%s19930_s3 + $0x210] ss:$8 sps:$4 sm:$0xff]  }
  0x6a   : > { %1206 = vmatpush1.bf16.msra.mxu1 %v13910_v36  ;;  %1131 = vmatprep.subr.bf16.mxu0 %v13914_v38  ;;  %v13988_v27 = vld [vmem:[#allocation5 + $0x20c] ss:$16 sps:$4 sm:$0xff]   ;;  %v13998_v32 = vld [vmem:[%s19930_s3 + $0x200] ss:$8 sps:$4 sm:$0xff]   ;;  %v14001_v34 = vld [vmem:[%s19930_s3 + $0x1f0] ss:$8 sps:$4 sm:$0xff]  }
  0x6b   : > { %1207 = vmatprep.subr.bf16.mxu1 %v13918_v39  ;;  %v13997_v28 = vld [vmem:[%s19930_s3 + $0x214] ss:$8 sps:$4 sm:$0xff]   ;;  %v14000_v31 = vld [vmem:[%s19930_s3 + $0x204] ss:$8 sps:$4 sm:$0xff]   ;;  %v14004_v36 = vld [vmem:[%s19930_s3 + $0x1e0] ss:$8 sps:$4 sm:$0xff]  }
  0x6c   : > { %v14003_v33 = vld [vmem:[%s19930_s3 + $0x1f4] ss:$8 sps:$4 sm:$0xff]   ;;  %v14006_v35 = vld [vmem:[%s19930_s3 + $0x1e4] ss:$8 sps:$4 sm:$0xff]   ;;  %v14010_v39 = vld [vmem:[%s19930_s3 + $0x1c0] ss:$8 sps:$4 sm:$0xff]  }
  0x6d   : > { %1132 = vmatpush2.bf16.msra.mxu0 %v13919_v41  ;;  %v14009_v37 = vld [vmem:[%s19930_s3 + $0x1d4] ss:$8 sps:$4 sm:$0xff]   ;;  %v14012_v38 = vld [vmem:[%s19930_s3 + $0x1c4] ss:$8 sps:$4 sm:$0xff]   ;;  %v14013_v41 = vld [vmem:[%s19930_s3 + $0x2b0] ss:$8 sps:$4 sm:$0xff]  }
  0x6e   : > { %1208 = vmatpush1.bf16.msra.mxu1 %v13916_v40  ;;  %1133 = vmatprep.subr.bf16.mxu0 %v13920_v42  ;;  %v14015_v40 = vld [vmem:[%s19930_s3 + $0x2b4] ss:$8 sps:$4 sm:$0xff]   ;;  %v14018_v42 = vld [vmem:[%s19930_s3 + $0x2a4] ss:$8 sps:$4 sm:$0xff]   ;;  %vm17399_vm6 = vmand %vm2738_vm2, %vm2739_vm3  ;;  %s11414_s20 = sshll.u32 %s557_s27, 4  ;;  %s19976_s21 = sld [smem:[#allocation22_spill]]  ;;  %s11415_s20 = int_to_ptr.vmem [resolvable:$true] %s11414_s20 }
  0x6f   : > { %1209 = vmatprep.subr.bf16.mxu1 %v13924_v43  ;;  %v14016_v43 = vld [vmem:[%s19930_s3 + $0x2a0] ss:$8 sps:$4 sm:$0xff]   ;;  %v14033_v52 = vld [vmem:[%s19930_s3 + $0x334] ss:$8 sps:$4 sm:$0xff]   ;;  %s11402_s24 = scalar_lea.sflag [#allocation7], %s556_s26  ;;  %s15897_s18 = scalar_lea.vmem %s11415_s20, 16 }
  0x70   : > { %p15898_p9 = scmp.ne.s32.totalorder %s11415_s20, %s15897_s18  ;;  %s15975_s25 = smov [#allocation11]  }
  0x71   : > { %1134 = vmatpush2.bf16.msra.mxu0 %v13925_v45  ;;  %v14019_v45 = vld [vmem:[%s19930_s3 + $0x290] ss:$8 sps:$4 sm:$0xff]   ;;  %s15901_s29 = sshll.u32 %s15975_s25, 4  ;;  %s15902_s29 = int_to_ptr.vmem [resolvable:$false] %s15901_s29 }
  0x72   : > { %1210 = vmatpush1.bf16.msra.mxu1 %v13922_v44  ;;  %1135 = vmatprep.subr.bf16.mxu0 %v13926_v46  ;;  %v14021_v44 = vld [vmem:[%s19930_s3 + $0x294] ss:$8 sps:$4 sm:$0xff]   ;;  %v14024_v46 = vld [vmem:[%s19930_s3 + $0x284] ss:$8 sps:$4 sm:$0xff]   ;;  %p15899_p12 = pnand %p15898_p9, %p16099_p5  ;;  %s15903_s19 = scalar_lea.vmem %s15902_s29, 32 }
  0x73   : > { %1211 = vmatprep.subr.bf16.mxu1 %v13930_v47  ;;  %v14022_v47 = vld [vmem:[%s19930_s3 + $0x280] ss:$8 sps:$4 sm:$0xff]   ;;  %p15904_p7 = scmp.lt.s32.totalorder %s11415_s20, %s15902_s29  ;;  %p15905_p8 = scmp.lt.s32.totalorder %s15903_s19, %s15897_s18 }
  0x74   : > { %s19977_s17 = smov %s19976_s21  ;;  %s19892_s23 = scalar_lea.hbm %s19976_s21, %s13750_s30 }
  0x75   : > { %1136 = vmatpush2.bf16.msra.mxu0 %v13931_v49  ;;  %v14025_v49 = vld [vmem:[%s19930_s3 + $0x270] ss:$8 sps:$4 sm:$0xff]   ;;  %p15900_p13 = pneg %p15899_p12  ;;  %p15906_p11 = por %p15905_p8, %p15904_p7 }
  0x76   : > { %1212 = vmatpush1.bf16.msra.mxu1 %v13928_v48  ;;  %1137 = vmatprep.subr.bf16.mxu0 %v13932_v50  ;;  %v14027_v48 = vld [vmem:[%s19930_s3 + $0x274] ss:$8 sps:$4 sm:$0xff]   ;;  %v14030_v50 = vld [vmem:[%s19930_s3 + $0x264] ss:$8 sps:$4 sm:$0xff]  }
  0x77   : > { %1213 = vmatprep.subr.bf16.mxu1 %v13936_v51  ;;  %v14028_v51 = vld [vmem:[%s19930_s3 + $0x260] ss:$8 sps:$4 sm:$0xff]   ;;  %p15907_p0 = pnand %p15906_p11, %p15900_p13 }
  0x79   : > { %1138 = vmatpush2.bf16.msra.mxu0 %v13937_v54  ;;  %v14036_v54 = vld [vmem:[%s19930_s3 + $0x254] ss:$8 sps:$4 sm:$0xff]  }
  0x7a   : > { %1214 = vmatpush1.bf16.msra.mxu1 %v13934_v53  ;;  %1139 = vmatprep.subr.bf16.mxu0 %v13938_v55  ;;  %v14031_v53 = vld [vmem:[%s19930_s3 + $0x330] ss:$8 sps:$4 sm:$0xff]  }
  0x7b   : > { %1215 = vmatprep.subr.bf16.mxu1 %v13942_v56  ;;  %v14034_v55 = vld [vmem:[%s19930_s3 + $0x250] ss:$8 sps:$4 sm:$0xff]   ;;  %v14039_v56 = vld [vmem:[%s19930_s3 + $0x324] ss:$8 sps:$4 sm:$0xff]  }
  0x7d   : > { %1140 = vmatpush2.bf16.msra.mxu0 %v13943_v58  ;;  %v14042_v58 = vld [vmem:[%s19930_s3 + $0x244] ss:$8 sps:$4 sm:$0xff]  }
  0x7e   : > { %1216 = vmatpush2.bf16.msra.mxu1 %v13940_v57  ;;  %1141 = vmatprep.subr.bf16.mxu0 %v13944_v59  ;;  %v14037_v57 = vld [vmem:[%s19930_s3 + $0x320] ss:$8 sps:$4 sm:$0xff]  }
  0x7f   : > { %1217 = vmatprep.subr.bf16.mxu1 %v13948_v60  ;;  %v14040_v59 = vld [vmem:[%s19930_s3 + $0x240] ss:$8 sps:$4 sm:$0xff]   ;;  %v14043_v60 = vld [vmem:[%s19930_s3 + $0x310] ss:$8 sps:$4 sm:$0xff]  }
  0x81   : > { %1142 = vmatpush2.bf16.msra.mxu0 %v13949_v62  ;;  %v14048_v62 = vld [vmem:[%s19930_s3 + $0x174] ss:$8 sps:$4 sm:$0xff]  }
  0x82   : > { %1218 = vmatpush2.bf16.msra.mxu1 %v13946_v61  ;;  %1143 = vmatprep.subr.bf16.mxu0 %v13950_v63  ;;  %v14045_v61 = vld [vmem:[%s19930_s3 + $0x314] ss:$8 sps:$4 sm:$0xff]   ;;  %v14051_v63 = vld [vmem:[%s19930_s3 + $0x304] ss:$8 sps:$4 sm:$0xff]  }
  0x83   : > { %1219 = vmatprep.subr.bf16.mxu1 %v13954_v1  ;;  %v14049_v1 = vld [vmem:[%s19930_s3 + $0x300] ss:$8 sps:$4 sm:$0xff]  }
  0x85   : > { %1144 = vmatpush2.bf16.msra.mxu0 %v13955_v3  ;;  %v14055_v3 = vld [vmem:[%s19930_s3 + $0x2f0] ss:$8 sps:$4 sm:$0xff]  }
  0x86   : > { %1220 = vmatpush2.bf16.msra.mxu1 %v13952_v2  ;;  %1786 = vmatprep.subr.bf16.mxu0 %v13991_v24  ;;  %v14057_v2 = vld [vmem:[%s19930_s3 + $0x2f4] ss:$8 sps:$4 sm:$0xff]  }
  0x87   : > { %1221 = vmatprep.subr.bf16.mxu1 %v13961_v4  ;;  %v14063_v4 = vld [vmem:[%s19930_s3 + $0x2e4] ss:$8 sps:$4 sm:$0xff]  }
  0x88   : > { %1146 = vmatmul.mubr.bf16.vlgmr.msra.gmra.mxu0 %v13956_v5 }
  0x89   : > { %1787 = vmatpush1.bf16.msra.mxu0 %v13989_v22  ;;  %v652_v22 = vld [vmem:[%s19929_s2] sm:$0xf] }
  0x8a   : > { %1222 = vmatpush2.bf16.msra.mxu1 %v13959_v6  ;;  %1788 = vmatprep.subr.bf16.mxu0 %v13994_v25  ;;  %v14069_v6 = vld [vmem:[%s19930_s3 + $0x2d4] ss:$8 sps:$4 sm:$0xff]  }
  0x8b   : > { %1223 = vmatprep.subr.bf16.mxu1 %v13964_v7  ;;  %v14067_v7 = vld [vmem:[%s19930_s3 + $0x2d0] ss:$8 sps:$4 sm:$0xff]  }
  0x8d   : > { %1789 = vmatpush1.bf16.msra.mxu0 %v13992_v26 }
  0x8e   : > { %1224 = vmatpush2.bf16.msra.mxu1 %v13962_v8  ;;  %1790 = vmatprep.subr.bf16.mxu0 %v13997_v28  ;;  %v14075_v8 = vld [vmem:[%s19930_s3 + $0x2c4] ss:$8 sps:$4 sm:$0xff]  }
  0x8f   : > { %1225 = vmatprep.subr.bf16.mxu1 %v13967_v9  ;;  %v14073_v9 = vld [vmem:[%s19930_s3 + $0x2c0] ss:$8 sps:$4 sm:$0xff]  }
  0x91   : > { %1791 = vmatpush1.bf16.msra.mxu0 %v13995_v30 }
  0x92   : > { %1226 = vmatpush2.bf16.msra.mxu1 %v13965_v10  ;;  %1792 = vmatprep.subr.bf16.mxu0 %v14000_v31  ;;  %v14081_v10 = vld [vmem:[%s19930_s3 + $0x374] ss:$8 sps:$4 sm:$0xff]  }
  0x93   : > { %1227 = vmatprep.subr.bf16.mxu1 %v13970_v11  ;;  %v14079_v11 = vld [vmem:[%s19930_s3 + $0x370] ss:$8 sps:$4 sm:$0xff]  }
  0x95   : > { %1793 = vmatpush1.bf16.msra.mxu0 %v13998_v32 }
  0x96   : > { %1228 = vmatpush2.bf16.msra.mxu1 %v13968_v12  ;;  %1794 = vmatprep.subr.bf16.mxu0 %v14003_v33  ;;  %v14087_v12 = vld [vmem:[%s19930_s3 + $0x364] ss:$8 sps:$4 sm:$0xff]  }
  0x97   : > { %1229 = vmatprep.subr.bf16.mxu1 %v13973_v13  ;;  %v14085_v13 = vld [vmem:[%s19930_s3 + $0x360] ss:$8 sps:$4 sm:$0xff]  }
  0x99   : > { %1795 = vmatpush1.bf16.msra.mxu0 %v14001_v34 }
  0x9a   : > { %1230 = vmatpush2.bf16.msra.mxu1 %v13971_v14  ;;  %1796 = vmatprep.subr.bf16.mxu0 %v14006_v35  ;;  %v14093_v14 = vld [vmem:[%s19930_s3 + $0x354] ss:$8 sps:$4 sm:$0xff]  }
  0x9b   : > { %1248 = vmatprep.subr.bf16.mxu1 %v13976_v15  ;;  %v14091_v15 = vld [vmem:[%s19930_s3 + $0x350] ss:$8 sps:$4 sm:$0xff]  }
  0x9d   : > { %1232 = vmatmul.mubr.bf16.vlgmr.msra.gmra.mxu1 %v13956_v5  ;;  %1797 = vmatpush1.bf16.msra.mxu0 %v14004_v36  ;;  %v14061_v5 = vld [vmem:[%s19930_s3 + $0x2e0] ss:$8 sps:$4 sm:$0xff]  }
  0x9e   : > { %1249 = vmatpush1.bf16.msra.mxu1 %v13974_v16  ;;  %1274 = vmatprep.mubr.bf16.mxu1 %v15974_v0  ;;  %v13983_v0 = vld [vmem:[#allocation5 + $0x228] ss:$16 sps:$4 sm:$0xff]   ;;  %v14101_v16 = vld [vmem:[%s19930_s3 + $0x344] ss:$8 sps:$4 sm:$0xff]  }
  0x9f   : > { %1250 = vmatprep.subr.bf16.mxu1 %v13979_v17  ;;  %1798 = vmatprep.subr.bf16.mxu0 %v14009_v37  ;;  %v14099_v17 = vld [vmem:[%s19930_s3 + $0x340] ss:$8 sps:$4 sm:$0xff]  }
  0xa2   : > { %1251 = vmatpush1.bf16.msra.mxu1 %v13977_v18  ;;  %v14107_v18 = vld [vmem:[%s19930_s3 + $0x74] ss:$8 sps:$4 sm:$0xff]  }
  0xa3   : > { %1252 = vmatprep.subr.bf16.mxu1 %v13982_v19  ;;  %v654_v19 = vlaneseq }
  0xa6   : > { %1253 = vmatpush1.bf16.msra.mxu1 %v13980_v20  ;;  %v655_v20 = vshrl.u32 %v654_v19, 7 }
  0xa7   : > { %1254 = vmatprep.subr.bf16.mxu1 %v13985_v21 }
  0xa8   : > { %v16356_v21 = vsub.s32 0, %v655_v20  ;;  %v16361_v24 = vsub.s32 1, %v655_v20 }
  0xaa   : > { %1255 = vmatpush1.bf16.msra.mxu1 %v13983_v0  ;;  %v657_v0 = vrot.slane %v652_v22, %v16356_v21  ;;  %v661_v26 = vrot.slane %v652_v22, %v16361_v24 }
  0xab   : > { %1256 = vmatprep.subr.bf16.mxu1 %v13988_v27 }
  0xae   : > { %1257 = vmatpush1.bf16.msra.mxu1 %v13986_v29 }
  0xaf   : > { %1829 = vmatprep.subr.bf16.mxu1 %v14033_v52 }
  0xb1   : > { %11599 = vmatmul.mubr.msk.bf16.vlgmr.msra.gmra.mxu1 %vm1109_vm0, %v16173_v23  ;;  %v14007_v23 = vld [vmem:[%s19930_s3 + $0x1d0] ss:$8 sps:$4 sm:$0xff]   ;;  %vm2736_vm0 = vsmask.f32 256 }
  0xb2   : > { %1799 = vmatpush1.bf16.msra.mxu0 %v14007_v23  ;;  %1830 = vmatpush1.bf16.msra.mxu1 %v14031_v53  ;;  %vm17390_vm5 = vmand %vm2735_vm1, %vm2736_vm0 }
  0xb3   : > { %1800 = vmatprep.subr.bf16.mxu0 %v14012_v38  ;;  %1831 = vmatprep.subr.bf16.mxu1 %v14039_v56 }
  0xb6   : > { %1801 = vmatpush1.bf16.msra.mxu0 %v14010_v39  ;;  %1832 = vmatpush1.bf16.msra.mxu1 %v14037_v57 }
  0xb7   : > { %1802 = vmatprep.subr.bf16.mxu0 %v14015_v40  ;;  %1833 = vmatprep.subr.bf16.mxu1 %v14045_v61 }
  0xba   : > { %1803 = vmatpush2.bf16.msra.mxu0 %v14013_v41  ;;  %1834 = vmatpush1.bf16.msra.mxu1 %v14043_v60  ;;  %v14090_v41 = vld [vmem:[%s19930_s3 + $0x104] ss:$8 sps:$4 sm:$0xff]  }
  0xbb   : > { %1804 = vmatprep.subr.bf16.mxu0 %v14018_v42  ;;  %1835 = vmatprep.subr.bf16.mxu1 %v14051_v63 }
  0xbe   : > { %1805 = vmatpush2.bf16.msra.mxu0 %v14016_v43  ;;  %1836 = vmatpush1.bf16.msra.mxu1 %v14049_v1  ;;  %v16383_v1 = vsub.s32 2, %v655_v20 }
  0xbf   : > { %1806 = vmatprep.subr.bf16.mxu0 %v14021_v44  ;;  %1837 = vmatprep.subr.bf16.mxu1 %v14057_v2  ;;  %v14054_v2 = vld [vmem:[%s19930_s3 + $0x164] ss:$8 sps:$4 sm:$0xff]  }
  0xc2   : > { %1807 = vmatpush2.bf16.msra.mxu0 %v14019_v45  ;;  %1838 = vmatpush1.bf16.msra.mxu1 %v14055_v3  ;;  %v16388_v3 = vsub.s32 3, %v655_v20 }
  0xc3   : > { %1808 = vmatprep.subr.bf16.mxu0 %v14024_v46  ;;  %1839 = vmatprep.subr.bf16.mxu1 %v14063_v4 }
  0xc6   : > { %1809 = vmatpush2.bf16.msra.mxu0 %v14022_v47  ;;  %1840 = vmatpush1.bf16.msra.mxu1 %v14061_v5  ;;  %v1329_v47 = vld [vmem:[#allocation2 + $0x10] sm:$0x33]  ;;  %v14052_v5 = vld [vmem:[%s19930_s3 + $0x160] ss:$8 sps:$4 sm:$0xff]  }
  0xc7   : > { %1810 = vmatprep.subr.bf16.mxu0 %v14027_v48  ;;  %1841 = vmatprep.subr.bf16.mxu1 %v14069_v6  ;;  %v665_v6 = vrot.slane %v652_v22, %v16383_v1 }
  0xca   : > { %1811 = vmatpush2.bf16.msra.mxu0 %v14025_v49  ;;  %1842 = vmatpush1.bf16.msra.mxu1 %v14067_v7  ;;  %v14060_v7 = vld [vmem:[%s19930_s3 + $0x154] ss:$8 sps:$4 sm:$0xff]  }
  0xcb   : > { %1812 = vmatprep.subr.bf16.mxu0 %v14030_v50  ;;  %1843 = vmatprep.subr.bf16.mxu1 %v14075_v8  ;;  %v669_v8 = vrot.slane %v652_v22, %v16388_v3  ;;  %v14140_v22 = vld [vmem:[%s19930_s3 + $0x24] ss:$8 sps:$4 sm:$0xff]  }
  0xce   : > { %1813 = vmatpush2.bf16.msra.mxu0 %v14028_v51  ;;  %1844 = vmatpush1.bf16.msra.mxu1 %v14073_v9 }
  0xcf   : > { %1814 = vmatprep.subr.bf16.mxu0 %v14036_v54  ;;  %1853 = vmatprep.subr.bf16.mxu1 %v14081_v10  ;;  %v14058_v10 = vld [vmem:[%s19930_s3 + $0x150] ss:$8 sps:$4 sm:$0xff]  }
  0xd2   : > { %1815 = vmatpush2.bf16.msra.mxu0 %v14034_v55  ;;  %1854 = vmatpush2.bf16.msra.mxu1 %v14079_v11  ;;  %v14066_v11 = vld [vmem:[%s19930_s3 + $0x144] ss:$8 sps:$4 sm:$0xff]  }
  0xd3   : > { %1816 = vmatprep.subr.bf16.mxu0 %v14042_v58  ;;  %1855 = vmatprep.subr.bf16.mxu1 %v14087_v12 }
  0xd6   : > { %1817 = vmatpush2.bf16.msra.mxu0 %v14040_v59  ;;  %1856 = vmatpush2.bf16.msra.mxu1 %v14085_v13 }
  0xd7   : > { %2200 = vmatprep.subr.bf16.mxu0 %v14048_v62  ;;  %1857 = vmatprep.subr.bf16.mxu1 %v14093_v14  ;;  %v14046_v62 = vld [vmem:[%s19930_s3 + $0x170] ss:$8 sps:$4 sm:$0xff]  }
  0xda   : > { %1858 = vmatpush2.bf16.msra.mxu1 %v14091_v15 }
  0xdb   : > { %1859 = vmatprep.subr.bf16.mxu1 %v14101_v16 }
  0xde   : > { %1860 = vmatpush2.bf16.msra.mxu1 %v14099_v17  ;;  %v14064_v17 = vld [vmem:[%s19930_s3 + $0x140] ss:$8 sps:$4 sm:$0xff]  }
  0xdf   : > { %2157 = vmatprep.subr.bf16.mxu1 %v14107_v18  ;;  %v14072_v18 = vld [vmem:[%s19930_s3 + $0x134] ss:$8 sps:$4 sm:$0xff]  }
 0x11d   : > { %v1190_v25 = vpop.f32.mrf.mxu1 }
 0x11f   : > { %v1192_v27 = vpop.f32.mrf.mxu1 }
 0x121   : > { %v1194_v33 = vpop.f32.mrf.mxu1 }
 0x123   : > { %v1196_v42 = vpop.f32.mrf.mxu1 }
 0x148   : > { %v1147_v28 = vpop.f32.mrf.mxu0 }
 0x149   : > { %v1148_v29 = vadd.f32 %v1147_v28, %v657_v0 }
 0x14a   : > { %v1149_v30 = vpop.f32.mrf.mxu0 }
 0x14b   : > { %v1191_v31 = vadd.f32 %v1190_v25, %v1148_v29  ;;  %v1150_v32 = vadd.f32 %v1149_v30, %v661_v26 }
 0x14c   : > { %v1151_v34 = vpop.f32.mrf.mxu0 }
 0x14d   : > { %v1193_v35 = vadd.f32 %v1192_v27, %v1150_v32  ;;  %v1152_v36 = vadd.f32 %v1151_v34, %v657_v0  ;;  %v1285_v23 = vmax.f32 %v1191_v31, 0.0  ;;  %v14070_v0 = vld [vmem:[%s19930_s3 + $0x130] ss:$8 sps:$4 sm:$0xff]   ;;  %v14078_v32 = vld [vmem:[%s19930_s3 + $0x124] ss:$8 sps:$4 sm:$0xff]  }
 0x14e   : > { %v1153_v37 = vpop.f32.mrf.mxu0  ;;  %v14152_v31 = vld [vmem:[%s19930_s3 + $0x4] ss:$8 sps:$4 sm:$0xff]  }
 0x14f   : > { %v1286_v38 = vmax.f32 %v1193_v35, 0.0  ;;  %v1195_v39 = vadd.f32 %v1194_v33, %v1152_v36  ;;  %v1154_v40 = vadd.f32 %v1153_v37, %v661_v26  ;;  %v1335_v35 = vld [vmem:[#allocation2 + $0x18] sm:$0x33]  ;;  %v14076_v36 = vld [vmem:[%s19930_s3 + $0x120] ss:$8 sps:$4 sm:$0xff]  }
 0x151   : > { %v13753_v43 = vpack.c.bf16 %v1286_v38, %v1285_v23  ;;  %v1197_v44 = vadd.f32 %v1196_v42, %v1154_v40  ;;  %v1289_v45 = vmax.f32 %v1195_v39, 0.0  ;;  %v14084_v38 = vld [vmem:[%s19930_s3 + $0x114] ss:$8 sps:$4 sm:$0xff]   ;;  %v14082_v42 = vld [vmem:[%s19930_s3 + $0x110] ss:$8 sps:$4 sm:$0xff]  }
 0x153   : > { %1317 = vst [vmem:[#allocation2] sm:$0xff] %v13753_v43  ;;  %v1290_v46 = vmax.f32 %v1197_v44, 0.0  ;;  %v14096_v44 = vld [vmem:[%s19930_s3 + $0x1b4] ss:$8 sps:$4 sm:$0xff]  }
 0x155   : > { %v13755_v48 = vpack.c.bf16 %v1290_v46, %v1289_v45 }
 0x157   : > { %v1330_v49 = vsel %vm1328_vm7, %v13755_v48, %v1329_v47  ;;  %v14094_v47 = vld [vmem:[%s19930_s3 + $0x1b0] ss:$8 sps:$4 sm:$0xff]   ;;  %vm2741_vm7 = vmor %vm17399_vm6, %vm17390_vm5 }
 0x158   : > { %1331 = vst [vmem:[#allocation2 + $0x10] sm:$0x33] %v1330_v49 }
 0x15d   : > { %v1233_v53 = vpop.f32.mrf.mxu1 }
 0x15e   : > { %v1234_v12 = vadd.f32 %v1233_v53, %v665_v6 }
 0x15f   : > { %v1340_v50 = vld [vmem:[#allocation2 + $0x10] sm:$0x11]  ;;  %v1235_v60 = vpop.f32.mrf.mxu1 }
 0x160   : > { %v16372_v51 = vcombine.low %v13753_v43, %v1340_v50  ;;  %v16374_v52 = vcombine.high %v13753_v43, %v1340_v50  ;;  %v1236_v14 = vadd.f32 %v1235_v60, %v669_v8  ;;  %v14088_v43 = vld [vmem:[%s19930_s3 + $0x100] ss:$8 sps:$4 sm:$0xff]   ;;  %v14104_v50 = vld [vmem:[%s19930_s3 + $0x1a4] ss:$8 sps:$4 sm:$0xff]   ;;  %v14110_v60 = vld [vmem:[%s19930_s3 + $0x194] ss:$8 sps:$4 sm:$0xff]  }
 0x161   : > { %v1237_v4 = vpop.f32.mrf.mxu1 }
 0x162   : > { %v1481_v54 = vshll.u32 %v16374_v52, 16  ;;  %v1474_v55 = vshll.u32 %v16372_v51, 16  ;;  %v1479_v56 = vshrl.u32 %v16374_v52, 16  ;;  %v1472_v58 = vshrl.u32 %v16372_v51, 16 }
 0x163   : > { %v1239_v9 = vpop.f32.mrf.mxu1  ;;  %v1238_v19 = vadd.f32 %v1237_v4, %v665_v6  ;;  %v14113_v4 = vld [vmem:[%s19930_s3 + $0x64] ss:$8 sps:$4 sm:$0xff]  }
 0x164   : > { %v1483_v57 = vrot.slane %v1481_v54, 1  ;;  %v1476_v59 = vrot.slane %v1474_v55, 1  ;;  %v1240_v26 = vadd.f32 %v1239_v9, %v669_v8  ;;  %v14102_v55 = vld [vmem:[%s19930_s3 + $0x1a0] ss:$8 sps:$4 sm:$0xff]   ;;  %v14116_v6 = vld [vmem:[%s19930_s3 + $0x184] ss:$8 sps:$4 sm:$0xff]  }
 0x165   : > { %v14119_v8 = vld [vmem:[%s19930_s3 + $0x54] ss:$8 sps:$4 sm:$0xff]   ;;  %v14117_v9 = vld [vmem:[%s19930_s3 + $0x50] ss:$8 sps:$4 sm:$0xff]  }
 0x166   : > { %v1484_v61 = vor.u32 %v1483_v57, %v1479_v56  ;;  %v1477_v63 = vor.u32 %v1476_v59, %v1472_v58 }
 0x168   : > { %1818 = vmatprep.mubr.bf16.mxu0 %v1484_v61 }
 0x169   : > { %1819 = vmatmul.mubr.bf16.vlgmr.msra.gmra.mxu0 %v1477_v63 }
 0x16a   : > { %2201 = vmatpush1.bf16.msra.mxu0 %v14046_v62  ;;  %v14105_v62 = vld [vmem:[%s19930_s3 + $0x70] ss:$8 sps:$4 sm:$0xff]  }
 0x16b   : > { %2202 = vmatprep.subr.bf16.mxu0 %v14054_v2  ;;  %v14108_v2 = vld [vmem:[%s19930_s3 + $0x190] ss:$8 sps:$4 sm:$0xff]  }
 0x16e   : > { %2203 = vmatpush1.bf16.msra.mxu0 %v14052_v5  ;;  %v14111_v5 = vld [vmem:[%s19930_s3 + $0x60] ss:$8 sps:$4 sm:$0xff]  }
 0x16f   : > { %2204 = vmatprep.subr.bf16.mxu0 %v14060_v7  ;;  %v14114_v7 = vld [vmem:[%s19930_s3 + $0x180] ss:$8 sps:$4 sm:$0xff]  }
 0x171   : > { %v1276_v13 = vpop.f32.mrf.mxu1 }
 0x172   : > { %v1277_v15 = vadd.f32 %v1276_v13, %v1234_v12  ;;  %2205 = vmatpush1.bf16.msra.mxu0 %v14058_v10  ;;  %v14122_v10 = vld [vmem:[%s19930_s3 + $0x3f4] ss:$8 sps:$4 sm:$0xff]   ;;  %v14128_v12 = vld [vmem:[%s19930_s3 + $0x44] ss:$8 sps:$4 sm:$0xff]   ;;  %v14126_v13 = vld [vmem:[%s19930_s3 + $0x40] ss:$8 sps:$4 sm:$0xff]  }
 0x173   : > { %v1278_v16 = vpop.f32.mrf.mxu1  ;;  %2206 = vmatprep.subr.bf16.mxu0 %v14066_v11  ;;  %v14125_v11 = vld [vmem:[#allocation2 + $0x4] ss:$16 sps:$4 sm:$0x3e]  }
 0x174   : > { %v1279_v20 = vadd.f32 %v1278_v16, %v1236_v14  ;;  %v1287_v27 = vmax.f32 %v1277_v15, 0.0  ;;  %v14131_v14 = vld [vmem:[%s19930_s3 + $0x3e4] ss:$8 sps:$4 sm:$0xff]   ;;  %v2321_v15 = vrot.slane %v14125_v11, 1  ;;  %v14129_v16 = vld [vmem:[%s19930_s3 + $0x3e0] ss:$8 sps:$4 sm:$0xff]  }
 0x175   : > { %v1280_v25 = vpop.f32.mrf.mxu1  ;;  %v14211_v11 = vld [vmem:[%s19930_s3 + $0x414] ss:$8 sps:$4 sm:$0xff]  }
 0x176   : > { %v1288_v28 = vmax.f32 %v1279_v20, 0.0  ;;  %v1281_v29 = vadd.f32 %v1280_v25, %v1238_v19  ;;  %2207 = vmatpush1.bf16.msra.mxu0 %v14064_v17  ;;  %v14134_v17 = vld [vmem:[%s19930_s3 + $0x34] ss:$8 sps:$4 sm:$0xff]   ;;  %v14135_v20 = vld [vmem:[%s19930_s3 + $0x3d0] ss:$8 sps:$4 sm:$0xff]  }
 0x177   : > { %v1282_v30 = vpop.f32.mrf.mxu1  ;;  %2208 = vmatprep.subr.bf16.mxu0 %v14072_v18  ;;  %v14132_v18 = vld [vmem:[%s19930_s3 + $0x30] ss:$8 sps:$4 sm:$0xff]   ;;  %v14137_v19 = vld [vmem:[%s19930_s3 + $0x3d4] ss:$8 sps:$4 sm:$0xff]   ;;  %v14138_v25 = vld [vmem:[%s19930_s3 + $0x20] ss:$8 sps:$4 sm:$0xff]  }
 0x178   : > { %v13754_v33 = vpack.c.bf16 %v1288_v28, %v1287_v27  ;;  %v1283_v34 = vadd.f32 %v1282_v30, %v1240_v26  ;;  %v1291_v37 = vmax.f32 %v1281_v29, 0.0  ;;  %v14141_v26 = vld [vmem:[%s19930_s3 + $0x3c0] ss:$8 sps:$4 sm:$0xff]   ;;  %v14146_v27 = vld [vmem:[%s19930_s3 + $0x14] ss:$8 sps:$4 sm:$0xff]  }
 0x179   : > { %v14144_v28 = vld [vmem:[%s19930_s3 + $0x10] ss:$8 sps:$4 sm:$0xff]   ;;  %v14149_v29 = vld [vmem:[%s19930_s3 + $0x3b4] ss:$8 sps:$4 sm:$0xff]  }
 0x17a   : > { %1321 = vst.msk [vmem:[#allocation2 + $0x8] sm:$0xff] %vm16411_vm11, %v13754_v33  ;;  %v1292_v23 = vmax.f32 %v1283_v34, 0.0  ;;  %2209 = vmatpush1.bf16.msra.mxu0 %v14070_v0  ;;  %v14143_v0 = vld [vmem:[%s19930_s3 + $0x3c4] ss:$8 sps:$4 sm:$0xff]   ;;  %v14147_v30 = vld [vmem:[%s19930_s3 + $0x3b0] ss:$8 sps:$4 sm:$0xff]  }
 0x17b   : > { %2210 = vmatprep.subr.bf16.mxu0 %v14078_v32  ;;  %v14150_v32 = vld [vmem:[%s19930_s3] ss:$8 sps:$4 sm:$0xff]   ;;  %v14155_v33 = vld [vmem:[%s19930_s3 + $0x3a4] ss:$8 sps:$4 sm:$0xff]  }
 0x17c   : > { %v13756_v39 = vpack.c.bf16 %v1292_v23, %v1291_v37  ;;  %v14153_v34 = vld [vmem:[%s19930_s3 + $0x3a0] ss:$8 sps:$4 sm:$0xff]   ;;  %v14161_v37 = vld [vmem:[%s19930_s3 + $0x394] ss:$8 sps:$4 sm:$0xff]   ;;  %v14159_v23 = vld [vmem:[%s19930_s3 + $0x390] ss:$8 sps:$4 sm:$0xff]  }
 0x17e   : > { %v1336_v40 = vsel %vm1334_vm13, %v13756_v39, %v1335_v35  ;;  %2211 = vmatpush1.bf16.msra.mxu0 %v14076_v36  ;;  %v14158_v35 = vld [vmem:[%s19930_s3 + $0xf4] ss:$8 sps:$4 sm:$0xff]   ;;  %v14156_v36 = vld [vmem:[%s19930_s3 + $0xf0] ss:$8 sps:$4 sm:$0xff]   ;;  %v14162_v39 = vld [vmem:[%s19930_s3 + $0xe0] ss:$8 sps:$4 sm:$0xff]  }
 0x17f   : > { %1337 = vst [vmem:[#allocation2 + $0x18] sm:$0x33] %v1336_v40  ;;  %2212 = vmatprep.subr.bf16.mxu0 %v14084_v38  ;;  %v14164_v38 = vld [vmem:[%s19930_s3 + $0xe4] ss:$8 sps:$4 sm:$0xff]  }
 0x180   : > { %v14167_v40 = vld [vmem:[%s19930_s3 + $0x384] ss:$8 sps:$4 sm:$0xff]  }
 0x181   : > { %v16450_v45 = vld [vmem:[#allocation2 + $0x8] sm:$0xff] }
 0x182   : > { %2213 = vmatpush1.bf16.msra.mxu0 %v14082_v42  ;;  %v14165_v42 = vld [vmem:[%s19930_s3 + $0x380] ss:$8 sps:$4 sm:$0xff]  }
 0x183   : > { %2214 = vmatprep.subr.bf16.mxu0 %v14090_v41  ;;  %v14170_v41 = vld [vmem:[%s19930_s3 + $0xd4] ss:$8 sps:$4 sm:$0xff]  }
 0x186   : > { %v1341_v46 = vld [vmem:[#allocation2 + $0x18] sm:$0x11]  ;;  %2215 = vmatpush1.bf16.msra.mxu0 %v14088_v43 }
 0x187   : > { %v11662_v48 = vcombine.low %v16450_v45, %v1341_v46  ;;  %v11663_v49 = vcombine.high %v16450_v45, %v1341_v46  ;;  %2224 = vmatprep.subr.bf16.mxu0 %v14096_v44  ;;  %v14168_v43 = vld [vmem:[%s19930_s3 + $0xd0] ss:$8 sps:$4 sm:$0xff]   ;;  %v14173_v44 = vld [vmem:[%s19930_s3 + $0x474] ss:$8 sps:$4 sm:$0xff]  }
 0x188   : > { %v14171_v46 = vld [vmem:[%s19930_s3 + $0x470] ss:$8 sps:$4 sm:$0xff]  }
 0x189   : > { %11777 = vmatprep.mubr.msk.bf16.mxu0 %vm1782_vm14, %v11663_v49  ;;  %v1495_v53 = vshll.u32 %v11663_v49, 16  ;;  %v1488_v54 = vshll.u32 %v11662_v48, 16  ;;  %v1493_v56 = vshrl.u32 %v11663_v49, 16  ;;  %v1486_v58 = vshrl.u32 %v11662_v48, 16  ;;  %v14179_v49 = vld [vmem:[%s19930_s3 + $0x464] ss:$8 sps:$4 sm:$0xff]  }
 0x18a   : > { %2225 = vmatpush2.bf16.msra.mxu0 %v14094_v47  ;;  %v14176_v47 = vld [vmem:[%s19930_s3 + $0xc4] ss:$8 sps:$4 sm:$0xff]  }
 0x18b   : > { %v1497_v57 = vrot.slane %v1495_v53, 1  ;;  %v1490_v59 = vrot.slane %v1488_v54, 1  ;;  %2226 = vmatprep.subr.bf16.mxu0 %v14104_v50  ;;  %v14177_v50 = vld [vmem:[%s19930_s3 + $0x460] ss:$8 sps:$4 sm:$0xff]   ;;  %v14182_v53 = vld [vmem:[%s19930_s3 + $0xb4] ss:$8 sps:$4 sm:$0xff]  }
 0x18c   : > { %v14180_v54 = vld [vmem:[%s19930_s3 + $0xb0] ss:$8 sps:$4 sm:$0xff]  }
 0x18d   : > { %v1498_v61 = vor.u32 %v1497_v57, %v1493_v56  ;;  %v1491_v63 = vor.u32 %v1490_v59, %v1486_v58  ;;  %v14183_v56 = vld [vmem:[%s19930_s3 + $0x450] ss:$8 sps:$4 sm:$0xff]   ;;  %v14188_v57 = vld [vmem:[%s19930_s3 + $0xa4] ss:$8 sps:$4 sm:$0xff]   ;;  %v14186_v58 = vld [vmem:[%s19930_s3 + $0xa0] ss:$8 sps:$4 sm:$0xff]  }
 0x18e   : > { %2227 = vmatpush2.bf16.msra.mxu0 %v14102_v55  ;;  %v14185_v55 = vld [vmem:[%s19930_s3 + $0x454] ss:$8 sps:$4 sm:$0xff]   ;;  %v14191_v59 = vld [vmem:[%s19930_s3 + $0x444] ss:$8 sps:$4 sm:$0xff]  }
 0x18f   : > { %11720 = vmatprep.mubr.msk.bf16.mxu1 %vm1782_vm14, %v1498_v61  ;;  %2228 = vmatprep.subr.bf16.mxu0 %v14110_v60  ;;  %v14189_v60 = vld [vmem:[%s19930_s3 + $0x440] ss:$8 sps:$4 sm:$0xff]   ;;  %v14194_v61 = vld [vmem:[%s19930_s3 + $0x94] ss:$8 sps:$4 sm:$0xff]  }
 0x190   : > { %1862 = vmatmul.mubr.bf16.vlgmr.msra.gmra.mxu1 %v1491_v63  ;;  %v14197_v63 = vld [vmem:[%s19930_s3 + $0x434] ss:$8 sps:$4 sm:$0xff]  }
 0x191   : > { %2158 = vmatpush1.bf16.msra.mxu1 %v14105_v62  ;;  %2189 = vmatprep.mubr.bf16.mxu1 %v16374_v52  ;;  %v14120_v52 = vld [vmem:[%s19930_s3 + $0x3f0] ss:$8 sps:$4 sm:$0xff]  }
 0x192   : > { %2159 = vmatprep.subr.bf16.mxu1 %v14113_v4  ;;  %2229 = vmatpush2.bf16.msra.mxu0 %v14108_v2  ;;  %v14192_v62 = vld [vmem:[%s19930_s3 + $0x90] ss:$8 sps:$4 sm:$0xff]   ;;  %v14200_v4 = vld [vmem:[%s19930_s3 + $0x84] ss:$8 sps:$4 sm:$0xff]  }
 0x193   : > { %2230 = vmatprep.subr.bf16.mxu0 %v14116_v6  ;;  %v14195_v2 = vld [vmem:[%s19930_s3 + $0x430] ss:$8 sps:$4 sm:$0xff]   ;;  %v14203_v6 = vld [vmem:[%s19930_s3 + $0x424] ss:$8 sps:$4 sm:$0xff]  }
 0x195   : > { %2160 = vmatpush1.bf16.msra.mxu1 %v14111_v5  ;;  %v14198_v5 = vld [vmem:[%s19930_s3 + $0x80] ss:$8 sps:$4 sm:$0xff]  }
 0x196   : > { %2161 = vmatprep.subr.bf16.mxu1 %v14119_v8  ;;  %2231 = vmatpush2.bf16.msra.mxu0 %v14114_v7  ;;  %v14201_v7 = vld [vmem:[%s19930_s3 + $0x420] ss:$8 sps:$4 sm:$0xff]   ;;  %v14206_v8 = vld [vmem:[%s19930_s3 + $0x4f4] ss:$8 sps:$4 sm:$0xff]  }
 0x197   : > { %2610 = vmatprep.subr.bf16.mxu0 %v14122_v10  ;;  %v14204_v10 = vld [vmem:[%s19930_s3 + $0x4f0] ss:$8 sps:$4 sm:$0xff]  }
 0x199   : > { %2162 = vmatpush1.bf16.msra.mxu1 %v14117_v9  ;;  %2233 = vmatmul.mubr.bf16.vlgmr.msra.gmra.mxu0 %v11662_v48  ;;  %v14174_v48 = vld [vmem:[%s19930_s3 + $0xc0] ss:$8 sps:$4 sm:$0xff]   ;;  %v16658_v9 = vld [vmem:[#allocation2 + $0x18] sm:$0x11] }
 0x19a   : > { %2163 = vmatprep.subr.bf16.mxu1 %v14128_v12  ;;  %2611 = vmatpush1.bf16.msra.mxu0 %v14120_v52  ;;  %v14207_v52 = vld [vmem:[#allocation2 + $0xc] ss:$16 sps:$4 sm:$0x3e]   ;;  %v14209_v12 = vld [vmem:[%s19930_s3 + $0x410] ss:$8 sps:$4 sm:$0xff]  }
 0x19b   : > { %2642 = vmatprep.mubr.bf16.mxu0 %v2321_v15  ;;  %2612 = vmatprep.subr.bf16.mxu0 %v14131_v14  ;;  %v16674_v14 = vcombine.high %v16450_v45, %v16658_v9  ;;  %v2323_v15 = vrot.slane %v14207_v52, 1  ;;  %v14279_v52 = vld [vmem:[#allocation2 + $0x8] ss:$16 sps:$4 sm:$0x3e]  }
 0x19d   : > { %2164 = vmatpush1.bf16.msra.mxu1 %v14126_v13  ;;  %v14214_v13 = vld [vmem:[%s19930_s3 + $0x4e4] ss:$8 sps:$4 sm:$0xff]  }
 0x19e   : > { %2165 = vmatprep.subr.bf16.mxu1 %v14134_v17  ;;  %2613 = vmatpush1.bf16.msra.mxu0 %v14129_v16  ;;  %v14212_v16 = vld [vmem:[%s19930_s3 + $0x4e0] ss:$8 sps:$4 sm:$0xff]   ;;  %v14217_v17 = vld [vmem:[%s19930_s3 + $0x404] ss:$8 sps:$4 sm:$0xff]  }
 0x19f   : > { %2614 = vmatprep.subr.bf16.mxu0 %v14137_v19  ;;  %v14220_v19 = vld [vmem:[%s19930_s3 + $0x4d4] ss:$8 sps:$4 sm:$0xff]  }
 0x1a1   : > { %2166 = vmatpush1.bf16.msra.mxu1 %v14132_v18  ;;  %v14215_v18 = vld [vmem:[%s19930_s3 + $0x400] ss:$8 sps:$4 sm:$0xff]  }
 0x1a2   : > { %2167 = vmatprep.subr.bf16.mxu1 %v14140_v22  ;;  %2615 = vmatpush1.bf16.msra.mxu0 %v14135_v20  ;;  %v2902_v20 = vshll.u32 %v16674_v14, 16  ;;  %v14123_v22 = vld [vmem:[#allocation2] ss:$16 sps:$4 sm:$0x3e]  }
 0x1a3   : > { %2616 = vmatprep.subr.bf16.mxu0 %v14143_v0  ;;  %v14221_v0 = vld [vmem:[%s19932_s5 + $0x330] ss:$8 sps:$4 sm:$0xff]  }
 0x1a5   : > { %2168 = vmatpush1.bf16.msra.mxu1 %v14138_v25  ;;  %v14223_v25 = vld [vmem:[%s19932_s5 + $0x334] ss:$8 sps:$4 sm:$0xff]  }
 0x1a6   : > { %2169 = vmatprep.subr.bf16.mxu1 %v14146_v27  ;;  %2617 = vmatpush1.bf16.msra.mxu0 %v14141_v26  ;;  %v2904_v26 = vrot.slane %v2902_v20, 1  ;;  %v14227_v27 = vld [vmem:[%s19930_s3 + $0x4c4] ss:$8 sps:$4 sm:$0xff]  }
 0x1a7   : > { %2618 = vmatprep.subr.bf16.mxu0 %v14149_v29  ;;  %v14225_v29 = vld [vmem:[%s19930_s3 + $0x4c0] ss:$8 sps:$4 sm:$0xff]   ;;  %v14294_v20 = vld [vmem:[%s19932_s5 + $0x344] ss:$8 sps:$4 sm:$0xff]  }
 0x1a9   : > { %2170 = vmatpush1.bf16.msra.mxu1 %v14144_v28  ;;  %v2900_v28 = vshrl.u32 %v16674_v14, 16 }
 0x1aa   : > { %2171 = vmatprep.subr.bf16.mxu1 %v14152_v31  ;;  %2619 = vmatpush1.bf16.msra.mxu0 %v14147_v30  ;;  %v14230_v30 = vld [vmem:[%s19932_s5 + $0x324] ss:$8 sps:$4 sm:$0xff]   ;;  %v2320_v31 = vrot.slane %v14123_v22, 1 }
 0x1ab   : > { %2620 = vmatprep.subr.bf16.mxu0 %v14155_v33  ;;  %v14228_v33 = vld [vmem:[%s19932_s5 + $0x320] ss:$8 sps:$4 sm:$0xff]  }
 0x1ad   : > { %2172 = vmatpush1.bf16.msra.mxu1 %v14150_v32  ;;  %v2905_v32 = vor.u32 %v2904_v26, %v2900_v28  ;;  %v14295_v26 = vld [vmem:[%s19932_s5 + $0x210] ss:$8 sps:$4 sm:$0xff]  }
 0x1ae   : > { %2173 = vmatprep.subr.bf16.mxu1 %v14158_v35  ;;  %2621 = vmatpush1.bf16.msra.mxu0 %v14153_v34  ;;  %v14233_v34 = vld [vmem:[%s19930_s3 + $0x4b4] ss:$8 sps:$4 sm:$0xff]   ;;  %v14231_v35 = vld [vmem:[%s19930_s3 + $0x4b0] ss:$8 sps:$4 sm:$0xff]  }
 0x1af   : > { %2622 = vmatprep.subr.bf16.mxu0 %v14161_v37  ;;  %v14234_v37 = vld [vmem:[%s19932_s5 + $0x310] ss:$8 sps:$4 sm:$0xff]  }
 0x1b0   : > { %v14299_v28 = vld [vmem:[%s19932_s5 + $0x70] ss:$8 sps:$4 sm:$0xff]  }
 0x1b1   : > { %2174 = vmatpush2.bf16.msra.mxu1 %v14156_v36  ;;  %v14236_v36 = vld [vmem:[%s19932_s5 + $0x314] ss:$8 sps:$4 sm:$0xff]  }
 0x1b2   : > { %2175 = vmatprep.subr.bf16.mxu1 %v14164_v38  ;;  %2623 = vmatpush1.bf16.msra.mxu0 %v14159_v23  ;;  %v14239_v23 = vld [vmem:[%s19930_s3 + $0x4a4] ss:$8 sps:$4 sm:$0xff]   ;;  %v14237_v38 = vld [vmem:[%s19930_s3 + $0x4a0] ss:$8 sps:$4 sm:$0xff]  }
 0x1b3   : > { %2624 = vmatprep.subr.bf16.mxu0 %v14167_v40  ;;  %v14240_v40 = vld [vmem:[%s19932_s5 + $0x300] ss:$8 sps:$4 sm:$0xff]  }
 0x1b5   : > { %2176 = vmatpush2.bf16.msra.mxu1 %v14162_v39  ;;  %v14242_v39 = vld [vmem:[%s19932_s5 + $0x304] ss:$8 sps:$4 sm:$0xff]  }
 0x1b6   : > { %2177 = vmatprep.subr.bf16.mxu1 %v14170_v41  ;;  %2625 = vmatpush1.bf16.msra.mxu0 %v14165_v42  ;;  %v14245_v42 = vld [vmem:[%s19930_s3 + $0x494] ss:$8 sps:$4 sm:$0xff]   ;;  %v14243_v41 = vld [vmem:[%s19930_s3 + $0x490] ss:$8 sps:$4 sm:$0xff]  }
 0x1b7   : > { %2626 = vmatprep.subr.bf16.mxu0 %v14173_v44  ;;  %v14246_v44 = vld [vmem:[%s19932_s5 + $0x2f0] ss:$8 sps:$4 sm:$0xff]  }
 0x1b9   : > { %2178 = vmatpush2.bf16.msra.mxu1 %v14168_v43  ;;  %v14248_v43 = vld [vmem:[%s19932_s5 + $0x2f4] ss:$8 sps:$4 sm:$0xff]  }
 0x1ba   : > { %2179 = vmatprep.subr.bf16.mxu1 %v14176_v47  ;;  %2627 = vmatpush2.bf16.msra.mxu0 %v14171_v46  ;;  %v14251_v46 = vld [vmem:[%s19930_s3 + $0x484] ss:$8 sps:$4 sm:$0xff]   ;;  %v14249_v47 = vld [vmem:[%s19930_s3 + $0x480] ss:$8 sps:$4 sm:$0xff]  }
 0x1bb   : > { %2628 = vmatprep.subr.bf16.mxu0 %v14179_v49  ;;  %v14252_v49 = vld [vmem:[%s19932_s5 + $0x2e0] ss:$8 sps:$4 sm:$0xff]  }
 0x1bd   : > { %2180 = vmatpush2.bf16.msra.mxu1 %v14174_v48  ;;  %v14254_v48 = vld [vmem:[%s19932_s5 + $0x2e4] ss:$8 sps:$4 sm:$0xff]  }
 0x1be   : > { %2181 = vmatprep.subr.bf16.mxu1 %v14182_v53  ;;  %2629 = vmatpush2.bf16.msra.mxu0 %v14177_v50  ;;  %v14257_v50 = vld [vmem:[%s19930_s3 + $0x534] ss:$8 sps:$4 sm:$0xff]   ;;  %v14255_v53 = vld [vmem:[%s19930_s3 + $0x530] ss:$8 sps:$4 sm:$0xff]  }
 0x1bf   : > { %2630 = vmatprep.subr.bf16.mxu0 %v14185_v55  ;;  %v14258_v55 = vld [vmem:[%s19932_s5 + $0x2d0] ss:$8 sps:$4 sm:$0xff]  }
 0x1c1   : > { %2182 = vmatpush2.bf16.msra.mxu1 %v14180_v54  ;;  %v14260_v54 = vld [vmem:[%s19932_s5 + $0x2d4] ss:$8 sps:$4 sm:$0xff]  }
 0x1c2   : > { %2183 = vmatprep.subr.bf16.mxu1 %v14188_v57  ;;  %2631 = vmatpush2.bf16.msra.mxu0 %v14183_v56  ;;  %v14263_v56 = vld [vmem:[%s19930_s3 + $0x524] ss:$8 sps:$4 sm:$0xff]   ;;  %v14261_v57 = vld [vmem:[%s19930_s3 + $0x520] ss:$8 sps:$4 sm:$0xff]  }
 0x1c3   : > { %2632 = vmatprep.subr.bf16.mxu0 %v14191_v59  ;;  %v14264_v59 = vld [vmem:[%s19932_s5 + $0x2c0] ss:$8 sps:$4 sm:$0xff]  }
 0x1c5   : > { %2184 = vmatpush2.bf16.msra.mxu1 %v14186_v58  ;;  %v14266_v58 = vld [vmem:[%s19932_s5 + $0x2c4] ss:$8 sps:$4 sm:$0xff]  }
 0x1c6   : > { %2185 = vmatprep.subr.bf16.mxu1 %v14194_v61  ;;  %2633 = vmatpush2.bf16.msra.mxu0 %v14189_v60  ;;  %v14269_v60 = vld [vmem:[%s19930_s3 + $0x514] ss:$8 sps:$4 sm:$0xff]  }
 0x1c7   : > { %2634 = vmatprep.subr.bf16.mxu0 %v14197_v63  ;;  %v16789_v61 = vld [vmem:[#allocation2 + $0x4] ss:$16 sps:$4 sm:$0x1f]  }
 0x1c8   : > { %v14272_v63 = vld [vmem:[%s19932_s5 + $0x374] ss:$8 sps:$4 sm:$0xff]  }
 0x1c9   : > { %2186 = vmatpush2.bf16.msra.mxu1 %v14192_v62  ;;  %v14267_v62 = vld [vmem:[%s19930_s3 + $0x510] ss:$8 sps:$4 sm:$0xff]  }
 0x1ca   : > { %2187 = vmatprep.subr.bf16.mxu1 %v14200_v4  ;;  %2635 = vmatpush2.bf16.msra.mxu0 %v14195_v2  ;;  %v14270_v2 = vld [vmem:[%s19932_s5 + $0x370] ss:$8 sps:$4 sm:$0xff]   ;;  %v14275_v4 = vld [vmem:[%s19930_s3 + $0x504] ss:$8 sps:$4 sm:$0xff]  }
 0x1cb   : > { %2636 = vmatprep.subr.bf16.mxu0 %v14203_v6  ;;  %v14278_v6 = vld [vmem:[%s19932_s5 + $0x364] ss:$8 sps:$4 sm:$0xff]  }
 0x1cd   : > { %2188 = vmatpush2.bf16.msra.mxu1 %v14198_v5  ;;  %v14273_v5 = vld [vmem:[%s19930_s3 + $0x500] ss:$8 sps:$4 sm:$0xff]  }
 0x1ce   : > { %2653 = vmatprep.subr.bf16.mxu1 %v14206_v8  ;;  %2637 = vmatpush2.bf16.msra.mxu0 %v14201_v7  ;;  %v2888_v7 = vshll.u32 %v16789_v61, 16  ;;  %v14282_v8 = vld [vmem:[%s19932_s5 + $0x234] ss:$8 sps:$4 sm:$0xff]  }
 0x1cf   : > { %2638 = vmatprep.subr.bf16.mxu0 %v14211_v11  ;;  %v14288_v11 = vld [vmem:[%s19932_s5 + $0x354] ss:$8 sps:$4 sm:$0xff]  }
 0x1d0   : > { %2190 = vmatmul.mubr.bf16.vlgmr.msra.gmra.mxu1 %v16372_v51  ;;  %v14218_v51 = vld [vmem:[%s19930_s3 + $0x4d0] ss:$8 sps:$4 sm:$0xff]  }
 0x1d1   : > { %2654 = vmatpush1.bf16.msra.mxu1 %v14204_v10  ;;  %11894 = vmatprep.mubr.msk.bf16.mxu1 %vm1782_vm14, %v2323_v15  ;;  %v14276_v10 = vld [vmem:[%s19932_s5 + $0x360] ss:$8 sps:$4 sm:$0xff]   ;;  %v16824_v15 = vcombine.low %v16450_v45, %v16658_v9 }
 0x1d2   : > { %2655 = vmatprep.subr.bf16.mxu1 %v14214_v13  ;;  %2639 = vmatpush2.bf16.msra.mxu0 %v14209_v12  ;;  %v14280_v12 = vld [vmem:[%s19932_s5 + $0x230] ss:$8 sps:$4 sm:$0xff]   ;;  %v2890_v13 = vrot.slane %v2888_v7, 1  ;;  %v14289_v9 = vld [vmem:[%s19932_s5 + $0x220] ss:$8 sps:$4 sm:$0xff]  }
 0x1d3   : > { %2640 = vmatprep.subr.bf16.mxu0 %v14217_v17  ;;  %v14286_v17 = vld [vmem:[%s19932_s5 + $0x350] ss:$8 sps:$4 sm:$0xff]   ;;  %v2895_v22 = vshll.u32 %v16824_v15, 16  ;;  %v14353_v7 = vld [vmem:[%s19932_s5 + $0xe0] ss:$8 sps:$4 sm:$0xff]  }
 0x1d5   : > { %2656 = vmatpush1.bf16.msra.mxu1 %v14212_v16  ;;  %v2886_v16 = vshrl.u32 %v16789_v61, 16 }
 0x1d6   : > { %2657 = vmatprep.subr.bf16.mxu1 %v14220_v19  ;;  %2641 = vmatpush2.bf16.msra.mxu0 %v14215_v18  ;;  %v14291_v18 = vld [vmem:[%s19932_s5 + $0x224] ss:$8 sps:$4 sm:$0xff]   ;;  %v2322_v19 = vrot.slane %v14279_v52, 1  ;;  %v14356_v52 = vld [vmem:[%s19932_s5 + $0x270] ss:$8 sps:$4 sm:$0xff]  }
 0x1d7   : > { %3235 = vmatprep.subr.bf16.mxu0 %v14223_v25  ;;  %v2891_v45 = vor.u32 %v2890_v13, %v2886_v16  ;;  %v14297_v25 = vld [vmem:[%s19932_s5 + $0x214] ss:$8 sps:$4 sm:$0xff]   ;;  %v14283_v13 = vld [vmem:[#allocation2] ss:$16 sps:$4 sm:$0x1f]  }
 0x1d8   : > { %v14367_v16 = vld [vmem:[%s19932_s5 + $0xc4] ss:$8 sps:$4 sm:$0xff]  }
 0x1d9   : > { %2658 = vmatpush1.bf16.msra.mxu1 %v14218_v51  ;;  %2643 = vmatmul.mubr.bf16.vlgmr.msra.gmra.mxu0 %v2320_v31  ;;  %v14292_v51 = vld [vmem:[%s19932_s5 + $0x340] ss:$8 sps:$4 sm:$0xff]   ;;  %v14307_v31 = vld [vmem:[%s19932_s5 + $0x64] ss:$8 sps:$4 sm:$0xff]  }
 0x1da   : > { %2659 = vmatprep.subr.bf16.mxu1 %v14227_v27  ;;  %3236 = vmatpush1.bf16.msra.mxu0 %v14221_v0  ;;  %v14301_v0 = vld [vmem:[%s19932_s5 + $0x74] ss:$8 sps:$4 sm:$0xff]   ;;  %v2897_v27 = vrot.slane %v2895_v22, 1  ;;  %v14376_v22 = vld [vmem:[%s19932_s5 + $0x244] ss:$8 sps:$4 sm:$0xff]  }
 0x1db   : > { %12013 = vmatprep.mubr.msk.bf16.mxu0 %vm1782_vm14, %v2905_v32  ;;  %3237 = vmatprep.subr.bf16.mxu0 %v14230_v30  ;;  %v2893_v30 = vshrl.u32 %v16824_v15, 16  ;;  %v14302_v32 = vld [vmem:[%s19932_s5 + $0x200] ss:$8 sps:$4 sm:$0xff]  }
 0x1dd   : > { %2660 = vmatpush1.bf16.msra.mxu1 %v14225_v29  ;;  %v14304_v29 = vld [vmem:[%s19932_s5 + $0x204] ss:$8 sps:$4 sm:$0xff]  }
 0x1de   : > { %2661 = vmatprep.subr.bf16.mxu1 %v14233_v34  ;;  %3238 = vmatpush1.bf16.msra.mxu0 %v14228_v33  ;;  %v2898_v33 = vor.u32 %v2897_v27, %v2893_v30  ;;  %v14305_v34 = vld [vmem:[%s19932_s5 + $0x60] ss:$8 sps:$4 sm:$0xff]   ;;  %v14382_v27 = vld [vmem:[%s19932_s5 + $0x174] ss:$8 sps:$4 sm:$0xff]   ;;  %v14380_v30 = vld [vmem:[%s19932_s5 + $0x170] ss:$8 sps:$4 sm:$0xff]  }
 0x1df   : > { %3239 = vmatprep.subr.bf16.mxu0 %v14236_v36  ;;  %v14313_v36 = vld [vmem:[%s19932_s5 + $0x54] ss:$8 sps:$4 sm:$0xff]  }
 0x1e1   : > { %2662 = vmatpush1.bf16.msra.mxu1 %v14231_v35  ;;  %v14310_v35 = vld [vmem:[%s19932_s5 + $0x1f4] ss:$8 sps:$4 sm:$0xff]  }
 0x1e2   : > { %2663 = vmatprep.subr.bf16.mxu1 %v14239_v23  ;;  %3240 = vmatpush1.bf16.msra.mxu0 %v14234_v37  ;;  %v14308_v37 = vld [vmem:[%s19932_s5 + $0x1f0] ss:$8 sps:$4 sm:$0xff]   ;;  %v14316_v23 = vld [vmem:[%s19932_s5 + $0x1e4] ss:$8 sps:$4 sm:$0xff]  }
 0x1e3   : > { %3241 = vmatprep.subr.bf16.mxu0 %v14242_v39  ;;  %v14319_v39 = vld [vmem:[%s19932_s5 + $0x44] ss:$8 sps:$4 sm:$0xff]  }
 0x1e5   : > { %2664 = vmatpush1.bf16.msra.mxu1 %v14237_v38  ;;  %v14311_v38 = vld [vmem:[%s19932_s5 + $0x50] ss:$8 sps:$4 sm:$0xff]  }
 0x1e6   : > { %2665 = vmatprep.subr.bf16.mxu1 %v14245_v42  ;;  %3242 = vmatpush1.bf16.msra.mxu0 %v14240_v40  ;;  %v14314_v40 = vld [vmem:[%s19932_s5 + $0x1e0] ss:$8 sps:$4 sm:$0xff]   ;;  %v14322_v42 = vld [vmem:[%s19932_s5 + $0x1d4] ss:$8 sps:$4 sm:$0xff]  }
 0x1e7   : > { %3243 = vmatprep.subr.bf16.mxu0 %v14248_v43  ;;  %v14320_v43 = vld [vmem:[%s19932_s5 + $0x1d0] ss:$8 sps:$4 sm:$0xff]  }
 0x1e9   : > { %2666 = vmatpush1.bf16.msra.mxu1 %v14243_v41  ;;  %v14317_v41 = vld [vmem:[%s19932_s5 + $0x40] ss:$8 sps:$4 sm:$0xff]  }
 0x1ea   : > { %2667 = vmatprep.subr.bf16.mxu1 %v14251_v46  ;;  %3244 = vmatpush1.bf16.msra.mxu0 %v14246_v44  ;;  %v14325_v44 = vld [vmem:[%s19932_s5 + $0x34] ss:$8 sps:$4 sm:$0xff]   ;;  %v14328_v46 = vld [vmem:[%s19932_s5 + $0x1c4] ss:$8 sps:$4 sm:$0xff]  }
 0x1eb   : > { %3245 = vmatprep.subr.bf16.mxu0 %v14254_v48  ;;  %v14326_v48 = vld [vmem:[%s19932_s5 + $0x1c0] ss:$8 sps:$4 sm:$0xff]  }
 0x1ed   : > { %2668 = vmatpush1.bf16.msra.mxu1 %v14249_v47  ;;  %v14323_v47 = vld [vmem:[%s19932_s5 + $0x30] ss:$8 sps:$4 sm:$0xff]  }
 0x1ee   : > { %2677 = vmatprep.subr.bf16.mxu1 %v14257_v50  ;;  %3246 = vmatpush1.bf16.msra.mxu0 %v14252_v49  ;;  %v14331_v49 = vld [vmem:[%s19932_s5 + $0x24] ss:$8 sps:$4 sm:$0xff]   ;;  %v14329_v50 = vld [vmem:[%s19932_s5 + $0x20] ss:$8 sps:$4 sm:$0xff]  }
 0x1ef   : > { %3247 = vmatprep.subr.bf16.mxu0 %v14260_v54  ;;  %v14332_v54 = vld [vmem:[%s19932_s5 + $0x2b0] ss:$8 sps:$4 sm:$0xff]  }
 0x1f1   : > { %2678 = vmatpush2.bf16.msra.mxu1 %v14255_v53  ;;  %v14334_v53 = vld [vmem:[%s19932_s5 + $0x2b4] ss:$8 sps:$4 sm:$0xff]  }
 0x1f2   : > { %2679 = vmatprep.subr.bf16.mxu1 %v14263_v56  ;;  %3248 = vmatpush1.bf16.msra.mxu0 %v14258_v55  ;;  %v14337_v55 = vld [vmem:[%s19932_s5 + $0x14] ss:$8 sps:$4 sm:$0xff]   ;;  %v14340_v56 = vld [vmem:[%s19932_s5 + $0x2a4] ss:$8 sps:$4 sm:$0xff]  }
 0x1f3   : > { %3249 = vmatprep.subr.bf16.mxu0 %v14266_v58  ;;  %v14338_v58 = vld [vmem:[%s19932_s5 + $0x2a0] ss:$8 sps:$4 sm:$0xff]  }
 0x1f5   : > { %2680 = vmatpush2.bf16.msra.mxu1 %v14261_v57  ;;  %v14335_v57 = vld [vmem:[%s19932_s5 + $0x10] ss:$8 sps:$4 sm:$0xff]  }
 0x1f6   : > { %2681 = vmatprep.subr.bf16.mxu1 %v14269_v60  ;;  %3250 = vmatpush1.bf16.msra.mxu0 %v14264_v59  ;;  %v14343_v59 = vld [vmem:[%s19932_s5 + $0x4] ss:$8 sps:$4 sm:$0xff]   ;;  %v14341_v60 = vld [vmem:[%s19932_s5] ss:$8 sps:$4 sm:$0xff]  }
 0x1f7   : > { %3259 = vmatprep.subr.bf16.mxu0 %v14272_v63  ;;  %v14344_v63 = vld [vmem:[%s19932_s5 + $0x290] ss:$8 sps:$4 sm:$0xff]  }
 0x1f9   : > { %2682 = vmatpush2.bf16.msra.mxu1 %v14267_v62  ;;  %v14349_v62 = vld [vmem:[%s19932_s5 + $0xf4] ss:$8 sps:$4 sm:$0xff]  }
 0x1fa   : > { %2683 = vmatprep.subr.bf16.mxu1 %v14275_v4  ;;  %3260 = vmatpush2.bf16.msra.mxu0 %v14270_v2  ;;  %v14347_v2 = vld [vmem:[%s19932_s5 + $0xf0] ss:$8 sps:$4 sm:$0xff]   ;;  %v14352_v4 = vld [vmem:[%s19932_s5 + $0x284] ss:$8 sps:$4 sm:$0xff]  }
 0x1fb   : > { %3261 = vmatprep.subr.bf16.mxu0 %v14278_v6  ;;  %v14350_v6 = vld [vmem:[%s19932_s5 + $0x280] ss:$8 sps:$4 sm:$0xff]  }
 0x1fd   : > { %2684 = vmatpush2.bf16.msra.mxu1 %v14273_v5  ;;  %v14355_v5 = vld [vmem:[%s19932_s5 + $0xe4] ss:$8 sps:$4 sm:$0xff]  }
 0x1fe   : > { %3192 = vmatprep.subr.bf16.mxu1 %v14282_v8  ;;  %3262 = vmatpush2.bf16.msra.mxu0 %v14276_v10  ;;  %v14358_v8 = vld [vmem:[%s19932_s5 + $0x274] ss:$8 sps:$4 sm:$0xff]  }
 0x1ff   : > { %3263 = vmatprep.subr.bf16.mxu0 %v14288_v11  ;;  %v14361_v10 = vld [vmem:[%s19932_s5 + $0xd4] ss:$8 sps:$4 sm:$0xff]   ;;  %v14364_v11 = vld [vmem:[%s19932_s5 + $0x264] ss:$8 sps:$4 sm:$0xff]  }
 0x200   : > { %2686 = vmatmul.mubr.bf16.vlgmr.msra.gmra.mxu1 %v2322_v19  ;;  %v14370_v19 = vld [vmem:[%s19932_s5 + $0x254] ss:$8 sps:$4 sm:$0xff]  }
 0x201   : > { %3193 = vmatpush1.bf16.msra.mxu1 %v14280_v12  ;;  %3224 = vmatprep.mubr.bf16.mxu1 %v2891_v45  ;;  %v14359_v12 = vld [vmem:[%s19932_s5 + $0xd0] ss:$8 sps:$4 sm:$0xff]  }
 0x202   : > { %3194 = vmatprep.subr.bf16.mxu1 %v14291_v18  ;;  %3264 = vmatpush2.bf16.msra.mxu0 %v14286_v17  ;;  %v14362_v17 = vld [vmem:[%s19932_s5 + $0x260] ss:$8 sps:$4 sm:$0xff]   ;;  %v14368_v45 = vld [vmem:[%s19932_s5 + $0x250] ss:$8 sps:$4 sm:$0xff]  }
 0x203   : > { %3265 = vmatprep.subr.bf16.mxu0 %v14294_v20  ;;  %v14365_v18 = vld [vmem:[%s19932_s5 + $0xc0] ss:$8 sps:$4 sm:$0xff]   ;;  %v14373_v20 = vld [vmem:[%s19932_s5 + $0xb4] ss:$8 sps:$4 sm:$0xff]  }
 0x205   : > { %3195 = vmatpush1.bf16.msra.mxu1 %v14289_v9  ;;  %v14371_v9 = vld [vmem:[%s19932_s5 + $0xb0] ss:$8 sps:$4 sm:$0xff]  }
 0x206   : > { %3196 = vmatprep.subr.bf16.mxu1 %v14297_v25  ;;  %3266 = vmatpush2.bf16.msra.mxu0 %v14292_v51  ;;  %v14379_v51 = vld [vmem:[%s19932_s5 + $0xa4] ss:$8 sps:$4 sm:$0xff]   ;;  %v2881_v25 = vshll.u32 %v14283_v13, 16 }
 0x207   : > { %3563 = vmatprep.subr.bf16.mxu0 %v14301_v0  ;;  %v14374_v0 = vld [vmem:[%s19932_s5 + $0x240] ss:$8 sps:$4 sm:$0xff]  }
 0x209   : > { %3197 = vmatpush1.bf16.msra.mxu1 %v14295_v26  ;;  %3268 = vmatmul.mubr.bf16.vlgmr.msra.gmra.mxu0 %v2898_v33  ;;  %v14377_v26 = vld [vmem:[%s19932_s5 + $0xa0] ss:$8 sps:$4 sm:$0xff]   ;;  %v14383_v33 = vld [vmem:[%s19932_s5 + $0x90] ss:$8 sps:$4 sm:$0xff]  }
 0x20a   : > { %3198 = vmatprep.subr.bf16.mxu1 %v14304_v29  ;;  %3564 = vmatpush1.bf16.msra.mxu0 %v14299_v28  ;;  %v2883_v28 = vrot.slane %v2881_v25, 1  ;;  %v14385_v29 = vld [vmem:[%s19932_s5 + $0x94] ss:$8 sps:$4 sm:$0xff]  }
 0x20b   : > { %3595 = vmatprep.mubr.bf16.mxu0 %v16789_v61  ;;  %3565 = vmatprep.subr.bf16.mxu0 %v14307_v31  ;;  %v14346_v61 = vld [vmem:[%s19932_s5 + $0x294] ss:$8 sps:$4 sm:$0xff]   ;;  %v2879_v31 = vshrl.u32 %v14283_v13, 16 }
 0x20c   : > { %v14462_v25 = vld [vmem:[%s19932_s5 + $0x514] ss:$8 sps:$4 sm:$0xff]  }
 0x20d   : > { %3199 = vmatpush1.bf16.msra.mxu1 %v14302_v32  ;;  %v14388_v32 = vld [vmem:[%s19932_s5 + $0x164] ss:$8 sps:$4 sm:$0xff]  }
 0x20e   : > { %3200 = vmatprep.subr.bf16.mxu1 %v14310_v35  ;;  %3566 = vmatpush1.bf16.msra.mxu0 %v14305_v34  ;;  %v2884_v34 = vor.u32 %v2883_v28, %v2879_v31  ;;  %v14391_v35 = vld [vmem:[%s19932_s5 + $0x84] ss:$8 sps:$4 sm:$0xff]   ;;  %v14463_v28 = vld [vmem:[%s19932_s5 + $0x3e0] ss:$8 sps:$4 sm:$0xff]  }
 0x20f   : > { %3567 = vmatprep.subr.bf16.mxu0 %v14313_v36  ;;  %v14386_v36 = vld [vmem:[%s19932_s5 + $0x160] ss:$8 sps:$4 sm:$0xff]  }
 0x210   : > { %v14472_v31 = vld [vmem:[#allocation2 + $0x8] ss:$16 sps:$4 sm:$0x3e]  }
 0x211   : > { %3201 = vmatpush1.bf16.msra.mxu1 %v14308_v37  ;;  %v14394_v37 = vld [vmem:[%s19932_s5 + $0x154] ss:$8 sps:$4 sm:$0xff]  }
 0x212   : > { %3202 = vmatprep.subr.bf16.mxu1 %v14316_v23  ;;  %3568 = vmatpush1.bf16.msra.mxu0 %v14311_v38  ;;  %v14389_v23 = vld [vmem:[%s19932_s5 + $0x80] ss:$8 sps:$4 sm:$0xff]   ;;  %v14392_v38 = vld [vmem:[%s19932_s5 + $0x150] ss:$8 sps:$4 sm:$0xff]  }
 0x213   : > { %3569 = vmatprep.subr.bf16.mxu0 %v14319_v39  ;;  %v14397_v39 = vld [vmem:[%s19932_s5 + $0x4f4] ss:$8 sps:$4 sm:$0xff]  }
 0x215   : > { %3203 = vmatpush1.bf16.msra.mxu1 %v14314_v40  ;;  %v14398_v40 = vld [vmem:[#allocation2 + $0xc] ss:$16 sps:$4 sm:$0x3e]  }
 0x216   : > { %3204 = vmatprep.subr.bf16.mxu1 %v14322_v42  ;;  %3570 = vmatpush1.bf16.msra.mxu0 %v14317_v41  ;;  %v14395_v42 = vld [vmem:[%s19932_s5 + $0x4f0] ss:$8 sps:$4 sm:$0xff]   ;;  %v14400_v41 = vld [vmem:[%s19932_s5 + $0x140] ss:$8 sps:$4 sm:$0xff]  }
 0x217   : > { %3571 = vmatprep.subr.bf16.mxu0 %v14325_v44  ;;  %v14408_v44 = vld [vmem:[%s19932_s5 + $0x134] ss:$8 sps:$4 sm:$0xff]  }
 0x219   : > { %3205 = vmatpush1.bf16.msra.mxu1 %v14320_v43  ;;  %v14405_v43 = vld [vmem:[%s19932_s5 + $0x4e4] ss:$8 sps:$4 sm:$0xff]  }
 0x21a   : > { %3206 = vmatprep.subr.bf16.mxu1 %v14328_v46  ;;  %3572 = vmatpush1.bf16.msra.mxu0 %v14323_v47  ;;  %v3729_v46 = vrot.slane %v14398_v40, 1  ;;  %v14403_v47 = vld [vmem:[%s19932_s5 + $0x4e0] ss:$8 sps:$4 sm:$0xff]  }
 0x21b   : > { %3573 = vmatprep.subr.bf16.mxu0 %v14331_v49  ;;  %v14406_v49 = vld [vmem:[%s19932_s5 + $0x130] ss:$8 sps:$4 sm:$0xff]  }
 0x21c   : > { %v14518_v40 = vld [vmem:[%s19934_s7 + $0x200] ss:$16 sps:$4 sm:$0xff]  }
 0x21d   : > { %3207 = vmatpush1.bf16.msra.mxu1 %v14326_v48  ;;  %v14411_v48 = vld [vmem:[%s19932_s5 + $0x4d4] ss:$8 sps:$4 sm:$0xff]  }
 0x21e   : > { %3208 = vmatprep.subr.bf16.mxu1 %v14334_v53  ;;  %3574 = vmatpush1.bf16.msra.mxu0 %v14329_v50  ;;  %v14414_v50 = vld [vmem:[%s19932_s5 + $0x124] ss:$8 sps:$4 sm:$0xff]   ;;  %v14409_v53 = vld [vmem:[%s19932_s5 + $0x4d0] ss:$8 sps:$4 sm:$0xff]  }
 0x21f   : > { %3575 = vmatprep.subr.bf16.mxu0 %v14337_v55  ;;  %v14412_v55 = vld [vmem:[%s19932_s5 + $0x120] ss:$8 sps:$4 sm:$0xff]  }
 0x221   : > { %3209 = vmatpush2.bf16.msra.mxu1 %v14332_v54  ;;  %v14417_v54 = vld [vmem:[%s19932_s5 + $0x4c4] ss:$8 sps:$4 sm:$0xff]  }
 0x222   : > { %3210 = vmatprep.subr.bf16.mxu1 %v14340_v56  ;;  %3576 = vmatpush1.bf16.msra.mxu0 %v14335_v57  ;;  %v14420_v56 = vld [vmem:[%s19932_s5 + $0x114] ss:$8 sps:$4 sm:$0xff]   ;;  %v14415_v57 = vld [vmem:[%s19932_s5 + $0x4c0] ss:$8 sps:$4 sm:$0xff]  }
 0x223   : > { %3577 = vmatprep.subr.bf16.mxu0 %v14343_v59  ;;  %v14418_v59 = vld [vmem:[%s19932_s5 + $0x110] ss:$8 sps:$4 sm:$0xff]  }
 0x225   : > { %3211 = vmatpush2.bf16.msra.mxu1 %v14338_v58  ;;  %v14423_v58 = vld [vmem:[%s19932_s5 + $0x4b4] ss:$8 sps:$4 sm:$0xff]  }
 0x226   : > { %3212 = vmatprep.subr.bf16.mxu1 %v14346_v61  ;;  %3578 = vmatpush1.bf16.msra.mxu0 %v14341_v60  ;;  %v14426_v60 = vld [vmem:[%s19932_s5 + $0x104] ss:$8 sps:$4 sm:$0xff]   ;;  %v14421_v61 = vld [vmem:[%s19932_s5 + $0x4b0] ss:$8 sps:$4 sm:$0xff]  }
 0x227   : > { %3579 = vmatprep.subr.bf16.mxu0 %v14349_v62  ;;  %v14429_v62 = vld [vmem:[%s19932_s5 + $0x4a4] ss:$8 sps:$4 sm:$0xff]  }
 0x229   : > { %3213 = vmatpush2.bf16.msra.mxu1 %v14344_v63  ;;  %v14424_v63 = vld [vmem:[%s19932_s5 + $0x100] ss:$8 sps:$4 sm:$0xff]  }
 0x22a   : > { %3214 = vmatprep.subr.bf16.mxu1 %v14352_v4  ;;  %3580 = vmatpush2.bf16.msra.mxu0 %v14347_v2  ;;  %v14427_v2 = vld [vmem:[%s19932_s5 + $0x4a0] ss:$8 sps:$4 sm:$0xff]   ;;  %v14432_v4 = vld [vmem:[%s19932_s5 + $0x1b4] ss:$8 sps:$4 sm:$0xff]  }
 0x22b   : > { %3581 = vmatprep.subr.bf16.mxu0 %v14355_v5  ;;  %v14435_v5 = vld [vmem:[%s19932_s5 + $0x494] ss:$8 sps:$4 sm:$0xff]  }
 0x22d   : > { %3215 = vmatpush2.bf16.msra.mxu1 %v14350_v6  ;;  %v14430_v6 = vld [vmem:[%s19932_s5 + $0x1b0] ss:$8 sps:$4 sm:$0xff]  }
 0x22e   : > { %3216 = vmatprep.subr.bf16.mxu1 %v14358_v8  ;;  %3582 = vmatpush2.bf16.msra.mxu0 %v14353_v7  ;;  %v14438_v7 = vld [vmem:[%s19932_s5 + $0x1a4] ss:$8 sps:$4 sm:$0xff]   ;;  %v14433_v8 = vld [vmem:[%s19932_s5 + $0x490] ss:$8 sps:$4 sm:$0xff]  }
 0x22f   : > { %3583 = vmatprep.subr.bf16.mxu0 %v14361_v10  ;;  %v14436_v10 = vld [vmem:[%s19932_s5 + $0x1a0] ss:$8 sps:$4 sm:$0xff]  }
 0x231   : > { %3217 = vmatpush2.bf16.msra.mxu1 %v14356_v52  ;;  %v14441_v52 = vld [vmem:[%s19932_s5 + $0x484] ss:$8 sps:$4 sm:$0xff]  }
 0x232   : > { %3218 = vmatprep.subr.bf16.mxu1 %v14364_v11  ;;  %3584 = vmatpush2.bf16.msra.mxu0 %v14359_v12  ;;  %v14444_v11 = vld [vmem:[%s19932_s5 + $0x194] ss:$8 sps:$4 sm:$0xff]   ;;  %v14439_v12 = vld [vmem:[%s19932_s5 + $0x480] ss:$8 sps:$4 sm:$0xff]  }
 0x233   : > { %3585 = vmatprep.subr.bf16.mxu0 %v14367_v16  ;;  %v14447_v16 = vld [vmem:[%s19932_s5 + $0x534] ss:$8 sps:$4 sm:$0xff]  }
 0x235   : > { %3219 = vmatpush2.bf16.msra.mxu1 %v14362_v17  ;;  %v14450_v17 = vld [vmem:[%s19932_s5 + $0x184] ss:$8 sps:$4 sm:$0xff]  }
 0x236   : > { %3220 = vmatprep.subr.bf16.mxu1 %v14370_v19  ;;  %3586 = vmatpush2.bf16.msra.mxu0 %v14365_v18  ;;  %v14445_v18 = vld [vmem:[%s19932_s5 + $0x530] ss:$8 sps:$4 sm:$0xff]   ;;  %v14448_v19 = vld [vmem:[%s19932_s5 + $0x180] ss:$8 sps:$4 sm:$0xff]  }
 0x237   : > { %3587 = vmatprep.subr.bf16.mxu0 %v14373_v20  ;;  %v14453_v20 = vld [vmem:[%s19932_s5 + $0x524] ss:$8 sps:$4 sm:$0xff]  }
 0x239   : > { %3221 = vmatpush2.bf16.msra.mxu1 %v14368_v45  ;;  %v14456_v45 = vld [vmem:[%s19932_s5 + $0x3f4] ss:$8 sps:$4 sm:$0xff]  }
 0x23a   : > { %3222 = vmatprep.subr.bf16.mxu1 %v14376_v22  ;;  %3588 = vmatpush2.bf16.msra.mxu0 %v14371_v9  ;;  %v14459_v9 = vld [vmem:[#allocation2 + $0x4] ss:$16 sps:$4 sm:$0x3e]   ;;  %v14451_v22 = vld [vmem:[%s19932_s5 + $0x520] ss:$8 sps:$4 sm:$0xff]  }
 0x23b   : > { %3589 = vmatprep.subr.bf16.mxu0 %v14379_v51  ;;  %v14454_v51 = vld [vmem:[%s19932_s5 + $0x3f0] ss:$8 sps:$4 sm:$0xff]  }
 0x23d   : > { %3223 = vmatpush2.bf16.msra.mxu1 %v14374_v0  ;;  %v14465_v0 = vld [vmem:[%s19932_s5 + $0x3e4] ss:$8 sps:$4 sm:$0xff]  }
 0x23e   : > { %3606 = vmatprep.subr.bf16.mxu1 %v14382_v27  ;;  %3590 = vmatpush2.bf16.msra.mxu0 %v14377_v26  ;;  %v3727_v26 = vrot.slane %v14459_v9, 1  ;;  %v14460_v27 = vld [vmem:[%s19932_s5 + $0x510] ss:$8 sps:$4 sm:$0xff]  }
 0x23f   : > { %3591 = vmatprep.subr.bf16.mxu0 %v14385_v29  ;;  %v14468_v29 = vld [vmem:[%s19932_s5 + $0x504] ss:$8 sps:$4 sm:$0xff]  }
 0x240   : > { %3225 = vmatmul.mubr.bf16.vlgmr.msra.gmra.mxu1 %v2884_v34  ;;  %v14514_v34 = vld [vmem:[%s19934_s7 + $0x224] ss:$16 sps:$4 sm:$0xff]  }
 0x241   : > { %3607 = vmatpush1.bf16.msra.mxu1 %v14380_v30  ;;  %12070 = vmatprep.mubr.msk.bf16.mxu1 %vm1782_vm14, %v16674_v14  ;;  %v14402_v14 = vld [vmem:[%s19932_s5 + $0x144] ss:$8 sps:$4 sm:$0xff]   ;;  %v14471_v30 = vld [vmem:[%s19932_s5 + $0x3d4] ss:$8 sps:$4 sm:$0xff]  }
 0x242   : > { %3608 = vmatprep.subr.bf16.mxu1 %v14388_v32  ;;  %3592 = vmatpush2.bf16.msra.mxu0 %v14383_v33  ;;  %v14466_v32 = vld [vmem:[%s19932_s5 + $0x500] ss:$8 sps:$4 sm:$0xff]   ;;  %v14475_v33 = vld [vmem:[%s19932_s5 + $0x3c4] ss:$8 sps:$4 sm:$0xff]  }
 0x243   : > { %3593 = vmatprep.subr.bf16.mxu0 %v14391_v35  ;;  %v14473_v35 = vld [vmem:[%s19932_s5 + $0x3c0] ss:$8 sps:$4 sm:$0xff]  }
 0x245   : > { %3609 = vmatpush1.bf16.msra.mxu1 %v14386_v36  ;;  %v14512_v36 = vld [vmem:[%s19934_s7 + $0x220] ss:$16 sps:$4 sm:$0xff]  }
 0x246   : > { %3610 = vmatprep.subr.bf16.mxu1 %v14394_v37  ;;  %3594 = vmatpush2.bf16.msra.mxu0 %v14389_v23  ;;  %v3728_v37 = vrot.slane %v14472_v31, 1  ;;  %v14478_v23 = vld [vmem:[%s19932_s5 + $0x3b4] ss:$8 sps:$4 sm:$0xff]  }
 0x247   : > { %4059 = vmatprep.subr.bf16.mxu0 %v14397_v39  ;;  %v14476_v39 = vld [vmem:[%s19932_s5 + $0x3b0] ss:$8 sps:$4 sm:$0xff]  }
 0x249   : > { %3611 = vmatpush1.bf16.msra.mxu1 %v14392_v38  ;;  %3596 = vmatmul.mubr.bf16.vlgmr.msra.gmra.mxu0 %v14283_v13  ;;  %v14442_v13 = vld [vmem:[%s19932_s5 + $0x190] ss:$8 sps:$4 sm:$0xff]   ;;  %v14520_v38 = vld [vmem:[%s19934_s7 + $0x204] ss:$16 sps:$4 sm:$0xff]  }
 0x24a   : > { %3612 = vmatprep.subr.bf16.mxu1 %v14402_v14  ;;  %4060 = vmatpush1.bf16.msra.mxu0 %v14395_v42  ;;  %v14481_v14 = vld [vmem:[%s19932_s5 + $0x3a4] ss:$8 sps:$4 sm:$0xff]  }
 0x24b   : > { %12187 = vmatprep.mubr.msk.bf16.mxu0 %vm1782_vm14, %v3729_v46  ;;  %4061 = vmatprep.subr.bf16.mxu0 %v14405_v43  ;;  %v14526_v42 = vld [vmem:[%s19934_s7 + $0x1e4] ss:$16 sps:$4 sm:$0xff]  }
 0x24c   : > { %v14532_v43 = vld [vmem:[%s19934_s7 + $0x1c4] ss:$16 sps:$4 sm:$0xff]  }
 0x24d   : > { %3613 = vmatpush1.bf16.msra.mxu1 %v14400_v41  ;;  %v14524_v41 = vld [vmem:[%s19934_s7 + $0x1e0] ss:$16 sps:$4 sm:$0xff]   ;;  %v14484_v46 = vld [vmem:[%s19932_s5 + $0x394] ss:$8 sps:$4 sm:$0xff]  }
 0x24e   : > { %3614 = vmatprep.subr.bf16.mxu1 %v14408_v44  ;;  %4062 = vmatpush1.bf16.msra.mxu0 %v14403_v47  ;;  %v14479_v44 = vld [vmem:[%s19932_s5 + $0x3a0] ss:$8 sps:$4 sm:$0xff]  }
 0x24f   : > { %4063 = vmatprep.subr.bf16.mxu0 %v14411_v48  ;;  %v14530_v47 = vld [vmem:[%s19934_s7 + $0x1c0] ss:$16 sps:$4 sm:$0xff]   ;;  %v14538_v48 = vld [vmem:[%s19934_s7 + $0x1a4] ss:$16 sps:$4 sm:$0xff]  }
 0x250   : > { %v1863_v9 = vpop.f32.mrf.mxu1 }
 0x251   : > { %3615 = vmatpush1.bf16.msra.mxu1 %v14406_v49  ;;  %v14482_v49 = vld [vmem:[%s19932_s5 + $0x390] ss:$8 sps:$4 sm:$0xff]  }
 0x252   : > { %3616 = vmatprep.subr.bf16.mxu1 %v14414_v50  ;;  %4064 = vmatpush1.bf16.msra.mxu0 %v14409_v53  ;;  %v14487_v50 = vld [vmem:[%s19932_s5 + $0x384] ss:$8 sps:$4 sm:$0xff]   ;;  %v14536_v53 = vld [vmem:[%s19934_s7 + $0x1a0] ss:$16 sps:$4 sm:$0xff]  }
 0x253   : > { %4065 = vmatprep.subr.bf16.mxu0 %v14417_v54  ;;  %v14485_v54 = vld [vmem:[%s19932_s5 + $0x380] ss:$8 sps:$4 sm:$0xff]  }
 0x255   : > { %3617 = vmatpush1.bf16.msra.mxu1 %v14412_v55  ;;  %v14490_v55 = vld [vmem:[%s19932_s5 + $0x474] ss:$8 sps:$4 sm:$0xff]  }
 0x256   : > { %3618 = vmatprep.subr.bf16.mxu1 %v14420_v56  ;;  %4066 = vmatpush1.bf16.msra.mxu0 %v14415_v57  ;;  %v14544_v56 = vld [vmem:[%s19934_s7 + $0x184] ss:$16 sps:$4 sm:$0xff]   ;;  %v14542_v57 = vld [vmem:[%s19934_s7 + $0x180] ss:$16 sps:$4 sm:$0xff]  }
 0x257   : > { %4067 = vmatprep.subr.bf16.mxu0 %v14423_v58  ;;  %v14550_v58 = vld [vmem:[%s19934_s7 + $0x164] ss:$16 sps:$4 sm:$0xff]  }
 0x259   : > { %3619 = vmatpush1.bf16.msra.mxu1 %v14418_v59  ;;  %v14488_v59 = vld [vmem:[%s19932_s5 + $0x470] ss:$8 sps:$4 sm:$0xff]  }
 0x25a   : > { %3620 = vmatprep.subr.bf16.mxu1 %v14426_v60  ;;  %4068 = vmatpush1.bf16.msra.mxu0 %v14421_v61  ;;  %v14493_v60 = vld [vmem:[%s19932_s5 + $0x464] ss:$8 sps:$4 sm:$0xff]   ;;  %v14548_v61 = vld [vmem:[%s19934_s7 + $0x160] ss:$16 sps:$4 sm:$0xff]  }
 0x25b   : > { %4069 = vmatprep.subr.bf16.mxu0 %v14429_v62  ;;  %v14556_v62 = vld [vmem:[%s19934_s7 + $0x144] ss:$16 sps:$4 sm:$0xff]  }
 0x25d   : > { %3621 = vmatpush1.bf16.msra.mxu1 %v14424_v63  ;;  %v14491_v63 = vld [vmem:[%s19932_s5 + $0x460] ss:$8 sps:$4 sm:$0xff]  }
 0x25e   : > { %3630 = vmatprep.subr.bf16.mxu1 %v14432_v4  ;;  %4070 = vmatpush1.bf16.msra.mxu0 %v14427_v2  ;;  %v14496_v2 = vld [vmem:[%s19932_s5 + $0x454] ss:$8 sps:$4 sm:$0xff]   ;;  %v14554_v4 = vld [vmem:[%s19934_s7 + $0x140] ss:$16 sps:$4 sm:$0xff]  }
 0x25f   : > { %4071 = vmatprep.subr.bf16.mxu0 %v14435_v5  ;;  %v14494_v5 = vld [vmem:[%s19932_s5 + $0x450] ss:$8 sps:$4 sm:$0xff]  }
 0x261   : > { %3631 = vmatpush2.bf16.msra.mxu1 %v14430_v6  ;;  %v14499_v6 = vld [vmem:[%s19932_s5 + $0x444] ss:$8 sps:$4 sm:$0xff]  }
 0x262   : > { %3632 = vmatprep.subr.bf16.mxu1 %v14438_v7  ;;  %4072 = vmatpush1.bf16.msra.mxu0 %v14433_v8  ;;  %v14562_v7 = vld [vmem:[%s19934_s7 + $0x264] ss:$16 sps:$4 sm:$0xff]   ;;  %v14560_v8 = vld [vmem:[%s19934_s7 + $0x260] ss:$16 sps:$4 sm:$0xff]  }
 0x263   : > { %4073 = vmatprep.subr.bf16.mxu0 %v14441_v52  ;;  %v14502_v52 = vld [vmem:[%s19932_s5 + $0x434] ss:$8 sps:$4 sm:$0xff]  }
 0x265   : > { %3633 = vmatpush2.bf16.msra.mxu1 %v14436_v10  ;;  %v14497_v10 = vld [vmem:[%s19932_s5 + $0x440] ss:$8 sps:$4 sm:$0xff]  }
 0x266   : > { %3634 = vmatprep.subr.bf16.mxu1 %v14444_v11  ;;  %4074 = vmatpush1.bf16.msra.mxu0 %v14439_v12  ;;  %v14568_v11 = vld [vmem:[%s19934_s7 + $0x244] ss:$16 sps:$4 sm:$0xff]   ;;  %v14566_v12 = vld [vmem:[%s19934_s7 + $0x240] ss:$16 sps:$4 sm:$0xff]  }
 0x267   : > { %4083 = vmatprep.subr.bf16.mxu0 %v14447_v16  ;;  %v14575_v16 = vld [vmem:[%s19934_s7 + $0xe4] ss:$16 sps:$4 sm:$0xff]  }
 0x269   : > { %3635 = vmatpush2.bf16.msra.mxu1 %v14442_v13  ;;  %v14500_v13 = vld [vmem:[%s19932_s5 + $0x430] ss:$8 sps:$4 sm:$0xff]  }
 0x26a   : > { %3636 = vmatprep.subr.bf16.mxu1 %v14450_v17  ;;  %4084 = vmatpush2.bf16.msra.mxu0 %v14445_v18  ;;  %v14505_v17 = vld [vmem:[%s19932_s5 + $0x424] ss:$8 sps:$4 sm:$0xff]   ;;  %v1820_v18 = vpop.f32.mrf.mxu0 }
 0x26b   : > { %4085 = vmatprep.subr.bf16.mxu0 %v14453_v20  ;;  %v14508_v20 = vld [vmem:[%s19932_s5 + $0x414] ss:$8 sps:$4 sm:$0xff]  }
 0x26d   : > { %3637 = vmatpush2.bf16.msra.mxu1 %v14448_v19  ;;  %v14503_v19 = vld [vmem:[%s19932_s5 + $0x420] ss:$8 sps:$4 sm:$0xff]  }
 0x26e   : > { %4016 = vmatprep.subr.bf16.mxu1 %v14456_v45  ;;  %4086 = vmatpush2.bf16.msra.mxu0 %v14451_v22  ;;  %v1822_v45 = vpop.f32.mrf.mxu0  ;;  %v14506_v22 = vld [vmem:[%s19932_s5 + $0x410] ss:$8 sps:$4 sm:$0xff]  }
 0x26f   : > { %4087 = vmatprep.subr.bf16.mxu0 %v14462_v25 }
 0x270   : > { %3639 = vmatmul.mubr.bf16.vlgmr.msra.gmra.mxu1 %v16824_v15  ;;  %v14469_v15 = vld [vmem:[%s19932_s5 + $0x3d0] ss:$8 sps:$4 sm:$0xff]   ;;  %v1824_v25 = vpop.f32.mrf.mxu0 }
 0x271   : > { %4017 = vmatpush1.bf16.msra.mxu1 %v14454_v51  ;;  %4048 = vmatprep.mubr.bf16.mxu1 %v3727_v26  ;;  %v14511_v51 = vld [vmem:[%s19932_s5 + $0x404] ss:$8 sps:$4 sm:$0xff]   ;;  %v1865_v26 = vpop.f32.mrf.mxu1 }
 0x272   : > { %4018 = vmatprep.subr.bf16.mxu1 %v14465_v0  ;;  %4088 = vmatpush2.bf16.msra.mxu0 %v14460_v27  ;;  %v14509_v0 = vld [vmem:[%s19932_s5 + $0x400] ss:$8 sps:$4 sm:$0xff]  }
 0x273   : > { %4089 = vmatprep.subr.bf16.mxu0 %v14468_v29  ;;  %v14457_v27 = vld [vmem:[#allocation2] ss:$16 sps:$4 sm:$0x3e]   ;;  %v1826_v29 = vpop.f32.mrf.mxu0 }
 0x275   : > { %4019 = vmatpush1.bf16.msra.mxu1 %v14463_v28  ;;  %v14517_v28 = vld [vmem:[%s19934_s7 + $0x22c] ss:$16 sps:$4 sm:$0xff]   ;;  %v2234_v31 = vpop.f32.mrf.mxu0 }
 0x276   : > { %4020 = vmatprep.subr.bf16.mxu1 %v14471_v30  ;;  %4090 = vmatpush2.bf16.msra.mxu0 %v14466_v32  ;;  %v1867_v30 = vpop.f32.mrf.mxu1  ;;  %v14515_v32 = vld [vmem:[%s19934_s7 + $0x228] ss:$16 sps:$4 sm:$0xff]  }
 0x277   : > { %4440 = vmatprep.subr.bf16.mxu0 %v14514_v34 }
 0x278   : > { %v1869_v34 = vpop.f32.mrf.mxu1 }
 0x279   : > { %4021 = vmatpush1.bf16.msra.mxu1 %v14469_v15  ;;  %4092 = vmatmul.mubr.bf16.vlgmr.msra.gmra.mxu0 %v3728_v37  ;;  %v3726_v15 = vrot.slane %v14457_v27, 1 }
 0x27a   : > { %4022 = vmatprep.subr.bf16.mxu1 %v14475_v33  ;;  %4441 = vmatpush1.bf16.msra.mxu0 %v14512_v36  ;;  %v14523_v33 = vld [vmem:[%s19934_s7 + $0x20c] ss:$16 sps:$4 sm:$0xff]   ;;  %v14521_v36 = vld [vmem:[%s19934_s7 + $0x208] ss:$16 sps:$4 sm:$0xff]  }
 0x27b   : > { %4442 = vmatprep.subr.bf16.mxu0 %v14520_v38 }
 0x27d   : > { %4023 = vmatpush1.bf16.msra.mxu1 %v14473_v35  ;;  %v2236_v35 = vpop.f32.mrf.mxu0 }
 0x27e   : > { %4024 = vmatprep.subr.bf16.mxu1 %v14478_v23  ;;  %4443 = vmatpush1.bf16.msra.mxu0 %v14518_v40  ;;  %v14529_v23 = vld [vmem:[%s19934_s7 + $0x1ec] ss:$16 sps:$4 sm:$0xff]  }
 0x27f   : > { %4444 = vmatprep.subr.bf16.mxu0 %v14526_v42  ;;  %v2238_v38 = vpop.f32.mrf.mxu0 }
 0x281   : > { %4025 = vmatpush1.bf16.msra.mxu1 %v14476_v39  ;;  %v14527_v39 = vld [vmem:[%s19934_s7 + $0x1e8] ss:$16 sps:$4 sm:$0xff]   ;;  %v2240_v42 = vpop.f32.mrf.mxu0 }
 0x282   : > { %4026 = vmatprep.subr.bf16.mxu1 %v14481_v14  ;;  %4445 = vmatpush1.bf16.msra.mxu0 %v14524_v41  ;;  %v14535_v14 = vld [vmem:[%s19934_s7 + $0x1cc] ss:$16 sps:$4 sm:$0xff]   ;;  %v14533_v41 = vld [vmem:[%s19934_s7 + $0x1c8] ss:$16 sps:$4 sm:$0xff]  }
 0x283   : > { %4446 = vmatprep.subr.bf16.mxu0 %v14532_v43  ;;  %v14541_v43 = vld [vmem:[%s19934_s7 + $0x1ac] ss:$16 sps:$4 sm:$0xff]  }
 0x285   : > { %4027 = vmatpush1.bf16.msra.mxu1 %v14479_v44 }
 0x286   : > { %4028 = vmatprep.subr.bf16.mxu1 %v14484_v46  ;;  %4447 = vmatpush1.bf16.msra.mxu0 %v14530_v47  ;;  %v1864_v47 = vadd.f32 %v1863_v9, %v1820_v18 }
 0x287   : > { %4448 = vmatprep.subr.bf16.mxu0 %v14538_v48  ;;  %v2700_v48 = vld [vmem:[%s19931_s4] sm:$0x3] }
 0x289   : > { %4029 = vmatpush1.bf16.msra.mxu1 %v14482_v49  ;;  %v14539_v49 = vld [vmem:[%s19934_s7 + $0x1a8] ss:$16 sps:$4 sm:$0xff]  }
 0x28a   : > { %4030 = vmatprep.subr.bf16.mxu1 %v14487_v50  ;;  %4449 = vmatpush1.bf16.msra.mxu0 %v14536_v53  ;;  %v1866_v50 = vadd.f32 %v1865_v26, %v1822_v45  ;;  %v14559_v45 = vld [vmem:[%s19934_s7 + $0x14c] ss:$16 sps:$4 sm:$0xff]  }
 0x28b   : > { %4450 = vmatprep.subr.bf16.mxu0 %v14544_v56 }
 0x28d   : > { %4031 = vmatpush1.bf16.msra.mxu1 %v14485_v54  ;;  %v14547_v54 = vld [vmem:[%s19934_s7 + $0x18c] ss:$16 sps:$4 sm:$0xff]  }
 0x28e   : > { %4032 = vmatprep.subr.bf16.mxu1 %v14490_v55  ;;  %4451 = vmatpush1.bf16.msra.mxu0 %v14542_v57  ;;  %v1868_v57 = vadd.f32 %v1867_v30, %v1824_v25 }
 0x28f   : > { %4452 = vmatprep.subr.bf16.mxu0 %v14550_v58 }
 0x290   : > { %v2191_v37 = vpop.f32.mrf.mxu1 }
 0x291   : > { %4033 = vmatpush2.bf16.msra.mxu1 %v14488_v59  ;;  %v2192_v53 = vadd.f32 %v2191_v37, %v1864_v47  ;;  %v2742_v37 = vld [vmem:[#allocation3 + $0x8] sm:$0x11] }
 0x292   : > { %4034 = vmatprep.subr.bf16.mxu1 %v14493_v60  ;;  %4453 = vmatpush1.bf16.msra.mxu0 %v14548_v61  ;;  %v2193_v40 = vpop.f32.mrf.mxu1  ;;  %v2705_v60 = vrot.slane %v2700_v48, %v16356_v21  ;;  %v14545_v61 = vld [vmem:[%s19934_s7 + $0x188] ss:$16 sps:$4 sm:$0xff]  }
 0x293   : > { %4454 = vmatprep.subr.bf16.mxu0 %v14556_v62  ;;  %v2194_v58 = vadd.f32 %v2193_v40, %v1866_v50  ;;  %v1870_v62 = vadd.f32 %v1869_v34, %v1826_v29  ;;  %v14557_v29 = vld [vmem:[%s19934_s7 + $0x148] ss:$16 sps:$4 sm:$0xff]   ;;  %v14565_v34 = vld [vmem:[%s19934_s7 + $0x26c] ss:$16 sps:$4 sm:$0xff]  }
 0x294   : > { %v2195_v44 = vpop.f32.mrf.mxu1  ;;  %v14571_v40 = vld [vmem:[%s19934_s7 + $0x24c] ss:$16 sps:$4 sm:$0xff]   ;;  %v14576_v50 = vld [vmem:[%s19934_s7 + $0xe8] ss:$16 sps:$4 sm:$0xff]  }
 0x295   : > { %4035 = vmatpush2.bf16.msra.mxu1 %v14491_v63  ;;  %v2235_v63 = vadd.f32 %v2234_v31, %v2192_v53 }
 0x296   : > { %4036 = vmatprep.subr.bf16.mxu1 %v14496_v2  ;;  %4455 = vmatpush1.bf16.msra.mxu0 %v14554_v4  ;;  %v2197_v55 = vpop.f32.mrf.mxu1  ;;  %v2196_v2 = vadd.f32 %v2195_v44, %v1868_v57  ;;  %v14583_v57 = vld [vmem:[%s19934_s7 + $0xc8] ss:$16 sps:$4 sm:$0xff]  }
 0x297   : > { %4468 = vmatprep.subr.bf16.mxu0 %v14562_v7 }
 0x299   : > { %4037 = vmatpush2.bf16.msra.mxu1 %v14494_v5  ;;  %v2644_v46 = vpop.f32.mrf.mxu0  ;;  %v14553_v5 = vld [vmem:[%s19934_s7 + $0x16c] ss:$16 sps:$4 sm:$0xff]  }
 0x29a   : > { %4038 = vmatprep.subr.bf16.mxu1 %v14499_v6  ;;  %4469 = vmatpush2.bf16.msra.mxu0 %v14560_v8  ;;  %v2709_v8 = vrot.slane %v2700_v48, %v16361_v24 }
 0x29b   : > { %4470 = vmatprep.subr.bf16.mxu0 %v14568_v11  ;;  %v2646_v56 = vpop.f32.mrf.mxu0 }
 0x29d   : > { %4039 = vmatpush2.bf16.msra.mxu1 %v14497_v10  ;;  %v2648_v6 = vpop.f32.mrf.mxu0  ;;  %v2237_v10 = vadd.f32 %v2236_v35, %v2194_v58  ;;  %v14588_v58 = vld [vmem:[%s19934_s7 + $0xa4] ss:$16 sps:$4 sm:$0xff]  }
 0x29e   : > { %4040 = vmatprep.subr.bf16.mxu1 %v14502_v52  ;;  %4471 = vmatpush2.bf16.msra.mxu0 %v14566_v12  ;;  %v2198_v52 = vadd.f32 %v2197_v55, %v1870_v62  ;;  %v14585_v55 = vld [vmem:[%s19934_s7 + $0xcc] ss:$16 sps:$4 sm:$0xff]   ;;  %v14594_v62 = vld [vmem:[%s19934_s7 + $0x84] ss:$16 sps:$4 sm:$0xff]  }
 0x29f   : > { %4725 = vmatprep.subr.bf16.mxu0 %v14575_v16  ;;  %v14551_v16 = vld [vmem:[%s19934_s7 + $0x168] ss:$16 sps:$4 sm:$0xff]   ;;  %v2650_v9 = vpop.f32.mrf.mxu0 }
 0x2a0   : > { %v2241_v25 = vadd.f32 %v2240_v42, %v2198_v52  ;;  %v14609_v52 = vld [vmem:[%s19934_s7 + $0x4c] ss:$16 sps:$4 sm:$0xff]  }
 0x2a1   : > { %4041 = vmatpush2.bf16.msra.mxu1 %v14500_v13 }
 0x2a2   : > { %4042 = vmatprep.subr.bf16.mxu1 %v14505_v17  ;;  %v2239_v17 = vadd.f32 %v2238_v38, %v2196_v2  ;;  %v14592_v2 = vld [vmem:[%s19934_s7 + $0x80] ss:$16 sps:$4 sm:$0xff]  }
 0x2a5   : > { %4043 = vmatpush2.bf16.msra.mxu1 %v14503_v19 }
 0x2a6   : > { %4044 = vmatprep.subr.bf16.mxu1 %v14508_v20 }
 0x2a9   : > { %4045 = vmatpush2.bf16.msra.mxu1 %v14506_v22 }
 0x2aa   : > { %4046 = vmatprep.subr.bf16.mxu1 %v14511_v51  ;;  %v14832_v51 = vld [vmem:[%s19934_s7 + $0x6e8] ss:$16 sps:$4 sm:$0xff]  }
 0x2ad   : > { %4047 = vmatpush2.bf16.msra.mxu1 %v14509_v0 }
 0x2ae   : > { %4481 = vmatprep.subr.bf16.mxu1 %v14517_v28  ;;  %v14843_v28 = vld [vmem:[%s19934_s7 + $0x6a4] ss:$16 sps:$4 sm:$0xff]  }
 0x2b0   : > { %4049 = vmatmul.mubr.bf16.vlgmr.msra.gmra.mxu1 %v3726_v15 }
 0x2b1   : > { %4482 = vmatpush1.bf16.msra.mxu1 %v14515_v32 }
 0x2b2   : > { %4483 = vmatprep.subr.bf16.mxu1 %v14523_v33  ;;  %v14838_v33 = vld [vmem:[%s19934_s7 + $0x6c8] ss:$16 sps:$4 sm:$0xff]  }
 0x2b5   : > { %4484 = vmatpush1.bf16.msra.mxu1 %v14521_v36 }
 0x2b6   : > { %4485 = vmatprep.subr.bf16.mxu1 %v14529_v23  ;;  %v14563_v23 = vld [vmem:[%s19934_s7 + $0x268] ss:$16 sps:$4 sm:$0xff]  }
 0x2b9   : > { %4486 = vmatpush1.bf16.msra.mxu1 %v14527_v39 }
 0x2ba   : > { %4487 = vmatprep.subr.bf16.mxu1 %v14535_v14 }
 0x2bd   : > { %4488 = vmatpush1.bf16.msra.mxu1 %v14533_v41  ;;  %v14569_v41 = vld [vmem:[%s19934_s7 + $0x248] ss:$16 sps:$4 sm:$0xff]  }
 0x2be   : > { %4489 = vmatprep.subr.bf16.mxu1 %v14541_v43  ;;  %v14578_v43 = vld [vmem:[%s19934_s7 + $0xec] ss:$16 sps:$4 sm:$0xff]  }
 0x2c0   : > { %v2687_v59 = vpop.f32.mrf.mxu1 }
 0x2c1   : > { %v2688_v4 = vadd.f32 %v2687_v59, %v2644_v46  ;;  %4490 = vmatpush1.bf16.msra.mxu1 %v14539_v49  ;;  %v14573_v49 = vld [vmem:[%s19934_s7 + $0xe0] ss:$16 sps:$4 sm:$0xff]   ;;  %v14591_v59 = vld [vmem:[%s19934_s7 + $0xac] ss:$16 sps:$4 sm:$0xff]  }
 0x2c2   : > { %v2689_v7 = vpop.f32.mrf.mxu1  ;;  %4491 = vmatprep.subr.bf16.mxu1 %v14547_v54  ;;  %v14582_v54 = vld [vmem:[%s19934_s7 + $0xc4] ss:$16 sps:$4 sm:$0xff]  }
 0x2c3   : > { %v2696_v11 = vadd.f32 %v2688_v4, %v2235_v63  ;;  %v2690_v12 = vadd.f32 %v2689_v7, %v2646_v56  ;;  %v14580_v56 = vld [vmem:[%s19934_s7 + $0xc0] ss:$16 sps:$4 sm:$0xff]   ;;  %v14597_v63 = vld [vmem:[%s19934_s7 + $0x8c] ss:$16 sps:$4 sm:$0xff]   ;;  %v14595_v4 = vld [vmem:[%s19934_s7 + $0x88] ss:$16 sps:$4 sm:$0xff]  }
 0x2c4   : > { %v2691_v13 = vpop.f32.mrf.mxu1  ;;  %v14598_v7 = vld [vmem:[%s19934_s7 + $0x60] ss:$16 sps:$4 sm:$0xff]  }
 0x2c5   : > { %v2712_v18 = vadd.f32 %v2705_v60, %v2696_v11  ;;  %v2697_v19 = vadd.f32 %v2690_v12, %v2237_v10  ;;  %v2692_v20 = vadd.f32 %v2691_v13, %v2648_v6  ;;  %4492 = vmatpush1.bf16.msra.mxu1 %v14545_v61  ;;  %v14589_v61 = vld [vmem:[%s19934_s7 + $0xa8] ss:$16 sps:$4 sm:$0xff]   ;;  %v14603_v6 = vld [vmem:[%s19934_s7 + $0x6c] ss:$16 sps:$4 sm:$0xff]   ;;  %v14606_v10 = vld [vmem:[%s19934_s7 + $0x44] ss:$16 sps:$4 sm:$0xff]  }
 0x2c6   : > { %v2693_v22 = vpop.f32.mrf.mxu1  ;;  %4493 = vmatprep.subr.bf16.mxu1 %v14553_v5  ;;  %v14600_v5 = vld [vmem:[%s19934_s7 + $0x64] ss:$16 sps:$4 sm:$0xff]   ;;  %v14604_v11 = vld [vmem:[%s19934_s7 + $0x40] ss:$16 sps:$4 sm:$0xff]   ;;  %v14607_v12 = vld [vmem:[%s19934_s7 + $0x48] ss:$16 sps:$4 sm:$0xff]  }
 0x2c7   : > { %v2713_v0 = vadd.f32 %v2709_v8, %v2697_v19  ;;  %v2698_v26 = vadd.f32 %v2692_v20, %v2239_v17  ;;  %v2694_v27 = vadd.f32 %v2693_v22, %v2650_v9  ;;  %v2716_v30 = vmax.f32 %v2712_v18, 0.0  ;;  %v14612_v13 = vld [vmem:[%s19934_s7 + $0x24] ss:$16 sps:$4 sm:$0xff]   ;;  %v14610_v17 = vld [vmem:[%s19934_s7 + $0x20] ss:$16 sps:$4 sm:$0xff]  }
 0x2c8   : > { %v14613_v18 = vld [vmem:[%s19934_s7 + $0x28] ss:$16 sps:$4 sm:$0xff]   ;;  %v14618_v19 = vld [vmem:[%s19934_s7 + $0x4] ss:$16 sps:$4 sm:$0xff]   ;;  %v14621_v20 = vld [vmem:[%s19934_s7 + $0xc] ss:$16 sps:$4 sm:$0xff]  }
 0x2c9   : > { %v2717_v31 = vmax.f32 %v2713_v0, 0.0  ;;  %v2714_v32 = vadd.f32 %v2705_v60, %v2698_v26  ;;  %v2699_v15 = vadd.f32 %v2694_v27, %v2241_v25  ;;  %4494 = vmatpush1.bf16.msra.mxu1 %v14551_v16  ;;  %v14586_v60 = vld [vmem:[%s19934_s7 + $0xa0] ss:$16 sps:$4 sm:$0xff]   ;;  %v14615_v16 = vld [vmem:[%s19934_s7 + $0x2c] ss:$16 sps:$4 sm:$0xff]  }
 0x2ca   : > { %4495 = vmatprep.subr.bf16.mxu1 %v14559_v45  ;;  %v14616_v45 = vld [vmem:[%s19934_s7] ss:$16 sps:$4 sm:$0xff]   ;;  %v14619_v9 = vld [vmem:[%s19934_s7 + $0x8] ss:$16 sps:$4 sm:$0xff]   ;;  %v14624_v22 = vld [vmem:[%s19934_s7 + $0x124] ss:$16 sps:$4 sm:$0xff]  }
 0x2cb   : > { %v13757_v35 = vpack.c.bf16 %v2717_v31, %v2716_v30  ;;  %v2715_v36 = vadd.f32 %v2709_v8, %v2699_v15  ;;  %v2718_v38 = vmax.f32 %v2714_v32, 0.0  ;;  %v14601_v8 = vld [vmem:[%s19934_s7 + $0x68] ss:$16 sps:$4 sm:$0xff]   ;;  %v14627_v25 = vld [vmem:[%s19934_s7 + $0x12c] ss:$16 sps:$4 sm:$0xff]  }
 0x2cc   : > { %v14622_v0 = vld [vmem:[%s19934_s7 + $0x120] ss:$16 sps:$4 sm:$0xff]   ;;  %v14625_v26 = vld [vmem:[%s19934_s7 + $0x128] ss:$16 sps:$4 sm:$0xff]   ;;  %v14630_v27 = vld [vmem:[%s19934_s7 + $0x104] ss:$16 sps:$4 sm:$0xff]  }
 0x2cd   : > { %2734 = vst.msk [vmem:[#allocation3] sm:$0xff] %vm17384_vm4, %v13757_v35  ;;  %v2719_v39 = vmax.f32 %v2715_v36, 0.0  ;;  %4496 = vmatpush1.bf16.msra.mxu1 %v14557_v29  ;;  %v14633_v29 = vld [vmem:[%s19934_s7 + $0x10c] ss:$16 sps:$4 sm:$0xff]   ;;  %v14628_v31 = vld [vmem:[%s19934_s7 + $0x100] ss:$16 sps:$4 sm:$0xff]  }
 0x2ce   : > { %4509 = vmatprep.subr.bf16.mxu1 %v14565_v34  ;;  %v14631_v32 = vld [vmem:[%s19934_s7 + $0x108] ss:$16 sps:$4 sm:$0xff]   ;;  %v14636_v15 = vld [vmem:[%s19934_s7 + $0x364] ss:$16 sps:$4 sm:$0xff]   ;;  %v14639_v34 = vld [vmem:[%s19934_s7 + $0x36c] ss:$16 sps:$4 sm:$0xff]  }
 0x2cf   : > { %v13758_v14 = vpack.c.bf16 %v2719_v39, %v2718_v38  ;;  %v14634_v36 = vld [vmem:[%s19934_s7 + $0x360] ss:$16 sps:$4 sm:$0xff]   ;;  %v14643_v38 = vld [vmem:[%s19934_s7 + $0x344] ss:$16 sps:$4 sm:$0xff]   ;;  %v14646_v39 = vld [vmem:[%s19934_s7 + $0x34c] ss:$16 sps:$4 sm:$0xff]  }
 0x2d1   : > { %v2743_v42 = vsel %vm2741_vm7, %v13758_v14, %v2742_v37  ;;  %4510 = vmatpush2.bf16.msra.mxu1 %v14563_v23  ;;  %v14637_v37 = vld [vmem:[%s19934_s7 + $0x368] ss:$16 sps:$4 sm:$0xff]  }
 0x2d2   : > { %2744 = vst [vmem:[#allocation3 + $0x8] sm:$0x11] %v2743_v42  ;;  %4511 = vmatprep.subr.bf16.mxu1 %v14571_v40  ;;  %v14641_v40 = vld [vmem:[%s19934_s7 + $0x340] ss:$16 sps:$4 sm:$0xff]   ;;  %v14644_v14 = vld [vmem:[%s19934_s7 + $0x348] ss:$16 sps:$4 sm:$0xff]  }
 0x2d3   : > { %v14649_v42 = vld [vmem:[%s19934_s7 + $0x324] ss:$16 sps:$4 sm:$0xff]  }
 0x2d4   : > { %v4142_v44 = vld [vmem:[#allocation3] sm:$0x11]  ;;  %v17544_v30 = vld [vmem:[#allocation3] sm:$0x22] }
 0x2d5   : > { %4512 = vmatpush2.bf16.msra.mxu1 %v14569_v41  ;;  %v12231_v46 = vcombine.high %v4142_v44, %v4142_v44  ;;  %v17429_v47 = vcombine.low %v4142_v44, %v4142_v44  ;;  %v17560_v35 = vcombine.high %v17544_v30, %v17544_v30  ;;  %v14652_v41 = vld [vmem:[%s19934_s7 + $0x32c] ss:$16 sps:$4 sm:$0xff]   ;;  %v14650_v44 = vld [vmem:[%s19934_s7 + $0x328] ss:$16 sps:$4 sm:$0xff]  }
 0x2d6   : > { %4766 = vmatprep.subr.bf16.mxu1 %v14578_v43  ;;  %v14647_v43 = vld [vmem:[%s19934_s7 + $0x320] ss:$16 sps:$4 sm:$0xff]  }
 0x2d7   : > { %v4233_v48 = vshrl.u32 %v12231_v46, 16  ;;  %v4230_v53 = vshrl.u32 %v17429_v47, 16  ;;  %v4855_v23 = vrot.slane %v17560_v35, 1 }
 0x2d9   : > { %12272 = vmatprep.mubr.msk.bf16.mxu0 %vm4436_vm8, %v4233_v48  ;;  %12273 = vmatprep.mubr.msk.bf16.mxu1 %vm4436_vm8, %v4233_v48  ;;  %v14653_v48 = vld [vmem:[%s19934_s7 + $0x300] ss:$16 sps:$4 sm:$0xff]  }
 0x2da   : > { %4473 = vmatmul.mubr.bf16.vlgmr.msra.gmra.mxu0 %v4230_v53  ;;  %4514 = vmatmul.mubr.bf16.vlgmr.msra.gmra.mxu1 %v4230_v53  ;;  %v14664_v53 = vld [vmem:[%s19934_s7 + $0x2ec] ss:$16 sps:$4 sm:$0xff]  }
 0x2db   : > { %4726 = vmatpush1.bf16.msra.mxu0 %v14573_v49  ;;  %4767 = vmatpush1.bf16.msra.mxu1 %v14576_v50  ;;  %v14656_v49 = vld [vmem:[%s19934_s7 + $0x308] ss:$16 sps:$4 sm:$0xff]   ;;  %v14661_v50 = vld [vmem:[%s19934_s7 + $0x2e4] ss:$16 sps:$4 sm:$0xff]  }
 0x2dc   : > { %12314 = vmatprep.mubr.msk.bf16.mxu0 %vm4436_vm8, %v12231_v46  ;;  %12315 = vmatprep.mubr.msk.bf16.mxu1 %vm4436_vm8, %v12231_v46  ;;  %v14655_v46 = vld [vmem:[%s19934_s7 + $0x304] ss:$16 sps:$4 sm:$0xff]  }
 0x2dd   : > { %4727 = vmatprep.subr.bf16.mxu0 %v14582_v54  ;;  %4768 = vmatprep.subr.bf16.mxu1 %v14585_v55  ;;  %v14659_v54 = vld [vmem:[%s19934_s7 + $0x2e0] ss:$16 sps:$4 sm:$0xff]   ;;  %v14662_v55 = vld [vmem:[%s19934_s7 + $0x2e8] ss:$16 sps:$4 sm:$0xff]  }
 0x2df   : > { %4728 = vmatpush1.bf16.msra.mxu0 %v14580_v56  ;;  %4769 = vmatpush1.bf16.msra.mxu1 %v14583_v57  ;;  %v14667_v56 = vld [vmem:[%s19934_s7 + $0x2c4] ss:$16 sps:$4 sm:$0xff]   ;;  %v14670_v57 = vld [vmem:[%s19934_s7 + $0x2cc] ss:$16 sps:$4 sm:$0xff]  }
 0x2e0   : > { %4729 = vmatprep.subr.bf16.mxu0 %v14588_v58  ;;  %4770 = vmatprep.subr.bf16.mxu1 %v14591_v59  ;;  %v14665_v58 = vld [vmem:[%s19934_s7 + $0x2c0] ss:$16 sps:$4 sm:$0xff]   ;;  %v14668_v59 = vld [vmem:[%s19934_s7 + $0x2c8] ss:$16 sps:$4 sm:$0xff]  }
 0x2e3   : > { %4730 = vmatpush1.bf16.msra.mxu0 %v14586_v60  ;;  %4771 = vmatpush1.bf16.msra.mxu1 %v14589_v61  ;;  %v14673_v60 = vld [vmem:[%s19934_s7 + $0x2a4] ss:$16 sps:$4 sm:$0xff]   ;;  %v14676_v61 = vld [vmem:[%s19934_s7 + $0x2ac] ss:$16 sps:$4 sm:$0xff]  }
 0x2e4   : > { %4731 = vmatprep.subr.bf16.mxu0 %v14594_v62  ;;  %4772 = vmatprep.subr.bf16.mxu1 %v14597_v63  ;;  %v14671_v62 = vld [vmem:[%s19934_s7 + $0x2a0] ss:$16 sps:$4 sm:$0xff]   ;;  %v14674_v63 = vld [vmem:[%s19934_s7 + $0x2a8] ss:$16 sps:$4 sm:$0xff]  }
 0x2e7   : > { %4732 = vmatpush1.bf16.msra.mxu0 %v14592_v2  ;;  %4773 = vmatpush1.bf16.msra.mxu1 %v14595_v4  ;;  %v14679_v2 = vld [vmem:[%s19934_s7 + $0x284] ss:$16 sps:$4 sm:$0xff]   ;;  %v14682_v4 = vld [vmem:[%s19934_s7 + $0x28c] ss:$16 sps:$4 sm:$0xff]  }
 0x2e8   : > { %4733 = vmatprep.subr.bf16.mxu0 %v14600_v5  ;;  %4774 = vmatprep.subr.bf16.mxu1 %v14603_v6  ;;  %v14677_v5 = vld [vmem:[%s19934_s7 + $0x280] ss:$16 sps:$4 sm:$0xff]   ;;  %v14680_v6 = vld [vmem:[%s19934_s7 + $0x288] ss:$16 sps:$4 sm:$0xff]  }
 0x2eb   : > { %4734 = vmatpush1.bf16.msra.mxu0 %v14598_v7  ;;  %4775 = vmatpush1.bf16.msra.mxu1 %v14601_v8  ;;  %v14685_v7 = vld [vmem:[%s19934_s7 + $0x3a4] ss:$16 sps:$4 sm:$0xff]   ;;  %v14688_v8 = vld [vmem:[%s19934_s7 + $0x3ac] ss:$16 sps:$4 sm:$0xff]  }
 0x2ec   : > { %4735 = vmatprep.subr.bf16.mxu0 %v14606_v10  ;;  %4776 = vmatprep.subr.bf16.mxu1 %v14609_v52  ;;  %v14683_v10 = vld [vmem:[%s19934_s7 + $0x3a0] ss:$16 sps:$4 sm:$0xff]   ;;  %v14686_v52 = vld [vmem:[%s19934_s7 + $0x3a8] ss:$16 sps:$4 sm:$0xff]  }
 0x2ef   : > { %4736 = vmatpush1.bf16.msra.mxu0 %v14604_v11  ;;  %4777 = vmatpush1.bf16.msra.mxu1 %v14607_v12  ;;  %v14691_v11 = vld [vmem:[%s19934_s7 + $0x384] ss:$16 sps:$4 sm:$0xff]   ;;  %v14694_v12 = vld [vmem:[%s19934_s7 + $0x38c] ss:$16 sps:$4 sm:$0xff]  }
 0x2f0   : > { %4737 = vmatprep.subr.bf16.mxu0 %v14612_v13  ;;  %4778 = vmatprep.subr.bf16.mxu1 %v14615_v16  ;;  %v14689_v13 = vld [vmem:[%s19934_s7 + $0x380] ss:$16 sps:$4 sm:$0xff]   ;;  %v14692_v16 = vld [vmem:[%s19934_s7 + $0x388] ss:$16 sps:$4 sm:$0xff]  }
 0x2f3   : > { %4738 = vmatpush1.bf16.msra.mxu0 %v14610_v17  ;;  %4779 = vmatpush1.bf16.msra.mxu1 %v14613_v18  ;;  %v17683_v17 = vcombine.low %v17544_v30, %v17544_v30  ;;  %v14698_v18 = vld [vmem:[%s19934_s7 + $0x4a4] ss:$16 sps:$4 sm:$0xff]  }
 0x2f4   : > { %4739 = vmatprep.subr.bf16.mxu0 %v14618_v19  ;;  %4780 = vmatprep.subr.bf16.mxu1 %v14621_v20  ;;  %v14701_v19 = vld [vmem:[%s19934_s7 + $0x4ac] ss:$16 sps:$4 sm:$0xff]   ;;  %v5192_v20 = vshrl.u32 %v17560_v35, 16  ;;  %v14710_v30 = vld [vmem:[%s19934_s7 + $0x464] ss:$16 sps:$4 sm:$0xff]  }
 0x2f5   : > { %v14719_v35 = vld [vmem:[%s19934_s7 + $0x44c] ss:$16 sps:$4 sm:$0xff]  }
 0x2f7   : > { %4740 = vmatpush1.bf16.msra.mxu0 %v14616_v45  ;;  %4781 = vmatpush1.bf16.msra.mxu1 %v14619_v9  ;;  %v14696_v45 = vld [vmem:[%s19934_s7 + $0x4a0] ss:$16 sps:$4 sm:$0xff]   ;;  %v4854_v9 = vrot.slane %v17683_v17, 1 }
 0x2f8   : > { %4753 = vmatprep.subr.bf16.mxu0 %v14624_v22  ;;  %4794 = vmatprep.subr.bf16.mxu1 %v14627_v25  ;;  %v14699_v22 = vld [vmem:[%s19934_s7 + $0x4a8] ss:$16 sps:$4 sm:$0xff]   ;;  %v14704_v25 = vld [vmem:[%s19934_s7 + $0x484] ss:$16 sps:$4 sm:$0xff]  }
 0x2fb   : > { %4754 = vmatpush2.bf16.msra.mxu0 %v14622_v0  ;;  %4795 = vmatpush2.bf16.msra.mxu1 %v14625_v26  ;;  %v5194_v0 = vrot.slane %v5192_v20, 1  ;;  %v14707_v26 = vld [vmem:[%s19934_s7 + $0x48c] ss:$16 sps:$4 sm:$0xff]   ;;  %v14771_v20 = vld [vmem:[%s19934_s7 + $0x5a4] ss:$16 sps:$4 sm:$0xff]  }
 0x2fc   : > { %4755 = vmatprep.subr.bf16.mxu0 %v14630_v27  ;;  %4796 = vmatprep.subr.bf16.mxu1 %v14633_v29  ;;  %v14702_v27 = vld [vmem:[%s19934_s7 + $0x480] ss:$16 sps:$4 sm:$0xff]   ;;  %v14705_v29 = vld [vmem:[%s19934_s7 + $0x488] ss:$16 sps:$4 sm:$0xff]  }
 0x2ff   : > { %4756 = vmatpush2.bf16.msra.mxu0 %v14628_v31  ;;  %4797 = vmatpush2.bf16.msra.mxu1 %v14631_v32  ;;  %v14713_v31 = vld [vmem:[%s19934_s7 + $0x46c] ss:$16 sps:$4 sm:$0xff]   ;;  %v14708_v32 = vld [vmem:[%s19934_s7 + $0x460] ss:$16 sps:$4 sm:$0xff]  }
 0x300   : > { %5060 = vmatprep.subr.bf16.mxu0 %v14636_v15  ;;  %5101 = vmatprep.subr.bf16.mxu1 %v14639_v34  ;;  %v14711_v15 = vld [vmem:[%s19934_s7 + $0x468] ss:$16 sps:$4 sm:$0xff]   ;;  %v14716_v34 = vld [vmem:[%s19934_s7 + $0x444] ss:$16 sps:$4 sm:$0xff]  }
 0x302   : > { %4758 = vmatmul.mubr.bf16.vlgmr.msra.gmra.mxu0 %v17429_v47  ;;  %4799 = vmatmul.mubr.bf16.vlgmr.msra.gmra.mxu1 %v17429_v47  ;;  %v14658_v47 = vld [vmem:[%s19934_s7 + $0x30c] ss:$16 sps:$4 sm:$0xff]  }
 0x303   : > { %5061 = vmatpush1.bf16.msra.mxu0 %v14634_v36  ;;  %12398 = vmatprep.mubr.msk.bf16.mxu0 %vm4436_vm8, %v4855_v23  ;;  %v14714_v36 = vld [vmem:[%s19934_s7 + $0x440] ss:$16 sps:$4 sm:$0xff]  }
 0x304   : > { %5102 = vmatpush1.bf16.msra.mxu1 %v14637_v37  ;;  %12399 = vmatprep.mubr.msk.bf16.mxu1 %vm4436_vm8, %v4855_v23  ;;  %v14717_v37 = vld [vmem:[%s19934_s7 + $0x448] ss:$16 sps:$4 sm:$0xff]   ;;  %v14722_v23 = vld [vmem:[%s19934_s7 + $0x424] ss:$16 sps:$4 sm:$0xff]  }
 0x305   : > { %5062 = vmatprep.subr.bf16.mxu0 %v14643_v38  ;;  %5103 = vmatprep.subr.bf16.mxu1 %v14646_v39  ;;  %v14725_v38 = vld [vmem:[%s19934_s7 + $0x42c] ss:$16 sps:$4 sm:$0xff]   ;;  %v14720_v39 = vld [vmem:[%s19934_s7 + $0x420] ss:$16 sps:$4 sm:$0xff]  }
 0x307   : > { %5063 = vmatpush1.bf16.msra.mxu0 %v14641_v40  ;;  %v14723_v40 = vld [vmem:[%s19934_s7 + $0x428] ss:$16 sps:$4 sm:$0xff]  }
 0x308   : > { %5104 = vmatpush1.bf16.msra.mxu1 %v14644_v14  ;;  %5064 = vmatprep.subr.bf16.mxu0 %v14649_v42  ;;  %v14728_v14 = vld [vmem:[%s19934_s7 + $0x404] ss:$16 sps:$4 sm:$0xff]   ;;  %v14731_v42 = vld [vmem:[%s19934_s7 + $0x40c] ss:$16 sps:$4 sm:$0xff]  }
 0x309   : > { %5105 = vmatprep.subr.bf16.mxu1 %v14652_v41  ;;  %v14726_v41 = vld [vmem:[%s19934_s7 + $0x400] ss:$16 sps:$4 sm:$0xff]  }
 0x30b   : > { %5065 = vmatpush1.bf16.msra.mxu0 %v14647_v43  ;;  %v14729_v43 = vld [vmem:[%s19934_s7 + $0x408] ss:$16 sps:$4 sm:$0xff]  }
 0x30c   : > { %5106 = vmatpush1.bf16.msra.mxu1 %v14650_v44  ;;  %5066 = vmatprep.subr.bf16.mxu0 %v14655_v46  ;;  %v14734_v44 = vld [vmem:[%s19934_s7 + $0x3e4] ss:$16 sps:$4 sm:$0xff]   ;;  %v14737_v46 = vld [vmem:[%s19934_s7 + $0x3ec] ss:$16 sps:$4 sm:$0xff]  }
 0x30d   : > { %5107 = vmatprep.subr.bf16.mxu1 %v14658_v47  ;;  %v14732_v47 = vld [vmem:[%s19934_s7 + $0x3e0] ss:$16 sps:$4 sm:$0xff]  }
 0x30f   : > { %5067 = vmatpush1.bf16.msra.mxu0 %v14653_v48  ;;  %v14735_v48 = vld [vmem:[%s19934_s7 + $0x3e8] ss:$16 sps:$4 sm:$0xff]  }
 0x310   : > { %5108 = vmatpush1.bf16.msra.mxu1 %v14656_v49  ;;  %5068 = vmatprep.subr.bf16.mxu0 %v14661_v50  ;;  %v14740_v49 = vld [vmem:[%s19934_s7 + $0x3c4] ss:$16 sps:$4 sm:$0xff]   ;;  %v14743_v50 = vld [vmem:[%s19934_s7 + $0x3cc] ss:$16 sps:$4 sm:$0xff]  }
 0x311   : > { %5109 = vmatprep.subr.bf16.mxu1 %v14664_v53  ;;  %v14738_v53 = vld [vmem:[%s19934_s7 + $0x3c0] ss:$16 sps:$4 sm:$0xff]  }
 0x313   : > { %5069 = vmatpush1.bf16.msra.mxu0 %v14659_v54  ;;  %v14741_v54 = vld [vmem:[%s19934_s7 + $0x3c8] ss:$16 sps:$4 sm:$0xff]  }
 0x314   : > { %5110 = vmatpush1.bf16.msra.mxu1 %v14662_v55  ;;  %5070 = vmatprep.subr.bf16.mxu0 %v14667_v56  ;;  %v14746_v55 = vld [vmem:[%s19934_s7 + $0x4e4] ss:$16 sps:$4 sm:$0xff]   ;;  %v14749_v56 = vld [vmem:[%s19934_s7 + $0x4ec] ss:$16 sps:$4 sm:$0xff]  }
 0x315   : > { %5111 = vmatprep.subr.bf16.mxu1 %v14670_v57  ;;  %v14744_v57 = vld [vmem:[%s19934_s7 + $0x4e0] ss:$16 sps:$4 sm:$0xff]  }
 0x317   : > { %5071 = vmatpush1.bf16.msra.mxu0 %v14665_v58  ;;  %v14747_v58 = vld [vmem:[%s19934_s7 + $0x4e8] ss:$16 sps:$4 sm:$0xff]  }
 0x318   : > { %5112 = vmatpush1.bf16.msra.mxu1 %v14668_v59  ;;  %5072 = vmatprep.subr.bf16.mxu0 %v14673_v60  ;;  %v14752_v59 = vld [vmem:[%s19934_s7 + $0x4c4] ss:$16 sps:$4 sm:$0xff]   ;;  %v14755_v60 = vld [vmem:[%s19934_s7 + $0x4cc] ss:$16 sps:$4 sm:$0xff]  }
 0x319   : > { %5113 = vmatprep.subr.bf16.mxu1 %v14676_v61  ;;  %v14750_v61 = vld [vmem:[%s19934_s7 + $0x4c0] ss:$16 sps:$4 sm:$0xff]  }
 0x31b   : > { %5073 = vmatpush1.bf16.msra.mxu0 %v14671_v62  ;;  %v17806_v62 = vld [vmem:[#allocation3] sm:$0x44] }
 0x31c   : > { %5114 = vmatpush1.bf16.msra.mxu1 %v14674_v63  ;;  %5074 = vmatprep.subr.bf16.mxu0 %v14679_v2  ;;  %v14753_v63 = vld [vmem:[%s19934_s7 + $0x4c8] ss:$16 sps:$4 sm:$0xff]   ;;  %v5188_v2 = vshrl.u32 %v17683_v17, 16  ;;  %v14763_v17 = vld [vmem:[%s19934_s7 + $0x5c0] ss:$16 sps:$4 sm:$0xff]  }
 0x31d   : > { %5115 = vmatprep.subr.bf16.mxu1 %v14682_v4  ;;  %v14758_v4 = vld [vmem:[%s19934_s7 + $0x5e4] ss:$16 sps:$4 sm:$0xff]  }
 0x31f   : > { %5075 = vmatpush1.bf16.msra.mxu0 %v14677_v5  ;;  %v14761_v5 = vld [vmem:[%s19934_s7 + $0x5ec] ss:$16 sps:$4 sm:$0xff]  }
 0x320   : > { %5116 = vmatpush1.bf16.msra.mxu1 %v14680_v6  ;;  %5088 = vmatprep.subr.bf16.mxu0 %v14685_v7  ;;  %v17818_v6 = vpop.f32.mrf.mxu0  ;;  %v17822_v7 = vcombine.high %v17806_v62, %v17806_v62 }
 0x321   : > { %5129 = vmatprep.subr.bf16.mxu1 %v14688_v8  ;;  %v14756_v8 = vld [vmem:[%s19934_s7 + $0x5e0] ss:$16 sps:$4 sm:$0xff]  }
 0x323   : > { %5089 = vmatpush2.bf16.msra.mxu0 %v14683_v10  ;;  %v5190_v10 = vrot.slane %v5188_v2, 1 }
 0x324   : > { %5130 = vmatpush2.bf16.msra.mxu1 %v14686_v52  ;;  %5090 = vmatprep.subr.bf16.mxu0 %v14691_v11  ;;  %v14759_v52 = vld [vmem:[%s19934_s7 + $0x5e8] ss:$16 sps:$4 sm:$0xff]   ;;  %v14765_v11 = vld [vmem:[%s19934_s7 + $0x5c4] ss:$16 sps:$4 sm:$0xff]  }
 0x325   : > { %5131 = vmatprep.subr.bf16.mxu1 %v14694_v12  ;;  %v17833_v12 = vpop.f32.mrf.mxu0 }
 0x327   : > { %5091 = vmatpush2.bf16.msra.mxu0 %v14689_v13  ;;  %v5533_v13 = vrot.slane %v17822_v7, 2 }
 0x328   : > { %5132 = vmatpush2.bf16.msra.mxu1 %v14692_v16  ;;  %5399 = vmatprep.subr.bf16.mxu0 %v14698_v18  ;;  %v14768_v16 = vld [vmem:[%s19934_s7 + $0x5cc] ss:$16 sps:$4 sm:$0xff]   ;;  %v17842_v18 = vpop.f32.mrf.mxu1 }
 0x329   : > { %5440 = vmatprep.subr.bf16.mxu1 %v14701_v19  ;;  %v14766_v19 = vld [vmem:[%s19934_s7 + $0x5c8] ss:$16 sps:$4 sm:$0xff]  }
 0x32a   : > { %5093 = vmatmul.mubr.bf16.vlgmr.msra.gmra.mxu0 %v4854_v9 }
 0x32b   : > { %5134 = vmatmul.mubr.bf16.vlgmr.msra.gmra.mxu1 %v4854_v9  ;;  %5400 = vmatpush1.bf16.msra.mxu0 %v14696_v45  ;;  %v14774_v45 = vld [vmem:[%s19934_s7 + $0x5ac] ss:$16 sps:$4 sm:$0xff]   ;;  %v17855_v9 = vpop.f32.mrf.mxu0 }
 0x32c   : > { %12480 = vmatprep.mubr.msk.bf16.mxu0 %vm4436_vm8, %v5194_v0  ;;  %5441 = vmatpush1.bf16.msra.mxu1 %v14699_v22  ;;  %v14769_v22 = vld [vmem:[%s19934_s7 + $0x5a0] ss:$16 sps:$4 sm:$0xff]  }
 0x32d   : > { %12481 = vmatprep.mubr.msk.bf16.mxu1 %vm4436_vm8, %v5194_v0  ;;  %5401 = vmatprep.subr.bf16.mxu0 %v14704_v25  ;;  %v3228_v25 = vpop.f32.mrf.mxu1  ;;  %v14772_v0 = vld [vmem:[%s19934_s7 + $0x5a8] ss:$16 sps:$4 sm:$0xff]  }
 0x32e   : > { %5442 = vmatprep.subr.bf16.mxu1 %v14707_v26  ;;  %v14777_v26 = vld [vmem:[%s19934_s7 + $0x584] ss:$16 sps:$4 sm:$0xff]  }
 0x32f   : > { %5402 = vmatpush1.bf16.msra.mxu0 %v14702_v27  ;;  %v14780_v27 = vld [vmem:[%s19934_s7 + $0x58c] ss:$16 sps:$4 sm:$0xff]  }
 0x330   : > { %5443 = vmatpush1.bf16.msra.mxu1 %v14705_v29  ;;  %5403 = vmatprep.subr.bf16.mxu0 %v14710_v30  ;;  %v17869_v29 = vpop.f32.mrf.mxu0  ;;  %v14775_v30 = vld [vmem:[%s19934_s7 + $0x580] ss:$16 sps:$4 sm:$0xff]  }
 0x331   : > { %5444 = vmatprep.subr.bf16.mxu1 %v14713_v31  ;;  %v3230_v31 = vpop.f32.mrf.mxu1 }
 0x333   : > { %5404 = vmatpush1.bf16.msra.mxu0 %v14708_v32  ;;  %v3597_v32 = vpop.f32.mrf.mxu0 }
 0x334   : > { %5445 = vmatpush1.bf16.msra.mxu1 %v14711_v15  ;;  %5405 = vmatprep.subr.bf16.mxu0 %v14716_v34  ;;  %v14778_v15 = vld [vmem:[%s19934_s7 + $0x588] ss:$16 sps:$4 sm:$0xff]   ;;  %v14783_v34 = vld [vmem:[%s19934_s7 + $0x564] ss:$16 sps:$4 sm:$0xff]  }
 0x335   : > { %5446 = vmatprep.subr.bf16.mxu1 %v14719_v35  ;;  %v14786_v35 = vld [vmem:[%s19934_s7 + $0x56c] ss:$16 sps:$4 sm:$0xff]  }
 0x337   : > { %5406 = vmatpush1.bf16.msra.mxu0 %v14714_v36  ;;  %v14781_v36 = vld [vmem:[%s19934_s7 + $0x560] ss:$16 sps:$4 sm:$0xff]  }
 0x338   : > { %5447 = vmatpush1.bf16.msra.mxu1 %v14717_v37  ;;  %5407 = vmatprep.subr.bf16.mxu0 %v14722_v23  ;;  %v3232_v37 = vpop.f32.mrf.mxu1  ;;  %v3599_v23 = vpop.f32.mrf.mxu0 }
 0x339   : > { %5448 = vmatprep.subr.bf16.mxu1 %v14725_v38  ;;  %v14784_v38 = vld [vmem:[%s19934_s7 + $0x568] ss:$16 sps:$4 sm:$0xff]  }
 0x33b   : > { %5408 = vmatpush1.bf16.msra.mxu0 %v14720_v39  ;;  %v14789_v39 = vld [vmem:[%s19934_s7 + $0x544] ss:$16 sps:$4 sm:$0xff]  }
 0x33c   : > { %5449 = vmatpush1.bf16.msra.mxu1 %v14723_v40  ;;  %5409 = vmatprep.subr.bf16.mxu0 %v14728_v14  ;;  %v14792_v40 = vld [vmem:[%s19934_s7 + $0x54c] ss:$16 sps:$4 sm:$0xff]   ;;  %v3640_v14 = vpop.f32.mrf.mxu1 }
 0x33d   : > { %5450 = vmatprep.subr.bf16.mxu1 %v14731_v42  ;;  %v14787_v42 = vld [vmem:[%s19934_s7 + $0x540] ss:$16 sps:$4 sm:$0xff]  }
 0x33f   : > { %5410 = vmatpush1.bf16.msra.mxu0 %v14726_v41  ;;  %v3601_v41 = vpop.f32.mrf.mxu0 }
 0x340   : > { %5451 = vmatpush1.bf16.msra.mxu1 %v14729_v43  ;;  %5411 = vmatprep.subr.bf16.mxu0 %v14734_v44  ;;  %v14790_v43 = vld [vmem:[%s19934_s7 + $0x548] ss:$16 sps:$4 sm:$0xff]   ;;  %v14795_v44 = vld [vmem:[%s19934_s7 + $0x524] ss:$16 sps:$4 sm:$0xff]  }
 0x341   : > { %5452 = vmatprep.subr.bf16.mxu1 %v14737_v46  ;;  %v14798_v46 = vld [vmem:[%s19934_s7 + $0x52c] ss:$16 sps:$4 sm:$0xff]  }
 0x343   : > { %5412 = vmatpush1.bf16.msra.mxu0 %v14732_v47  ;;  %v3642_v47 = vpop.f32.mrf.mxu1 }
 0x344   : > { %5453 = vmatpush1.bf16.msra.mxu1 %v14735_v48  ;;  %5413 = vmatprep.subr.bf16.mxu0 %v14740_v49  ;;  %v14793_v48 = vld [vmem:[%s19934_s7 + $0x520] ss:$16 sps:$4 sm:$0xff]   ;;  %v3603_v49 = vpop.f32.mrf.mxu0 }
 0x345   : > { %5454 = vmatprep.subr.bf16.mxu1 %v14743_v50  ;;  %v14796_v50 = vld [vmem:[%s19934_s7 + $0x528] ss:$16 sps:$4 sm:$0xff]  }
 0x347   : > { %5414 = vmatpush1.bf16.msra.mxu0 %v14738_v53  ;;  %v14801_v53 = vld [vmem:[%s19934_s7 + $0x504] ss:$16 sps:$4 sm:$0xff]  }
 0x348   : > { %5455 = vmatpush1.bf16.msra.mxu1 %v14741_v54  ;;  %5427 = vmatprep.subr.bf16.mxu0 %v14746_v55  ;;  %v14804_v54 = vld [vmem:[%s19934_s7 + $0x50c] ss:$16 sps:$4 sm:$0xff]   ;;  %v3644_v55 = vpop.f32.mrf.mxu1 }
 0x349   : > { %5468 = vmatprep.subr.bf16.mxu1 %v14749_v56  ;;  %v4093_v56 = vpop.f32.mrf.mxu0 }
 0x34a   : > { %v3646_v2 = vpop.f32.mrf.mxu1 }
 0x34b   : > { %5428 = vmatpush2.bf16.msra.mxu0 %v14744_v57  ;;  %v14799_v57 = vld [vmem:[%s19934_s7 + $0x500] ss:$16 sps:$4 sm:$0xff]  }
 0x34c   : > { %5469 = vmatpush2.bf16.msra.mxu1 %v14747_v58  ;;  %5429 = vmatprep.subr.bf16.mxu0 %v14752_v59  ;;  %v14802_v58 = vld [vmem:[%s19934_s7 + $0x508] ss:$16 sps:$4 sm:$0xff]   ;;  %v14807_v59 = vld [vmem:[%s19934_s7 + $0x624] ss:$16 sps:$4 sm:$0xff]  }
 0x34d   : > { %5470 = vmatprep.subr.bf16.mxu1 %v14755_v60  ;;  %v3270_v60 = vadd.f32 %v17818_v6, %v17842_v18 }
 0x34f   : > { %5430 = vmatpush2.bf16.msra.mxu0 %v14750_v61  ;;  %v4106_v61 = vld [vmem:[%s19933_s6] sm:$0x3] }
 0x350   : > { %5471 = vmatpush2.bf16.msra.mxu1 %v14753_v63  ;;  %5738 = vmatprep.subr.bf16.mxu0 %v14758_v4  ;;  %v14810_v63 = vld [vmem:[%s19934_s7 + $0x62c] ss:$16 sps:$4 sm:$0xff]   ;;  %v4095_v4 = vpop.f32.mrf.mxu0 }
 0x351   : > { %5779 = vmatprep.subr.bf16.mxu1 %v14761_v5  ;;  %v3272_v5 = vadd.f32 %v17833_v12, %v3228_v25  ;;  %v3274_v12 = vadd.f32 %v17855_v9, %v3230_v31  ;;  %v4115_v25 = vrot.slane %v4106_v61, %v16361_v24  ;;  %v14811_v9 = vld [vmem:[%s19934_s7 + $0x600] ss:$16 sps:$4 sm:$0xff]  }
 0x352   : > { %5432 = vmatmul.mubr.bf16.vlgmr.msra.gmra.mxu0 %v5190_v10 }
 0x353   : > { %5473 = vmatmul.mubr.bf16.vlgmr.msra.gmra.mxu1 %v5190_v10  ;;  %5739 = vmatpush1.bf16.msra.mxu0 %v14756_v8  ;;  %v3598_v8 = vadd.f32 %v3597_v32, %v3270_v60  ;;  %v14805_v10 = vld [vmem:[%s19934_s7 + $0x620] ss:$16 sps:$4 sm:$0xff]   ;;  %v14831_v60 = vld [vmem:[%s19934_s7 + $0x6e4] ss:$16 sps:$4 sm:$0xff]  }
 0x354   : > { %12564 = vmatprep.mubr.msk.bf16.mxu0 %vm4436_vm8, %v5533_v13  ;;  %5780 = vmatpush1.bf16.msra.mxu1 %v14759_v52  ;;  %v4111_v52 = vrot.slane %v4106_v61, %v16356_v21 }
 0x355   : > { %12565 = vmatprep.mubr.msk.bf16.mxu1 %vm4436_vm8, %v5533_v13  ;;  %5740 = vmatprep.subr.bf16.mxu0 %v14765_v11  ;;  %v14808_v11 = vld [vmem:[%s19934_s7 + $0x628] ss:$16 sps:$4 sm:$0xff]   ;;  %v14813_v13 = vld [vmem:[%s19934_s7 + $0x604] ss:$16 sps:$4 sm:$0xff]  }
 0x356   : > { %5781 = vmatprep.subr.bf16.mxu1 %v14768_v16  ;;  %v3600_v16 = vadd.f32 %v3599_v23, %v3272_v5 }
 0x357   : > { %5741 = vmatpush1.bf16.msra.mxu0 %v14763_v17  ;;  %v3641_v17 = vadd.f32 %v3640_v14, %v3598_v8  ;;  %v5870_v14 = vshrl.u32 %v17822_v7, 16  ;;  %v14829_v8 = vld [vmem:[%s19934_s7 + $0x6e0] ss:$16 sps:$4 sm:$0xff]  }
 0x358   : > { %5782 = vmatpush1.bf16.msra.mxu1 %v14766_v19  ;;  %5742 = vmatprep.subr.bf16.mxu0 %v14771_v20  ;;  %v14816_v19 = vld [vmem:[%s19934_s7 + $0x60c] ss:$16 sps:$4 sm:$0xff]   ;;  %v3276_v20 = vadd.f32 %v17869_v29, %v3232_v37  ;;  %v14814_v29 = vld [vmem:[%s19934_s7 + $0x608] ss:$16 sps:$4 sm:$0xff]  }
 0x359   : > { %5783 = vmatprep.subr.bf16.mxu1 %v14774_v45  ;;  %v4097_v45 = vpop.f32.mrf.mxu0 }
 0x35a   : > { %v3604_v31 = vadd.f32 %v3603_v49, %v3276_v20  ;;  %v14850_v20 = vld [vmem:[%s19934_s7 + $0x688] ss:$16 sps:$4 sm:$0xff]  }
 0x35b   : > { %5743 = vmatpush1.bf16.msra.mxu0 %v14769_v22 }
 0x35c   : > { %5784 = vmatpush1.bf16.msra.mxu1 %v14772_v0  ;;  %5744 = vmatprep.subr.bf16.mxu0 %v14777_v26  ;;  %v3602_v0 = vadd.f32 %v3601_v41, %v3274_v12  ;;  %v3643_v26 = vadd.f32 %v3642_v47, %v3600_v16  ;;  %v14820_v47 = vld [vmem:[%s19934_s7 + $0x728] ss:$16 sps:$4 sm:$0xff]   ;;  %v14841_v12 = vld [vmem:[%s19934_s7 + $0x6a0] ss:$16 sps:$4 sm:$0xff]  }
 0x35d   : > { %5785 = vmatprep.subr.bf16.mxu1 %v14780_v27  ;;  %v14844_v16 = vld [vmem:[%s19934_s7 + $0x6a8] ss:$16 sps:$4 sm:$0xff]  }
 0x35f   : > { %5745 = vmatpush1.bf16.msra.mxu0 %v14775_v30 }
 0x360   : > { %5786 = vmatpush1.bf16.msra.mxu1 %v14778_v15  ;;  %5746 = vmatprep.subr.bf16.mxu0 %v14783_v34  ;;  %v17961_v15 = vcombine.low %v17806_v62, %v17806_v62  ;;  %v14819_v34 = vld [vmem:[%s19934_s7 + $0x724] ss:$16 sps:$4 sm:$0xff]  }
 0x361   : > { %5787 = vmatprep.subr.bf16.mxu1 %v14786_v35  ;;  %v3645_v35 = vadd.f32 %v3644_v55, %v3602_v0  ;;  %v14828_v55 = vld [vmem:[%s19934_s7 + $0x70c] ss:$16 sps:$4 sm:$0xff]   ;;  %v14856_v0 = vld [vmem:[%s19934_s7 + $0x668] ss:$16 sps:$4 sm:$0xff]  }
 0x363   : > { %5747 = vmatpush1.bf16.msra.mxu0 %v14781_v36 }
 0x364   : > { %5788 = vmatpush1.bf16.msra.mxu1 %v14784_v38  ;;  %5748 = vmatprep.subr.bf16.mxu0 %v14789_v39  ;;  %v14822_v38 = vld [vmem:[%s19934_s7 + $0x72c] ss:$16 sps:$4 sm:$0xff]   ;;  %v4099_v39 = vpop.f32.mrf.mxu0 }
 0x365   : > { %5789 = vmatprep.subr.bf16.mxu1 %v14792_v40 }
 0x367   : > { %5749 = vmatpush1.bf16.msra.mxu0 %v14787_v42  ;;  %v3647_v42 = vadd.f32 %v3646_v2, %v3604_v31  ;;  %v14834_v2 = vld [vmem:[%s19934_s7 + $0x6ec] ss:$16 sps:$4 sm:$0xff]   ;;  %v14867_v31 = vld [vmem:[%s19934_s7 + $0x764] ss:$16 sps:$4 sm:$0xff]  }
 0x368   : > { %5790 = vmatpush1.bf16.msra.mxu1 %v14790_v43  ;;  %5750 = vmatprep.subr.bf16.mxu0 %v14795_v44  ;;  %v14817_v44 = vld [vmem:[%s19934_s7 + $0x720] ss:$16 sps:$4 sm:$0xff]  }
 0x369   : > { %5791 = vmatprep.subr.bf16.mxu1 %v14798_v46  ;;  %v5532_v46 = vrot.slane %v17961_v15, 2 }
 0x36b   : > { %5751 = vmatpush1.bf16.msra.mxu0 %v14793_v48 }
 0x36c   : > { %5792 = vmatpush1.bf16.msra.mxu1 %v14796_v50  ;;  %5752 = vmatprep.subr.bf16.mxu0 %v14801_v53  ;;  %v14825_v53 = vld [vmem:[%s19934_s7 + $0x704] ss:$16 sps:$4 sm:$0xff]  }
 0x36d   : > { %5793 = vmatprep.subr.bf16.mxu1 %v14804_v54  ;;  %v5872_v54 = vrot.slane %v5870_v14, 2 }
 0x36f   : > { %5753 = vmatpush1.bf16.msra.mxu0 %v14799_v57 }
 0x370   : > { %5794 = vmatpush1.bf16.msra.mxu1 %v14802_v58  ;;  %v4050_v6 = vpop.f32.mrf.mxu1  ;;  %5766 = vmatprep.subr.bf16.mxu0 %v14807_v59  ;;  %v14823_v58 = vld [vmem:[%s19934_s7 + $0x700] ss:$16 sps:$4 sm:$0xff]   ;;  %v14826_v59 = vld [vmem:[%s19934_s7 + $0x708] ss:$16 sps:$4 sm:$0xff]  }
 0x371   : > { %v4094_v18 = vadd.f32 %v4093_v56, %v4050_v6  ;;  %5807 = vmatprep.subr.bf16.mxu1 %v14810_v63 }
 0x372   : > { %v4052_v22 = vpop.f32.mrf.mxu1 }
 0x373   : > { %v4102_v27 = vadd.f32 %v4094_v18, %v3641_v17  ;;  %v4096_v30 = vadd.f32 %v4095_v4, %v4052_v22  ;;  %5767 = vmatpush2.bf16.msra.mxu0 %v14805_v10  ;;  %v4139_v4 = vld [vmem:[#allocation4 + $0x8] sm:$0x11]  ;;  %v14837_v10 = vld [vmem:[%s19934_s7 + $0x6c4] ss:$16 sps:$4 sm:$0xff]  }
 0x374   : > { %5808 = vmatpush2.bf16.msra.mxu1 %v14808_v11  ;;  %v4054_v32 = vpop.f32.mrf.mxu1  ;;  %5768 = vmatprep.subr.bf16.mxu0 %v14813_v13  ;;  %v14835_v11 = vld [vmem:[%s19934_s7 + $0x6c0] ss:$16 sps:$4 sm:$0xff]   ;;  %v14846_v13 = vld [vmem:[%s19934_s7 + $0x6ac] ss:$16 sps:$4 sm:$0xff]   ;;  %v14849_v17 = vld [vmem:[%s19934_s7 + $0x684] ss:$16 sps:$4 sm:$0xff]  }
 0x375   : > { %v4118_v36 = vadd.f32 %v4111_v52, %v4102_v27  ;;  %v4103_v37 = vadd.f32 %v4096_v30, %v3643_v26  ;;  %v4098_v23 = vadd.f32 %v4097_v45, %v4054_v32  ;;  %5809 = vmatprep.subr.bf16.mxu1 %v14816_v19  ;;  %v14852_v18 = vld [vmem:[%s19934_s7 + $0x68c] ss:$16 sps:$4 sm:$0xff]   ;;  %v14847_v19 = vld [vmem:[%s19934_s7 + $0x680] ss:$16 sps:$4 sm:$0xff]   ;;  %v14855_v45 = vld [vmem:[%s19934_s7 + $0x664] ss:$16 sps:$4 sm:$0xff]  }
 0x376   : > { %v4056_v40 = vpop.f32.mrf.mxu1  ;;  %v14858_v22 = vld [vmem:[%s19934_s7 + $0x66c] ss:$16 sps:$4 sm:$0xff]   ;;  %v14861_v26 = vld [vmem:[%s19934_s7 + $0x644] ss:$16 sps:$4 sm:$0xff]   ;;  %v14859_v30 = vld [vmem:[%s19934_s7 + $0x640] ss:$16 sps:$4 sm:$0xff]  }
 0x377   : > { %v4119_v62 = vadd.f32 %v4115_v25, %v4103_v37  ;;  %v4104_v41 = vadd.f32 %v4098_v23, %v3645_v35  ;;  %v4100_v43 = vadd.f32 %v4099_v39, %v4056_v40  ;;  %5769 = vmatpush2.bf16.msra.mxu0 %v14811_v9  ;;  %v4122_v48 = vmax.f32 %v4118_v36, 0.0  ;;  %v14864_v27 = vld [vmem:[%s19934_s7 + $0x64c] ss:$16 sps:$4 sm:$0xff]   ;;  %v14862_v9 = vld [vmem:[%s19934_s7 + $0x648] ss:$16 sps:$4 sm:$0xff]  }
 0x378   : > { %5810 = vmatpush2.bf16.msra.mxu1 %v14814_v29  ;;  %6077 = vmatprep.subr.bf16.mxu0 %v14819_v34  ;;  %v14870_v32 = vld [vmem:[%s19934_s7 + $0x76c] ss:$16 sps:$4 sm:$0xff]   ;;  %v14865_v29 = vld [vmem:[%s19934_s7 + $0x760] ss:$16 sps:$4 sm:$0xff]   ;;  %v14868_v34 = vld [vmem:[%s19934_s7 + $0x768] ss:$16 sps:$4 sm:$0xff]  }
 0x379   : > { %v4123_v49 = vmax.f32 %v4119_v62, 0.0  ;;  %v4120_v7 = vadd.f32 %v4111_v52, %v4104_v41  ;;  %v4105_v50 = vadd.f32 %v4100_v43, %v3647_v42  ;;  %6118 = vmatprep.subr.bf16.mxu1 %v14822_v38  ;;  %v14840_v52 = vld [vmem:[%s19934_s7 + $0x6cc] ss:$16 sps:$4 sm:$0xff]   ;;  %v14873_v35 = vld [vmem:[%s19934_s7 + $0x744] ss:$16 sps:$4 sm:$0xff]   ;;  %v5866_v62 = vshrl.u32 %v17961_v15, 16 }
 0x37a   : > { %5771 = vmatmul.mubr.bf16.vlgmr.msra.gmra.mxu0 %v5532_v46  ;;  %v14876_v36 = vld [vmem:[%s19934_s7 + $0x74c] ss:$16 sps:$4 sm:$0xff]   ;;  %v14871_v38 = vld [vmem:[%s19934_s7 + $0x740] ss:$16 sps:$4 sm:$0xff]   ;;  %v14874_v42 = vld [vmem:[%s19934_s7 + $0x748] ss:$16 sps:$4 sm:$0xff]  }
 0x37b   : > { %v13759_v56 = vpack.c.bf16 %v4123_v49, %v4122_v48  ;;  %v4121_v57 = vadd.f32 %v4115_v25, %v4105_v50  ;;  %5812 = vmatmul.mubr.bf16.vlgmr.msra.gmra.mxu1 %v5532_v46  ;;  %6078 = vmatpush1.bf16.msra.mxu0 %v14817_v44  ;;  %v4124_v61 = vmax.f32 %v4120_v7, 0.0  ;;  %v14853_v25 = vld [vmem:[%s19934_s7 + $0x660] ss:$16 sps:$4 sm:$0xff]   ;;  %v14879_v41 = vld [vmem:[%s19934_s7 + $0x864] ss:$16 sps:$4 sm:$0xff]   ;;  %v5868_v7 = vrot.slane %v5866_v62, 2 }
 0x37c   : > { %12646 = vmatprep.mubr.msk.bf16.mxu0 %vm4436_vm8, %v5872_v54  ;;  %6119 = vmatpush1.bf16.msra.mxu1 %v14820_v47  ;;  %v18095_v39 = vld [vmem:[#allocation3] sm:$0x88]  ;;  %v14882_v43 = vld [vmem:[%s19934_s7 + $0x86c] ss:$16 sps:$4 sm:$0xff]   ;;  %v14880_v50 = vld [vmem:[%s19934_s7 + $0x868] ss:$16 sps:$4 sm:$0xff]  }
 0x37d   : > { %4138 = vst.msk [vmem:[#allocation4] sm:$0xff] %vm17384_vm4, %v13759_v56  ;;  %v4125_v63 = vmax.f32 %v4121_v57, 0.0  ;;  %12647 = vmatprep.mubr.msk.bf16.mxu1 %vm4436_vm8, %v5872_v54  ;;  %6079 = vmatprep.subr.bf16.mxu0 %v14825_v53  ;;  %v18113_v47 = vcombine.high %v18095_v39, %v18095_v39  ;;  %v14877_v15 = vld [vmem:[%s19934_s7 + $0x860] ss:$16 sps:$4 sm:$0xff]   ;;  %v14886_v53 = vld [vmem:[%s19934_s7 + $0x844] ss:$16 sps:$4 sm:$0xff]  }
 0x37e   : > { %6120 = vmatprep.subr.bf16.mxu1 %v14828_v55  ;;  %v14889_v55 = vld [vmem:[%s19934_s7 + $0x84c] ss:$16 sps:$4 sm:$0xff]   ;;  %v14884_v56 = vld [vmem:[%s19934_s7 + $0x840] ss:$16 sps:$4 sm:$0xff]   ;;  %v14887_v57 = vld [vmem:[%s19934_s7 + $0x848] ss:$16 sps:$4 sm:$0xff]  }
 0x37f   : > { %v13760_v5 = vpack.c.bf16 %v4125_v63, %v4124_v61  ;;  %6080 = vmatpush1.bf16.msra.mxu0 %v14823_v58  ;;  %v6211_v54 = vrot.slane %v18113_v47, 3  ;;  %v14892_v58 = vld [vmem:[%s19934_s7 + $0x824] ss:$16 sps:$4 sm:$0xff]   ;;  %v14893_v61 = vld [vmem:[%s19934_s7 + $0x828] ss:$16 sps:$4 sm:$0xff]  }
 0x380   : > { %6121 = vmatpush1.bf16.msra.mxu1 %v14826_v59  ;;  %6081 = vmatprep.subr.bf16.mxu0 %v14831_v60  ;;  %v14895_v59 = vld [vmem:[%s19934_s7 + $0x82c] ss:$16 sps:$4 sm:$0xff]   ;;  %v14890_v60 = vld [vmem:[%s19934_s7 + $0x820] ss:$16 sps:$4 sm:$0xff]   ;;  %v14898_v63 = vld [vmem:[%s19934_s7 + $0x804] ss:$16 sps:$4 sm:$0xff]  }
 0x381   : > { %v4140_v6 = vsel %vm2741_vm7, %v13760_v5, %v4139_v4  ;;  %6122 = vmatprep.subr.bf16.mxu1 %v14834_v2  ;;  %v14901_v2 = vld [vmem:[%s19934_s7 + $0x80c] ss:$16 sps:$4 sm:$0xff]   ;;  %v14896_v4 = vld [vmem:[%s19934_s7 + $0x800] ss:$16 sps:$4 sm:$0xff]   ;;  %v14899_v5 = vld [vmem:[%s19934_s7 + $0x808] ss:$16 sps:$4 sm:$0xff]  }
 0x382   : > { %4141 = vst [vmem:[#allocation4 + $0x8] sm:$0x11] %v4140_v6  ;;  %v14905_v6 = vld [vmem:[%s19934_s7 + $0x7e8] ss:$16 sps:$4 sm:$0xff]  }
 0x383   : > { %6082 = vmatpush1.bf16.msra.mxu0 %v14829_v8  ;;  %v14904_v8 = vld [vmem:[%s19934_s7 + $0x7e4] ss:$16 sps:$4 sm:$0xff]  }
 0x384   : > { %6123 = vmatpush1.bf16.msra.mxu1 %v14832_v51  ;;  %6083 = vmatprep.subr.bf16.mxu0 %v14837_v10  ;;  %v14907_v51 = vld [vmem:[%s19934_s7 + $0x7ec] ss:$16 sps:$4 sm:$0xff]   ;;  %v14902_v10 = vld [vmem:[%s19934_s7 + $0x7e0] ss:$16 sps:$4 sm:$0xff]  }
 0x385   : > { %6124 = vmatprep.subr.bf16.mxu1 %v14840_v52  ;;  %v14910_v52 = vld [vmem:[%s19934_s7 + $0x7c4] ss:$16 sps:$4 sm:$0xff]  }
 0x387   : > { %6084 = vmatpush1.bf16.msra.mxu0 %v14835_v11  ;;  %v14913_v11 = vld [vmem:[%s19934_s7 + $0x7cc] ss:$16 sps:$4 sm:$0xff]  }
 0x388   : > { %6125 = vmatpush1.bf16.msra.mxu1 %v14838_v33  ;;  %6085 = vmatprep.subr.bf16.mxu0 %v14843_v28  ;;  %v14908_v33 = vld [vmem:[%s19934_s7 + $0x7c0] ss:$16 sps:$4 sm:$0xff]   ;;  %v14911_v28 = vld [vmem:[%s19934_s7 + $0x7c8] ss:$16 sps:$4 sm:$0xff]  }
 0x389   : > { %6126 = vmatprep.subr.bf16.mxu1 %v14846_v13  ;;  %v14916_v13 = vld [vmem:[%s19934_s7 + $0x7a4] ss:$16 sps:$4 sm:$0xff]  }
 0x38b   : > { %6086 = vmatpush1.bf16.msra.mxu0 %v14841_v12  ;;  %v14919_v12 = vld [vmem:[%s19934_s7 + $0x7ac] ss:$16 sps:$4 sm:$0xff]  }
 0x38c   : > { %6127 = vmatpush1.bf16.msra.mxu1 %v14844_v16  ;;  %6087 = vmatprep.subr.bf16.mxu0 %v14849_v17  ;;  %v14914_v16 = vld [vmem:[%s19934_s7 + $0x7a0] ss:$16 sps:$4 sm:$0xff]   ;;  %v14917_v17 = vld [vmem:[%s19934_s7 + $0x7a8] ss:$16 sps:$4 sm:$0xff]  }
 0x38d   : > { %6128 = vmatprep.subr.bf16.mxu1 %v14852_v18  ;;  %v14922_v18 = vld [vmem:[%s19934_s7 + $0x784] ss:$16 sps:$4 sm:$0xff]  }
 0x38f   : > { %6088 = vmatpush1.bf16.msra.mxu0 %v14847_v19  ;;  %v14925_v19 = vld [vmem:[%s19934_s7 + $0x78c] ss:$16 sps:$4 sm:$0xff]  }
 0x390   : > { %6129 = vmatpush1.bf16.msra.mxu1 %v14850_v20  ;;  %6089 = vmatprep.subr.bf16.mxu0 %v14855_v45  ;;  %v14920_v20 = vld [vmem:[%s19934_s7 + $0x780] ss:$16 sps:$4 sm:$0xff]   ;;  %v14923_v45 = vld [vmem:[%s19934_s7 + $0x788] ss:$16 sps:$4 sm:$0xff]  }
 0x391   : > { %6130 = vmatprep.subr.bf16.mxu1 %v14858_v22  ;;  %v14928_v22 = vld [vmem:[%s19934_s7 + $0x8a4] ss:$16 sps:$4 sm:$0xff]  }
 0x393   : > { %6090 = vmatpush1.bf16.msra.mxu0 %v14853_v25  ;;  %v14931_v25 = vld [vmem:[%s19934_s7 + $0x8ac] ss:$16 sps:$4 sm:$0xff]  }
 0x394   : > { %6131 = vmatpush1.bf16.msra.mxu1 %v14856_v0  ;;  %6091 = vmatprep.subr.bf16.mxu0 %v14861_v26  ;;  %v14926_v0 = vld [vmem:[%s19934_s7 + $0x8a0] ss:$16 sps:$4 sm:$0xff]   ;;  %v14929_v26 = vld [vmem:[%s19934_s7 + $0x8a8] ss:$16 sps:$4 sm:$0xff]  }
 0x395   : > { %6132 = vmatprep.subr.bf16.mxu1 %v14864_v27  ;;  %v14934_v27 = vld [vmem:[%s19934_s7 + $0x884] ss:$16 sps:$4 sm:$0xff]  }
 0x397   : > { %6092 = vmatpush1.bf16.msra.mxu0 %v14859_v30  ;;  %v14937_v30 = vld [vmem:[%s19934_s7 + $0x88c] ss:$16 sps:$4 sm:$0xff]  }
 0x398   : > { %6133 = vmatpush1.bf16.msra.mxu1 %v14862_v9  ;;  %6105 = vmatprep.subr.bf16.mxu0 %v14867_v31 }
 0x399   : > { %6146 = vmatprep.subr.bf16.mxu1 %v14870_v32 }
 0x39a   : > { %v18088_v37 = vpop.f32.mrf.mxu0  ;;  %v18090_v23 = vpop.f32.mrf.mxu1 }
 0x39b   : > { %6106 = vmatpush2.bf16.msra.mxu0 %v14865_v29 }
 0x39c   : > { %6147 = vmatpush2.bf16.msra.mxu1 %v14868_v34  ;;  %v18097_v40 = vpop.f32.mrf.mxu0  ;;  %v18099_v14 = vpop.f32.mrf.mxu1  ;;  %6107 = vmatprep.subr.bf16.mxu0 %v14873_v35  ;;  %v14932_v34 = vld [vmem:[%s19934_s7 + $0x880] ss:$16 sps:$4 sm:$0xff]  }
 0x39d   : > { %6148 = vmatprep.subr.bf16.mxu1 %v14876_v36 }
 0x39e   : > { %v4478_v44 = vpop.f32.mrf.mxu0  ;;  %v4519_v46 = vpop.f32.mrf.mxu1 }
 0x39f   : > { %6108 = vmatpush2.bf16.msra.mxu0 %v14871_v38  ;;  %v14935_v38 = vld [vmem:[%s19934_s7 + $0x888] ss:$16 sps:$4 sm:$0xff]   ;;  %v14939_v46 = vld [vmem:[%s19934_s7 + $0x9a0] ss:$16 sps:$4 sm:$0xff]  }
 0x3a0   : > { %6149 = vmatpush2.bf16.msra.mxu1 %v14874_v42  ;;  %v4479_v48 = vpop.f32.mrf.mxu0  ;;  %v4520_v49 = vpop.f32.mrf.mxu1  ;;  %6416 = vmatprep.subr.bf16.mxu0 %v14879_v41  ;;  %v14944_v41 = vld [vmem:[%s19934_s7 + $0x9ac] ss:$16 sps:$4 sm:$0xff]  }
 0x3a1   : > { %6457 = vmatprep.subr.bf16.mxu1 %v14882_v43  ;;  %v14942_v48 = vld [vmem:[%s19934_s7 + $0x9a8] ss:$16 sps:$4 sm:$0xff]  }
 0x3a2   : > { %6110 = vmatmul.mubr.bf16.vlgmr.msra.gmra.mxu0 %v5868_v7 }
 0x3a3   : > { %6151 = vmatmul.mubr.bf16.vlgmr.msra.gmra.mxu1 %v5868_v7  ;;  %6417 = vmatpush1.bf16.msra.mxu0 %v14877_v15  ;;  %v14950_v7 = vld [vmem:[%s19934_s7 + $0x98c] ss:$16 sps:$4 sm:$0xff]  }
 0x3a4   : > { %12730 = vmatprep.mubr.msk.bf16.mxu0 %vm4436_vm8, %v6211_v54  ;;  %6458 = vmatpush1.bf16.msra.mxu1 %v14880_v50  ;;  %v14945_v50 = vld [vmem:[%s19934_s7 + $0x980] ss:$16 sps:$4 sm:$0xff]  }
 0x3a5   : > { %12731 = vmatprep.mubr.msk.bf16.mxu1 %vm4436_vm8, %v6211_v54  ;;  %6418 = vmatprep.subr.bf16.mxu0 %v14886_v53  ;;  %v14948_v53 = vld [vmem:[%s19934_s7 + $0x988] ss:$16 sps:$4 sm:$0xff]   ;;  %v14953_v54 = vld [vmem:[%s19934_s7 + $0x964] ss:$16 sps:$4 sm:$0xff]  }
 0x3a6   : > { %6459 = vmatprep.subr.bf16.mxu1 %v14889_v55  ;;  %v14956_v55 = vld [vmem:[%s19934_s7 + $0x96c] ss:$16 sps:$4 sm:$0xff]  }
 0x3a7   : > { %6419 = vmatpush1.bf16.msra.mxu0 %v14884_v56  ;;  %v14951_v56 = vld [vmem:[%s19934_s7 + $0x960] ss:$16 sps:$4 sm:$0xff]  }
 0x3a8   : > { %6460 = vmatpush1.bf16.msra.mxu1 %v14887_v57  ;;  %6420 = vmatprep.subr.bf16.mxu0 %v14892_v58  ;;  %v14954_v57 = vld [vmem:[%s19934_s7 + $0x968] ss:$16 sps:$4 sm:$0xff]   ;;  %v14959_v58 = vld [vmem:[%s19934_s7 + $0x944] ss:$16 sps:$4 sm:$0xff]  }
 0x3a9   : > { %6461 = vmatprep.subr.bf16.mxu1 %v14895_v59  ;;  %v14962_v59 = vld [vmem:[%s19934_s7 + $0x94c] ss:$16 sps:$4 sm:$0xff]  }
 0x3ab   : > { %6421 = vmatpush1.bf16.msra.mxu0 %v14890_v60  ;;  %v14957_v60 = vld [vmem:[%s19934_s7 + $0x940] ss:$16 sps:$4 sm:$0xff]  }
 0x3ac   : > { %6462 = vmatpush1.bf16.msra.mxu1 %v14893_v61  ;;  %6422 = vmatprep.subr.bf16.mxu0 %v14898_v63  ;;  %v14960_v61 = vld [vmem:[%s19934_s7 + $0x948] ss:$16 sps:$4 sm:$0xff]   ;;  %v14965_v63 = vld [vmem:[%s19934_s7 + $0x924] ss:$16 sps:$4 sm:$0xff]  }
 0x3ad   : > { %6463 = vmatprep.subr.bf16.mxu1 %v14901_v2  ;;  %v14968_v2 = vld [vmem:[%s19934_s7 + $0x92c] ss:$16 sps:$4 sm:$0xff]  }
 0x3af   : > { %6423 = vmatpush1.bf16.msra.mxu0 %v14896_v4  ;;  %v14963_v4 = vld [vmem:[%s19934_s7 + $0x920] ss:$16 sps:$4 sm:$0xff]  }
 0x3b0   : > { %6464 = vmatpush1.bf16.msra.mxu1 %v14899_v5  ;;  %6424 = vmatprep.subr.bf16.mxu0 %v14904_v8  ;;  %v14966_v5 = vld [vmem:[%s19934_s7 + $0x928] ss:$16 sps:$4 sm:$0xff]   ;;  %v14971_v8 = vld [vmem:[%s19934_s7 + $0x904] ss:$16 sps:$4 sm:$0xff]  }
 0x3b1   : > { %6465 = vmatprep.subr.bf16.mxu1 %v14907_v51  ;;  %v14974_v51 = vld [vmem:[%s19934_s7 + $0x90c] ss:$16 sps:$4 sm:$0xff]  }
 0x3b3   : > { %6425 = vmatpush1.bf16.msra.mxu0 %v14902_v10  ;;  %v14969_v10 = vld [vmem:[%s19934_s7 + $0x900] ss:$16 sps:$4 sm:$0xff]  }
 0x3b4   : > { %6466 = vmatpush1.bf16.msra.mxu1 %v14905_v6  ;;  %6426 = vmatprep.subr.bf16.mxu0 %v14910_v52  ;;  %v14972_v6 = vld [vmem:[%s19934_s7 + $0x908] ss:$16 sps:$4 sm:$0xff]   ;;  %v14977_v52 = vld [vmem:[%s19934_s7 + $0x8e4] ss:$16 sps:$4 sm:$0xff]  }
 0x3b5   : > { %6467 = vmatprep.subr.bf16.mxu1 %v14913_v11  ;;  %v14980_v11 = vld [vmem:[%s19934_s7 + $0x8ec] ss:$16 sps:$4 sm:$0xff]  }
 0x3b7   : > { %6427 = vmatpush1.bf16.msra.mxu0 %v14908_v33  ;;  %v14975_v33 = vld [vmem:[%s19934_s7 + $0x8e0] ss:$16 sps:$4 sm:$0xff]  }
 0x3b8   : > { %6468 = vmatpush1.bf16.msra.mxu1 %v14911_v28  ;;  %6428 = vmatprep.subr.bf16.mxu0 %v14916_v13  ;;  %v14978_v28 = vld [vmem:[%s19934_s7 + $0x8e8] ss:$16 sps:$4 sm:$0xff]   ;;  %v14983_v13 = vld [vmem:[%s19934_s7 + $0x8c4] ss:$16 sps:$4 sm:$0xff]  }
 0x3b9   : > { %6469 = vmatprep.subr.bf16.mxu1 %v14919_v12  ;;  %v14986_v12 = vld [vmem:[%s19934_s7 + $0x8cc] ss:$16 sps:$4 sm:$0xff]  }
 0x3bb   : > { %6429 = vmatpush1.bf16.msra.mxu0 %v14914_v16  ;;  %v14981_v16 = vld [vmem:[%s19934_s7 + $0x8c0] ss:$16 sps:$4 sm:$0xff]  }
 0x3bc   : > { %6470 = vmatpush1.bf16.msra.mxu1 %v14917_v17  ;;  %6430 = vmatprep.subr.bf16.mxu0 %v14922_v18  ;;  %v14984_v17 = vld [vmem:[%s19934_s7 + $0x8c8] ss:$16 sps:$4 sm:$0xff]   ;;  %v14989_v18 = vld [vmem:[%s19934_s7 + $0x9e4] ss:$16 sps:$4 sm:$0xff]  }
 0x3bd   : > { %6471 = vmatprep.subr.bf16.mxu1 %v14925_v19  ;;  %v14992_v19 = vld [vmem:[%s19934_s7 + $0x9ec] ss:$16 sps:$4 sm:$0xff]  }
 0x3bf   : > { %6431 = vmatpush1.bf16.msra.mxu0 %v14920_v20  ;;  %v14987_v20 = vld [vmem:[%s19934_s7 + $0x9e0] ss:$16 sps:$4 sm:$0xff]  }
 0x3c0   : > { %6472 = vmatpush1.bf16.msra.mxu1 %v14923_v45  ;;  %6444 = vmatprep.subr.bf16.mxu0 %v14928_v22  ;;  %v14990_v45 = vld [vmem:[%s19934_s7 + $0x9e8] ss:$16 sps:$4 sm:$0xff]   ;;  %v14995_v22 = vld [vmem:[%s19934_s7 + $0x9c4] ss:$16 sps:$4 sm:$0xff]  }
 0x3c1   : > { %6485 = vmatprep.subr.bf16.mxu1 %v14931_v25  ;;  %v14998_v25 = vld [vmem:[%s19934_s7 + $0x9cc] ss:$16 sps:$4 sm:$0xff]  }
 0x3c2   : > { %v4759_v9 = vpop.f32.mrf.mxu0  ;;  %v4800_v31 = vpop.f32.mrf.mxu1 }
 0x3c3   : > { %v18227_v32 = vadd.f32 %v4759_v9, %v18088_v37  ;;  %v18230_v29 = vadd.f32 %v4800_v31, %v18090_v23  ;;  %6445 = vmatpush2.bf16.msra.mxu0 %v14926_v0  ;;  %v18240_v37 = vcombine.low %v18095_v39, %v18095_v39  ;;  %v14941_v23 = vld [vmem:[%s19934_s7 + $0x9a4] ss:$16 sps:$4 sm:$0xff]   ;;  %v6548_v39 = vshrl.u32 %v18113_v47, 16 }
 0x3c4   : > { %6486 = vmatpush2.bf16.msra.mxu1 %v14929_v26  ;;  %v4761_v35 = vpop.f32.mrf.mxu0  ;;  %v4802_v36 = vpop.f32.mrf.mxu1  ;;  %6446 = vmatprep.subr.bf16.mxu0 %v14934_v27  ;;  %v14947_v47 = vld [vmem:[%s19934_s7 + $0x984] ss:$16 sps:$4 sm:$0xff]  }
 0x3c5   : > { %v18246_v42 = vadd.f32 %v4761_v35, %v18097_v40  ;;  %v18249_v62 = vadd.f32 %v4802_v36, %v18099_v14  ;;  %6487 = vmatprep.subr.bf16.mxu1 %v14937_v30  ;;  %v6210_v14 = vrot.slane %v18240_v37, 3  ;;  %v6550_v49 = vrot.slane %v6548_v39, 3  ;;  %v14993_v30 = vld [vmem:[%s19934_s7 + $0x9c0] ss:$16 sps:$4 sm:$0xff]  }
 0x3c6   : > { %v4763_v43 = vpop.f32.mrf.mxu0  ;;  %v4804_v44 = vpop.f32.mrf.mxu1  ;;  %v6544_v35 = vshrl.u32 %v18240_v37, 16  ;;  %v14999_v37 = vld [vmem:[%s19934_s7 + $0xae0] ss:$16 sps:$4 sm:$0xff]  }
 0x3c7   : > { %6447 = vmatpush2.bf16.msra.mxu0 %v14932_v34  ;;  %v14996_v34 = vld [vmem:[%s19934_s7 + $0x9c8] ss:$16 sps:$4 sm:$0xff]  }
 0x3c8   : > { %6488 = vmatpush2.bf16.msra.mxu1 %v14935_v38  ;;  %v4764_v40 = vpop.f32.mrf.mxu0  ;;  %v4805_v15 = vpop.f32.mrf.mxu1  ;;  %6755 = vmatprep.subr.bf16.mxu0 %v14941_v23  ;;  %v18394_v44 = vld [vmem:[#allocation3 + $0x8] sm:$0x11]  ;;  %v6546_v39 = vrot.slane %v6544_v35, 3 }
 0x3c9   : > { %6796 = vmatprep.subr.bf16.mxu1 %v14944_v41  ;;  %v12855_v15 = vcombine.high %v18394_v44, %v18394_v44 }
 0x3ca   : > { %6449 = vmatmul.mubr.bf16.vlgmr.msra.gmra.mxu0 %v6210_v14 }
 0x3cb   : > { %6490 = vmatmul.mubr.bf16.vlgmr.msra.gmra.mxu1 %v6210_v14  ;;  %6756 = vmatpush1.bf16.msra.mxu0 %v14939_v46  ;;  %v15002_v46 = vld [vmem:[%s19934_s7 + $0xae8] ss:$16 sps:$4 sm:$0xff]   ;;  %v15011_v14 = vld [vmem:[%s19934_s7 + $0xacc] ss:$16 sps:$4 sm:$0xff]  }
 0x3cc   : > { %12812 = vmatprep.mubr.msk.bf16.mxu0 %vm4436_vm8, %v6550_v49  ;;  %6797 = vmatpush1.bf16.msra.mxu1 %v14942_v48  ;;  %v15006_v48 = vld [vmem:[%s19934_s7 + $0xac0] ss:$16 sps:$4 sm:$0xff]  }
 0x3cd   : > { %12813 = vmatprep.mubr.msk.bf16.mxu1 %vm4436_vm8, %v6550_v49  ;;  %6757 = vmatprep.subr.bf16.mxu0 %v14947_v47  ;;  %v15009_v47 = vld [vmem:[%s19934_s7 + $0xac8] ss:$16 sps:$4 sm:$0xff]   ;;  %v15014_v49 = vld [vmem:[%s19934_s7 + $0xaa4] ss:$16 sps:$4 sm:$0xff]  }
 0x3ce   : > { %6798 = vmatprep.subr.bf16.mxu1 %v14950_v7  ;;  %v15017_v7 = vld [vmem:[%s19934_s7 + $0xaac] ss:$16 sps:$4 sm:$0xff]  }
 0x3cf   : > { %6758 = vmatpush1.bf16.msra.mxu0 %v14945_v50  ;;  %v15012_v50 = vld [vmem:[%s19934_s7 + $0xaa0] ss:$16 sps:$4 sm:$0xff]  }
 0x3d0   : > { %6799 = vmatpush1.bf16.msra.mxu1 %v14948_v53  ;;  %6759 = vmatprep.subr.bf16.mxu0 %v14953_v54  ;;  %v15015_v53 = vld [vmem:[%s19934_s7 + $0xaa8] ss:$16 sps:$4 sm:$0xff]   ;;  %v15020_v54 = vld [vmem:[%s19934_s7 + $0xa84] ss:$16 sps:$4 sm:$0xff]  }
 0x3d1   : > { %6800 = vmatprep.subr.bf16.mxu1 %v14956_v55  ;;  %v15023_v55 = vld [vmem:[%s19934_s7 + $0xa8c] ss:$16 sps:$4 sm:$0xff]  }
 0x3d3   : > { %6760 = vmatpush1.bf16.msra.mxu0 %v14951_v56  ;;  %v15018_v56 = vld [vmem:[%s19934_s7 + $0xa80] ss:$16 sps:$4 sm:$0xff]  }
 0x3d4   : > { %6801 = vmatpush1.bf16.msra.mxu1 %v14954_v57  ;;  %6761 = vmatprep.subr.bf16.mxu0 %v14959_v58  ;;  %v15021_v57 = vld [vmem:[%s19934_s7 + $0xa88] ss:$16 sps:$4 sm:$0xff]   ;;  %v15026_v58 = vld [vmem:[%s19934_s7 + $0xa64] ss:$16 sps:$4 sm:$0xff]  }
 0x3d5   : > { %6802 = vmatprep.subr.bf16.mxu1 %v14962_v59  ;;  %v15029_v59 = vld [vmem:[%s19934_s7 + $0xa6c] ss:$16 sps:$4 sm:$0xff]  }
 0x3d7   : > { %6762 = vmatpush1.bf16.msra.mxu0 %v14957_v60  ;;  %v15024_v60 = vld [vmem:[%s19934_s7 + $0xa60] ss:$16 sps:$4 sm:$0xff]  }
 0x3d8   : > { %6803 = vmatpush1.bf16.msra.mxu1 %v14960_v61  ;;  %6763 = vmatprep.subr.bf16.mxu0 %v14965_v63  ;;  %v15027_v61 = vld [vmem:[%s19934_s7 + $0xa68] ss:$16 sps:$4 sm:$0xff]   ;;  %v15032_v63 = vld [vmem:[%s19934_s7 + $0xa44] ss:$16 sps:$4 sm:$0xff]  }
 0x3d9   : > { %6804 = vmatprep.subr.bf16.mxu1 %v14968_v2  ;;  %v15035_v2 = vld [vmem:[%s19934_s7 + $0xa4c] ss:$16 sps:$4 sm:$0xff]  }
 0x3db   : > { %6764 = vmatpush1.bf16.msra.mxu0 %v14963_v4  ;;  %v15030_v4 = vld [vmem:[%s19934_s7 + $0xa40] ss:$16 sps:$4 sm:$0xff]  }
 0x3dc   : > { %6805 = vmatpush1.bf16.msra.mxu1 %v14966_v5  ;;  %6765 = vmatprep.subr.bf16.mxu0 %v14971_v8  ;;  %v15033_v5 = vld [vmem:[%s19934_s7 + $0xa48] ss:$16 sps:$4 sm:$0xff]   ;;  %v15038_v8 = vld [vmem:[%s19934_s7 + $0xa24] ss:$16 sps:$4 sm:$0xff]  }
 0x3dd   : > { %6806 = vmatprep.subr.bf16.mxu1 %v14974_v51  ;;  %v15041_v51 = vld [vmem:[%s19934_s7 + $0xa2c] ss:$16 sps:$4 sm:$0xff]  }
 0x3df   : > { %6766 = vmatpush1.bf16.msra.mxu0 %v14969_v10  ;;  %v15036_v10 = vld [vmem:[%s19934_s7 + $0xa20] ss:$16 sps:$4 sm:$0xff]  }
 0x3e0   : > { %6807 = vmatpush1.bf16.msra.mxu1 %v14972_v6  ;;  %6767 = vmatprep.subr.bf16.mxu0 %v14977_v52  ;;  %v15039_v6 = vld [vmem:[%s19934_s7 + $0xa28] ss:$16 sps:$4 sm:$0xff]   ;;  %v15044_v52 = vld [vmem:[%s19934_s7 + $0xa04] ss:$16 sps:$4 sm:$0xff]  }
 0x3e1   : > { %6808 = vmatprep.subr.bf16.mxu1 %v14980_v11  ;;  %v15047_v11 = vld [vmem:[%s19934_s7 + $0xa0c] ss:$16 sps:$4 sm:$0xff]  }
 0x3e3   : > { %6768 = vmatpush1.bf16.msra.mxu0 %v14975_v33  ;;  %v15042_v33 = vld [vmem:[%s19934_s7 + $0xa00] ss:$16 sps:$4 sm:$0xff]  }
 0x3e4   : > { %6809 = vmatpush1.bf16.msra.mxu1 %v14978_v28  ;;  %6769 = vmatprep.subr.bf16.mxu0 %v14983_v13  ;;  %v15045_v28 = vld [vmem:[%s19934_s7 + $0xa08] ss:$16 sps:$4 sm:$0xff]   ;;  %v15050_v13 = vld [vmem:[%s19934_s7 + $0xb24] ss:$16 sps:$4 sm:$0xff]  }
 0x3e5   : > { %6810 = vmatprep.subr.bf16.mxu1 %v14986_v12  ;;  %v15053_v12 = vld [vmem:[%s19934_s7 + $0xb2c] ss:$16 sps:$4 sm:$0xff]  }
 0x3e7   : > { %6770 = vmatpush1.bf16.msra.mxu0 %v14981_v16  ;;  %v15048_v16 = vld [vmem:[%s19934_s7 + $0xb20] ss:$16 sps:$4 sm:$0xff]  }
 0x3e8   : > { %6811 = vmatpush1.bf16.msra.mxu1 %v14984_v17  ;;  %6783 = vmatprep.subr.bf16.mxu0 %v14989_v18  ;;  %v15051_v17 = vld [vmem:[%s19934_s7 + $0xb28] ss:$16 sps:$4 sm:$0xff]   ;;  %v15056_v18 = vld [vmem:[%s19934_s7 + $0xb04] ss:$16 sps:$4 sm:$0xff]  }
 0x3e9   : > { %6824 = vmatprep.subr.bf16.mxu1 %v14992_v19  ;;  %v15059_v19 = vld [vmem:[%s19934_s7 + $0xb0c] ss:$16 sps:$4 sm:$0xff]  }
 0x3ea   : > { %v5094_v0 = vpop.f32.mrf.mxu0 }
 0x3eb   : > { %v18367_v26 = vadd.f32 %v5094_v0, %v18227_v32  ;;  %v5135_v27 = vpop.f32.mrf.mxu1  ;;  %6784 = vmatpush2.bf16.msra.mxu0 %v14987_v20  ;;  %v15001_v32 = vld [vmem:[%s19934_s7 + $0xae4] ss:$16 sps:$4 sm:$0xff]  }
 0x3ec   : > { %v18373_v9 = vadd.f32 %v5135_v27, %v18230_v29  ;;  %6825 = vmatpush2.bf16.msra.mxu1 %v14990_v45  ;;  %v5096_v31 = vpop.f32.mrf.mxu0  ;;  %6785 = vmatprep.subr.bf16.mxu0 %v14995_v22  ;;  %v15004_v29 = vld [vmem:[%s19934_s7 + $0xaec] ss:$16 sps:$4 sm:$0xff]   ;;  %v18511_v0 = vld [vmem:[#allocation4] sm:$0x11] }
 0x3ed   : > { %v18383_v36 = vadd.f32 %v5096_v31, %v18246_v42  ;;  %v5137_v38 = vpop.f32.mrf.mxu1  ;;  %6826 = vmatprep.subr.bf16.mxu1 %v14998_v25  ;;  %v15054_v25 = vld [vmem:[%s19934_s7 + $0xb00] ss:$16 sps:$4 sm:$0xff]   ;;  %v15057_v31 = vld [vmem:[%s19934_s7 + $0xb08] ss:$16 sps:$4 sm:$0xff]  }
 0x3ee   : > { %v18389_v23 = vadd.f32 %v5137_v38, %v18249_v62  ;;  %v5098_v41 = vpop.f32.mrf.mxu0  ;;  %v15008_v62 = vld [vmem:[%s19934_s7 + $0xac4] ss:$16 sps:$4 sm:$0xff]  }
 0x3ef   : > { %v5139_v43 = vpop.f32.mrf.mxu1  ;;  %6786 = vmatpush2.bf16.msra.mxu0 %v14993_v30 }
 0x3f0   : > { %6827 = vmatpush2.bf16.msra.mxu1 %v14996_v34  ;;  %v5099_v42 = vpop.f32.mrf.mxu0  ;;  %7092 = vmatprep.subr.bf16.mxu0 %v15001_v32 }
 0x3f1   : > { %v5140_v40 = vpop.f32.mrf.mxu1  ;;  %7133 = vmatprep.subr.bf16.mxu1 %v15004_v29  ;;  %v18533_v29 = vcombine.high %v18511_v0, %v18511_v0 }
 0x3f2   : > { %6788 = vmatmul.mubr.bf16.vlgmr.msra.gmra.mxu0 %v6546_v39  ;;  %v15073_v40 = vld [vmem:[%s19936_s9 + $0x20c] ss:$16 sps:$4 sm:$0xff]  }
 0x3f3   : > { %6829 = vmatmul.mubr.bf16.vlgmr.msra.gmra.mxu1 %v6546_v39  ;;  %7093 = vmatpush1.bf16.msra.mxu0 %v14999_v37  ;;  %v12854_v37 = vcombine.low %v18394_v44, %v18394_v44  ;;  %v15070_v39 = vld [vmem:[%s19936_s9 + $0x204] ss:$16 sps:$4 sm:$0xff]   ;;  %v15068_v44 = vld [vmem:[%s19936_s9 + $0x200] ss:$16 sps:$4 sm:$0xff]  }
 0x3f4   : > { %12896 = vmatprep.mubr.msk.bf16.mxu0 %vm4436_vm8, %v12855_v15  ;;  %7134 = vmatpush1.bf16.msra.mxu1 %v15002_v46  ;;  %v7303_v46 = vshrl.u32 %v18533_v29, 16 }
 0x3f5   : > { %12897 = vmatprep.mubr.msk.bf16.mxu1 %vm4436_vm8, %v12855_v15  ;;  %7094 = vmatprep.subr.bf16.mxu0 %v15008_v62  ;;  %v15071_v62 = vld [vmem:[%s19936_s9 + $0x208] ss:$16 sps:$4 sm:$0xff]   ;;  %v15076_v15 = vld [vmem:[%s19936_s9 + $0x1e4] ss:$16 sps:$4 sm:$0xff]  }
 0x3f6   : > { %7135 = vmatprep.subr.bf16.mxu1 %v15011_v14  ;;  %v15079_v14 = vld [vmem:[%s19936_s9 + $0x1ec] ss:$16 sps:$4 sm:$0xff]  }
 0x3f7   : > { %7095 = vmatpush1.bf16.msra.mxu0 %v15006_v48  ;;  %v15074_v48 = vld [vmem:[%s19936_s9 + $0x1e0] ss:$16 sps:$4 sm:$0xff]  }
 0x3f8   : > { %7136 = vmatpush1.bf16.msra.mxu1 %v15009_v47  ;;  %7096 = vmatprep.subr.bf16.mxu0 %v15014_v49  ;;  %v15077_v47 = vld [vmem:[%s19936_s9 + $0x1e8] ss:$16 sps:$4 sm:$0xff]   ;;  %v15082_v49 = vld [vmem:[%s19936_s9 + $0x1c4] ss:$16 sps:$4 sm:$0xff]  }
 0x3f9   : > { %7137 = vmatprep.subr.bf16.mxu1 %v15017_v7  ;;  %v15085_v7 = vld [vmem:[%s19936_s9 + $0x1cc] ss:$16 sps:$4 sm:$0xff]  }
 0x3fb   : > { %7097 = vmatpush1.bf16.msra.mxu0 %v15012_v50  ;;  %v15080_v50 = vld [vmem:[%s19936_s9 + $0x1c0] ss:$16 sps:$4 sm:$0xff]  }
 0x3fc   : > { %7138 = vmatpush1.bf16.msra.mxu1 %v15015_v53  ;;  %7098 = vmatprep.subr.bf16.mxu0 %v15020_v54  ;;  %v15083_v53 = vld [vmem:[%s19936_s9 + $0x1c8] ss:$16 sps:$4 sm:$0xff]   ;;  %v15088_v54 = vld [vmem:[%s19936_s9 + $0x1a4] ss:$16 sps:$4 sm:$0xff]  }
 0x3fd   : > { %7139 = vmatprep.subr.bf16.mxu1 %v15023_v55  ;;  %v15091_v55 = vld [vmem:[%s19936_s9 + $0x1ac] ss:$16 sps:$4 sm:$0xff]  }
 0x3ff   : > { %7099 = vmatpush1.bf16.msra.mxu0 %v15018_v56  ;;  %v15086_v56 = vld [vmem:[%s19936_s9 + $0x1a0] ss:$16 sps:$4 sm:$0xff]  }
 0x400   : > { %7140 = vmatpush1.bf16.msra.mxu1 %v15021_v57  ;;  %7100 = vmatprep.subr.bf16.mxu0 %v15026_v58  ;;  %v15089_v57 = vld [vmem:[%s19936_s9 + $0x1a8] ss:$16 sps:$4 sm:$0xff]   ;;  %v15094_v58 = vld [vmem:[%s19936_s9 + $0x184] ss:$16 sps:$4 sm:$0xff]  }
 0x401   : > { %7141 = vmatprep.subr.bf16.mxu1 %v15029_v59  ;;  %v15097_v59 = vld [vmem:[%s19936_s9 + $0x18c] ss:$16 sps:$4 sm:$0xff]  }
 0x403   : > { %7101 = vmatpush1.bf16.msra.mxu0 %v15024_v60  ;;  %v15092_v60 = vld [vmem:[%s19936_s9 + $0x180] ss:$16 sps:$4 sm:$0xff]  }
 0x404   : > { %7142 = vmatpush1.bf16.msra.mxu1 %v15027_v61  ;;  %7102 = vmatprep.subr.bf16.mxu0 %v15032_v63  ;;  %v15095_v61 = vld [vmem:[%s19936_s9 + $0x188] ss:$16 sps:$4 sm:$0xff]   ;;  %v15100_v63 = vld [vmem:[%s19936_s9 + $0x164] ss:$16 sps:$4 sm:$0xff]  }
 0x405   : > { %7143 = vmatprep.subr.bf16.mxu1 %v15035_v2  ;;  %v15103_v2 = vld [vmem:[%s19936_s9 + $0x16c] ss:$16 sps:$4 sm:$0xff]  }
 0x407   : > { %7103 = vmatpush1.bf16.msra.mxu0 %v15030_v4  ;;  %v15098_v4 = vld [vmem:[%s19936_s9 + $0x160] ss:$16 sps:$4 sm:$0xff]  }
 0x408   : > { %7144 = vmatpush1.bf16.msra.mxu1 %v15033_v5  ;;  %7104 = vmatprep.subr.bf16.mxu0 %v15038_v8  ;;  %v15101_v5 = vld [vmem:[%s19936_s9 + $0x168] ss:$16 sps:$4 sm:$0xff]   ;;  %v15106_v8 = vld [vmem:[%s19936_s9 + $0x144] ss:$16 sps:$4 sm:$0xff]  }
 0x409   : > { %7145 = vmatprep.subr.bf16.mxu1 %v15041_v51  ;;  %v15109_v51 = vld [vmem:[%s19936_s9 + $0x14c] ss:$16 sps:$4 sm:$0xff]  }
 0x40b   : > { %7105 = vmatpush1.bf16.msra.mxu0 %v15036_v10  ;;  %v15104_v10 = vld [vmem:[%s19936_s9 + $0x140] ss:$16 sps:$4 sm:$0xff]  }
 0x40c   : > { %7146 = vmatpush1.bf16.msra.mxu1 %v15039_v6  ;;  %7106 = vmatprep.subr.bf16.mxu0 %v15044_v52  ;;  %v15107_v6 = vld [vmem:[%s19936_s9 + $0x148] ss:$16 sps:$4 sm:$0xff]   ;;  %v15112_v52 = vld [vmem:[%s19936_s9 + $0x264] ss:$16 sps:$4 sm:$0xff]  }
 0x40d   : > { %7147 = vmatprep.subr.bf16.mxu1 %v15047_v11  ;;  %v15115_v11 = vld [vmem:[%s19936_s9 + $0x26c] ss:$16 sps:$4 sm:$0xff]  }
 0x40f   : > { %7107 = vmatpush1.bf16.msra.mxu0 %v15042_v33  ;;  %v15110_v33 = vld [vmem:[%s19936_s9 + $0x260] ss:$16 sps:$4 sm:$0xff]  }
 0x410   : > { %7148 = vmatpush1.bf16.msra.mxu1 %v15045_v28  ;;  %7120 = vmatprep.subr.bf16.mxu0 %v15050_v13  ;;  %v15113_v28 = vld [vmem:[%s19936_s9 + $0x268] ss:$16 sps:$4 sm:$0xff]   ;;  %v15118_v13 = vld [vmem:[%s19936_s9 + $0x244] ss:$16 sps:$4 sm:$0xff]  }
 0x411   : > { %7161 = vmatprep.subr.bf16.mxu1 %v15053_v12  ;;  %v15121_v12 = vld [vmem:[%s19936_s9 + $0x24c] ss:$16 sps:$4 sm:$0xff]  }
 0x412   : > { %v5433_v20 = vpop.f32.mrf.mxu0 }
 0x413   : > { %v18506_v45 = vadd.f32 %v5433_v20, %v18367_v26  ;;  %v5474_v22 = vpop.f32.mrf.mxu1  ;;  %7121 = vmatpush2.bf16.msra.mxu0 %v15048_v16  ;;  %v15063_v26 = vld [vmem:[%s19936_s9 + $0x224] ss:$16 sps:$4 sm:$0xff]  }
 0x414   : > { %v18514_v27 = vadd.f32 %v5474_v22, %v18373_v9  ;;  %7162 = vmatpush2.bf16.msra.mxu1 %v15051_v17  ;;  %v5435_v30 = vpop.f32.mrf.mxu0  ;;  %7122 = vmatprep.subr.bf16.mxu0 %v15056_v18  ;;  %v15066_v9 = vld [vmem:[%s19936_s9 + $0x22c] ss:$16 sps:$4 sm:$0xff]  }
 0x415   : > { %v18523_v34 = vadd.f32 %v5435_v30, %v18383_v36  ;;  %v5476_v35 = vpop.f32.mrf.mxu1  ;;  %7163 = vmatprep.subr.bf16.mxu1 %v15059_v19  ;;  %v15061_v36 = vld [vmem:[%s19936_s9 + $0x220] ss:$16 sps:$4 sm:$0xff]   ;;  %v15125_v30 = vld [vmem:[%s19936_s9 + $0xe4] ss:$16 sps:$4 sm:$0xff]  }
 0x416   : > { %v18529_v32 = vadd.f32 %v5476_v35, %v18389_v23  ;;  %v5437_v38 = vpop.f32.mrf.mxu0  ;;  %v15064_v23 = vld [vmem:[%s19936_s9 + $0x228] ss:$16 sps:$4 sm:$0xff]   ;;  %v15116_v19 = vld [vmem:[%s19936_s9 + $0x240] ss:$16 sps:$4 sm:$0xff]  }
 0x417   : > { %v5478_v41 = vpop.f32.mrf.mxu1  ;;  %7123 = vmatpush2.bf16.msra.mxu0 %v15054_v25  ;;  %v15119_v25 = vld [vmem:[%s19936_s9 + $0x248] ss:$16 sps:$4 sm:$0xff]  }
 0x418   : > { %7164 = vmatpush2.bf16.msra.mxu1 %v15057_v31  ;;  %v5438_v43 = vpop.f32.mrf.mxu0  ;;  %7509 = vmatprep.subr.bf16.mxu0 %v15063_v26  ;;  %v15128_v26 = vld [vmem:[%s19936_s9 + $0xec] ss:$16 sps:$4 sm:$0xff]  }
 0x419   : > { %v5479_v42 = vpop.f32.mrf.mxu1  ;;  %7550 = vmatprep.subr.bf16.mxu1 %v15066_v9 }
 0x41a   : > { %7125 = vmatmul.mubr.bf16.vlgmr.msra.gmra.mxu0 %v12854_v37  ;;  %v15132_v42 = vld [vmem:[%s19936_s9 + $0xc8] ss:$16 sps:$4 sm:$0xff]  }
 0x41b   : > { %7166 = vmatmul.mubr.bf16.vlgmr.msra.gmra.mxu1 %v12854_v37  ;;  %7510 = vmatpush1.bf16.msra.mxu0 %v15061_v36  ;;  %v15126_v36 = vld [vmem:[%s19936_s9 + $0xe8] ss:$16 sps:$4 sm:$0xff]   ;;  %v15134_v37 = vld [vmem:[%s19936_s9 + $0xcc] ss:$16 sps:$4 sm:$0xff]  }
 0x41c   : > { %12980 = vmatprep.mubr.msk.bf16.mxu0 %vm4436_vm8, %v7303_v46  ;;  %7551 = vmatpush1.bf16.msra.mxu1 %v15064_v23  ;;  %v15129_v23 = vld [vmem:[%s19936_s9 + $0xc0] ss:$16 sps:$4 sm:$0xff]  }
 0x41d   : > { %12981 = vmatprep.mubr.msk.bf16.mxu1 %vm4436_vm8, %v7303_v46  ;;  %7511 = vmatprep.subr.bf16.mxu0 %v15070_v39  ;;  %v15137_v39 = vld [vmem:[%s19936_s9 + $0xa4] ss:$16 sps:$4 sm:$0xff]   ;;  %v15140_v46 = vld [vmem:[%s19936_s9 + $0xac] ss:$16 sps:$4 sm:$0xff]  }
 0x41e   : > { %7552 = vmatprep.subr.bf16.mxu1 %v15073_v40  ;;  %v15135_v40 = vld [vmem:[%s19936_s9 + $0xa0] ss:$16 sps:$4 sm:$0xff]  }
 0x41f   : > { %7512 = vmatpush1.bf16.msra.mxu0 %v15068_v44  ;;  %v15138_v44 = vld [vmem:[%s19936_s9 + $0xa8] ss:$16 sps:$4 sm:$0xff]  }
 0x420   : > { %7553 = vmatpush1.bf16.msra.mxu1 %v15071_v62  ;;  %7513 = vmatprep.subr.bf16.mxu0 %v15076_v15  ;;  %v15146_v62 = vld [vmem:[%s19936_s9 + $0x8c] ss:$16 sps:$4 sm:$0xff]   ;;  %v15141_v15 = vld [vmem:[%s19936_s9 + $0x80] ss:$16 sps:$4 sm:$0xff]  }
 0x421   : > { %7554 = vmatprep.subr.bf16.mxu1 %v15079_v14  ;;  %v15144_v14 = vld [vmem:[%s19936_s9 + $0x88] ss:$16 sps:$4 sm:$0xff]  }
 0x423   : > { %7514 = vmatpush1.bf16.msra.mxu0 %v15074_v48  ;;  %v15149_v48 = vld [vmem:[%s19936_s9 + $0x64] ss:$16 sps:$4 sm:$0xff]  }
 0x424   : > { %7555 = vmatpush1.bf16.msra.mxu1 %v15077_v47  ;;  %7515 = vmatprep.subr.bf16.mxu0 %v15082_v49  ;;  %v15152_v47 = vld [vmem:[%s19936_s9 + $0x6c] ss:$16 sps:$4 sm:$0xff]   ;;  %v15147_v49 = vld [vmem:[%s19936_s9 + $0x60] ss:$16 sps:$4 sm:$0xff]  }
 0x425   : > { %7556 = vmatprep.subr.bf16.mxu1 %v15085_v7  ;;  %v15150_v7 = vld [vmem:[%s19936_s9 + $0x68] ss:$16 sps:$4 sm:$0xff]  }
 0x427   : > { %7516 = vmatpush1.bf16.msra.mxu0 %v15080_v50  ;;  %v15155_v50 = vld [vmem:[%s19936_s9 + $0x44] ss:$16 sps:$4 sm:$0xff]  }
 0x428   : > { %7557 = vmatpush1.bf16.msra.mxu1 %v15083_v53  ;;  %7517 = vmatprep.subr.bf16.mxu0 %v15088_v54  ;;  %v15158_v53 = vld [vmem:[%s19936_s9 + $0x4c] ss:$16 sps:$4 sm:$0xff]   ;;  %v15153_v54 = vld [vmem:[%s19936_s9 + $0x40] ss:$16 sps:$4 sm:$0xff]  }
 0x429   : > { %7558 = vmatprep.subr.bf16.mxu1 %v15091_v55  ;;  %v15156_v55 = vld [vmem:[%s19936_s9 + $0x48] ss:$16 sps:$4 sm:$0xff]  }
 0x42b   : > { %7518 = vmatpush1.bf16.msra.mxu0 %v15086_v56  ;;  %v15161_v56 = vld [vmem:[%s19936_s9 + $0x24] ss:$16 sps:$4 sm:$0xff]  }
 0x42c   : > { %7559 = vmatpush1.bf16.msra.mxu1 %v15089_v57  ;;  %7519 = vmatprep.subr.bf16.mxu0 %v15094_v58  ;;  %v15164_v57 = vld [vmem:[%s19936_s9 + $0x2c] ss:$16 sps:$4 sm:$0xff]   ;;  %v15159_v58 = vld [vmem:[%s19936_s9 + $0x20] ss:$16 sps:$4 sm:$0xff]  }
 0x42d   : > { %7560 = vmatprep.subr.bf16.mxu1 %v15097_v59  ;;  %v15162_v59 = vld [vmem:[%s19936_s9 + $0x28] ss:$16 sps:$4 sm:$0xff]  }
 0x42f   : > { %7520 = vmatpush1.bf16.msra.mxu0 %v15092_v60  ;;  %v15167_v60 = vld [vmem:[%s19936_s9 + $0x4] ss:$16 sps:$4 sm:$0xff]  }
 0x430   : > { %7561 = vmatpush1.bf16.msra.mxu1 %v15095_v61  ;;  %7521 = vmatprep.subr.bf16.mxu0 %v15100_v63  ;;  %v15170_v61 = vld [vmem:[%s19936_s9 + $0xc] ss:$16 sps:$4 sm:$0xff]   ;;  %v15165_v63 = vld [vmem:[%s19936_s9] ss:$16 sps:$4 sm:$0xff]  }
 0x431   : > { %7562 = vmatprep.subr.bf16.mxu1 %v15103_v2  ;;  %v15168_v2 = vld [vmem:[%s19936_s9 + $0x8] ss:$16 sps:$4 sm:$0xff]  }
 0x433   : > { %7522 = vmatpush1.bf16.msra.mxu0 %v15098_v4  ;;  %v15173_v4 = vld [vmem:[%s19936_s9 + $0x124] ss:$16 sps:$4 sm:$0xff]  }
 0x434   : > { %7563 = vmatpush1.bf16.msra.mxu1 %v15101_v5  ;;  %7523 = vmatprep.subr.bf16.mxu0 %v15106_v8  ;;  %v15176_v5 = vld [vmem:[%s19936_s9 + $0x12c] ss:$16 sps:$4 sm:$0xff]   ;;  %v15171_v8 = vld [vmem:[%s19936_s9 + $0x120] ss:$16 sps:$4 sm:$0xff]  }
 0x435   : > { %7564 = vmatprep.subr.bf16.mxu1 %v15109_v51  ;;  %v15174_v51 = vld [vmem:[%s19936_s9 + $0x128] ss:$16 sps:$4 sm:$0xff]  }
 0x437   : > { %7524 = vmatpush1.bf16.msra.mxu0 %v15104_v10  ;;  %v15179_v10 = vld [vmem:[%s19936_s9 + $0x104] ss:$16 sps:$4 sm:$0xff]  }
 0x438   : > { %7565 = vmatpush1.bf16.msra.mxu1 %v15107_v6  ;;  %7537 = vmatprep.subr.bf16.mxu0 %v15112_v52  ;;  %v15182_v6 = vld [vmem:[%s19936_s9 + $0x10c] ss:$16 sps:$4 sm:$0xff]  }
 0x439   : > { %7578 = vmatprep.subr.bf16.mxu1 %v15115_v11 }
 0x43a   : > { %v5772_v16 = vpop.f32.mrf.mxu0 }
 0x43b   : > { %v18649_v17 = vadd.f32 %v5772_v16, %v18506_v45  ;;  %v5813_v18 = vpop.f32.mrf.mxu1  ;;  %7538 = vmatpush2.bf16.msra.mxu0 %v15110_v33  ;;  %v18662_v45 = vcombine.low %v18511_v0, %v18511_v0  ;;  %v15123_v0 = vld [vmem:[%s19936_s9 + $0xe0] ss:$16 sps:$4 sm:$0xff]  }
 0x43c   : > { %v18655_v20 = vadd.f32 %v5813_v18, %v18514_v27  ;;  %7579 = vmatpush2.bf16.msra.mxu1 %v15113_v28  ;;  %v5774_v22 = vpop.f32.mrf.mxu0  ;;  %7539 = vmatprep.subr.bf16.mxu0 %v15118_v13  ;;  %v15177_v28 = vld [vmem:[%s19936_s9 + $0x100] ss:$16 sps:$4 sm:$0xff]   ;;  %v15180_v18 = vld [vmem:[%s19936_s9 + $0x108] ss:$16 sps:$4 sm:$0xff]  }
 0x43d   : > { %v18668_v31 = vadd.f32 %v5774_v22, %v18523_v34  ;;  %v5815_v27 = vpop.f32.mrf.mxu1  ;;  %7580 = vmatprep.subr.bf16.mxu1 %v15121_v12  ;;  %v7300_v34 = vshrl.u32 %v18662_v45, 16  ;;  %v18795_v13 = vld [vmem:[#allocation4] sm:$0x22] }
 0x43e   : > { %v18674_v35 = vadd.f32 %v5815_v27, %v18529_v32  ;;  %v5776_v9 = vpop.f32.mrf.mxu0  ;;  %v15131_v32 = vld [vmem:[%s19936_s9 + $0xc4] ss:$16 sps:$4 sm:$0xff]   ;;  %v18817_v27 = vcombine.high %v18795_v13, %v18795_v13 }
 0x43f   : > { %v5817_v38 = vpop.f32.mrf.mxu1  ;;  %7540 = vmatpush2.bf16.msra.mxu0 %v15116_v19 }
 0x440   : > { %7581 = vmatpush2.bf16.msra.mxu1 %v15119_v25  ;;  %v5777_v41 = vpop.f32.mrf.mxu0  ;;  %7794 = vmatprep.subr.bf16.mxu0 %v15125_v30  ;;  %v15186_v38 = vld [vmem:[%s19936_s9 + $0x368] ss:$16 sps:$4 sm:$0xff]  }
 0x441   : > { %v5818_v43 = vpop.f32.mrf.mxu1  ;;  %7835 = vmatprep.subr.bf16.mxu1 %v15128_v26  ;;  %v7924_v41 = vrot.slane %v18817_v27, 1 }
 0x442   : > { %7542 = vmatmul.mubr.bf16.vlgmr.msra.gmra.mxu0 %v7300_v34  ;;  %v15193_v43 = vld [vmem:[%s19936_s9 + $0x348] ss:$16 sps:$4 sm:$0xff]  }
 0x443   : > { %7583 = vmatmul.mubr.bf16.vlgmr.msra.gmra.mxu1 %v7300_v34  ;;  %7795 = vmatpush1.bf16.msra.mxu0 %v15123_v0  ;;  %v15192_v0 = vld [vmem:[%s19936_s9 + $0x344] ss:$16 sps:$4 sm:$0xff]   ;;  %v15195_v34 = vld [vmem:[%s19936_s9 + $0x34c] ss:$16 sps:$4 sm:$0xff]  }
 0x444   : > { %13022 = vmatprep.mubr.msk.bf16.mxu0 %vm4436_vm8, %v18533_v29  ;;  %7836 = vmatpush1.bf16.msra.mxu1 %v15126_v36  ;;  %v15190_v36 = vld [vmem:[%s19936_s9 + $0x340] ss:$16 sps:$4 sm:$0xff]  }
 0x445   : > { %13023 = vmatprep.mubr.msk.bf16.mxu1 %vm4436_vm8, %v18533_v29  ;;  %7796 = vmatprep.subr.bf16.mxu0 %v15131_v32  ;;  %v15143_v29 = vld [vmem:[%s19936_s9 + $0x84] ss:$16 sps:$4 sm:$0xff]  }
 0x446   : > { %7837 = vmatprep.subr.bf16.mxu1 %v15134_v37  ;;  %v15198_v32 = vld [vmem:[%s19936_s9 + $0x324] ss:$16 sps:$4 sm:$0xff]   ;;  %v15196_v37 = vld [vmem:[%s19936_s9 + $0x320] ss:$16 sps:$4 sm:$0xff]  }
 0x447   : > { %7797 = vmatpush1.bf16.msra.mxu0 %v15129_v23  ;;  %v15199_v23 = vld [vmem:[%s19936_s9 + $0x328] ss:$16 sps:$4 sm:$0xff]  }
 0x448   : > { %7838 = vmatpush1.bf16.msra.mxu1 %v15132_v42  ;;  %7798 = vmatprep.subr.bf16.mxu0 %v15137_v39  ;;  %v15204_v42 = vld [vmem:[%s19936_s9 + $0x304] ss:$16 sps:$4 sm:$0xff]   ;;  %v15207_v39 = vld [vmem:[%s19936_s9 + $0x30c] ss:$16 sps:$4 sm:$0xff]  }
 0x449   : > { %7839 = vmatprep.subr.bf16.mxu1 %v15140_v46  ;;  %v15202_v46 = vld [vmem:[%s19936_s9 + $0x300] ss:$16 sps:$4 sm:$0xff]  }
 0x44b   : > { %7799 = vmatpush1.bf16.msra.mxu0 %v15135_v40  ;;  %v15205_v40 = vld [vmem:[%s19936_s9 + $0x308] ss:$16 sps:$4 sm:$0xff]  }
 0x44c   : > { %7840 = vmatpush1.bf16.msra.mxu1 %v15138_v44  ;;  %7800 = vmatprep.subr.bf16.mxu0 %v15143_v29  ;;  %v15210_v44 = vld [vmem:[%s19936_s9 + $0x2e4] ss:$16 sps:$4 sm:$0xff]   ;;  %v15213_v29 = vld [vmem:[%s19936_s9 + $0x2ec] ss:$16 sps:$4 sm:$0xff]  }
 0x44d   : > { %7841 = vmatprep.subr.bf16.mxu1 %v15146_v62  ;;  %v15208_v62 = vld [vmem:[%s19936_s9 + $0x2e0] ss:$16 sps:$4 sm:$0xff]  }
 0x44f   : > { %7801 = vmatpush1.bf16.msra.mxu0 %v15141_v15  ;;  %v15211_v15 = vld [vmem:[%s19936_s9 + $0x2e8] ss:$16 sps:$4 sm:$0xff]  }
 0x450   : > { %7842 = vmatpush1.bf16.msra.mxu1 %v15144_v14  ;;  %7802 = vmatprep.subr.bf16.mxu0 %v15149_v48  ;;  %v15216_v14 = vld [vmem:[%s19936_s9 + $0x2c4] ss:$16 sps:$4 sm:$0xff]   ;;  %v15219_v48 = vld [vmem:[%s19936_s9 + $0x2cc] ss:$16 sps:$4 sm:$0xff]  }
 0x451   : > { %7843 = vmatprep.subr.bf16.mxu1 %v15152_v47  ;;  %v15214_v47 = vld [vmem:[%s19936_s9 + $0x2c0] ss:$16 sps:$4 sm:$0xff]  }
 0x453   : > { %7803 = vmatpush1.bf16.msra.mxu0 %v15147_v49  ;;  %v15217_v49 = vld [vmem:[%s19936_s9 + $0x2c8] ss:$16 sps:$4 sm:$0xff]  }
 0x454   : > { %7844 = vmatpush1.bf16.msra.mxu1 %v15150_v7  ;;  %7804 = vmatprep.subr.bf16.mxu0 %v15155_v50  ;;  %v15222_v7 = vld [vmem:[%s19936_s9 + $0x2a4] ss:$16 sps:$4 sm:$0xff]   ;;  %v15225_v50 = vld [vmem:[%s19936_s9 + $0x2ac] ss:$16 sps:$4 sm:$0xff]  }
 0x455   : > { %7845 = vmatprep.subr.bf16.mxu1 %v15158_v53  ;;  %v15220_v53 = vld [vmem:[%s19936_s9 + $0x2a0] ss:$16 sps:$4 sm:$0xff]  }
 0x457   : > { %7805 = vmatpush1.bf16.msra.mxu0 %v15153_v54  ;;  %v15223_v54 = vld [vmem:[%s19936_s9 + $0x2a8] ss:$16 sps:$4 sm:$0xff]  }
 0x458   : > { %7846 = vmatpush1.bf16.msra.mxu1 %v15156_v55  ;;  %7806 = vmatprep.subr.bf16.mxu0 %v15161_v56  ;;  %v15228_v55 = vld [vmem:[%s19936_s9 + $0x284] ss:$16 sps:$4 sm:$0xff]   ;;  %v15231_v56 = vld [vmem:[%s19936_s9 + $0x28c] ss:$16 sps:$4 sm:$0xff]  }
 0x459   : > { %7847 = vmatprep.subr.bf16.mxu1 %v15164_v57  ;;  %v15226_v57 = vld [vmem:[%s19936_s9 + $0x280] ss:$16 sps:$4 sm:$0xff]  }
 0x45b   : > { %7807 = vmatpush1.bf16.msra.mxu0 %v15159_v58  ;;  %v15229_v58 = vld [vmem:[%s19936_s9 + $0x288] ss:$16 sps:$4 sm:$0xff]  }
 0x45c   : > { %7848 = vmatpush1.bf16.msra.mxu1 %v15162_v59  ;;  %7808 = vmatprep.subr.bf16.mxu0 %v15167_v60  ;;  %v15234_v59 = vld [vmem:[%s19936_s9 + $0x3a4] ss:$16 sps:$4 sm:$0xff]   ;;  %v15237_v60 = vld [vmem:[%s19936_s9 + $0x3ac] ss:$16 sps:$4 sm:$0xff]  }
 0x45d   : > { %7849 = vmatprep.subr.bf16.mxu1 %v15170_v61  ;;  %v15232_v61 = vld [vmem:[%s19936_s9 + $0x3a0] ss:$16 sps:$4 sm:$0xff]  }
 0x45f   : > { %7809 = vmatpush1.bf16.msra.mxu0 %v15165_v63  ;;  %v15235_v63 = vld [vmem:[%s19936_s9 + $0x3a8] ss:$16 sps:$4 sm:$0xff]  }
 0x460   : > { %7850 = vmatpush1.bf16.msra.mxu1 %v15168_v2  ;;  %7822 = vmatprep.subr.bf16.mxu0 %v15173_v4  ;;  %v15240_v2 = vld [vmem:[%s19936_s9 + $0x384] ss:$16 sps:$4 sm:$0xff]   ;;  %v15243_v4 = vld [vmem:[%s19936_s9 + $0x38c] ss:$16 sps:$4 sm:$0xff]  }
 0x461   : > { %7863 = vmatprep.subr.bf16.mxu1 %v15176_v5 }
 0x462   : > { %v6111_v52 = vpop.f32.mrf.mxu0 }
 0x463   : > { %v18790_v11 = vadd.f32 %v6111_v52, %v18649_v17  ;;  %v6152_v33 = vpop.f32.mrf.mxu1  ;;  %7823 = vmatpush2.bf16.msra.mxu0 %v15171_v8  ;;  %v15185_v17 = vld [vmem:[%s19936_s9 + $0x364] ss:$16 sps:$4 sm:$0xff]  }
 0x464   : > { %v18798_v12 = vadd.f32 %v6152_v33, %v18655_v20  ;;  %7864 = vmatpush2.bf16.msra.mxu1 %v15174_v51  ;;  %v6113_v16 = vpop.f32.mrf.mxu0  ;;  %7824 = vmatprep.subr.bf16.mxu0 %v15179_v10  ;;  %v15188_v20 = vld [vmem:[%s19936_s9 + $0x36c] ss:$16 sps:$4 sm:$0xff]   ;;  %v15238_v10 = vld [vmem:[%s19936_s9 + $0x380] ss:$16 sps:$4 sm:$0xff]   ;;  %v15241_v33 = vld [vmem:[%s19936_s9 + $0x388] ss:$16 sps:$4 sm:$0xff]  }
 0x465   : > { %v18807_v19 = vadd.f32 %v6113_v16, %v18668_v31  ;;  %v6154_v22 = vpop.f32.mrf.mxu1  ;;  %7865 = vmatprep.subr.bf16.mxu1 %v15182_v6  ;;  %v15183_v31 = vld [vmem:[%s19936_s9 + $0x360] ss:$16 sps:$4 sm:$0xff]  }
 0x466   : > { %v18813_v25 = vadd.f32 %v6154_v22, %v18674_v35  ;;  %v6115_v30 = vpop.f32.mrf.mxu0 }
 0x467   : > { %v6156_v26 = vpop.f32.mrf.mxu1  ;;  %7825 = vmatpush2.bf16.msra.mxu0 %v15177_v28  ;;  %v15247_v28 = vld [vmem:[%s19936_s9 + $0x4a4] ss:$16 sps:$4 sm:$0xff]   ;;  %v15245_v30 = vld [vmem:[%s19936_s9 + $0x4a0] ss:$16 sps:$4 sm:$0xff]  }
 0x468   : > { %7866 = vmatpush2.bf16.msra.mxu1 %v15180_v18  ;;  %v6116_v9 = vpop.f32.mrf.mxu0  ;;  %8129 = vmatprep.subr.bf16.mxu0 %v15185_v17  ;;  %v15250_v18 = vld [vmem:[%s19936_s9 + $0x4ac] ss:$16 sps:$4 sm:$0xff]  }
 0x469   : > { %v6157_v35 = vpop.f32.mrf.mxu1  ;;  %8170 = vmatprep.subr.bf16.mxu1 %v15188_v20 }
 0x46a   : > { %7827 = vmatmul.mubr.bf16.vlgmr.msra.gmra.mxu0 %v18662_v45  ;;  %v15251_v35 = vld [vmem:[%s19936_s9 + $0x480] ss:$16 sps:$4 sm:$0xff]  }
 0x46b   : > { %7868 = vmatmul.mubr.bf16.vlgmr.msra.gmra.mxu1 %v18662_v45  ;;  %8130 = vmatpush1.bf16.msra.mxu0 %v15183_v31  ;;  %v15201_v45 = vld [vmem:[%s19936_s9 + $0x32c] ss:$16 sps:$4 sm:$0xff]   ;;  %v15248_v31 = vld [vmem:[%s19936_s9 + $0x4a8] ss:$16 sps:$4 sm:$0xff]  }
 0x46c   : > { %13106 = vmatprep.mubr.msk.bf16.mxu0 %vm4436_vm8, %v7924_v41  ;;  %8171 = vmatpush1.bf16.msra.mxu1 %v15186_v38  ;;  %v15256_v38 = vld [vmem:[%s19936_s9 + $0x48c] ss:$16 sps:$4 sm:$0xff]  }
 0x46d   : > { %13107 = vmatprep.mubr.msk.bf16.mxu1 %vm4436_vm8, %v7924_v41  ;;  %8131 = vmatprep.subr.bf16.mxu0 %v15192_v0  ;;  %v15254_v0 = vld [vmem:[%s19936_s9 + $0x488] ss:$16 sps:$4 sm:$0xff]   ;;  %v15259_v41 = vld [vmem:[%s19936_s9 + $0x464] ss:$16 sps:$4 sm:$0xff]  }
 0x46e   : > { %8172 = vmatprep.subr.bf16.mxu1 %v15195_v34  ;;  %v15262_v34 = vld [vmem:[%s19936_s9 + $0x46c] ss:$16 sps:$4 sm:$0xff]  }
 0x46f   : > { %8132 = vmatpush1.bf16.msra.mxu0 %v15190_v36  ;;  %v15257_v36 = vld [vmem:[%s19936_s9 + $0x460] ss:$16 sps:$4 sm:$0xff]  }
 0x470   : > { %8173 = vmatpush1.bf16.msra.mxu1 %v15193_v43  ;;  %8133 = vmatprep.subr.bf16.mxu0 %v15198_v32  ;;  %v15260_v43 = vld [vmem:[%s19936_s9 + $0x468] ss:$16 sps:$4 sm:$0xff]   ;;  %v15265_v32 = vld [vmem:[%s19936_s9 + $0x444] ss:$16 sps:$4 sm:$0xff]  }
 0x471   : > { %8174 = vmatprep.subr.bf16.mxu1 %v15201_v45  ;;  %v15268_v45 = vld [vmem:[%s19936_s9 + $0x44c] ss:$16 sps:$4 sm:$0xff]  }
 0x473   : > { %8134 = vmatpush1.bf16.msra.mxu0 %v15196_v37  ;;  %v15263_v37 = vld [vmem:[%s19936_s9 + $0x440] ss:$16 sps:$4 sm:$0xff]  }
 0x474   : > { %8175 = vmatpush1.bf16.msra.mxu1 %v15199_v23  ;;  %8135 = vmatprep.subr.bf16.mxu0 %v15204_v42  ;;  %v15266_v23 = vld [vmem:[%s19936_s9 + $0x448] ss:$16 sps:$4 sm:$0xff]   ;;  %v15271_v42 = vld [vmem:[%s19936_s9 + $0x424] ss:$16 sps:$4 sm:$0xff]  }
 0x475   : > { %8176 = vmatprep.subr.bf16.mxu1 %v15207_v39  ;;  %v15274_v39 = vld [vmem:[%s19936_s9 + $0x42c] ss:$16 sps:$4 sm:$0xff]  }
 0x477   : > { %8136 = vmatpush1.bf16.msra.mxu0 %v15202_v46  ;;  %v15269_v46 = vld [vmem:[%s19936_s9 + $0x420] ss:$16 sps:$4 sm:$0xff]  }
 0x478   : > { %8177 = vmatpush1.bf16.msra.mxu1 %v15205_v40  ;;  %8137 = vmatprep.subr.bf16.mxu0 %v15210_v44  ;;  %v15272_v40 = vld [vmem:[%s19936_s9 + $0x428] ss:$16 sps:$4 sm:$0xff]   ;;  %v15277_v44 = vld [vmem:[%s19936_s9 + $0x404] ss:$16 sps:$4 sm:$0xff]  }
 0x479   : > { %8178 = vmatprep.subr.bf16.mxu1 %v15213_v29  ;;  %v15280_v29 = vld [vmem:[%s19936_s9 + $0x40c] ss:$16 sps:$4 sm:$0xff]  }
 0x47b   : > { %8138 = vmatpush1.bf16.msra.mxu0 %v15208_v62  ;;  %v15275_v62 = vld [vmem:[%s19936_s9 + $0x400] ss:$16 sps:$4 sm:$0xff]  }
 0x47c   : > { %8179 = vmatpush1.bf16.msra.mxu1 %v15211_v15  ;;  %8139 = vmatprep.subr.bf16.mxu0 %v15216_v14  ;;  %v15278_v15 = vld [vmem:[%s19936_s9 + $0x408] ss:$16 sps:$4 sm:$0xff]   ;;  %v15283_v14 = vld [vmem:[%s19936_s9 + $0x3e4] ss:$16 sps:$4 sm:$0xff]  }
 0x47d   : > { %8180 = vmatprep.subr.bf16.mxu1 %v15219_v48  ;;  %v15286_v48 = vld [vmem:[%s19936_s9 + $0x3ec] ss:$16 sps:$4 sm:$0xff]  }
 0x47f   : > { %8140 = vmatpush1.bf16.msra.mxu0 %v15214_v47  ;;  %v15281_v47 = vld [vmem:[%s19936_s9 + $0x3e0] ss:$16 sps:$4 sm:$0xff]  }
 0x480   : > { %8181 = vmatpush1.bf16.msra.mxu1 %v15217_v49  ;;  %8141 = vmatprep.subr.bf16.mxu0 %v15222_v7  ;;  %v15284_v49 = vld [vmem:[%s19936_s9 + $0x3e8] ss:$16 sps:$4 sm:$0xff]   ;;  %v15289_v7 = vld [vmem:[%s19936_s9 + $0x3c4] ss:$16 sps:$4 sm:$0xff]  }
 0x481   : > { %8182 = vmatprep.subr.bf16.mxu1 %v15225_v50  ;;  %v15292_v50 = vld [vmem:[%s19936_s9 + $0x3cc] ss:$16 sps:$4 sm:$0xff]  }
 0x483   : > { %8142 = vmatpush1.bf16.msra.mxu0 %v15220_v53  ;;  %v15287_v53 = vld [vmem:[%s19936_s9 + $0x3c0] ss:$16 sps:$4 sm:$0xff]  }
 0x484   : > { %8183 = vmatpush1.bf16.msra.mxu1 %v15223_v54  ;;  %8143 = vmatprep.subr.bf16.mxu0 %v15228_v55  ;;  %v15290_v54 = vld [vmem:[%s19936_s9 + $0x3c8] ss:$16 sps:$4 sm:$0xff]   ;;  %v15295_v55 = vld [vmem:[%s19936_s9 + $0x4e4] ss:$16 sps:$4 sm:$0xff]  }
 0x485   : > { %8184 = vmatprep.subr.bf16.mxu1 %v15231_v56  ;;  %v15298_v56 = vld [vmem:[%s19936_s9 + $0x4ec] ss:$16 sps:$4 sm:$0xff]  }
 0x487   : > { %8144 = vmatpush1.bf16.msra.mxu0 %v15226_v57  ;;  %v15293_v57 = vld [vmem:[%s19936_s9 + $0x4e0] ss:$16 sps:$4 sm:$0xff]  }
 0x488   : > { %8185 = vmatpush1.bf16.msra.mxu1 %v15229_v58  ;;  %8157 = vmatprep.subr.bf16.mxu0 %v15234_v59  ;;  %v15296_v58 = vld [vmem:[%s19936_s9 + $0x4e8] ss:$16 sps:$4 sm:$0xff]   ;;  %v15301_v59 = vld [vmem:[%s19936_s9 + $0x4c4] ss:$16 sps:$4 sm:$0xff]  }
 0x489   : > { %8198 = vmatprep.subr.bf16.mxu1 %v15237_v60  ;;  %v15304_v60 = vld [vmem:[%s19936_s9 + $0x4cc] ss:$16 sps:$4 sm:$0xff]  }
 0x48a   : > { %v6450_v5 = vpop.f32.mrf.mxu0 }
 0x48b   : > { %v18933_v8 = vadd.f32 %v6450_v5, %v18790_v11  ;;  %v6491_v51 = vpop.f32.mrf.mxu1  ;;  %8158 = vmatpush2.bf16.msra.mxu0 %v15232_v61  ;;  %v18946_v11 = vcombine.low %v18795_v13, %v18795_v13  ;;  %v8261_v13 = vshrl.u32 %v18817_v27, 16  ;;  %v15253_v27 = vld [vmem:[%s19936_s9 + $0x484] ss:$16 sps:$4 sm:$0xff]  }
 0x48c   : > { %v18939_v6 = vadd.f32 %v6491_v51, %v18798_v12  ;;  %8199 = vmatpush2.bf16.msra.mxu1 %v15235_v63  ;;  %v6452_v52 = vpop.f32.mrf.mxu0  ;;  %8159 = vmatprep.subr.bf16.mxu0 %v15240_v2  ;;  %v19078_v5 = vld [vmem:[#allocation4] sm:$0x44] }
 0x48d   : > { %v18952_v16 = vadd.f32 %v6452_v52, %v18807_v19  ;;  %v6493_v12 = vpop.f32.mrf.mxu1  ;;  %8200 = vmatprep.subr.bf16.mxu1 %v15243_v4  ;;  %v7923_v26 = vrot.slane %v18946_v11, 1  ;;  %v8263_v9 = vrot.slane %v8261_v13, 1  ;;  %v15299_v4 = vld [vmem:[%s19936_s9 + $0x4c0] ss:$16 sps:$4 sm:$0xff]   ;;  %v15302_v52 = vld [vmem:[%s19936_s9 + $0x4c8] ss:$16 sps:$4 sm:$0xff]  }
 0x48e   : > { %v18958_v17 = vadd.f32 %v6493_v12, %v18813_v25  ;;  %v6454_v22 = vpop.f32.mrf.mxu0 }
 0x48f   : > { %v6495_v20 = vpop.f32.mrf.mxu1  ;;  %8160 = vmatpush2.bf16.msra.mxu0 %v15238_v10 }
 0x490   : > { %8201 = vmatpush2.bf16.msra.mxu1 %v15241_v33  ;;  %v6455_v19 = vpop.f32.mrf.mxu0  ;;  %8468 = vmatprep.subr.bf16.mxu0 %v15247_v28  ;;  %v15307_v33 = vld [vmem:[%s19936_s9 + $0x5e4] ss:$16 sps:$4 sm:$0xff]  }
 0x491   : > { %v6496_v25 = vpop.f32.mrf.mxu1  ;;  %8509 = vmatprep.subr.bf16.mxu1 %v15250_v18 }
 0x492   : > { %8162 = vmatmul.mubr.bf16.vlgmr.msra.gmra.mxu0 %v7923_v26  ;;  %v15317_v25 = vld [vmem:[%s19936_s9 + $0x5cc] ss:$16 sps:$4 sm:$0xff]  }
 0x493   : > { %8203 = vmatmul.mubr.bf16.vlgmr.msra.gmra.mxu1 %v7923_v26  ;;  %8469 = vmatpush1.bf16.msra.mxu0 %v15245_v30  ;;  %v15314_v26 = vld [vmem:[%s19936_s9 + $0x5c4] ss:$16 sps:$4 sm:$0xff]  }
 0x494   : > { %13188 = vmatprep.mubr.msk.bf16.mxu0 %vm4436_vm8, %v8263_v9  ;;  %8510 = vmatpush1.bf16.msra.mxu1 %v15248_v31 }
 0x495   : > { %13189 = vmatprep.mubr.msk.bf16.mxu1 %vm4436_vm8, %v8263_v9  ;;  %8470 = vmatprep.subr.bf16.mxu0 %v15253_v27  ;;  %v15312_v27 = vld [vmem:[%s19936_s9 + $0x5c0] ss:$16 sps:$4 sm:$0xff]   ;;  %v15315_v9 = vld [vmem:[%s19936_s9 + $0x5c8] ss:$16 sps:$4 sm:$0xff]  }
 0x496   : > { %8511 = vmatprep.subr.bf16.mxu1 %v15256_v38  ;;  %v15320_v38 = vld [vmem:[%s19936_s9 + $0x5a4] ss:$16 sps:$4 sm:$0xff]  }
 0x497   : > { %8471 = vmatpush1.bf16.msra.mxu0 %v15251_v35  ;;  %v15323_v35 = vld [vmem:[%s19936_s9 + $0x5ac] ss:$16 sps:$4 sm:$0xff]  }
 0x498   : > { %8512 = vmatpush1.bf16.msra.mxu1 %v15254_v0  ;;  %8472 = vmatprep.subr.bf16.mxu0 %v15259_v41  ;;  %v15318_v0 = vld [vmem:[%s19936_s9 + $0x5a0] ss:$16 sps:$4 sm:$0xff]   ;;  %v15321_v41 = vld [vmem:[%s19936_s9 + $0x5a8] ss:$16 sps:$4 sm:$0xff]  }
 0x499   : > { %8513 = vmatprep.subr.bf16.mxu1 %v15262_v34  ;;  %v15326_v34 = vld [vmem:[%s19936_s9 + $0x584] ss:$16 sps:$4 sm:$0xff]  }
 0x49b   : > { %8473 = vmatpush1.bf16.msra.mxu0 %v15257_v36  ;;  %v15329_v36 = vld [vmem:[%s19936_s9 + $0x58c] ss:$16 sps:$4 sm:$0xff]  }
 0x49c   : > { %8514 = vmatpush1.bf16.msra.mxu1 %v15260_v43  ;;  %8474 = vmatprep.subr.bf16.mxu0 %v15265_v32  ;;  %v15324_v43 = vld [vmem:[%s19936_s9 + $0x580] ss:$16 sps:$4 sm:$0xff]   ;;  %v15327_v32 = vld [vmem:[%s19936_s9 + $0x588] ss:$16 sps:$4 sm:$0xff]  }
 0x49d   : > { %8515 = vmatprep.subr.bf16.mxu1 %v15268_v45  ;;  %v15332_v45 = vld [vmem:[%s19936_s9 + $0x564] ss:$16 sps:$4 sm:$0xff]  }
 0x49f   : > { %8475 = vmatpush1.bf16.msra.mxu0 %v15263_v37  ;;  %v15335_v37 = vld [vmem:[%s19936_s9 + $0x56c] ss:$16 sps:$4 sm:$0xff]  }
 0x4a0   : > { %8516 = vmatpush1.bf16.msra.mxu1 %v15266_v23  ;;  %8476 = vmatprep.subr.bf16.mxu0 %v15271_v42  ;;  %v15330_v23 = vld [vmem:[%s19936_s9 + $0x560] ss:$16 sps:$4 sm:$0xff]   ;;  %v15333_v42 = vld [vmem:[%s19936_s9 + $0x568] ss:$16 sps:$4 sm:$0xff]  }
 0x4a1   : > { %8517 = vmatprep.subr.bf16.mxu1 %v15274_v39  ;;  %v15338_v39 = vld [vmem:[%s19936_s9 + $0x544] ss:$16 sps:$4 sm:$0xff]  }
 0x4a3   : > { %8477 = vmatpush1.bf16.msra.mxu0 %v15269_v46  ;;  %v15341_v46 = vld [vmem:[%s19936_s9 + $0x54c] ss:$16 sps:$4 sm:$0xff]  }
 0x4a4   : > { %8518 = vmatpush1.bf16.msra.mxu1 %v15272_v40  ;;  %8478 = vmatprep.subr.bf16.mxu0 %v15277_v44  ;;  %v15336_v40 = vld [vmem:[%s19936_s9 + $0x540] ss:$16 sps:$4 sm:$0xff]   ;;  %v15339_v44 = vld [vmem:[%s19936_s9 + $0x548] ss:$16 sps:$4 sm:$0xff]  }
 0x4a5   : > { %8519 = vmatprep.subr.bf16.mxu1 %v15280_v29  ;;  %v15344_v29 = vld [vmem:[%s19936_s9 + $0x524] ss:$16 sps:$4 sm:$0xff]  }
 0x4a7   : > { %8479 = vmatpush1.bf16.msra.mxu0 %v15275_v62  ;;  %v15347_v62 = vld [vmem:[%s19936_s9 + $0x52c] ss:$16 sps:$4 sm:$0xff]  }
 0x4a8   : > { %8520 = vmatpush1.bf16.msra.mxu1 %v15278_v15  ;;  %8480 = vmatprep.subr.bf16.mxu0 %v15283_v14  ;;  %v15342_v15 = vld [vmem:[%s19936_s9 + $0x520] ss:$16 sps:$4 sm:$0xff]   ;;  %v15345_v14 = vld [vmem:[%s19936_s9 + $0x528] ss:$16 sps:$4 sm:$0xff]  }
 0x4a9   : > { %8521 = vmatprep.subr.bf16.mxu1 %v15286_v48  ;;  %v15350_v48 = vld [vmem:[%s19936_s9 + $0x504] ss:$16 sps:$4 sm:$0xff]  }
 0x4ab   : > { %8481 = vmatpush1.bf16.msra.mxu0 %v15281_v47  ;;  %v15353_v47 = vld [vmem:[%s19936_s9 + $0x50c] ss:$16 sps:$4 sm:$0xff]  }
 0x4ac   : > { %8522 = vmatpush1.bf16.msra.mxu1 %v15284_v49  ;;  %8482 = vmatprep.subr.bf16.mxu0 %v15289_v7  ;;  %v15348_v49 = vld [vmem:[%s19936_s9 + $0x500] ss:$16 sps:$4 sm:$0xff]   ;;  %v15351_v7 = vld [vmem:[%s19936_s9 + $0x508] ss:$16 sps:$4 sm:$0xff]  }
 0x4ad   : > { %8523 = vmatprep.subr.bf16.mxu1 %v15292_v50  ;;  %v15356_v50 = vld [vmem:[%s19936_s9 + $0x624] ss:$16 sps:$4 sm:$0xff]  }
 0x4af   : > { %8483 = vmatpush1.bf16.msra.mxu0 %v15287_v53  ;;  %v15359_v53 = vld [vmem:[%s19936_s9 + $0x62c] ss:$16 sps:$4 sm:$0xff]  }
 0x4b0   : > { %8524 = vmatpush1.bf16.msra.mxu1 %v15290_v54  ;;  %8496 = vmatprep.subr.bf16.mxu0 %v15295_v55  ;;  %v15354_v54 = vld [vmem:[%s19936_s9 + $0x620] ss:$16 sps:$4 sm:$0xff]   ;;  %v15357_v55 = vld [vmem:[%s19936_s9 + $0x628] ss:$16 sps:$4 sm:$0xff]  }
 0x4b1   : > { %8537 = vmatprep.subr.bf16.mxu1 %v15298_v56  ;;  %v15362_v56 = vld [vmem:[%s19936_s9 + $0x604] ss:$16 sps:$4 sm:$0xff]  }
 0x4b2   : > { %v6789_v61 = vpop.f32.mrf.mxu0 }
 0x4b3   : > { %v19073_v63 = vadd.f32 %v6789_v61, %v18933_v8  ;;  %v6830_v2 = vpop.f32.mrf.mxu1  ;;  %8497 = vmatpush2.bf16.msra.mxu0 %v15293_v57  ;;  %v8257_v8 = vshrl.u32 %v18946_v11, 16  ;;  %v19101_v11 = vcombine.high %v19078_v5, %v19078_v5  ;;  %v15365_v57 = vld [vmem:[%s19936_s9 + $0x60c] ss:$16 sps:$4 sm:$0xff]   ;;  %v15360_v61 = vld [vmem:[%s19936_s9 + $0x600] ss:$16 sps:$4 sm:$0xff]  }
 0x4b4   : > { %v19081_v51 = vadd.f32 %v6830_v2, %v18939_v6  ;;  %8538 = vmatpush2.bf16.msra.mxu1 %v15296_v58  ;;  %v6791_v10 = vpop.f32.mrf.mxu0  ;;  %8498 = vmatprep.subr.bf16.mxu0 %v15301_v59  ;;  %v15310_v6 = vld [vmem:[%s19936_s9 + $0x5ec] ss:$16 sps:$4 sm:$0xff]  }
 0x4b5   : > { %v19091_v28 = vadd.f32 %v6791_v10, %v18952_v16  ;;  %v6832_v12 = vpop.f32.mrf.mxu1  ;;  %8539 = vmatprep.subr.bf16.mxu1 %v15304_v60  ;;  %v15305_v16 = vld [vmem:[%s19936_s9 + $0x5e0] ss:$16 sps:$4 sm:$0xff]   ;;  %v8259_v30 = vrot.slane %v8257_v8, 1  ;;  %v8602_v31 = vrot.slane %v19101_v11, 2  ;;  %v15363_v10 = vld [vmem:[%s19936_s9 + $0x608] ss:$16 sps:$4 sm:$0xff]  }
 0x4b6   : > { %v19097_v18 = vadd.f32 %v6832_v12, %v18958_v17  ;;  %v6793_v22 = vpop.f32.mrf.mxu0  ;;  %v15308_v17 = vld [vmem:[%s19936_s9 + $0x5e8] ss:$16 sps:$4 sm:$0xff]  }
 0x4b7   : > { %v6834_v13 = vpop.f32.mrf.mxu1  ;;  %8499 = vmatpush2.bf16.msra.mxu0 %v15299_v4 }
 0x4b8   : > { %8540 = vmatpush2.bf16.msra.mxu1 %v15302_v52  ;;  %v6794_v20 = vpop.f32.mrf.mxu0  ;;  %8807 = vmatprep.subr.bf16.mxu0 %v15307_v33  ;;  %v15369_v52 = vld [vmem:[%s19936_s9 + $0x724] ss:$16 sps:$4 sm:$0xff]   ;;  %v15372_v33 = vld [vmem:[%s19936_s9 + $0x72c] ss:$16 sps:$4 sm:$0xff]   ;;  %v15367_v13 = vld [vmem:[%s19936_s9 + $0x720] ss:$16 sps:$4 sm:$0xff]  }
 0x4b9   : > { %v6835_v19 = vpop.f32.mrf.mxu1  ;;  %8848 = vmatprep.subr.bf16.mxu1 %v15310_v6  ;;  %v15370_v20 = vld [vmem:[%s19936_s9 + $0x728] ss:$16 sps:$4 sm:$0xff]  }
 0x4ba   : > { %8501 = vmatmul.mubr.bf16.vlgmr.msra.gmra.mxu0 %v8259_v30  ;;  %v15373_v19 = vld [vmem:[%s19936_s9 + $0x700] ss:$16 sps:$4 sm:$0xff]  }
 0x4bb   : > { %8542 = vmatmul.mubr.bf16.vlgmr.msra.gmra.mxu1 %v8259_v30  ;;  %8808 = vmatpush1.bf16.msra.mxu0 %v15305_v16 }
 0x4bc   : > { %13272 = vmatprep.mubr.msk.bf16.mxu0 %vm4436_vm8, %v8602_v31  ;;  %8849 = vmatpush1.bf16.msra.mxu1 %v15308_v17  ;;  %v15378_v17 = vld [vmem:[%s19936_s9 + $0x70c] ss:$16 sps:$4 sm:$0xff]  }
 0x4bd   : > { %13273 = vmatprep.mubr.msk.bf16.mxu1 %vm4436_vm8, %v8602_v31  ;;  %8809 = vmatprep.subr.bf16.mxu0 %v15314_v26  ;;  %v15376_v26 = vld [vmem:[%s19936_s9 + $0x708] ss:$16 sps:$4 sm:$0xff]   ;;  %v15381_v31 = vld [vmem:[%s19936_s9 + $0x6e4] ss:$16 sps:$4 sm:$0xff]  }
 0x4be   : > { %8850 = vmatprep.subr.bf16.mxu1 %v15317_v25  ;;  %v15384_v25 = vld [vmem:[%s19936_s9 + $0x6ec] ss:$16 sps:$4 sm:$0xff]  }
 0x4bf   : > { %8810 = vmatpush1.bf16.msra.mxu0 %v15312_v27  ;;  %v15379_v27 = vld [vmem:[%s19936_s9 + $0x6e0] ss:$16 sps:$4 sm:$0xff]  }
 0x4c0   : > { %8851 = vmatpush1.bf16.msra.mxu1 %v15315_v9  ;;  %8811 = vmatprep.subr.bf16.mxu0 %v15320_v38  ;;  %v15382_v9 = vld [vmem:[%s19936_s9 + $0x6e8] ss:$16 sps:$4 sm:$0xff]   ;;  %v15387_v38 = vld [vmem:[%s19936_s9 + $0x6c4] ss:$16 sps:$4 sm:$0xff]  }
 0x4c1   : > { %8852 = vmatprep.subr.bf16.mxu1 %v15323_v35  ;;  %v15390_v35 = vld [vmem:[%s19936_s9 + $0x6cc] ss:$16 sps:$4 sm:$0xff]  }
 0x4c3   : > { %8812 = vmatpush1.bf16.msra.mxu0 %v15318_v0  ;;  %v15385_v0 = vld [vmem:[%s19936_s9 + $0x6c0] ss:$16 sps:$4 sm:$0xff]  }
 0x4c4   : > { %8853 = vmatpush1.bf16.msra.mxu1 %v15321_v41  ;;  %8813 = vmatprep.subr.bf16.mxu0 %v15326_v34  ;;  %v15388_v41 = vld [vmem:[%s19936_s9 + $0x6c8] ss:$16 sps:$4 sm:$0xff]   ;;  %v15393_v34 = vld [vmem:[%s19936_s9 + $0x6a4] ss:$16 sps:$4 sm:$0xff]  }
 0x4c5   : > { %8854 = vmatprep.subr.bf16.mxu1 %v15329_v36  ;;  %v15396_v36 = vld [vmem:[%s19936_s9 + $0x6ac] ss:$16 sps:$4 sm:$0xff]  }
 0x4c7   : > { %8814 = vmatpush1.bf16.msra.mxu0 %v15324_v43  ;;  %v15391_v43 = vld [vmem:[%s19936_s9 + $0x6a0] ss:$16 sps:$4 sm:$0xff]  }
 0x4c8   : > { %8855 = vmatpush1.bf16.msra.mxu1 %v15327_v32  ;;  %8815 = vmatprep.subr.bf16.mxu0 %v15332_v45  ;;  %v15394_v32 = vld [vmem:[%s19936_s9 + $0x6a8] ss:$16 sps:$4 sm:$0xff]   ;;  %v15399_v45 = vld [vmem:[%s19936_s9 + $0x684] ss:$16 sps:$4 sm:$0xff]  }
 0x4c9   : > { %8856 = vmatprep.subr.bf16.mxu1 %v15335_v37  ;;  %v15402_v37 = vld [vmem:[%s19936_s9 + $0x68c] ss:$16 sps:$4 sm:$0xff]  }
 0x4cb   : > { %8816 = vmatpush1.bf16.msra.mxu0 %v15330_v23  ;;  %v15397_v23 = vld [vmem:[%s19936_s9 + $0x680] ss:$16 sps:$4 sm:$0xff]  }
 0x4cc   : > { %8857 = vmatpush1.bf16.msra.mxu1 %v15333_v42  ;;  %8817 = vmatprep.subr.bf16.mxu0 %v15338_v39  ;;  %v15400_v42 = vld [vmem:[%s19936_s9 + $0x688] ss:$16 sps:$4 sm:$0xff]   ;;  %v15405_v39 = vld [vmem:[%s19936_s9 + $0x664] ss:$16 sps:$4 sm:$0xff]  }
 0x4cd   : > { %8858 = vmatprep.subr.bf16.mxu1 %v15341_v46  ;;  %v15408_v46 = vld [vmem:[%s19936_s9 + $0x66c] ss:$16 sps:$4 sm:$0xff]  }
 0x4cf   : > { %8818 = vmatpush1.bf16.msra.mxu0 %v15336_v40  ;;  %v15403_v40 = vld [vmem:[%s19936_s9 + $0x660] ss:$16 sps:$4 sm:$0xff]  }
 0x4d0   : > { %8859 = vmatpush1.bf16.msra.mxu1 %v15339_v44  ;;  %8819 = vmatprep.subr.bf16.mxu0 %v15344_v29  ;;  %v15406_v44 = vld [vmem:[%s19936_s9 + $0x668] ss:$16 sps:$4 sm:$0xff]   ;;  %v15411_v29 = vld [vmem:[%s19936_s9 + $0x644] ss:$16 sps:$4 sm:$0xff]  }
 0x4d1   : > { %8860 = vmatprep.subr.bf16.mxu1 %v15347_v62  ;;  %v15414_v62 = vld [vmem:[%s19936_s9 + $0x64c] ss:$16 sps:$4 sm:$0xff]  }
 0x4d3   : > { %8820 = vmatpush1.bf16.msra.mxu0 %v15342_v15  ;;  %v15409_v15 = vld [vmem:[%s19936_s9 + $0x640] ss:$16 sps:$4 sm:$0xff]  }
 0x4d4   : > { %8861 = vmatpush1.bf16.msra.mxu1 %v15345_v14  ;;  %8821 = vmatprep.subr.bf16.mxu0 %v15350_v48  ;;  %v15412_v14 = vld [vmem:[%s19936_s9 + $0x648] ss:$16 sps:$4 sm:$0xff]   ;;  %v15417_v48 = vld [vmem:[%s19936_s9 + $0x764] ss:$16 sps:$4 sm:$0xff]  }
 0x4d5   : > { %8862 = vmatprep.subr.bf16.mxu1 %v15353_v47  ;;  %v15420_v47 = vld [vmem:[%s19936_s9 + $0x76c] ss:$16 sps:$4 sm:$0xff]  }
 0x4d7   : > { %8822 = vmatpush1.bf16.msra.mxu0 %v15348_v49  ;;  %v15415_v49 = vld [vmem:[%s19936_s9 + $0x760] ss:$16 sps:$4 sm:$0xff]  }
 0x4d8   : > { %8863 = vmatpush1.bf16.msra.mxu1 %v15351_v7  ;;  %8835 = vmatprep.subr.bf16.mxu0 %v15356_v50  ;;  %v15418_v7 = vld [vmem:[%s19936_s9 + $0x768] ss:$16 sps:$4 sm:$0xff]   ;;  %v15423_v50 = vld [vmem:[%s19936_s9 + $0x744] ss:$16 sps:$4 sm:$0xff]  }
 0x4d9   : > { %8876 = vmatprep.subr.bf16.mxu1 %v15359_v53  ;;  %v15426_v53 = vld [vmem:[%s19936_s9 + $0x74c] ss:$16 sps:$4 sm:$0xff]  }
 0x4da   : > { %v7126_v58 = vpop.f32.mrf.mxu0 }
 0x4db   : > { %v19215_v59 = vadd.f32 %v7126_v58, %v19073_v63  ;;  %v7167_v60 = vpop.f32.mrf.mxu1  ;;  %8836 = vmatpush2.bf16.msra.mxu0 %v15354_v54  ;;  %v19228_v63 = vcombine.low %v19078_v5, %v19078_v5  ;;  %v8939_v5 = vshrl.u32 %v19101_v11, 16  ;;  %v15375_v11 = vld [vmem:[%s19936_s9 + $0x704] ss:$16 sps:$4 sm:$0xff]  }
 0x4dc   : > { %v19221_v2 = vadd.f32 %v7167_v60, %v19081_v51  ;;  %8877 = vmatpush2.bf16.msra.mxu1 %v15357_v55  ;;  %v7128_v4 = vpop.f32.mrf.mxu0  ;;  %8837 = vmatprep.subr.bf16.mxu0 %v15362_v56  ;;  %v15421_v56 = vld [vmem:[%s19936_s9 + $0x740] ss:$16 sps:$4 sm:$0xff]   ;;  %v15424_v60 = vld [vmem:[%s19936_s9 + $0x748] ss:$16 sps:$4 sm:$0xff]  }
 0x4dd   : > { %v19234_v8 = vadd.f32 %v7128_v4, %v19091_v28  ;;  %v7169_v51 = vpop.f32.mrf.mxu1  ;;  %8878 = vmatprep.subr.bf16.mxu1 %v15365_v57  ;;  %v8601_v16 = vrot.slane %v19228_v63, 2  ;;  %v8941_v30 = vrot.slane %v8939_v5, 2  ;;  %v19361_v57 = vld [vmem:[#allocation4] sm:$0x88] }
 0x4de   : > { %v19240_v12 = vadd.f32 %v7169_v51, %v19097_v18  ;;  %v7130_v6 = vpop.f32.mrf.mxu0  ;;  %v15429_v4 = vld [vmem:[%s19936_s9 + $0x864] ss:$16 sps:$4 sm:$0xff]  }
 0x4df   : > { %v7171_v22 = vpop.f32.mrf.mxu1  ;;  %8838 = vmatpush2.bf16.msra.mxu0 %v15360_v61  ;;  %v8935_v61 = vshrl.u32 %v19228_v63, 16  ;;  %v15427_v63 = vld [vmem:[%s19936_s9 + $0x860] ss:$16 sps:$4 sm:$0xff]  }
 0x4e0   : > { %8879 = vmatpush2.bf16.msra.mxu1 %v15363_v10  ;;  %v7131_v28 = vpop.f32.mrf.mxu0  ;;  %9146 = vmatprep.subr.bf16.mxu0 %v15369_v52  ;;  %v15432_v52 = vld [vmem:[%s19936_s9 + $0x86c] ss:$16 sps:$4 sm:$0xff]  }
 0x4e1   : > { %v7172_v18 = vpop.f32.mrf.mxu1  ;;  %9187 = vmatprep.subr.bf16.mxu1 %v15372_v33  ;;  %v19379_v33 = vcombine.high %v19361_v57, %v19361_v57  ;;  %v8937_v22 = vrot.slane %v8935_v61, 2 }
 0x4e2   : > { %8840 = vmatmul.mubr.bf16.vlgmr.msra.gmra.mxu0 %v8601_v16  ;;  %v15439_v18 = vld [vmem:[%s19936_s9 + $0x84c] ss:$16 sps:$4 sm:$0xff]  }
 0x4e3   : > { %8881 = vmatmul.mubr.bf16.vlgmr.msra.gmra.mxu1 %v8601_v16  ;;  %9147 = vmatpush1.bf16.msra.mxu0 %v15367_v13  ;;  %v15430_v13 = vld [vmem:[%s19936_s9 + $0x868] ss:$16 sps:$4 sm:$0xff]   ;;  %v15436_v16 = vld [vmem:[%s19936_s9 + $0x844] ss:$16 sps:$4 sm:$0xff]  }
 0x4e4   : > { %13354 = vmatprep.mubr.msk.bf16.mxu0 %vm4436_vm8, %v8941_v30  ;;  %9188 = vmatpush1.bf16.msra.mxu1 %v15370_v20  ;;  %v9280_v20 = vrot.slane %v19379_v33, 3 }
 0x4e5   : > { %13355 = vmatprep.mubr.msk.bf16.mxu1 %vm4436_vm8, %v8941_v30  ;;  %9148 = vmatprep.subr.bf16.mxu0 %v15375_v11  ;;  %v15434_v11 = vld [vmem:[%s19936_s9 + $0x840] ss:$16 sps:$4 sm:$0xff]   ;;  %v15437_v30 = vld [vmem:[%s19936_s9 + $0x848] ss:$16 sps:$4 sm:$0xff]  }
 0x4e6   : > { %9189 = vmatprep.subr.bf16.mxu1 %v15378_v17  ;;  %v15442_v17 = vld [vmem:[%s19936_s9 + $0x824] ss:$16 sps:$4 sm:$0xff]  }
 0x4e7   : > { %9149 = vmatpush1.bf16.msra.mxu0 %v15373_v19  ;;  %v15445_v19 = vld [vmem:[%s19936_s9 + $0x82c] ss:$16 sps:$4 sm:$0xff]  }
 0x4e8   : > { %9190 = vmatpush1.bf16.msra.mxu1 %v15376_v26  ;;  %9150 = vmatprep.subr.bf16.mxu0 %v15381_v31  ;;  %v15440_v26 = vld [vmem:[%s19936_s9 + $0x820] ss:$16 sps:$4 sm:$0xff]   ;;  %v15443_v31 = vld [vmem:[%s19936_s9 + $0x828] ss:$16 sps:$4 sm:$0xff]  }
 0x4e9   : > { %9191 = vmatprep.subr.bf16.mxu1 %v15384_v25  ;;  %v15448_v25 = vld [vmem:[%s19936_s9 + $0x804] ss:$16 sps:$4 sm:$0xff]  }
 0x4eb   : > { %9151 = vmatpush1.bf16.msra.mxu0 %v15379_v27  ;;  %v15451_v27 = vld [vmem:[%s19936_s9 + $0x80c] ss:$16 sps:$4 sm:$0xff]  }
 0x4ec   : > { %9192 = vmatpush1.bf16.msra.mxu1 %v15382_v9  ;;  %9152 = vmatprep.subr.bf16.mxu0 %v15387_v38  ;;  %v15446_v9 = vld [vmem:[%s19936_s9 + $0x800] ss:$16 sps:$4 sm:$0xff]   ;;  %v15449_v38 = vld [vmem:[%s19936_s9 + $0x808] ss:$16 sps:$4 sm:$0xff]  }
 0x4ed   : > { %9193 = vmatprep.subr.bf16.mxu1 %v15390_v35  ;;  %v15454_v35 = vld [vmem:[%s19936_s9 + $0x7e4] ss:$16 sps:$4 sm:$0xff]  }
 0x4ef   : > { %9153 = vmatpush1.bf16.msra.mxu0 %v15385_v0  ;;  %v15457_v0 = vld [vmem:[%s19936_s9 + $0x7ec] ss:$16 sps:$4 sm:$0xff]  }
 0x4f0   : > { %9194 = vmatpush1.bf16.msra.mxu1 %v15388_v41  ;;  %9154 = vmatprep.subr.bf16.mxu0 %v15393_v34  ;;  %v15452_v41 = vld [vmem:[%s19936_s9 + $0x7e0] ss:$16 sps:$4 sm:$0xff]   ;;  %v15455_v34 = vld [vmem:[%s19936_s9 + $0x7e8] ss:$16 sps:$4 sm:$0xff]  }
 0x4f1   : > { %9195 = vmatprep.subr.bf16.mxu1 %v15396_v36  ;;  %v15460_v36 = vld [vmem:[%s19936_s9 + $0x7c4] ss:$16 sps:$4 sm:$0xff]  }
 0x4f3   : > { %9155 = vmatpush1.bf16.msra.mxu0 %v15391_v43  ;;  %v15463_v43 = vld [vmem:[%s19936_s9 + $0x7cc] ss:$16 sps:$4 sm:$0xff]  }
 0x4f4   : > { %9196 = vmatpush1.bf16.msra.mxu1 %v15394_v32  ;;  %9156 = vmatprep.subr.bf16.mxu0 %v15399_v45  ;;  %v15458_v32 = vld [vmem:[%s19936_s9 + $0x7c0] ss:$16 sps:$4 sm:$0xff]   ;;  %v15461_v45 = vld [vmem:[%s19936_s9 + $0x7c8] ss:$16 sps:$4 sm:$0xff]  }
 0x4f5   : > { %9197 = vmatprep.subr.bf16.mxu1 %v15402_v37  ;;  %v15466_v37 = vld [vmem:[%s19936_s9 + $0x7a4] ss:$16 sps:$4 sm:$0xff]  }
 0x4f7   : > { %9157 = vmatpush1.bf16.msra.mxu0 %v15397_v23  ;;  %v15469_v23 = vld [vmem:[%s19936_s9 + $0x7ac] ss:$16 sps:$4 sm:$0xff]  }
 0x4f8   : > { %9198 = vmatpush1.bf16.msra.mxu1 %v15400_v42  ;;  %9158 = vmatprep.subr.bf16.mxu0 %v15405_v39  ;;  %v15464_v42 = vld [vmem:[%s19936_s9 + $0x7a0] ss:$16 sps:$4 sm:$0xff]   ;;  %v15467_v39 = vld [vmem:[%s19936_s9 + $0x7a8] ss:$16 sps:$4 sm:$0xff]  }
 0x4f9   : > { %9199 = vmatprep.subr.bf16.mxu1 %v15408_v46  ;;  %v15472_v46 = vld [vmem:[%s19936_s9 + $0x784] ss:$16 sps:$4 sm:$0xff]  }
 0x4fb   : > { %9159 = vmatpush1.bf16.msra.mxu0 %v15403_v40  ;;  %v15475_v40 = vld [vmem:[%s19936_s9 + $0x78c] ss:$16 sps:$4 sm:$0xff]  }
 0x4fc   : > { %9200 = vmatpush1.bf16.msra.mxu1 %v15406_v44  ;;  %9160 = vmatprep.subr.bf16.mxu0 %v15411_v29  ;;  %v15470_v44 = vld [vmem:[%s19936_s9 + $0x780] ss:$16 sps:$4 sm:$0xff]   ;;  %v15473_v29 = vld [vmem:[%s19936_s9 + $0x788] ss:$16 sps:$4 sm:$0xff]  }
 0x4fd   : > { %9201 = vmatprep.subr.bf16.mxu1 %v15414_v62  ;;  %v15478_v62 = vld [vmem:[%s19936_s9 + $0x8a4] ss:$16 sps:$4 sm:$0xff]  }
 0x4ff   : > { %9161 = vmatpush1.bf16.msra.mxu0 %v15409_v15  ;;  %v15481_v15 = vld [vmem:[%s19936_s9 + $0x8ac] ss:$16 sps:$4 sm:$0xff]  }
 0x500   : > { %9202 = vmatpush1.bf16.msra.mxu1 %v15412_v14  ;;  %9174 = vmatprep.subr.bf16.mxu0 %v15417_v48  ;;  %v15476_v14 = vld [vmem:[%s19936_s9 + $0x8a0] ss:$16 sps:$4 sm:$0xff]   ;;  %v15479_v48 = vld [vmem:[%s19936_s9 + $0x8a8] ss:$16 sps:$4 sm:$0xff]  }
 0x501   : > { %9215 = vmatprep.subr.bf16.mxu1 %v15420_v47  ;;  %v15484_v47 = vld [vmem:[%s19936_s9 + $0x884] ss:$16 sps:$4 sm:$0xff]  }
 0x502   : > { %v19354_v54 = vpop.f32.mrf.mxu0 }
 0x503   : > { %v19356_v55 = vpop.f32.mrf.mxu1  ;;  %9175 = vmatpush2.bf16.msra.mxu0 %v15415_v49  ;;  %v15487_v49 = vld [vmem:[%s19936_s9 + $0x88c] ss:$16 sps:$4 sm:$0xff]  }
 0x504   : > { %9216 = vmatpush2.bf16.msra.mxu1 %v15418_v7  ;;  %v19363_v58 = vpop.f32.mrf.mxu0  ;;  %9176 = vmatprep.subr.bf16.mxu0 %v15423_v50 }
 0x505   : > { %v19372_v10 = vpop.f32.mrf.mxu1  ;;  %9217 = vmatprep.subr.bf16.mxu1 %v15426_v53 }
 0x506   : > { %v7547_v51 = vpop.f32.mrf.mxu0 }
 0x507   : > { %v7588_v6 = vpop.f32.mrf.mxu1  ;;  %9177 = vmatpush2.bf16.msra.mxu0 %v15421_v56  ;;  %v15482_v56 = vld [vmem:[%s19936_s9 + $0x880] ss:$16 sps:$4 sm:$0xff]  }
 0x508   : > { %9218 = vmatpush2.bf16.msra.mxu1 %v15424_v60  ;;  %v7548_v5 = vpop.f32.mrf.mxu0  ;;  %9485 = vmatprep.subr.bf16.mxu0 %v15429_v4  ;;  %v15485_v4 = vld [vmem:[%s19936_s9 + $0x888] ss:$16 sps:$4 sm:$0xff]   ;;  %v15494_v6 = vld [vmem:[%s19936_s9 + $0x9ac] ss:$16 sps:$4 sm:$0xff]  }
 0x509   : > { %v7589_v28 = vpop.f32.mrf.mxu1  ;;  %9526 = vmatprep.subr.bf16.mxu1 %v15432_v52  ;;  %v15491_v52 = vld [vmem:[%s19936_s9 + $0x9a4] ss:$16 sps:$4 sm:$0xff]  }
 0x50a   : > { %9179 = vmatmul.mubr.bf16.vlgmr.msra.gmra.mxu0 %v8937_v22 }
 0x50b   : > { %9220 = vmatmul.mubr.bf16.vlgmr.msra.gmra.mxu1 %v8937_v22  ;;  %9486 = vmatpush1.bf16.msra.mxu0 %v15427_v63 }
 0x50c   : > { %13438 = vmatprep.mubr.msk.bf16.mxu0 %vm4436_vm8, %v9280_v20  ;;  %9527 = vmatpush1.bf16.msra.mxu1 %v15430_v13  ;;  %v15489_v13 = vld [vmem:[%s19936_s9 + $0x9a0] ss:$16 sps:$4 sm:$0xff]  }
 0x50d   : > { %13439 = vmatprep.mubr.msk.bf16.mxu1 %vm4436_vm8, %v9280_v20  ;;  %9487 = vmatprep.subr.bf16.mxu0 %v15436_v16  ;;  %v15492_v16 = vld [vmem:[%s19936_s9 + $0x9a8] ss:$16 sps:$4 sm:$0xff]  }
 0x50e   : > { %9528 = vmatprep.subr.bf16.mxu1 %v15439_v18  ;;  %v15500_v18 = vld [vmem:[%s19936_s9 + $0x98c] ss:$16 sps:$4 sm:$0xff]  }
 0x50f   : > { %9488 = vmatpush1.bf16.msra.mxu0 %v15434_v11  ;;  %v15495_v11 = vld [vmem:[%s19936_s9 + $0x980] ss:$16 sps:$4 sm:$0xff]  }
 0x510   : > { %9529 = vmatpush1.bf16.msra.mxu1 %v15437_v30  ;;  %9489 = vmatprep.subr.bf16.mxu0 %v15442_v17  ;;  %v15498_v30 = vld [vmem:[%s19936_s9 + $0x988] ss:$16 sps:$4 sm:$0xff]   ;;  %v15503_v17 = vld [vmem:[%s19936_s9 + $0x964] ss:$16 sps:$4 sm:$0xff]  }
 0x511   : > { %9530 = vmatprep.subr.bf16.mxu1 %v15445_v19  ;;  %v15506_v19 = vld [vmem:[%s19936_s9 + $0x96c] ss:$16 sps:$4 sm:$0xff]  }
 0x513   : > { %9490 = vmatpush1.bf16.msra.mxu0 %v15440_v26  ;;  %v15501_v26 = vld [vmem:[%s19936_s9 + $0x960] ss:$16 sps:$4 sm:$0xff]  }
 0x514   : > { %9531 = vmatpush1.bf16.msra.mxu1 %v15443_v31  ;;  %9491 = vmatprep.subr.bf16.mxu0 %v15448_v25  ;;  %v15504_v31 = vld [vmem:[%s19936_s9 + $0x968] ss:$16 sps:$4 sm:$0xff]   ;;  %v15509_v25 = vld [vmem:[%s19936_s9 + $0x944] ss:$16 sps:$4 sm:$0xff]  }
 0x515   : > { %9532 = vmatprep.subr.bf16.mxu1 %v15451_v27  ;;  %v15512_v27 = vld [vmem:[%s19936_s9 + $0x94c] ss:$16 sps:$4 sm:$0xff]  }
 0x517   : > { %9492 = vmatpush1.bf16.msra.mxu0 %v15446_v9  ;;  %v15507_v9 = vld [vmem:[%s19936_s9 + $0x940] ss:$16 sps:$4 sm:$0xff]  }
 0x518   : > { %9533 = vmatpush1.bf16.msra.mxu1 %v15449_v38  ;;  %9493 = vmatprep.subr.bf16.mxu0 %v15454_v35  ;;  %v15510_v38 = vld [vmem:[%s19936_s9 + $0x948] ss:$16 sps:$4 sm:$0xff]   ;;  %v15515_v35 = vld [vmem:[%s19936_s9 + $0x924] ss:$16 sps:$4 sm:$0xff]  }
 0x519   : > { %9534 = vmatprep.subr.bf16.mxu1 %v15457_v0  ;;  %v15518_v0 = vld [vmem:[%s19936_s9 + $0x92c] ss:$16 sps:$4 sm:$0xff]  }
 0x51b   : > { %9494 = vmatpush1.bf16.msra.mxu0 %v15452_v41  ;;  %v15513_v41 = vld [vmem:[%s19936_s9 + $0x920] ss:$16 sps:$4 sm:$0xff]  }
 0x51c   : > { %9535 = vmatpush1.bf16.msra.mxu1 %v15455_v34  ;;  %9495 = vmatprep.subr.bf16.mxu0 %v15460_v36  ;;  %v15516_v34 = vld [vmem:[%s19936_s9 + $0x928] ss:$16 sps:$4 sm:$0xff]   ;;  %v15521_v36 = vld [vmem:[%s19936_s9 + $0x904] ss:$16 sps:$4 sm:$0xff]  }
 0x51d   : > { %9536 = vmatprep.subr.bf16.mxu1 %v15463_v43  ;;  %v15524_v43 = vld [vmem:[%s19936_s9 + $0x90c] ss:$16 sps:$4 sm:$0xff]  }
 0x51f   : > { %9496 = vmatpush1.bf16.msra.mxu0 %v15458_v32  ;;  %v15519_v32 = vld [vmem:[%s19936_s9 + $0x900] ss:$16 sps:$4 sm:$0xff]  }
 0x520   : > { %9537 = vmatpush1.bf16.msra.mxu1 %v15461_v45  ;;  %9497 = vmatprep.subr.bf16.mxu0 %v15466_v37  ;;  %v15522_v45 = vld [vmem:[%s19936_s9 + $0x908] ss:$16 sps:$4 sm:$0xff]   ;;  %v15527_v37 = vld [vmem:[%s19936_s9 + $0x8e4] ss:$16 sps:$4 sm:$0xff]  }
 0x521   : > { %9538 = vmatprep.subr.bf16.mxu1 %v15469_v23  ;;  %v15530_v23 = vld [vmem:[%s19936_s9 + $0x8ec] ss:$16 sps:$4 sm:$0xff]  }
 0x523   : > { %9498 = vmatpush1.bf16.msra.mxu0 %v15464_v42  ;;  %v15525_v42 = vld [vmem:[%s19936_s9 + $0x8e0] ss:$16 sps:$4 sm:$0xff]  }
 0x524   : > { %9539 = vmatpush1.bf16.msra.mxu1 %v15467_v39  ;;  %9499 = vmatprep.subr.bf16.mxu0 %v15472_v46  ;;  %v15528_v39 = vld [vmem:[%s19936_s9 + $0x8e8] ss:$16 sps:$4 sm:$0xff]   ;;  %v15533_v46 = vld [vmem:[%s19936_s9 + $0x8c4] ss:$16 sps:$4 sm:$0xff]  }
 0x525   : > { %9540 = vmatprep.subr.bf16.mxu1 %v15475_v40  ;;  %v15536_v40 = vld [vmem:[%s19936_s9 + $0x8cc] ss:$16 sps:$4 sm:$0xff]  }
 0x527   : > { %9500 = vmatpush1.bf16.msra.mxu0 %v15470_v44  ;;  %v15531_v44 = vld [vmem:[%s19936_s9 + $0x8c0] ss:$16 sps:$4 sm:$0xff]  }
 0x528   : > { %9541 = vmatpush1.bf16.msra.mxu1 %v15473_v29  ;;  %9513 = vmatprep.subr.bf16.mxu0 %v15478_v62  ;;  %v15534_v29 = vld [vmem:[%s19936_s9 + $0x8c8] ss:$16 sps:$4 sm:$0xff]   ;;  %v15539_v62 = vld [vmem:[%s19936_s9 + $0x9e4] ss:$16 sps:$4 sm:$0xff]  }
 0x529   : > { %9554 = vmatprep.subr.bf16.mxu1 %v15481_v15  ;;  %v15542_v15 = vld [vmem:[%s19936_s9 + $0x9ec] ss:$16 sps:$4 sm:$0xff]  }
 0x52a   : > { %v7828_v7 = vpop.f32.mrf.mxu0 }
 0x52b   : > { %v19493_v50 = vadd.f32 %v7828_v7, %v19354_v54  ;;  %v7869_v53 = vpop.f32.mrf.mxu1  ;;  %9514 = vmatpush2.bf16.msra.mxu0 %v15476_v14  ;;  %v19506_v54 = vcombine.low %v19361_v57, %v19361_v57  ;;  %v9617_v57 = vshrl.u32 %v19379_v33, 16  ;;  %v15497_v33 = vld [vmem:[%s19936_s9 + $0x984] ss:$16 sps:$4 sm:$0xff]   ;;  %v15537_v14 = vld [vmem:[%s19936_s9 + $0x9e0] ss:$16 sps:$4 sm:$0xff]  }
 0x52c   : > { %v19499_v60 = vadd.f32 %v7869_v53, %v19356_v55  ;;  %9555 = vmatpush2.bf16.msra.mxu1 %v15479_v48  ;;  %v7830_v61 = vpop.f32.mrf.mxu0  ;;  %9515 = vmatprep.subr.bf16.mxu0 %v15484_v47  ;;  %v15540_v48 = vld [vmem:[%s19936_s9 + $0x9e8] ss:$16 sps:$4 sm:$0xff]   ;;  %v15545_v47 = vld [vmem:[%s19936_s9 + $0x9c4] ss:$16 sps:$4 sm:$0xff]  }
 0x52d   : > { %v19512_v51 = vadd.f32 %v7830_v61, %v19363_v58  ;;  %v7871_v55 = vpop.f32.mrf.mxu1  ;;  %9556 = vmatprep.subr.bf16.mxu1 %v15487_v49  ;;  %v9279_v28 = vrot.slane %v19506_v54, 3  ;;  %v9619_v20 = vrot.slane %v9617_v57, 3  ;;  %v15548_v49 = vld [vmem:[%s19936_s9 + $0x9cc] ss:$16 sps:$4 sm:$0xff]   ;;  %v15543_v61 = vld [vmem:[%s19936_s9 + $0x9c0] ss:$16 sps:$4 sm:$0xff]  }
 0x52e   : > { %v19518_v63 = vadd.f32 %v7871_v55, %v19372_v10  ;;  %v7832_v5 = vpop.f32.mrf.mxu0  ;;  %v15546_v55 = vld [vmem:[%s19936_s9 + $0x9c8] ss:$16 sps:$4 sm:$0xff]  }
 0x52f   : > { %v7873_v22 = vpop.f32.mrf.mxu1  ;;  %9516 = vmatpush2.bf16.msra.mxu0 %v15482_v56 }
 0x530   : > { %9557 = vmatpush2.bf16.msra.mxu1 %v15485_v4  ;;  %v7833_v58 = vpop.f32.mrf.mxu0  ;;  %9824 = vmatprep.subr.bf16.mxu0 %v15491_v52 }
 0x531   : > { %v7874_v10 = vpop.f32.mrf.mxu1  ;;  %9865 = vmatprep.subr.bf16.mxu1 %v15494_v6  ;;  %v9613_v6 = vshrl.u32 %v19506_v54, 16  ;;  %v15549_v54 = vld [vmem:[%s19936_s9 + $0xae0] ss:$16 sps:$4 sm:$0xff]  }
 0x532   : > { %9518 = vmatmul.mubr.bf16.vlgmr.msra.gmra.mxu0 %v9279_v28  ;;  %v15552_v10 = vld [vmem:[%s19936_s9 + $0xae8] ss:$16 sps:$4 sm:$0xff]  }
 0x533   : > { %9559 = vmatmul.mubr.bf16.vlgmr.msra.gmra.mxu1 %v9279_v28  ;;  %9825 = vmatpush1.bf16.msra.mxu0 %v15489_v13  ;;  %v19660_v28 = vld [vmem:[#allocation4 + $0x8] sm:$0x11] }
 0x534   : > { %13520 = vmatprep.mubr.msk.bf16.mxu0 %vm4436_vm8, %v9619_v20  ;;  %9866 = vmatpush1.bf16.msra.mxu1 %v15492_v16  ;;  %v9615_v16 = vrot.slane %v9613_v6, 3 }
 0x535   : > { %13521 = vmatprep.mubr.msk.bf16.mxu1 %vm4436_vm8, %v9619_v20  ;;  %9826 = vmatprep.subr.bf16.mxu0 %v15497_v33  ;;  %v13563_v20 = vcombine.high %v19660_v28, %v19660_v28 }
 0x536   : > { %9867 = vmatprep.subr.bf16.mxu1 %v15500_v18  ;;  %v15561_v18 = vld [vmem:[%s19936_s9 + $0xacc] ss:$16 sps:$4 sm:$0xff]  }
 0x537   : > { %9827 = vmatpush1.bf16.msra.mxu0 %v15495_v11  ;;  %v15556_v11 = vld [vmem:[%s19936_s9 + $0xac0] ss:$16 sps:$4 sm:$0xff]  }
 0x538   : > { %9868 = vmatpush1.bf16.msra.mxu1 %v15498_v30  ;;  %9828 = vmatprep.subr.bf16.mxu0 %v15503_v17  ;;  %v15559_v30 = vld [vmem:[%s19936_s9 + $0xac8] ss:$16 sps:$4 sm:$0xff]   ;;  %v15564_v17 = vld [vmem:[%s19936_s9 + $0xaa4] ss:$16 sps:$4 sm:$0xff]  }
 0x539   : > { %9869 = vmatprep.subr.bf16.mxu1 %v15506_v19  ;;  %v15567_v19 = vld [vmem:[%s19936_s9 + $0xaac] ss:$16 sps:$4 sm:$0xff]  }
 0x53b   : > { %9829 = vmatpush1.bf16.msra.mxu0 %v15501_v26  ;;  %v15562_v26 = vld [vmem:[%s19936_s9 + $0xaa0] ss:$16 sps:$4 sm:$0xff]  }
 0x53c   : > { %9870 = vmatpush1.bf16.msra.mxu1 %v15504_v31  ;;  %9830 = vmatprep.subr.bf16.mxu0 %v15509_v25  ;;  %v15565_v31 = vld [vmem:[%s19936_s9 + $0xaa8] ss:$16 sps:$4 sm:$0xff]   ;;  %v15570_v25 = vld [vmem:[%s19936_s9 + $0xa84] ss:$16 sps:$4 sm:$0xff]  }
 0x53d   : > { %9871 = vmatprep.subr.bf16.mxu1 %v15512_v27  ;;  %v15573_v27 = vld [vmem:[%s19936_s9 + $0xa8c] ss:$16 sps:$4 sm:$0xff]  }
 0x53f   : > { %9831 = vmatpush1.bf16.msra.mxu0 %v15507_v9  ;;  %v15568_v9 = vld [vmem:[%s19936_s9 + $0xa80] ss:$16 sps:$4 sm:$0xff]  }
 0x540   : > { %9872 = vmatpush1.bf16.msra.mxu1 %v15510_v38  ;;  %9832 = vmatprep.subr.bf16.mxu0 %v15515_v35  ;;  %v15571_v38 = vld [vmem:[%s19936_s9 + $0xa88] ss:$16 sps:$4 sm:$0xff]   ;;  %v15576_v35 = vld [vmem:[%s19936_s9 + $0xa64] ss:$16 sps:$4 sm:$0xff]  }
 0x541   : > { %9873 = vmatprep.subr.bf16.mxu1 %v15518_v0  ;;  %v15579_v0 = vld [vmem:[%s19936_s9 + $0xa6c] ss:$16 sps:$4 sm:$0xff]  }
 0x543   : > { %9833 = vmatpush1.bf16.msra.mxu0 %v15513_v41  ;;  %v15574_v41 = vld [vmem:[%s19936_s9 + $0xa60] ss:$16 sps:$4 sm:$0xff]  }
 0x544   : > { %9874 = vmatpush1.bf16.msra.mxu1 %v15516_v34  ;;  %9834 = vmatprep.subr.bf16.mxu0 %v15521_v36  ;;  %v15577_v34 = vld [vmem:[%s19936_s9 + $0xa68] ss:$16 sps:$4 sm:$0xff]   ;;  %v15582_v36 = vld [vmem:[%s19936_s9 + $0xa44] ss:$16 sps:$4 sm:$0xff]  }
 0x545   : > { %9875 = vmatprep.subr.bf16.mxu1 %v15524_v43  ;;  %v15585_v43 = vld [vmem:[%s19936_s9 + $0xa4c] ss:$16 sps:$4 sm:$0xff]  }
 0x547   : > { %9835 = vmatpush1.bf16.msra.mxu0 %v15519_v32  ;;  %v15580_v32 = vld [vmem:[%s19936_s9 + $0xa40] ss:$16 sps:$4 sm:$0xff]  }
 0x548   : > { %9876 = vmatpush1.bf16.msra.mxu1 %v15522_v45  ;;  %9836 = vmatprep.subr.bf16.mxu0 %v15527_v37  ;;  %v15583_v45 = vld [vmem:[%s19936_s9 + $0xa48] ss:$16 sps:$4 sm:$0xff]   ;;  %v15588_v37 = vld [vmem:[%s19936_s9 + $0xa24] ss:$16 sps:$4 sm:$0xff]  }
 0x549   : > { %9877 = vmatprep.subr.bf16.mxu1 %v15530_v23  ;;  %v15591_v23 = vld [vmem:[%s19936_s9 + $0xa2c] ss:$16 sps:$4 sm:$0xff]  }
 0x54b   : > { %9837 = vmatpush1.bf16.msra.mxu0 %v15525_v42  ;;  %v15586_v42 = vld [vmem:[%s19936_s9 + $0xa20] ss:$16 sps:$4 sm:$0xff]  }
 0x54c   : > { %9878 = vmatpush1.bf16.msra.mxu1 %v15528_v39  ;;  %9838 = vmatprep.subr.bf16.mxu0 %v15533_v46  ;;  %v15589_v39 = vld [vmem:[%s19936_s9 + $0xa28] ss:$16 sps:$4 sm:$0xff]   ;;  %v15594_v46 = vld [vmem:[%s19936_s9 + $0xa04] ss:$16 sps:$4 sm:$0xff]  }
 0x54d   : > { %9879 = vmatprep.subr.bf16.mxu1 %v15536_v40  ;;  %v15597_v40 = vld [vmem:[%s19936_s9 + $0xa0c] ss:$16 sps:$4 sm:$0xff]  }
 0x54f   : > { %9839 = vmatpush1.bf16.msra.mxu0 %v15531_v44  ;;  %v15592_v44 = vld [vmem:[%s19936_s9 + $0xa00] ss:$16 sps:$4 sm:$0xff]  }
 0x550   : > { %9880 = vmatpush1.bf16.msra.mxu1 %v15534_v29  ;;  %9852 = vmatprep.subr.bf16.mxu0 %v15539_v62  ;;  %v15595_v29 = vld [vmem:[%s19936_s9 + $0xa08] ss:$16 sps:$4 sm:$0xff]   ;;  %v15600_v62 = vld [vmem:[%s19936_s9 + $0xb24] ss:$16 sps:$4 sm:$0xff]  }
 0x551   : > { %9893 = vmatprep.subr.bf16.mxu1 %v15542_v15  ;;  %v15603_v15 = vld [vmem:[%s19936_s9 + $0xb2c] ss:$16 sps:$4 sm:$0xff]  }
 0x552   : > { %v8163_v7 = vpop.f32.mrf.mxu0 }
 0x553   : > { %v19633_v53 = vadd.f32 %v8163_v7, %v19493_v50  ;;  %v8204_v56 = vpop.f32.mrf.mxu1  ;;  %9853 = vmatpush2.bf16.msra.mxu0 %v15537_v14  ;;  %v15551_v50 = vld [vmem:[%s19936_s9 + $0xae4] ss:$16 sps:$4 sm:$0xff]   ;;  %v15598_v14 = vld [vmem:[%s19936_s9 + $0xb20] ss:$16 sps:$4 sm:$0xff]  }
 0x554   : > { %v19639_v4 = vadd.f32 %v8204_v56, %v19499_v60  ;;  %9894 = vmatpush2.bf16.msra.mxu1 %v15540_v48  ;;  %v8165_v52 = vpop.f32.mrf.mxu0  ;;  %9854 = vmatprep.subr.bf16.mxu0 %v15545_v47  ;;  %v15554_v60 = vld [vmem:[%s19936_s9 + $0xaec] ss:$16 sps:$4 sm:$0xff]   ;;  %v15601_v48 = vld [vmem:[%s19936_s9 + $0xb28] ss:$16 sps:$4 sm:$0xff]   ;;  %v15606_v47 = vld [vmem:[%s19936_s9 + $0xb04] ss:$16 sps:$4 sm:$0xff]  }
 0x555   : > { %v19649_v5 = vadd.f32 %v8165_v52, %v19512_v51  ;;  %v8206_v57 = vpop.f32.mrf.mxu1  ;;  %9895 = vmatprep.subr.bf16.mxu1 %v15548_v49  ;;  %v15609_v49 = vld [vmem:[%s19936_s9 + $0xb0c] ss:$16 sps:$4 sm:$0xff]   ;;  %v15604_v52 = vld [vmem:[%s19936_s9 + $0xb00] ss:$16 sps:$4 sm:$0xff]  }
 0x556   : > { %v19655_v22 = vadd.f32 %v8206_v57, %v19518_v63  ;;  %v8167_v13 = vpop.f32.mrf.mxu0  ;;  %v15558_v63 = vld [vmem:[%s19936_s9 + $0xac4] ss:$16 sps:$4 sm:$0xff]  }
 0x557   : > { %v8208_v58 = vpop.f32.mrf.mxu1  ;;  %9855 = vmatpush2.bf16.msra.mxu0 %v15543_v61  ;;  %v15613_v57 = vld [vmem:[#allocation10 + $0x74] ss:$8 sps:$4 sm:$0xff]  }
 0x558   : > { %9896 = vmatpush2.bf16.msra.mxu1 %v15546_v55  ;;  %v8168_v51 = vpop.f32.mrf.mxu0  ;;  %10161 = vmatprep.subr.bf16.mxu0 %v15551_v50  ;;  %v15607_v50 = vld [vmem:[%s19936_s9 + $0xb08] ss:$16 sps:$4 sm:$0xff]   ;;  %v15616_v13 = vld [vmem:[#allocation10 + $0x174] ss:$8 sps:$4 sm:$0xff]  }
 0x559   : > { %v8209_v33 = vpop.f32.mrf.mxu1  ;;  %10202 = vmatprep.subr.bf16.mxu1 %v15554_v60  ;;  %v15611_v51 = vld [vmem:[#allocation10 + $0x70] ss:$8 sps:$4 sm:$0xff]  }
 0x55a   : > { %9857 = vmatmul.mubr.bf16.vlgmr.msra.gmra.mxu0 %v9615_v16  ;;  %v15614_v33 = vld [vmem:[#allocation10 + $0x170] ss:$8 sps:$4 sm:$0xff]  }
 0x55b   : > { %9898 = vmatmul.mubr.bf16.vlgmr.msra.gmra.mxu1 %v9615_v16  ;;  %10162 = vmatpush1.bf16.msra.mxu0 %v15549_v54 }
 0x55c   : > { %13604 = vmatprep.mubr.msk.bf16.mxu0 %vm4436_vm8, %v13563_v20  ;;  %10203 = vmatpush1.bf16.msra.mxu1 %v15552_v10  ;;  %v13562_v10 = vcombine.low %v19660_v28, %v19660_v28  ;;  %v15626_v28 = vld [vmem:[#allocation10 + $0x150] ss:$8 sps:$4 sm:$0xff]  }
 0x55d   : > { %13605 = vmatprep.mubr.msk.bf16.mxu1 %vm4436_vm8, %v13563_v20  ;;  %10163 = vmatprep.subr.bf16.mxu0 %v15558_v63  ;;  %v15619_v63 = vld [vmem:[#allocation10 + $0x64] ss:$8 sps:$4 sm:$0xff]  }
 0x55e   : > { %10204 = vmatprep.subr.bf16.mxu1 %v15561_v18  ;;  %v15622_v20 = vld [vmem:[#allocation10 + $0x164] ss:$8 sps:$4 sm:$0xff]   ;;  %v15620_v18 = vld [vmem:[#allocation10 + $0x160] ss:$8 sps:$4 sm:$0xff]  }
 0x55f   : > { %10164 = vmatpush1.bf16.msra.mxu0 %v15556_v11  ;;  %v15625_v11 = vld [vmem:[#allocation10 + $0x54] ss:$8 sps:$4 sm:$0xff]  }
 0x560   : > { %10205 = vmatpush1.bf16.msra.mxu1 %v15559_v30  ;;  %10165 = vmatprep.subr.bf16.mxu0 %v15564_v17  ;;  %v15628_v30 = vld [vmem:[#allocation10 + $0x154] ss:$8 sps:$4 sm:$0xff]   ;;  %v15623_v17 = vld [vmem:[#allocation10 + $0x50] ss:$8 sps:$4 sm:$0xff]  }
 0x561   : > { %10206 = vmatprep.subr.bf16.mxu1 %v15567_v19  ;;  %v15631_v19 = vld [vmem:[#allocation10 + $0x44] ss:$8 sps:$4 sm:$0xff]  }
 0x563   : > { %10166 = vmatpush1.bf16.msra.mxu0 %v15562_v26  ;;  %v15634_v26 = vld [vmem:[#allocation10 + $0x144] ss:$8 sps:$4 sm:$0xff]  }
 0x564   : > { %10207 = vmatpush1.bf16.msra.mxu1 %v15565_v31  ;;  %10167 = vmatprep.subr.bf16.mxu0 %v15570_v25  ;;  %v15629_v31 = vld [vmem:[#allocation10 + $0x40] ss:$8 sps:$4 sm:$0xff]  }
 0x565   : > { %10208 = vmatprep.subr.bf16.mxu1 %v15573_v27  ;;  %v15632_v25 = vld [vmem:[#allocation10 + $0x140] ss:$8 sps:$4 sm:$0xff]   ;;  %v15635_v27 = vld [vmem:[#allocation10 + $0x30] ss:$8 sps:$4 sm:$0xff]  }
 0x567   : > { %10168 = vmatpush1.bf16.msra.mxu0 %v15568_v9  ;;  %v15637_v9 = vld [vmem:[#allocation10 + $0x34] ss:$8 sps:$4 sm:$0xff]  }
 0x568   : > { %10209 = vmatpush1.bf16.msra.mxu1 %v15571_v38  ;;  %10169 = vmatprep.subr.bf16.mxu0 %v15576_v35  ;;  %v15638_v38 = vld [vmem:[#allocation10 + $0x130] ss:$8 sps:$4 sm:$0xff]   ;;  %v15640_v35 = vld [vmem:[#allocation10 + $0x134] ss:$8 sps:$4 sm:$0xff]  }
 0x569   : > { %10210 = vmatprep.subr.bf16.mxu1 %v15579_v0  ;;  %v15641_v0 = vld [vmem:[#allocation10 + $0x20] ss:$8 sps:$4 sm:$0xff]  }
 0x56b   : > { %10170 = vmatpush1.bf16.msra.mxu0 %v15574_v41  ;;  %v15643_v41 = vld [vmem:[#allocation10 + $0x24] ss:$8 sps:$4 sm:$0xff]  }
 0x56c   : > { %10211 = vmatpush1.bf16.msra.mxu1 %v15577_v34  ;;  %10171 = vmatprep.subr.bf16.mxu0 %v15582_v36  ;;  %v15644_v36 = vld [vmem:[#allocation10 + $0x120] ss:$8 sps:$4 sm:$0xff]  }
 0x56d   : > { %10212 = vmatprep.subr.bf16.mxu1 %v15585_v43  ;;  %v15646_v43 = vld [vmem:[#allocation10 + $0x124] ss:$8 sps:$4 sm:$0xff]  }
 0x56f   : > { %10172 = vmatpush1.bf16.msra.mxu0 %v15580_v32  ;;  %v15649_v32 = vld [vmem:[#allocation10 + $0x14] ss:$8 sps:$4 sm:$0xff]  }
 0x570   : > { %10213 = vmatpush1.bf16.msra.mxu1 %v15583_v45  ;;  %10173 = vmatprep.subr.bf16.mxu0 %v15588_v37 }
 0x571   : > { %10214 = vmatprep.subr.bf16.mxu1 %v15591_v23  ;;  %v15652_v23 = vld [vmem:[#allocation10 + $0x114] ss:$8 sps:$4 sm:$0xff]  }
 0x573   : > { %10174 = vmatpush1.bf16.msra.mxu0 %v15586_v42 }
 0x574   : > { %10215 = vmatpush1.bf16.msra.mxu1 %v15589_v39  ;;  %10175 = vmatprep.subr.bf16.mxu0 %v15594_v46 }
 0x575   : > { %10216 = vmatprep.subr.bf16.mxu1 %v15597_v40 }
 0x577   : > { %10176 = vmatpush1.bf16.msra.mxu0 %v15592_v44  ;;  %v15647_v44 = vld [vmem:[#allocation10 + $0x10] ss:$8 sps:$4 sm:$0xff]  }
 0x578   : > { %10217 = vmatpush1.bf16.msra.mxu1 %v15595_v29  ;;  %10189 = vmatprep.subr.bf16.mxu0 %v15600_v62 }
 0x579   : > { %10230 = vmatprep.subr.bf16.mxu1 %v15603_v15  ;;  %v15650_v15 = vld [vmem:[#allocation10 + $0x110] ss:$8 sps:$4 sm:$0xff]  }
 0x57a   : > { %v8502_v7 = vpop.f32.mrf.mxu0 }
 0x57b   : > { %v19772_v56 = vadd.f32 %v8502_v7, %v19633_v53  ;;  %v8543_v61 = vpop.f32.mrf.mxu1  ;;  %10190 = vmatpush2.bf16.msra.mxu0 %v15598_v14  ;;  %v15655_v14 = vld [vmem:[#allocation10 + $0x4] ss:$8 sps:$4 sm:$0xff]  }
 0x57c   : > { %v19778_v55 = vadd.f32 %v8543_v61, %v19639_v4  ;;  %10231 = vmatpush2.bf16.msra.mxu1 %v15601_v48  ;;  %v8504_v6 = vpop.f32.mrf.mxu0  ;;  %10191 = vmatprep.subr.bf16.mxu0 %v15606_v47  ;;  %v15658_v47 = vld [vmem:[#allocation10 + $0x104] ss:$8 sps:$4 sm:$0xff]   ;;  %v15656_v61 = vld [vmem:[#allocation10 + $0x100] ss:$8 sps:$4 sm:$0xff]  }
 0x57d   : > { %v19784_v53 = vadd.f32 %v8504_v6, %v19649_v5  ;;  %v8545_v60 = vpop.f32.mrf.mxu1  ;;  %10232 = vmatprep.subr.bf16.mxu1 %v15609_v49  ;;  %v15659_v6 = vld [vmem:[#allocation10 + $0xf0] ss:$8 sps:$4 sm:$0xff]  }
 0x57e   : > { %v19787_v58 = vadd.f32 %v8545_v60, %v19655_v22  ;;  %v8506_v54 = vpop.f32.mrf.mxu0  ;;  %v15617_v22 = vld [vmem:[#allocation10 + $0x60] ss:$8 sps:$4 sm:$0xff]  }
 0x57f   : > { %v8547_v4 = vpop.f32.mrf.mxu1  ;;  %10192 = vmatpush2.bf16.msra.mxu0 %v15604_v52  ;;  %v15661_v52 = vld [vmem:[#allocation10 + $0xf4] ss:$8 sps:$4 sm:$0xff]   ;;  %v15665_v60 = vld [vmem:[#allocation10 + $0xe0] ss:$8 sps:$4 sm:$0xff]  }
 0x580   : > { %10233 = vmatpush2.bf16.msra.mxu1 %v15607_v50  ;;  %v8507_v16 = vpop.f32.mrf.mxu0  ;;  %10729 = vmatprep.subr.bf16.mxu0 %v15613_v57  ;;  %v15662_v50 = vld [vmem:[#allocation10 + $0x1f0] ss:$8 sps:$4 sm:$0xff]   ;;  %v15667_v57 = vld [vmem:[#allocation10 + $0xe4] ss:$8 sps:$4 sm:$0xff]   ;;  %v15676_v54 = vld [vmem:[#allocation10 + $0x1d4] ss:$8 sps:$4 sm:$0xff]  }
 0x581   : > { %v8548_v5 = vpop.f32.mrf.mxu1  ;;  %10770 = vmatprep.subr.bf16.mxu1 %v15616_v13  ;;  %v15668_v13 = vld [vmem:[#allocation10 + $0x1e0] ss:$8 sps:$4 sm:$0xff]   ;;  %v15671_v4 = vld [vmem:[#allocation10 + $0xd0] ss:$8 sps:$4 sm:$0xff]   ;;  %v15679_v16 = vld [vmem:[#allocation10 + $0xc4] ss:$8 sps:$4 sm:$0xff]  }
 0x582   : > { %10194 = vmatmul.mubr.bf16.vlgmr.msra.gmra.mxu0 %v13562_v10  ;;  %v15685_v5 = vld [vmem:[#allocation10 + $0xb4] ss:$8 sps:$4 sm:$0xff]  }
 0x583   : > { %10235 = vmatmul.mubr.bf16.vlgmr.msra.gmra.mxu1 %v13562_v10  ;;  %10730 = vmatpush1.bf16.msra.mxu0 %v15611_v51  ;;  %v15674_v51 = vld [vmem:[#allocation10 + $0x1d0] ss:$8 sps:$4 sm:$0xff]   ;;  %v15682_v10 = vld [vmem:[#allocation10 + $0x1c4] ss:$8 sps:$4 sm:$0xff]  }
 0x584   : > { %10771 = vmatpush1.bf16.msra.mxu1 %v15614_v33  ;;  %10731 = vmatprep.subr.bf16.mxu0 %v15619_v63  ;;  %v15677_v33 = vld [vmem:[#allocation10 + $0xc0] ss:$8 sps:$4 sm:$0xff]  }
 0x585   : > { %10772 = vmatprep.subr.bf16.mxu1 %v15622_v20  ;;  %v15680_v63 = vld [vmem:[#allocation10 + $0x1c0] ss:$8 sps:$4 sm:$0xff]   ;;  %v15688_v20 = vld [vmem:[#allocation10 + $0x1b4] ss:$8 sps:$4 sm:$0xff]  }
 0x587   : > { %10732 = vmatpush1.bf16.msra.mxu0 %v15617_v22  ;;  %v15683_v22 = vld [vmem:[#allocation10 + $0xb0] ss:$8 sps:$4 sm:$0xff]  }
 0x588   : > { %10773 = vmatpush1.bf16.msra.mxu1 %v15620_v18  ;;  %10733 = vmatprep.subr.bf16.mxu0 %v15625_v11  ;;  %v15686_v18 = vld [vmem:[#allocation10 + $0x1b0] ss:$8 sps:$4 sm:$0xff]   ;;  %v15691_v11 = vld [vmem:[#allocation10 + $0xa4] ss:$8 sps:$4 sm:$0xff]  }
 0x589   : > { %10774 = vmatprep.subr.bf16.mxu1 %v15628_v30  ;;  %v15694_v30 = vld [vmem:[#allocation10 + $0x1a4] ss:$8 sps:$4 sm:$0xff]  }
 0x58b   : > { %10734 = vmatpush1.bf16.msra.mxu0 %v15623_v17  ;;  %v15689_v17 = vld [vmem:[#allocation10 + $0xa0] ss:$8 sps:$4 sm:$0xff]  }
 0x58c   : > { %10775 = vmatpush1.bf16.msra.mxu1 %v15626_v28  ;;  %10735 = vmatprep.subr.bf16.mxu0 %v15631_v19  ;;  %v15692_v28 = vld [vmem:[#allocation10 + $0x1a0] ss:$8 sps:$4 sm:$0xff]  }
 0x58d   : > { %10776 = vmatprep.subr.bf16.mxu1 %v15634_v26 }
 0x58f   : > { %10736 = vmatpush1.bf16.msra.mxu0 %v15629_v31 }
 0x590   : > { %10777 = vmatpush1.bf16.msra.mxu1 %v15632_v25  ;;  %10737 = vmatprep.subr.bf16.mxu0 %v15637_v9  ;;  %v15695_v9 = vld [vmem:[#allocation10 + $0x90] ss:$8 sps:$4 sm:$0xff]  }
 0x591   : > { %10778 = vmatprep.subr.bf16.mxu1 %v15640_v35  ;;  %v15698_v35 = vld [vmem:[#allocation10 + $0x190] ss:$8 sps:$4 sm:$0xff]  }
 0x593   : > { %10738 = vmatpush1.bf16.msra.mxu0 %v15635_v27 }
 0x594   : > { %10779 = vmatpush1.bf16.msra.mxu1 %v15638_v38  ;;  %10739 = vmatprep.subr.bf16.mxu0 %v15643_v41  ;;  %v15697_v38 = vld [vmem:[#allocation10 + $0x94] ss:$8 sps:$4 sm:$0xff]  }
 0x595   : > { %10780 = vmatprep.subr.bf16.mxu1 %v15646_v43 }
 0x597   : > { %10740 = vmatpush1.bf16.msra.mxu0 %v15641_v0 }
 0x598   : > { %10781 = vmatpush1.bf16.msra.mxu1 %v15644_v36  ;;  %10741 = vmatprep.subr.bf16.mxu0 %v15649_v32  ;;  %v15703_v36 = vld [vmem:[#allocation10 + $0x84] ss:$8 sps:$4 sm:$0xff]  }
 0x599   : > { %10782 = vmatprep.subr.bf16.mxu1 %v15652_v23 }
 0x59b   : > { %10742 = vmatpush1.bf16.msra.mxu0 %v15647_v44 }
 0x59c   : > { %10783 = vmatpush1.bf16.msra.mxu1 %v15650_v15  ;;  %10743 = vmatprep.subr.bf16.mxu0 %v15655_v14 }
 0x59d   : > { %10784 = vmatprep.subr.bf16.mxu1 %v15658_v47 }
 0x5a0   : > { %10785 = vmatpush1.bf16.msra.mxu1 %v15656_v61 }
 0x5a2   : > { %v8841_v34 = vpop.f32.mrf.mxu0 }
 0x5a3   : > { %v19792_v45 = vadd.f32 %v8841_v34, %v19772_v56  ;;  %v8882_v37 = vpop.f32.mrf.mxu1  ;;  %v15653_v56 = vld [vmem:[#allocation10] ss:$8 sps:$4 sm:$0xff]   ;;  %v15700_v34 = vld [vmem:[#allocation10 + $0x194] ss:$8 sps:$4 sm:$0xff]  }
 0x5a4   : > { %v19795_v42 = vadd.f32 %v8882_v37, %v19778_v55  ;;  %v8843_v39 = vpop.f32.mrf.mxu0  ;;  %v15664_v55 = vld [vmem:[#allocation10 + $0x1f4] ss:$8 sps:$4 sm:$0xff]   ;;  %10744 = vmatpush1.bf16.msra.mxu0 %v15653_v56  ;;  %v15706_v37 = vld [vmem:[#allocation10 + $0x184] ss:$8 sps:$4 sm:$0xff]  }
 0x5a5   : > { %v19798_v46 = vadd.f32 %v8843_v39, %v19784_v53  ;;  %v8884_v40 = vpop.f32.mrf.mxu1  ;;  %10745 = vmatprep.subr.bf16.mxu0 %v15661_v52  ;;  %10786 = vmatprep.subr.bf16.mxu1 %v15664_v55  ;;  %v15670_v53 = vld [vmem:[#allocation10 + $0x1e4] ss:$8 sps:$4 sm:$0xff]  }
 0x5a6   : > { %v19801_v29 = vadd.f32 %v8884_v40, %v19787_v58  ;;  %v8845_v62 = vpop.f32.mrf.mxu0  ;;  %10787 = vmatpush2.bf16.msra.mxu1 %v15662_v50  ;;  %v15673_v58 = vld [vmem:[#allocation10 + $0xd4] ss:$8 sps:$4 sm:$0xff]  }
 0x5a7   : > { %v8886_v48 = vpop.f32.mrf.mxu1  ;;  %10788 = vmatprep.subr.bf16.mxu1 %v15670_v53  ;;  %v15709_v40 = vld [vmem:[#allocation8 + $0x74] ss:$8 sps:$4 sm:$0xff]  }
 0x5a8   : > { %v8846_v49 = vpop.f32.mrf.mxu0  ;;  %10746 = vmatpush2.bf16.msra.mxu0 %v15659_v6 }
 0x5a9   : > { %v8887_v7 = vpop.f32.mrf.mxu1  ;;  %10747 = vmatprep.subr.bf16.mxu0 %v15667_v57 }
 0x5aa   : > { %10789 = vmatpush2.bf16.msra.mxu1 %v15668_v13 }
 0x5ab   : > { %10790 = vmatprep.subr.bf16.mxu1 %v15676_v54 }
 0x5ac   : > { %10748 = vmatpush2.bf16.msra.mxu0 %v15665_v60 }
 0x5ad   : > { %10749 = vmatprep.subr.bf16.mxu0 %v15673_v58 }
 0x5ae   : > { %10791 = vmatpush2.bf16.msra.mxu1 %v15674_v51  ;;  %v19813_v51 = vld [vmem:[%s19935_s8] sm:$0xf] }
 0x5af   : > { %10792 = vmatprep.subr.bf16.mxu1 %v15682_v10 }
 0x5b0   : > { %10750 = vmatpush2.bf16.msra.mxu0 %v15671_v4  ;;  %v10247_v4 = vld [vmem:[%s19937_s10] sm:$0xf] }
 0x5b1   : > { %10751 = vmatprep.subr.bf16.mxu0 %v15679_v16  ;;  %v10252_v10 = vrot.slane %v10247_v4, %v16356_v21 }
 0x5b2   : > { %10793 = vmatpush2.bf16.msra.mxu1 %v15680_v63 }
 0x5b3   : > { %10794 = vmatprep.subr.bf16.mxu1 %v15688_v20  ;;  %v10260_v20 = vrot.slane %v10247_v4, %v16383_v1 }
 0x5b4   : > { %10752 = vmatpush2.bf16.msra.mxu0 %v15677_v33  ;;  %v7187_v33 = vrot.slane %v19813_v51, %v16361_v24 }
 0x5b5   : > { %10753 = vmatprep.subr.bf16.mxu0 %v15685_v5 }
 0x5b6   : > { %10795 = vmatpush2.bf16.msra.mxu1 %v15686_v18 }
 0x5b7   : > { %10796 = vmatprep.subr.bf16.mxu1 %v15694_v30 }
 0x5b8   : > { %10754 = vmatpush2.bf16.msra.mxu0 %v15683_v22  ;;  %v7195_v22 = vrot.slane %v19813_v51, %v16388_v3 }
 0x5b9   : > { %10755 = vmatprep.subr.bf16.mxu0 %v15691_v11 }
 0x5ba   : > { %10797 = vmatpush2.bf16.msra.mxu1 %v15692_v28 }
 0x5bb   : > { %10798 = vmatprep.subr.bf16.mxu1 %v15700_v34  ;;  %v7203_v34 = vadd.f32 %v7195_v22, %v19240_v12  ;;  %v15743_v22 = vld [vmem:[#allocation8 + $0x10] ss:$8 sps:$4 sm:$0xff]  }
 0x5bc   : > { %10756 = vmatpush2.bf16.msra.mxu0 %v15689_v17  ;;  %v10256_v17 = vrot.slane %v10247_v4, %v16361_v24 }
 0x5bd   : > { %10757 = vmatprep.subr.bf16.mxu0 %v15697_v38  ;;  %v7201_v38 = vadd.f32 %v7187_v33, %v19234_v8  ;;  %v15737_v33 = vld [vmem:[#allocation8 + $0x20] ss:$8 sps:$4 sm:$0xff]  }
 0x5be   : > { %10799 = vmatpush2.bf16.msra.mxu1 %v15698_v35 }
 0x5bf   : > { %10800 = vmatprep.subr.bf16.mxu1 %v15706_v37 }
 0x5c0   : > { %10758 = vmatpush2.bf16.msra.mxu0 %v15695_v9 }
 0x5c1   : > { %10759 = vmatprep.subr.bf16.mxu0 %v15703_v36 }
 0x5ca   : > { %v9180_v19 = vpop.f32.mrf.mxu0 }
 0x5cb   : > { %v9228_v26 = vadd.f32 %v9180_v19, %v19792_v45  ;;  %v9221_v31 = vpop.f32.mrf.mxu1  ;;  %v15701_v45 = vld [vmem:[#allocation10 + $0x80] ss:$8 sps:$4 sm:$0xff]  }
 0x5cc   : > { %v9230_v25 = vadd.f32 %v9221_v31, %v19795_v42  ;;  %v9182_v27 = vpop.f32.mrf.mxu0  ;;  %v15704_v42 = vld [vmem:[#allocation10 + $0x180] ss:$8 sps:$4 sm:$0xff]   ;;  %10760 = vmatpush2.bf16.msra.mxu0 %v15701_v45  ;;  %v10264_v31 = vrot.slane %v10247_v4, %v16388_v3  ;;  %v15734_v4 = vld [vmem:[#allocation8 + $0x130] ss:$8 sps:$4 sm:$0xff]  }
 0x5cd   : > { %v9229_v0 = vadd.f32 %v9182_v27, %v19798_v46  ;;  %v9223_v41 = vpop.f32.mrf.mxu1  ;;  %v15712_v46 = vld [vmem:[#allocation8 + $0x174] ss:$8 sps:$4 sm:$0xff]   ;;  %10801 = vmatpush2.bf16.msra.mxu1 %v15704_v42  ;;  %11131 = vmatprep.subr.bf16.mxu0 %v15709_v40  ;;  %v7205_v40 = vmax.f32 %v7201_v38, 0.0  ;;  %v15761_v38 = vld [vmem:[#allocation8 + $0xe0] ss:$8 sps:$4 sm:$0xff]  }
 0x5ce   : > { %v9231_v43 = vadd.f32 %v9223_v41, %v19801_v29  ;;  %v9184_v32 = vpop.f32.mrf.mxu0  ;;  %11172 = vmatprep.subr.bf16.mxu1 %v15712_v46 }
 0x5cf   : > { %v9225_v23 = vpop.f32.mrf.mxu1  ;;  %v7209_v12 = vpack.c.bf16 %v7205_v40, %v7205_v40  ;;  %v15782_v40 = vld [vmem:[#allocation8 + $0x1b0] ss:$8 sps:$4 sm:$0xff]  }
 0x5d0   : > { %v9185_v39 = vpop.f32.mrf.mxu0 }
 0x5d1   : > { %v9226_v44 = vpop.f32.mrf.mxu1 }
 0x5d2   : > { %v7207_v44 = vmax.f32 %v7203_v34, 0.0  ;;  %v15767_v34 = vld [vmem:[#allocation8 + $0xd0] ss:$8 sps:$4 sm:$0xff]  }
 0x5f2   : > { %v9519_v29 = vpop.f32.mrf.mxu0 }
 0x5f3   : > { %v9567_v62 = vadd.f32 %v9519_v29, %v9228_v26  ;;  %v9560_v15 = vpop.f32.mrf.mxu1  ;;  %v15707_v29 = vld [vmem:[#allocation8 + $0x70] ss:$8 sps:$4 sm:$0xff]  }
 0x5f4   : > { %v9569_v14 = vadd.f32 %v9560_v15, %v9230_v25  ;;  %v9521_v48 = vpop.f32.mrf.mxu0  ;;  %v15710_v15 = vld [vmem:[#allocation8 + $0x170] ss:$8 sps:$4 sm:$0xff]  }
 0x5f5   : > { %v9568_v47 = vadd.f32 %v9521_v48, %v9229_v0  ;;  %v9562_v49 = vpop.f32.mrf.mxu1  ;;  %v15715_v48 = vld [vmem:[#allocation8 + $0x64] ss:$8 sps:$4 sm:$0xff]  }
 0x5f6   : > { %v9570_v7 = vadd.f32 %v9562_v49, %v9231_v43  ;;  %v9523_v56 = vpop.f32.mrf.mxu0  ;;  %v7211_v49 = vpack.c.bf16 %v7207_v44, %v7207_v44  ;;  %v15790_v44 = vld [vmem:[#allocation8 + $0x1a4] ss:$8 sps:$4 sm:$0xff]  }
 0x5f7   : > { %v9564_v61 = vpop.f32.mrf.mxu1  ;;  %v15716_v56 = vld [vmem:[#allocation8 + $0x160] ss:$8 sps:$4 sm:$0xff]  }
 0x5f8   : > { %v9524_v52 = vpop.f32.mrf.mxu0  ;;  %v15721_v61 = vld [vmem:[#allocation8 + $0x54] ss:$8 sps:$4 sm:$0xff]  }
 0x5f9   : > { %v9565_v55 = vpop.f32.mrf.mxu1  ;;  %v15724_v52 = vld [vmem:[#allocation8 + $0x154] ss:$8 sps:$4 sm:$0xff]  }
 0x5fa   : > { %v15719_v55 = vld [vmem:[#allocation8 + $0x50] ss:$8 sps:$4 sm:$0xff]  }
 0x61a   : > { %v9858_v6 = vpop.f32.mrf.mxu0 }
 0x61b   : > { %v9899_v50 = vpop.f32.mrf.mxu1  ;;  %v9906_v16 = vadd.f32 %v9858_v6, %v9567_v62  ;;  %v15722_v6 = vld [vmem:[#allocation8 + $0x150] ss:$8 sps:$4 sm:$0xff]  }
 0x61c   : > { %v9860_v57 = vpop.f32.mrf.mxu0  ;;  %v9908_v63 = vadd.f32 %v9899_v50, %v9569_v14  ;;  %v15727_v50 = vld [vmem:[#allocation8 + $0x44] ss:$8 sps:$4 sm:$0xff]  }
 0x61d   : > { %v9901_v53 = vpop.f32.mrf.mxu1  ;;  %v9907_v18 = vadd.f32 %v9860_v57, %v9568_v47  ;;  %v15718_v47 = vld [vmem:[#allocation8 + $0x164] ss:$8 sps:$4 sm:$0xff]  }
 0x61e   : > { %v9862_v60 = vpop.f32.mrf.mxu0  ;;  %v9909_v28 = vadd.f32 %v9901_v53, %v9570_v7  ;;  %v15713_v7 = vld [vmem:[#allocation8 + $0x60] ss:$8 sps:$4 sm:$0xff]   ;;  %v15730_v57 = vld [vmem:[#allocation8 + $0x144] ss:$8 sps:$4 sm:$0xff]  }
 0x61f   : > { %v9903_v13 = vpop.f32.mrf.mxu1  ;;  %v15725_v53 = vld [vmem:[#allocation8 + $0x40] ss:$8 sps:$4 sm:$0xff]  }
 0x620   : > { %v9863_v58 = vpop.f32.mrf.mxu0  ;;  %v15728_v60 = vld [vmem:[#allocation8 + $0x140] ss:$8 sps:$4 sm:$0xff]   ;;  %v15733_v13 = vld [vmem:[#allocation8 + $0x34] ss:$8 sps:$4 sm:$0xff]  }
 0x621   : > { %v9904_v54 = vpop.f32.mrf.mxu1  ;;  %v15736_v58 = vld [vmem:[#allocation8 + $0x134] ss:$8 sps:$4 sm:$0xff]  }
 0x622   : > { %v15731_v54 = vld [vmem:[#allocation8 + $0x30] ss:$8 sps:$4 sm:$0xff]  }
 0x642   : > { %v10195_v5 = vpop.f32.mrf.mxu0 }
 0x643   : > { %v10243_v11 = vadd.f32 %v10195_v5, %v9906_v16  ;;  %v10236_v30 = vpop.f32.mrf.mxu1  ;;  %v15739_v16 = vld [vmem:[#allocation8 + $0x24] ss:$8 sps:$4 sm:$0xff]   ;;  %v15745_v5 = vld [vmem:[#allocation8 + $0x14] ss:$8 sps:$4 sm:$0xff]  }
 0x644   : > { %v10245_v19 = vadd.f32 %v10236_v30, %v9908_v63  ;;  %v10197_v26 = vpop.f32.mrf.mxu0  ;;  %v15740_v63 = vld [vmem:[#allocation8 + $0x120] ss:$8 sps:$4 sm:$0xff]   ;;  %v15754_v30 = vld [vmem:[#allocation8 + $0x104] ss:$8 sps:$4 sm:$0xff]  }
 0x645   : > { %v10269_v25 = vadd.f32 %v10252_v10, %v10243_v11  ;;  %v10244_v27 = vadd.f32 %v10197_v26, %v9907_v18  ;;  %v10238_v9 = vpop.f32.mrf.mxu1  ;;  %v15742_v10 = vld [vmem:[#allocation8 + $0x124] ss:$8 sps:$4 sm:$0xff]   ;;  %v15746_v18 = vld [vmem:[#allocation8 + $0x110] ss:$8 sps:$4 sm:$0xff]   ;;  %v15760_v26 = vld [vmem:[#allocation8 + $0x1f4] ss:$8 sps:$4 sm:$0xff]  }
 0x646   : > { %v10271_v35 = vadd.f32 %v10260_v20, %v10245_v19  ;;  %v10246_v0 = vadd.f32 %v10238_v9, %v9909_v28  ;;  %v10199_v41 = vpop.f32.mrf.mxu0  ;;  %v15748_v20 = vld [vmem:[#allocation8 + $0x114] ss:$8 sps:$4 sm:$0xff]   ;;  %v15751_v11 = vld [vmem:[#allocation8 + $0x4] ss:$8 sps:$4 sm:$0xff]   ;;  %v15752_v28 = vld [vmem:[#allocation8 + $0x100] ss:$8 sps:$4 sm:$0xff]  }
 0x647   : > { %v10270_v36 = vadd.f32 %v10256_v17, %v10244_v27  ;;  %v10240_v43 = vpop.f32.mrf.mxu1  ;;  %v10273_v32 = vmax.f32 %v10269_v25, 0.0  ;;  %v15749_v17 = vld [vmem:[#allocation8] ss:$8 sps:$4 sm:$0xff]   ;;  %v15757_v19 = vld [vmem:[#allocation8 + $0xf4] ss:$8 sps:$4 sm:$0xff]  }
 0x648   : > { %v10272_v37 = vadd.f32 %v10264_v31, %v10246_v0  ;;  %v10200_v23 = vpop.f32.mrf.mxu0  ;;  %v10275_v45 = vmax.f32 %v10271_v35, 0.0  ;;  %v15755_v31 = vld [vmem:[#allocation8 + $0xf0] ss:$8 sps:$4 sm:$0xff]   ;;  %v15763_v27 = vld [vmem:[#allocation8 + $0xe4] ss:$8 sps:$4 sm:$0xff]  }
 0x649   : > { %v10274_v39 = vmax.f32 %v10270_v36, 0.0  ;;  %v10241_v42 = vpop.f32.mrf.mxu1  ;;  %v10277_v62 = vpack.c.bf16 %v10273_v32, %v10273_v32  ;;  %v15758_v25 = vld [vmem:[#allocation8 + $0x1f0] ss:$8 sps:$4 sm:$0xff]   ;;  %v15766_v9 = vld [vmem:[#allocation8 + $0x1e4] ss:$8 sps:$4 sm:$0xff]  }
 0x64a   : > { %v10276_v3 = vmax.f32 %v10272_v37, 0.0  ;;  %v10279_v14 = vpack.c.bf16 %v10275_v45, %v10275_v45  ;;  %v15764_v35 = vld [vmem:[#allocation8 + $0x1e0] ss:$8 sps:$4 sm:$0xff]   ;;  %v15769_v0 = vld [vmem:[#allocation8 + $0xd4] ss:$8 sps:$4 sm:$0xff]  }
 0x64b   : > { %v10278_v46 = vpack.c.bf16 %v10274_v39, %v10274_v39  ;;  %v15772_v41 = vld [vmem:[#allocation8 + $0x1d4] ss:$8 sps:$4 sm:$0xff]   ;;  %v15770_v36 = vld [vmem:[#allocation8 + $0x1d0] ss:$8 sps:$4 sm:$0xff]   ;;  %v15775_v43 = vld [vmem:[#allocation8 + $0xc4] ss:$8 sps:$4 sm:$0xff]  }
 0x64c   : > { %v10280_v8 = vpack.c.bf16 %v10276_v3, %v10276_v3  ;;  %v15778_v32 = vld [vmem:[#allocation8 + $0x1c4] ss:$8 sps:$4 sm:$0xff]   ;;  %v15773_v37 = vld [vmem:[#allocation8 + $0xc0] ss:$8 sps:$4 sm:$0xff]   ;;  %v15781_v45 = vld [vmem:[#allocation8 + $0xb4] ss:$8 sps:$4 sm:$0xff]  }
 0x64d   : > { %10761 = vmatprep.mubr.bf16.mxu0 %v10278_v46  ;;  %v15776_v23 = vld [vmem:[#allocation8 + $0x1c0] ss:$8 sps:$4 sm:$0xff]   ;;  %v15784_v39 = vld [vmem:[#allocation8 + $0x1b4] ss:$8 sps:$4 sm:$0xff]   ;;  %v15779_v42 = vld [vmem:[#allocation8 + $0xb0] ss:$8 sps:$4 sm:$0xff]  }
 0x64e   : > { %10802 = vmatprep.mubr.bf16.mxu1 %v10280_v8  ;;  %10762 = vmatmul.mubr.bf16.vlgmr.msra.gmra.mxu0 %v10277_v62  ;;  %v15787_v3 = vld [vmem:[#allocation8 + $0xa4] ss:$8 sps:$4 sm:$0xff]   ;;  %v15785_v46 = vld [vmem:[#allocation8 + $0xa0] ss:$8 sps:$4 sm:$0xff]   ;;  %v15793_v8 = vld [vmem:[#allocation8 + $0x94] ss:$8 sps:$4 sm:$0xff]  }
 0x64f   : > { %10803 = vmatmul.mubr.bf16.vlgmr.msra.gmra.mxu1 %v10279_v14  ;;  %11132 = vmatpush1.bf16.msra.mxu0 %v15707_v29  ;;  %v7183_v29 = vrot.slane %v19813_v51, %v16356_v21  ;;  %v15788_v62 = vld [vmem:[#allocation8 + $0x1a0] ss:$8 sps:$4 sm:$0xff]   ;;  %v15796_v14 = vld [vmem:[#allocation8 + $0x194] ss:$8 sps:$4 sm:$0xff]  }
 0x650   : > { %11173 = vmatpush1.bf16.msra.mxu1 %v15710_v15  ;;  %11163 = vmatprep.mubr.bf16.mxu0 %v7209_v12  ;;  %v7191_v15 = vrot.slane %v19813_v51, %v16383_v1  ;;  %v15800_v1 = vld [vmem:[#allocation8 + $0x180] ss:$8 sps:$4 sm:$0xff]  }
 0x651   : > { %11204 = vmatprep.mubr.bf16.mxu1 %v7211_v49  ;;  %11133 = vmatprep.subr.bf16.mxu0 %v15715_v48  ;;  %v15791_v48 = vld [vmem:[#allocation8 + $0x90] ss:$8 sps:$4 sm:$0xff]   ;;  %v7200_v12 = vadd.f32 %v7183_v29, %v19215_v59  ;;  %v15799_v49 = vld [vmem:[#allocation8 + $0x84] ss:$8 sps:$4 sm:$0xff]  }
 0x652   : > { %11174 = vmatprep.subr.bf16.mxu1 %v15718_v47  ;;  %v15794_v47 = vld [vmem:[#allocation8 + $0x190] ss:$8 sps:$4 sm:$0xff]  }
 0x653   : > { %11134 = vmatpush1.bf16.msra.mxu0 %v15713_v7  ;;  %v7202_v7 = vadd.f32 %v7191_v15, %v19221_v2  ;;  %v15803_v2 = vld [vmem:[%s19941_s14 + $0x78] sm:$0xff]  }
 0x654   : > { %11175 = vmatpush1.bf16.msra.mxu1 %v15716_v56  ;;  %11135 = vmatprep.subr.bf16.mxu0 %v15721_v61  ;;  %v15802_v56 = vld [vmem:[#allocation8 + $0x184] ss:$8 sps:$4 sm:$0xff]   ;;  %v15797_v61 = vld [vmem:[#allocation8 + $0x80] ss:$8 sps:$4 sm:$0xff]  }
 0x655   : > { %11176 = vmatprep.subr.bf16.mxu1 %v15724_v52  ;;  %v7204_v52 = vmax.f32 %v7200_v12, 0.0  ;;  %v7206_v51 = vmax.f32 %v7202_v7, 0.0 }
 0x657   : > { %11136 = vmatpush1.bf16.msra.mxu0 %v15719_v55  ;;  %v7208_v55 = vpack.c.bf16 %v7204_v52, %v7204_v52  ;;  %v7210_v59 = vpack.c.bf16 %v7206_v51, %v7206_v51 }
 0x658   : > { %11177 = vmatpush1.bf16.msra.mxu1 %v15722_v6  ;;  %11137 = vmatprep.subr.bf16.mxu0 %v15727_v50  ;;  %v15804_v6 = vld [vmem:[%s19941_s14 + $0x38] sm:$0xff]   ;;  %v15805_v50 = vld [vmem:[%s19941_s14 + $0x70] sm:$0xff]  }
 0x659   : > { %11178 = vmatprep.subr.bf16.mxu1 %v15730_v57  ;;  %v15806_v57 = vld [vmem:[%s19941_s14 + $0x30] sm:$0xff]  }
 0x65b   : > { %11138 = vmatpush1.bf16.msra.mxu0 %v15725_v53  ;;  %v15807_v53 = vld [vmem:[%s19941_s14 + $0x68] sm:$0xff]  }
 0x65c   : > { %11179 = vmatpush1.bf16.msra.mxu1 %v15728_v60  ;;  %11139 = vmatprep.subr.bf16.mxu0 %v15733_v13  ;;  %v15808_v60 = vld [vmem:[%s19941_s14 + $0x28] sm:$0xff]   ;;  %v15809_v13 = vld [vmem:[%s19941_s14 + $0x60] sm:$0xff]  }
 0x65d   : > { %11180 = vmatprep.subr.bf16.mxu1 %v15736_v58  ;;  %v15810_v58 = vld [vmem:[%s19941_s14 + $0x20] sm:$0xff]  }
 0x65f   : > { %11140 = vmatpush1.bf16.msra.mxu0 %v15731_v54  ;;  %v15811_v54 = vld [vmem:[%s19941_s14 + $0x58] sm:$0xff]  }
 0x660   : > { %11181 = vmatpush1.bf16.msra.mxu1 %v15734_v4  ;;  %11141 = vmatprep.subr.bf16.mxu0 %v15739_v16  ;;  %v15812_v4 = vld [vmem:[%s19941_s14 + $0x18] sm:$0xff]   ;;  %v15813_v16 = vld [vmem:[%s19941_s14 + $0x50] sm:$0xff]  }
 0x661   : > { %11182 = vmatprep.subr.bf16.mxu1 %v15742_v10  ;;  %v15814_v10 = vld [vmem:[%s19941_s14 + $0x10] sm:$0xff]  }
 0x663   : > { %11142 = vmatpush1.bf16.msra.mxu0 %v15737_v33  ;;  %v15815_v33 = vld [vmem:[%s19941_s14 + $0x48] sm:$0xff]  }
 0x664   : > { %11183 = vmatpush1.bf16.msra.mxu1 %v15740_v63  ;;  %11143 = vmatprep.subr.bf16.mxu0 %v15745_v5  ;;  %v15816_v63 = vld [vmem:[%s19941_s14 + $0x8] sm:$0xff]   ;;  %v15817_v5 = vld [vmem:[%s19941_s14 + $0x40] sm:$0xff]  }
 0x665   : > { %11184 = vmatprep.subr.bf16.mxu1 %v15748_v20  ;;  %v15818_v20 = vld [vmem:[%s19941_s14] sm:$0xff]  }
 0x667   : > { %11144 = vmatpush1.bf16.msra.mxu0 %v15743_v22 }
 0x668   : > { %11185 = vmatpush1.bf16.msra.mxu1 %v15746_v18  ;;  %11145 = vmatprep.subr.bf16.mxu0 %v15751_v11 }
 0x669   : > { %11186 = vmatprep.subr.bf16.mxu1 %v15754_v30 }
 0x66b   : > { %11146 = vmatpush1.bf16.msra.mxu0 %v15749_v17 }
 0x66c   : > { %11187 = vmatpush1.bf16.msra.mxu1 %v15752_v28  ;;  %11147 = vmatprep.subr.bf16.mxu0 %v15757_v19 }
 0x66d   : > { %11188 = vmatprep.subr.bf16.mxu1 %v15760_v26 }
 0x66f   : > { %11148 = vmatpush2.bf16.msra.mxu0 %v15755_v31 }
 0x670   : > { %11189 = vmatpush2.bf16.msra.mxu1 %v15758_v25  ;;  %11149 = vmatprep.subr.bf16.mxu0 %v15763_v27  ;;  %v11213_v25 = vld [vmem:[%s19940_s13] sm:$0x3] }
 0x671   : > { %11190 = vmatprep.subr.bf16.mxu1 %v15766_v9 }
 0x673   : > { %11150 = vmatpush2.bf16.msra.mxu0 %v15761_v38 }
 0x674   : > { %11191 = vmatpush2.bf16.msra.mxu1 %v15764_v35  ;;  %11151 = vmatprep.subr.bf16.mxu0 %v15769_v0  ;;  %v11218_v0 = vrot.slane %v11213_v25, %v16356_v21 }
 0x675   : > { %11192 = vmatprep.subr.bf16.mxu1 %v15772_v41 }
 0x677   : > { %11152 = vmatpush2.bf16.msra.mxu0 %v15767_v34 }
 0x678   : > { %11193 = vmatpush2.bf16.msra.mxu1 %v15770_v36  ;;  %11153 = vmatprep.subr.bf16.mxu0 %v15775_v43 }
 0x679   : > { %11194 = vmatprep.subr.bf16.mxu1 %v15778_v32  ;;  %v11222_v32 = vrot.slane %v11213_v25, %v16361_v24  ;;  %v11263_v24 = vld [vmem:[%s19942_s15] sm:$0x1] }
 0x67b   : > { %11154 = vmatpush2.bf16.msra.mxu0 %v15773_v37 }
 0x67c   : > { %11195 = vmatpush2.bf16.msra.mxu1 %v15776_v23  ;;  %11155 = vmatprep.subr.bf16.mxu0 %v15781_v45 }
 0x67d   : > { %11196 = vmatprep.subr.bf16.mxu1 %v15784_v39 }
 0x67f   : > { %11156 = vmatpush2.bf16.msra.mxu0 %v15779_v42 }
 0x680   : > { %11197 = vmatpush2.bf16.msra.mxu1 %v15782_v40  ;;  %11157 = vmatprep.subr.bf16.mxu0 %v15787_v3 }
 0x681   : > { %11198 = vmatprep.subr.bf16.mxu1 %v15790_v44 }
 0x683   : > { %11158 = vmatpush2.bf16.msra.mxu0 %v15785_v46 }
 0x684   : > { %11199 = vmatpush2.bf16.msra.mxu1 %v15788_v62  ;;  %11159 = vmatprep.subr.bf16.mxu0 %v15793_v8 }
 0x685   : > { %11200 = vmatprep.subr.bf16.mxu1 %v15796_v14 }
 0x687   : > { %11160 = vmatpush2.bf16.msra.mxu0 %v15791_v48 }
 0x688   : > { %11201 = vmatpush2.bf16.msra.mxu1 %v15794_v47  ;;  %11161 = vmatprep.subr.bf16.mxu0 %v15799_v49 }
 0x689   : > { %11202 = vmatprep.subr.bf16.mxu1 %v15802_v56 }
 0x68b   : > { %11162 = vmatpush2.bf16.msra.mxu0 %v15797_v61 }
 0x68c   : > { %11203 = vmatpush2.bf16.msra.mxu1 %v15800_v1  ;;  %13761 = vmatprep.subr.bf16.mxu0 %v15803_v2 }
 0x68e   : > { %11164 = vmatmul.mubr.bf16.vlgmr.msra.gmra.mxu0 %v7208_v55 }
 0x68f   : > { %11205 = vmatmul.mubr.bf16.vlgmr.msra.gmra.mxu1 %v7210_v59  ;;  %13762 = vmatpush3.bf16.msra.mxu0 %v15804_v6 }
 0x690   : > { %13763 = vmatprep.subr.bf16.mxu0 %v15805_v50 }
 0x693   : > { %13764 = vmatpush3.bf16.msra.mxu0 %v15806_v57 }
 0x694   : > { %13765 = vmatprep.subr.bf16.mxu0 %v15807_v53 }
 0x697   : > { %13766 = vmatpush3.bf16.msra.mxu0 %v15808_v60 }
 0x698   : > { %13767 = vmatprep.subr.bf16.mxu0 %v15809_v13 }
 0x69b   : > { %13768 = vmatpush3.bf16.msra.mxu0 %v15810_v58 }
 0x69c   : > { %13769 = vmatprep.subr.bf16.mxu0 %v15811_v54 }
 0x69f   : > { %13770 = vmatpush3.bf16.msra.mxu0 %v15812_v4 }
 0x6a0   : > { %13771 = vmatprep.subr.bf16.mxu0 %v15813_v16 }
 0x6a3   : > { %13772 = vmatpush3.bf16.msra.mxu0 %v15814_v10 }
 0x6a4   : > { %13773 = vmatprep.subr.bf16.mxu0 %v15815_v33 }
 0x6a7   : > { %13774 = vmatpush3.bf16.msra.mxu0 %v15816_v63 }
 0x6a8   : > { %13775 = vmatprep.subr.bf16.mxu0 %v15817_v5 }
 0x6ab   : > { %13776 = vmatpush3.bf16.msra.mxu0 %v15818_v20 }
 0x70e   : > { %v10763_v22 = vpop.f32.mrf.mxu0 }
 0x70f   : > { %v10804_v18 = vpop.f32.mrf.mxu1 }
 0x710   : > { %v10805_v11 = vadd.f32 %v10804_v18, %v10763_v22  ;;  %v10765_v30 = vpop.f32.mrf.mxu0 }
 0x711   : > { %v10806_v17 = vpop.f32.mrf.mxu1 }
 0x712   : > { %v10767_v28 = vpop.f32.mrf.mxu0  ;;  %v10807_v9 = vadd.f32 %v10806_v17, %v10765_v30 }
 0x713   : > { %v10808_v19 = vpop.f32.mrf.mxu1 }
 0x714   : > { %v10768_v26 = vpop.f32.mrf.mxu0 }
 0x715   : > { %v10809_v31 = vpop.f32.mrf.mxu1 }
 0x74e   : > { %v11165_v27 = vpop.f32.mrf.mxu0 }
 0x74f   : > { %v11166_v38 = vadd.f32 %v11165_v27, %v10805_v11  ;;  %v11206_v35 = vpop.f32.mrf.mxu1 }
 0x750   : > { %v11167_v41 = vpop.f32.mrf.mxu0 }
 0x751   : > { %v11207_v34 = vadd.f32 %v11206_v35, %v11166_v38  ;;  %v11168_v36 = vadd.f32 %v11167_v41, %v10807_v9  ;;  %v11208_v43 = vpop.f32.mrf.mxu1 }
 0x752   : > { %v11169_v37 = vpop.f32.mrf.mxu0 }
 0x753   : > { %v11225_v23 = vadd.f32 %v11218_v0, %v11207_v34  ;;  %v11209_v45 = vadd.f32 %v11208_v43, %v11168_v36  ;;  %v11210_v39 = vpop.f32.mrf.mxu1 }
 0x754   : > { %v11170_v42 = vpop.f32.mrf.mxu0 }
 0x755   : > { %v11226_v40 = vadd.f32 %v11222_v32, %v11209_v45  ;;  %v11211_v3 = vpop.f32.mrf.mxu1  ;;  %v11227_v44 = vmax.f32 %v11225_v23, 0.0 }
 0x757   : > { %v11228_v46 = vmax.f32 %v11226_v40, 0.0  ;;  %v11229_v62 = vpack.c.bf16 %v11227_v44, %v11227_v44 }
 0x759   : > { %v11230_v29 = vpack.c.bf16 %v11228_v46, %v11228_v46 }
 0x75b   : > { %11392 = vmatprep.mubr.bf16.mxu0 %v11230_v29 }
 0x75c   : > { %11393 = vmatmul.mubr.bf16.vlgmr.msra.gmra.mxu0 %v11229_v62 }
 0x81c   : > { %v13777_v21 = vpop.f32.mrf.mxu0 }
 0x81e   : > { %v13778_v8 = vpop.f32.mrf.mxu0 }
 0x81f   : > { %v13779_v15 = vadd.f32 %v13778_v8, %v13777_v21 }
 0x820   : > { %v13780_v14 = vpop.f32.mrf.mxu0 }
 0x821   : > { %v11395_v48 = vadd.f32 %v13779_v15, %v11263_v24 }
 0x822   : > { %v13781_v12 = vpop.f32.mrf.mxu0 }
 0x823   : > { %11400 = vst [vmem:[%s557_s27] sm:$0x1] %v11395_v48 }
 0x824   : > { %15910 = shalt.err (!%p15907_p0)
}
 0x825   : > { %s15911_s30 = scalar_lea.hbm %s19892_s23, 16  ;;  %s15915_s28 = scalar_lea.hbm %s19977_s17, 32 }
 0x826   : > { %p15912_p1 = scmp.ne.s32.totalorder %s19892_s23, %s15911_s30  ;;  %p15916_p4 = scmp.lt.s32.totalorder %s19892_s23, %s19977_s17 }
 0x827   : > { %p15917_p10 = scmp.lt.s32.totalorder %s15915_s28, %s15911_s30 }
 0x828   : > { %p15913_p2 = pnand %p15912_p1, %p16099_p5 }
 0x829   : > { %p15918_p9 = por %p15917_p10, %p15916_p4 }
 0x82a   : > { %p15914_p3 = pneg %p15913_p2 }
 0x82c   : > { %p15919_p12 = pnand %p15918_p9, %p15914_p3 }
 0x82e   : > { %15922 = shalt.err (!%p15919_p12)
}
 0x82f   : > { %13796 = dma.vmem_to_hbm [thread:$0]  (%p16099_p5), %s11415_s20, 16, %s19892_s23, %s11402_s24  }
 0x830 PF: > { %s19978_s18 = sld [smem:[#allocation17_spill]] }
 0x831   : > { %s19979_s25 = sld [smem:[#allocation15_spill]] }
 0x836   : > { %p13818_p13 = scmp.ge.s32.totalorder %s19978_s18, 2 }
 0x837   : > { %s11426_s19 = sand.u32 1, %s19979_s25  }
 0x838   : > { %p13809_p7 = pnand %p13818_p13, %p16103_p6  ;;  %s11427_s26 = scalar_lea.sflag [#allocation7], %s11426_s19 }
 0x83a   : > { %p13810_p8 = pneg %p13809_p7 }
 0x83c   : > { %15948 = dma.done.wait (%p13810_p8), %s11427_s26, 16  }
 0x83d   : > { %15950 = vsyncadd (%p13810_p8), %s11427_s26, 4294967280  ;;  %s19981_s24 = sld [smem:[#allocation18_spill]]  ;;  %s19984_s21 = smov %s15957_s22 }
 0x83e   : > { %s19982_s30 = sld [smem:[#allocation16_spill]] }
 0x83f   : > { %s19983_s23 = sld [smem:[#allocation19_spill]] }
 0x843   : > { %p28_p11 = scmp.ge.s32.totalorder %s19981_s24, 4  }
 0x844   : > { %s19985_s22 = smov %s19982_s30 }
 0x845   :  { %30 = sbr.rel (!%p28_p11) target bundleno = 8 (0x8), region = 152 }
 0x84a   :  { %11431 = vsyncpa [#allocation6], 1 }
 0x84b   :  { %11433 = vsyncpa [#allocation6 + $0x1], 1 }
 0x84c   :  { %11434 = vsyncpa [#allocation9], 1 }
 0x84d   :  { %11435 = vsyncpa [#allocation7], 1 }
 0x84e   :  { %11437 = vsyncpa [#allocation7 + $0x1], 1 }

</bundles_post_ra>
